<compile_context>
chip_gen: v7x
topology: tpu7x:2x2x1
jax: 0.10.0
libtpu: 0.0.40
codegen_flags: <defaults>
</compile_context>

<pallas_src>
import functools
import numpy as np
import jax
import jax.numpy as jnp
from jax.experimental import pallas as pl
from jax.experimental.pallas import tpu as pltpu

_VMEM_LIMIT = 32 * 1024 * 1024   # explicit scoped-VMEM budget; safe on v5e/v6e/v7x


def _round_up(x, m):
    return (x + m - 1) // m * m


# ---------------------------------------------------------------------------
# Pallas kernel 1: GEMM + bias + fused activation (bf16 operands, f32 accum)
# ---------------------------------------------------------------------------
def _mm_bias_act_kernel(a_ref, b_ref, bias_ref, o_ref, *, activation):
    r = jnp.dot(a_ref[...], b_ref[...], preferred_element_type=jnp.float32)
    r = r + bias_ref[...]
    if activation == "relu":
        r = jnp.maximum(r, 0.0)
    elif activation == "tanh_scaled":              # (tanh(x) + 1) / 2
        r = (jnp.tanh(r) + 1.0) * 0.5
    o_ref[...] = r.astype(o_ref.dtype)


def _pick_tm(m):
    # Large tiles amortize per-step overhead; keep >= 2 parallel blocks when
    # possible so both v7x TensorCores get work.
    if m >= 4096:
        return 512
    if m >= 1024:
        return 256
    if m >= 256:
        return 128
    return _round_up(max(m, 16), 16)               # tiny layer: single block


def matmul_bias_act(a, b, bias, activation="none", out_dtype=jnp.bfloat16):
    M, K = a.shape
    _, N = b.shape
    tm = _pick_tm(M)
    Mp, Kp, Np = _round_up(M, tm), _round_up(K, 128), _round_up(N, 128)
    a_p = jnp.pad(a.astype(jnp.bfloat16), ((0, Mp - M), (0, Kp - K)))
    b_p = jnp.pad(b.astype(jnp.bfloat16), ((0, Kp - K), (0, Np - N)))
    bias_p = jnp.pad(bias.astype(jnp.float32).reshape(1, N), ((0, 0), (0, Np - N)))
    out = pl.pallas_call(
        functools.partial(_mm_bias_act_kernel, activation=activation),
        out_shape=jax.ShapeDtypeStruct((Mp, Np), out_dtype),
        grid=(Mp // tm,),
        in_specs=[pl.BlockSpec((tm, Kp), lambda i: (i, 0)),
                  pl.BlockSpec((Kp, Np), lambda i: (0, 0)),   # weights stay resident
                  pl.BlockSpec((1, Np), lambda i: (0, 0))],   # bias stays resident
        out_specs=pl.BlockSpec((tm, Np), lambda i: (i, 0)),
        compiler_params=pltpu.CompilerParams(
            dimension_semantics=("parallel",),
            vmem_limit_bytes=_VMEM_LIMIT),
    )(a_p, b_p, bias_p)
    return out[:M, :N]


# ---------------------------------------------------------------------------
# Pallas kernel 2: fused 3x3 conv (implicit GEMM) + InstanceNorm2d(affine)
#                  [+ ReLU] [+ residual add], one sample per grid step.
# The padded input lives flat as (Hp*Wp, C); each of the 9 taps is a matmul of a
# shifted contiguous row slab against its (C, Cout) weight slice.
# ---------------------------------------------------------------------------
def _res_conv_in_kernel(*refs, Wp, Mo, inv_hw, relu, has_skip, eps):
    if has_skip:
        x_ref, w_ref, g_ref, b_ref, m_ref, skip_ref, o_ref = refs
    else:
        x_ref, w_ref, g_ref, b_ref, m_ref, o_ref = refs
        skip_ref = None

    def tap(t):
        off = (t // 3) * Wp + (t % 3)              # static shift for this tap
        a = x_ref[0, pl.ds(off, Mo), :]            # (Mo, Cin) bf16 shifted slab
        return jnp.dot(a, w_ref[t], preferred_element_type=jnp.float32)

    acc = tap(0)
    for t in range(1, 9):                          # static unroll over the 9 taps
        acc = acc + tap(t)

    # InstanceNorm2d stats over the H*W valid positions only (padded-width
    # "garbage" columns are masked here and sliced off outside the kernel).
    valid = m_ref[0, :, :]                         # (Mo, 1) 1.0/0.0 mask
    mean = jnp.sum(acc * valid, axis=0, keepdims=True) * inv_hw
    yc = acc - mean
    var = jnp.sum(yc * yc * valid, axis=0, keepdims=True) * inv_hw   # biased (PyTorch)
    y = yc * jax.lax.rsqrt(var + eps) * g_ref[...] + b_ref[...]
    if relu:
        y = jnp.maximum(y, 0.0)
    if has_skip:
        y = y + skip_ref[0, :, :].astype(jnp.float32)
    o_ref[0, :, :] = y.astype(o_ref.dtype)


def conv3x3_instance_norm(x, w, gamma, beta, relu, skip=None, eps=1e-5):
    """Fused Conv2d(3x3, stride 1, pad 1) + InstanceNorm2d(affine) [+ReLU] [+skip].

    The conv bias is omitted on purpose: InstanceNorm subtracts the per-(sample,
    channel) spatial mean, which cancels any per-channel constant exactly.
    """
    N, H, W, C = x.shape
    cout = w.shape[0]
    Wp = W + 2
    Mo = H * Wp
    # pad 1 row on top / 2 on the bottom (the extra bottom row keeps the last
    # shifted tap slab in-bounds), 1 column left/right, then flatten spatial.
    xp = jnp.pad(x.astype(jnp.bfloat16), ((0, 0), (1, 2), (1, 1), (0, 0)))
    L = (H + 3) * Wp
    xf = xp.reshape(N, L, C)
    wt = jnp.transpose(w, (2, 3, 1, 0)).reshape(9, C, cout).astype(jnp.bfloat16)
    g = gamma.astype(jnp.float32).reshape(1, cout)
    bt = beta.astype(jnp.float32).reshape(1, cout)
    mask = (jnp.arange(Mo, dtype=jnp.int32) % Wp < W)
    mask = mask.astype(jnp.float32).reshape(1, Mo, 1)

    in_specs = [pl.BlockSpec((1, L, C), lambda n: (n, 0, 0)),
                pl.BlockSpec((9, C, cout), lambda n: (0, 0, 0)),
                pl.BlockSpec((1, cout), lambda n: (0, 0)),
                pl.BlockSpec((1, cout), lambda n: (0, 0)),
                pl.BlockSpec((1, Mo, 1), lambda n: (0, 0, 0))]
    args = [xf, wt, g, bt, mask]
    if skip is not None:
        skip_f = jnp.pad(skip.astype(jnp.bfloat16),
                         ((0, 0), (0, 0), (0, Wp - W), (0, 0))).reshape(N, Mo, cout)
        in_specs.append(pl.BlockSpec((1, Mo, cout), lambda n: (n, 0, 0)))
        args.append(skip_f)

    # TODO(synk): for very large feature maps, tile H with two-phase IN statistics
    # to bound per-sample VMEM on v7x (64 MiB physical per TensorCore).
    out = pl.pallas_call(
        functools.partial(_res_conv_in_kernel, Wp=Wp, Mo=Mo,
                          inv_hw=1.0 / float(H * W), relu=relu,
                          has_skip=skip is not None, eps=eps),
        out_shape=jax.ShapeDtypeStruct((N, Mo, cout), jnp.bfloat16),
        grid=(N,),
        in_specs=in_specs,
        out_specs=pl.BlockSpec((1, Mo, cout), lambda n: (n, 0, 0)),
        compiler_params=pltpu.CompilerParams(
            dimension_semantics=("parallel",),
            vmem_limit_bytes=_VMEM_LIMIT),
    )(*args)
    # drop the padded-width garbage columns
    return out.reshape(N, H, Wp, cout)[:, :, :W, :]


# ---------------------------------------------------------------------------
# Conv glue: im2col + GEMM for the encoder/decoder convs; polyphase (subpixel)
# decomposition for ConvTranspose2d.
# ---------------------------------------------------------------------------
def _im2col(x, kh, kw, stride, pad):
    N, H, W, C = x.shape
    xp = jnp.pad(x, ((0, 0), (pad, pad), (pad, pad), (0, 0)))
    Ho = (H + 2 * pad - kh) // stride + 1
    Wo = (W + 2 * pad - kw) // stride + 1
    cols = []
    for dy in range(kh):
        for dx in range(kw):
            cols.append(xp[:, dy:dy + stride * Ho:stride,
                           dx:dx + stride * Wo:stride, :])
    a = jnp.concatenate(cols, axis=-1)              # (N, Ho, Wo, kh*kw*C)
    return a.reshape(N * Ho * Wo, kh * kw * C), (N, Ho, Wo)


def conv2d(x, w, b, stride, pad, activation="none", out_dtype=jnp.bfloat16):
    # w: PyTorch Conv2d layout (Cout, Cin, kh, kw)
    cout, cin, kh, kw = w.shape
    a, (N, Ho, Wo) = _im2col(x, kh, kw, stride, pad)
    wm = jnp.transpose(w, (2, 3, 1, 0)).reshape(kh * kw * cin, cout)
    y = matmul_bias_act(a, wm, b, activation, out_dtype=out_dtype)
    return y.reshape(N, Ho, Wo, cout)


def conv_transpose2d(x, w, b, activation="none"):
    # PyTorch ConvTranspose2d(cin, cout, 3, stride=2, padding=1, output_padding=1)
    # via polyphase decomposition: 4 stride-1 sub-convolutions on the un-dilated
    # input whose outputs interleave into the 2x-upsampled result.
    cin, cout, kh, kw = w.shape
    N, H, W, _ = x.shape
    out = jnp.zeros((N, 2 * H, 2 * W, cout), jnp.bfloat16)
    for r in (0, 1):
        for s in (0, 1):
            ky = np.array([1] if r == 0 else [2, 0])
            kx = np.array([1] if s == 0 else [2, 0])
            w_sub = w[:, :, ky, :][:, :, :, kx]          # (cin, cout, nr, ns)
            w_sub = jnp.transpose(w_sub, (1, 0, 2, 3))   # -> Conv2d layout
            xp = jnp.pad(x, ((0, 0), (0, r), (0, s), (0, 0)))
            ph = conv2d(xp, w_sub, b, stride=1, pad=0, activation=activation)
            out = out.at[:, r::2, s::2, :].set(ph)
    return out


# ---------------------------------------------------------------------------
# Parameters (deterministic synthetic init, PyTorch-shaped weights)
# ---------------------------------------------------------------------------
def init_params(key):
    keys = iter(jax.random.split(key, 64))

    def conv(cout, cin, k):
        s = 1.0 / np.sqrt(cin * k * k)
        w = jax.random.normal(next(keys), (cout, cin, k, k), jnp.float32) * s
        b = jax.random.normal(next(keys), (cout,), jnp.float32) * s
        return w, b

    def tconv(cin, cout, k):
        s = 1.0 / np.sqrt(cin * k * k)
        w = jax.random.normal(next(keys), (cin, cout, k, k), jnp.float32) * s
        b = jax.random.normal(next(keys), (cout,), jnp.float32) * s
        return w, b

    def inorm(c):
        g = 1.0 + 0.1 * jax.random.normal(next(keys), (c,), jnp.float32)
        bt = 0.1 * jax.random.normal(next(keys), (c,), jnp.float32)
        return g, bt

    p = {"c1": conv(32, 3, 9), "c2": conv(64, 32, 3), "c3": conv(128, 64, 3),
         "res": []}
    for _ in range(5):
        p["res"].append({"conv_a": conv(128, 128, 3), "in_a": inorm(128),
                         "conv_b": conv(128, 128, 3), "in_b": inorm(128)})
    p["t1"] = tconv(128, 64, 3)
    p["t2"] = tconv(64, 32, 3)
    p["cout"] = conv(3, 32, 9)
    return p


# ---------------------------------------------------------------------------
# Full forward pass (mirrors TransformerNet.forward)
# ---------------------------------------------------------------------------
def transformer_net(params, x_nchw):
    x = jnp.transpose(x_nchw, (0, 2, 3, 1)).astype(jnp.bfloat16)   # NCHW -> NHWC

    # conv1 stack (Conv + ReLU x3)
    y = conv2d(x, *params["c1"], stride=1, pad=4, activation="relu")
    y = conv2d(y, *params["c2"], stride=2, pad=1, activation="relu")
    y = conv2d(y, *params["c3"], stride=2, pad=1, activation="relu")

    # 5 sequential residual-style blocks with a single skip around ALL of them
    # (matches the reference forward: y = residuals(y) + y); the skip add is
    # fused into the last block's second instance norm.
    r = y
    for bi, blk in enumerate(params["res"]):
        last = bi == len(params["res"]) - 1
        r = conv3x3_instance_norm(r, blk["conv_a"][0], *blk["in_a"], relu=True)
        r = conv3x3_instance_norm(r, blk["conv_b"][0], *blk["in_b"], relu=False,
                                  skip=y if last else None)
    y = r

    # upsample stack; final (tanh(x)+1)/2 fused into the GEMM epilogue
    y = conv_transpose2d(y, *params["t1"], activation="relu")
    y = conv_transpose2d(y, *params["t2"], activation="relu")
    y = conv2d(y, *params["cout"], stride=1, pad=4, activation="tanh_scaled",
               out_dtype=jnp.float32)

    return jnp.transpose(y, (0, 3, 1, 2))                          # NHWC -> NCHW


if __name__ == "__main__":
    key = jax.random.PRNGKey(0)
    pkey, xkey = jax.random.split(key)
    params = init_params(pkey)
    x = jax.random.normal(xkey, (2, 3, 16, 16), jnp.float32)       # NCHW, like PyTorch
    fwd = jax.jit(functools.partial(transformer_net, params))
    out = fwd(x)
    jax.block_until_ready(out)
    assert out.shape == (2, 3, 16, 16), out.shape
    assert bool(jnp.all(jnp.isfinite(out)))
    print("KERNEL_OK")
</pallas_src>

<mosaic_0001>
module attributes {stable_mosaic.version = 11 : i64} {
  func.func @_mm_bias_act_kernel(%arg0: i32, %arg1: memref<128x256xbf16, #tpu.memory_space<vmem>>, %arg2: memref<256x128xbf16, #tpu.memory_space<vmem>>, %arg3: memref<1x128xf32, #tpu.memory_space<vmem>>, %arg4: memref<128x128xbf16, #tpu.memory_space<vmem>>) attributes {dimension_semantics = [#tpu.dimension_semantics<parallel>], iteration_bounds = array<i64: 4>, scalar_prefetch = 0 : i64, scratch_operands = 0 : i64, tpu.core_type = #tpu.core_type<tc>, window_params = [{transform_indices = @transform_0, window_bounds = array<i64: 128, 256>}, {pipeline_mode = #tpu.pipeline_mode<synchronous>, transform_indices = @transform_1, window_bounds = array<i64: 256, 128>}, {pipeline_mode = #tpu.pipeline_mode<synchronous>, transform_indices = @transform_2, window_bounds = array<i64: 1, 128>}, {transform_indices = @transform_3, window_bounds = array<i64: 128, 128>}]} {
    %c0 = arith.constant 0 : index
    %c0_0 = arith.constant 0 : index
    %0 = vector.load %arg1[%c0, %c0_0] : memref<128x256xbf16, #tpu.memory_space<vmem>>, vector<128x256xbf16>
    %c0_1 = arith.constant 0 : index
    %c0_2 = arith.constant 0 : index
    %1 = vector.load %arg2[%c0_1, %c0_2] : memref<256x128xbf16, #tpu.memory_space<vmem>>, vector<256x128xbf16>
    %cst = arith.constant dense<0.000000e+00> : vector<128x128xf32>
    %2 = tpu.matmul %0, %1, %cst {dimension_numbers = #tpu.dot_dimension_numbers<[1], [0], [0], [1], [0, 0, 1, 1], [], []>} : vector<128x256xbf16>, vector<256x128xbf16>, vector<128x128xf32> -> vector<128x128xf32>
    %c0_3 = arith.constant 0 : index
    %c0_4 = arith.constant 0 : index
    %3 = vector.load %arg3[%c0_3, %c0_4] : memref<1x128xf32, #tpu.memory_space<vmem>>, vector<1x128xf32>
    %4 = vector.broadcast %3 : vector<1x128xf32> to vector<128x128xf32>
    %5 = arith.addf %2, %4 : vector<128x128xf32>
    %cst_5 = arith.constant 0.000000e+00 : f32
    %6 = vector.broadcast %cst_5 : f32 to vector<128x128xf32>
    %7 = arith.maximumf %5, %6 : vector<128x128xf32>
    %8 = arith.truncf %7 : vector<128x128xf32> to vector<128x128xbf16>
    %c0_6 = arith.constant 0 : index
    %c0_7 = arith.constant 0 : index
    %9 = vector.load %arg4[%c0_6, %c0_7] : memref<128x128xbf16, #tpu.memory_space<vmem>>, vector<128x128xbf16>
    tpu.vector_store %arg4[%c0_6, %c0_7], %8 {strides = array<i32>} : memref<128x128xbf16, #tpu.memory_space<vmem>>, vector<128x128xbf16>,
    return
  }
  func.func @transform_0(%arg0: i32) -> (i32, i32) {
    %c0_i32 = arith.constant 0 : i32
    %c0_i32_0 = arith.constant 0 : i32
    return %arg0, %c0_i32 : i32, i32
  }
  func.func @transform_1(%arg0: i32) -> (i32, i32) {
    %c0_i32 = arith.constant 0 : i32
    %c0_i32_0 = arith.constant 0 : i32
    %c0_i32_1 = arith.constant 0 : i32
    return %c0_i32, %c0_i32_0 : i32, i32
  }
  func.func @transform_2(%arg0: i32) -> (i32, i32) {
    %c0_i32 = arith.constant 0 : i32
    %c0_i32_0 = arith.constant 0 : i32
    %c0_i32_1 = arith.constant 0 : i32
    return %c0_i32, %c0_i32_0 : i32, i32
  }
  func.func @transform_3(%arg0: i32) -> (i32, i32) {
    %c0_i32 = arith.constant 0 : i32
    %c0_i32_0 = arith.constant 0 : i32
    return %arg0, %c0_i32 : i32, i32
  }
}

module attributes {stable_mosaic.version = 11 : i64} {
  func.func @_mm_bias_act_kernel(%arg0: i32, %arg1: memref<128x384xbf16, #tpu.memory_space<vmem>>, %arg2: memref<384x128xbf16, #tpu.memory_space<vmem>>, %arg3: memref<1x128xf32, #tpu.memory_space<vmem>>, %arg4: memref<128x128xbf16, #tpu.memory_space<vmem>>) attributes {dimension_semantics = [#tpu.dimension_semantics<parallel>], iteration_bounds = array<i64: 1>, scalar_prefetch = 0 : i64, scratch_operands = 0 : i64, tpu.core_type = #tpu.core_type<tc>, window_params = [{transform_indices = @transform_0, window_bounds = array<i64: 128, 384>}, {pipeline_mode = #tpu.pipeline_mode<synchronous>, transform_indices = @transform_1, window_bounds = array<i64: 384, 128>}, {pipeline_mode = #tpu.pipeline_mode<synchronous>, transform_indices = @transform_2, window_bounds = array<i64: 1, 128>}, {transform_indices = @transform_3, window_bounds = array<i64: 128, 128>}]} {
    %c0 = arith.constant 0 : index
    %c0_0 = arith.constant 0 : index
    %0 = vector.load %arg1[%c0, %c0_0] : memref<128x384xbf16, #tpu.memory_space<vmem>>, vector<128x384xbf16>
    %c0_1 = arith.constant 0 : index
    %c0_2 = arith.constant 0 : index
    %1 = vector.load %arg2[%c0_1, %c0_2] : memref<384x128xbf16, #tpu.memory_space<vmem>>, vector<384x128xbf16>
    %cst = arith.constant dense<0.000000e+00> : vector<128x128xf32>
    %2 = tpu.matmul %0, %1, %cst {dimension_numbers = #tpu.dot_dimension_numbers<[1], [0], [0], [1], [0, 0, 1, 1], [], []>} : vector<128x384xbf16>, vector<384x128xbf16>, vector<128x128xf32> -> vector<128x128xf32>
    %c0_3 = arith.constant 0 : index
    %c0_4 = arith.constant 0 : index
    %3 = vector.load %arg3[%c0_3, %c0_4] : memref<1x128xf32, #tpu.memory_space<vmem>>, vector<1x128xf32>
    %4 = vector.broadcast %3 : vector<1x128xf32> to vector<128x128xf32>
    %5 = arith.addf %2, %4 : vector<128x128xf32>
    %cst_5 = arith.constant 0.000000e+00 : f32
    %6 = vector.broadcast %cst_5 : f32 to vector<128x128xf32>
    %7 = arith.maximumf %5, %6 : vector<128x128xf32>
    %8 = arith.truncf %7 : vector<128x128xf32> to vector<128x128xbf16>
    %c0_6 = arith.constant 0 : index
    %c0_7 = arith.constant 0 : index
    %9 = vector.load %arg4[%c0_6, %c0_7] : memref<128x128xbf16, #tpu.memory_space<vmem>>, vector<128x128xbf16>
    tpu.vector_store %arg4[%c0_6, %c0_7], %8 {strides = array<i32>} : memref<128x128xbf16, #tpu.memory_space<vmem>>, vector<128x128xbf16>,
    return
  }
  func.func @transform_0(%arg0: i32) -> (i32, i32) {
    %c0_i32 = arith.constant 0 : i32
    %c0_i32_0 = arith.constant 0 : i32
    return %arg0, %c0_i32 : i32, i32
  }
  func.func @transform_1(%arg0: i32) -> (i32, i32) {
    %c0_i32 = arith.constant 0 : i32
    %c0_i32_0 = arith.constant 0 : i32
    %c0_i32_1 = arith.constant 0 : i32
    return %c0_i32, %c0_i32_0 : i32, i32
  }
  func.func @transform_2(%arg0: i32) -> (i32, i32) {
    %c0_i32 = arith.constant 0 : i32
    %c0_i32_0 = arith.constant 0 : i32
    %c0_i32_1 = arith.constant 0 : i32
    return %c0_i32, %c0_i32_0 : i32, i32
  }
  func.func @transform_3(%arg0: i32) -> (i32, i32) {
    %c0_i32 = arith.constant 0 : i32
    %c0_i32_0 = arith.constant 0 : i32
    return %arg0, %c0_i32 : i32, i32
  }
}

module attributes {stable_mosaic.version = 11 : i64} {
  func.func @_mm_bias_act_kernel(%arg0: i32, %arg1: memref<32x640xbf16, #tpu.memory_space<vmem>>, %arg2: memref<640x128xbf16, #tpu.memory_space<vmem>>, %arg3: memref<1x128xf32, #tpu.memory_space<vmem>>, %arg4: memref<32x128xbf16, #tpu.memory_space<vmem>>) attributes {dimension_semantics = [#tpu.dimension_semantics<parallel>], iteration_bounds = array<i64: 1>, scalar_prefetch = 0 : i64, scratch_operands = 0 : i64, tpu.core_type = #tpu.core_type<tc>, window_params = [{transform_indices = @transform_0, window_bounds = array<i64: 32, 640>}, {pipeline_mode = #tpu.pipeline_mode<synchronous>, transform_indices = @transform_1, window_bounds = array<i64: 640, 128>}, {pipeline_mode = #tpu.pipeline_mode<synchronous>, transform_indices = @transform_2, window_bounds = array<i64: 1, 128>}, {transform_indices = @transform_3, window_bounds = array<i64: 32, 128>}]} {
    %c0 = arith.constant 0 : index
    %c0_0 = arith.constant 0 : index
    %0 = vector.load %arg1[%c0, %c0_0] : memref<32x640xbf16, #tpu.memory_space<vmem>>, vector<32x640xbf16>
    %c0_1 = arith.constant 0 : index
    %c0_2 = arith.constant 0 : index
    %1 = vector.load %arg2[%c0_1, %c0_2] : memref<640x128xbf16, #tpu.memory_space<vmem>>, vector<640x128xbf16>
    %cst = arith.constant dense<0.000000e+00> : vector<32x128xf32>
    %2 = tpu.matmul %0, %1, %cst {dimension_numbers = #tpu.dot_dimension_numbers<[1], [0], [0], [1], [0, 0, 1, 1], [], []>} : vector<32x640xbf16>, vector<640x128xbf16>, vector<32x128xf32> -> vector<32x128xf32>
    %c0_3 = arith.constant 0 : index
    %c0_4 = arith.constant 0 : index
    %3 = vector.load %arg3[%c0_3, %c0_4] : memref<1x128xf32, #tpu.memory_space<vmem>>, vector<1x128xf32>
    %4 = vector.broadcast %3 : vector<1x128xf32> to vector<32x128xf32>
    %5 = arith.addf %2, %4 : vector<32x128xf32>
    %cst_5 = arith.constant 0.000000e+00 : f32
    %6 = vector.broadcast %cst_5 : f32 to vector<32x128xf32>
    %7 = arith.maximumf %5, %6 : vector<32x128xf32>
    %8 = arith.truncf %7 : vector<32x128xf32> to vector<32x128xbf16>
    %c0_6 = arith.constant 0 : index
    %c0_7 = arith.constant 0 : index
    %9 = vector.load %arg4[%c0_6, %c0_7] : memref<32x128xbf16, #tpu.memory_space<vmem>>, vector<32x128xbf16>
    tpu.vector_store %arg4[%c0_6, %c0_7], %8 {strides = array<i32>} : memref<32x128xbf16, #tpu.memory_space<vmem>>, vector<32x128xbf16>,
    return
  }
  func.func @transform_0(%arg0: i32) -> (i32, i32) {
    %c0_i32 = arith.constant 0 : i32
    %c0_i32_0 = arith.constant 0 : i32
    return %arg0, %c0_i32 : i32, i32
  }
  func.func @transform_1(%arg0: i32) -> (i32, i32) {
    %c0_i32 = arith.constant 0 : i32
    %c0_i32_0 = arith.constant 0 : i32
    %c0_i32_1 = arith.constant 0 : i32
    return %c0_i32, %c0_i32_0 : i32, i32
  }
  func.func @transform_2(%arg0: i32) -> (i32, i32) {
    %c0_i32 = arith.constant 0 : i32
    %c0_i32_0 = arith.constant 0 : i32
    %c0_i32_1 = arith.constant 0 : i32
    return %c0_i32, %c0_i32_0 : i32, i32
  }
  func.func @transform_3(%arg0: i32) -> (i32, i32) {
    %c0_i32 = arith.constant 0 : i32
    %c0_i32_0 = arith.constant 0 : i32
    return %arg0, %c0_i32 : i32, i32
  }
}

module attributes {stable_mosaic.version = 11 : i64} {
  func.func @_res_conv_in_kernel(%arg0: i32, %arg1: memref<1x42x128xbf16, #tpu.memory_space<vmem>>, %arg2: memref<9x128x128xbf16, #tpu.memory_space<vmem>>, %arg3: memref<1x128xf32, #tpu.memory_space<vmem>>, %arg4: memref<1x128xf32, #tpu.memory_space<vmem>>, %arg5: memref<1x24x1xf32, #tpu.memory_space<vmem>>, %arg6: memref<1x24x128xbf16, #tpu.memory_space<vmem>>) attributes {dimension_semantics = [#tpu.dimension_semantics<parallel>], iteration_bounds = array<i64: 2>, scalar_prefetch = 0 : i64, scratch_operands = 0 : i64, tpu.core_type = #tpu.core_type<tc>, window_params = [{transform_indices = @transform_0, window_bounds = array<i64: 1, 42, 128>}, {pipeline_mode = #tpu.pipeline_mode<synchronous>, transform_indices = @transform_1, window_bounds = array<i64: 9, 128, 128>}, {pipeline_mode = #tpu.pipeline_mode<synchronous>, transform_indices = @transform_2, window_bounds = array<i64: 1, 128>}, {pipeline_mode = #tpu.pipeline_mode<synchronous>, transform_indices = @transform_3, window_bounds = array<i64: 1, 128>}, {pipeline_mode = #tpu.pipeline_mode<synchronous>, transform_indices = @transform_4, window_bounds = array<i64: 1, 24, 1>}, {transform_indices = @transform_5, window_bounds = array<i64: 1, 24, 128>}]} {
    %c0 = arith.constant 0 : index
    %c0_0 = arith.constant 0 : index
    %c0_1 = arith.constant 0 : index
    %0 = vector.load %arg1[%c0, %c0_0, %c0_1] : memref<1x42x128xbf16, #tpu.memory_space<vmem>>, vector<1x24x128xbf16>
    %1 = vector.shape_cast %0 : vector<1x24x128xbf16> to vector<24x128xbf16>
    %c0_2 = arith.constant 0 : index
    %c0_3 = arith.constant 0 : index
    %c0_4 = arith.constant 0 : index
    %2 = vector.load %arg2[%c0_2, %c0_3, %c0_4] : memref<9x128x128xbf16, #tpu.memory_space<vmem>>, vector<1x128x128xbf16>
    %3 = vector.shape_cast %2 : vector<1x128x128xbf16> to vector<128x128xbf16>
    %cst = arith.constant dense<0.000000e+00> : vector<24x128xf32>
    %4 = tpu.matmul %1, %3, %cst {dimension_numbers = #tpu.dot_dimension_numbers<[1], [0], [0], [1], [0, 0, 1, 1], [], []>} : vector<24x128xbf16>, vector<128x128xbf16>, vector<24x128xf32> -> vector<24x128xf32>
    %c0_5 = arith.constant 0 : index
    %c1 = arith.constant 1 : index
    %c0_6 = arith.constant 0 : index
    %5 = vector.load %arg1[%c0_5, %c1, %c0_6] : memref<1x42x128xbf16, #tpu.memory_space<vmem>>, vector<1x24x128xbf16>
    %6 = vector.shape_cast %5 : vector<1x24x128xbf16> to vector<24x128xbf16>
    %c1_7 = arith.constant 1 : index
    %c0_8 = arith.constant 0 : index
    %c0_9 = arith.constant 0 : index
    %7 = vector.load %arg2[%c1_7, %c0_8, %c0_9] : memref<9x128x128xbf16, #tpu.memory_space<vmem>>, vector<1x128x128xbf16>
    %8 = vector.shape_cast %7 : vector<1x128x128xbf16> to vector<128x128xbf16>
    %cst_10 = arith.constant dense<0.000000e+00> : vector<24x128xf32>
    %9 = tpu.matmul %6, %8, %cst_10 {dimension_numbers = #tpu.dot_dimension_numbers<[1], [0], [0], [1], [0, 0, 1, 1], [], []>} : vector<24x128xbf16>, vector<128x128xbf16>, vector<24x128xf32> -> vector<24x128xf32>
    %10 = arith.addf %4, %9 : vector<24x128xf32>
    %c0_11 = arith.constant 0 : index
    %c2 = arith.constant 2 : index
    %c0_12 = arith.constant 0 : index
    %11 = vector.load %arg1[%c0_11, %c2, %c0_12] : memref<1x42x128xbf16, #tpu.memory_space<vmem>>, vector<1x24x128xbf16>
    %12 = vector.shape_cast %11 : vector<1x24x128xbf16> to vector<24x128xbf16>
    %c2_13 = arith.constant 2 : index
    %c0_14 = arith.constant 0 : index
    %c0_15 = arith.constant 0 : index
    %13 = vector.load %arg2[%c2_13, %c0_14, %c0_15] : memref<9x128x128xbf16, #tpu.memory_space<vmem>>, vector<1x128x128xbf16>
    %14 = vector.shape_cast %13 : vector<1x128x128xbf16> to vector<128x128xbf16>
    %cst_16 = arith.constant dense<0.000000e+00> : vector<24x128xf32>
    %15 = tpu.matmul %12, %14, %cst_16 {dimension_numbers = #tpu.dot_dimension_numbers<[1], [0], [0], [1], [0, 0, 1, 1], [], []>} : vector<24x128xbf16>, vector<128x128xbf16>, vector<24x128xf32> -> vector<24x128xf32>
    %16 = arith.addf %10, %15 : vector<24x128xf32>
    %c0_17 = arith.constant 0 : index
    %c6 = arith.constant 6 : index
    %c0_18 = arith.constant 0 : index
    %17 = vector.load %arg1[%c0_17, %c6, %c0_18] : memref<1x42x128xbf16, #tpu.memory_space<vmem>>, vector<1x24x128xbf16>
    %18 = vector.shape_cast %17 : vector<1x24x128xbf16> to vector<24x128xbf16>
    %c3 = arith.constant 3 : index
    %c0_19 = arith.constant 0 : index
    %c0_20 = arith.constant 0 : index
    %19 = vector.load %arg2[%c3, %c0_19, %c0_20] : memref<9x128x128xbf16, #tpu.memory_space<vmem>>, vector<1x128x128xbf16>
    %20 = vector.shape_cast %19 : vector<1x128x128xbf16> to vector<128x128xbf16>
    %cst_21 = arith.constant dense<0.000000e+00> : vector<24x128xf32>
    %21 = tpu.matmul %18, %20, %cst_21 {dimension_numbers = #tpu.dot_dimension_numbers<[1], [0], [0], [1], [0, 0, 1, 1], [], []>} : vector<24x128xbf16>, vector<128x128xbf16>, vector<24x128xf32> -> vector<24x128xf32>
    %22 = arith.addf %16, %21 : vector<24x128xf32>
    %c0_22 = arith.constant 0 : index
    %c7 = arith.constant 7 : index
    %c0_23 = arith.constant 0 : index
    %23 = vector.load %arg1[%c0_22, %c7, %c0_23] : memref<1x42x128xbf16, #tpu.memory_space<vmem>>, vector<1x24x128xbf16>
    %24 = vector.shape_cast %23 : vector<1x24x128xbf16> to vector<24x128xbf16>
    %c4 = arith.constant 4 : index
    %c0_24 = arith.constant 0 : index
    %c0_25 = arith.constant 0 : index
    %25 = vector.load %arg2[%c4, %c0_24, %c0_25] : memref<9x128x128xbf16, #tpu.memory_space<vmem>>, vector<1x128x128xbf16>
    %26 = vector.shape_cast %25 : vector<1x128x128xbf16> to vector<128x128xbf16>
    %cst_26 = arith.constant dense<0.000000e+00> : vector<24x128xf32>
    %27 = tpu.matmul %24, %26, %cst_26 {dimension_numbers = #tpu.dot_dimension_numbers<[1], [0], [0], [1], [0, 0, 1, 1], [], []>} : vector<24x128xbf16>, vector<128x128xbf16>, vector<24x128xf32> -> vector<24x128xf32>
    %28 = arith.addf %22, %27 : vector<24x128xf32>
    %c0_27 = arith.constant 0 : index
    %c8 = arith.constant 8 : index
    %c0_28 = arith.constant 0 : index
    %29 = vector.load %arg1[%c0_27, %c8, %c0_28] : memref<1x42x128xbf16, #tpu.memory_space<vmem>>, vector<1x24x128xbf16>
    %30 = vector.shape_cast %29 : vector<1x24x128xbf16> to vector<24x128xbf16>
    %c5 = arith.constant 5 : index
    %c0_29 = arith.constant 0 : index
    %c0_30 = arith.constant 0 : index
    %31 = vector.load %arg2[%c5, %c0_29, %c0_30] : memref<9x128x128xbf16, #tpu.memory_space<vmem>>, vector<1x128x128xbf16>
    %32 = vector.shape_cast %31 : vector<1x128x128xbf16> to vector<128x128xbf16>
    %cst_31 = arith.constant dense<0.000000e+00> : vector<24x128xf32>
    %33 = tpu.matmul %30, %32, %cst_31 {dimension_numbers = #tpu.dot_dimension_numbers<[1], [0], [0], [1], [0, 0, 1, 1], [], []>} : vector<24x128xbf16>, vector<128x128xbf16>, vector<24x128xf32> -> vector<24x128xf32>
    %34 = arith.addf %28, %33 : vector<24x128xf32>
    %c0_32 = arith.constant 0 : index
    %c12 = arith.constant 12 : index
    %c0_33 = arith.constant 0 : index
    %35 = vector.load %arg1[%c0_32, %c12, %c0_33] : memref<1x42x128xbf16, #tpu.memory_space<vmem>>, vector<1x24x128xbf16>
    %36 = vector.shape_cast %35 : vector<1x24x128xbf16> to vector<24x128xbf16>
    %c6_34 = arith.constant 6 : index
    %c0_35 = arith.constant 0 : index
    %c0_36 = arith.constant 0 : index
    %37 = vector.load %arg2[%c6_34, %c0_35, %c0_36] : memref<9x128x128xbf16, #tpu.memory_space<vmem>>, vector<1x128x128xbf16>
    %38 = vector.shape_cast %37 : vector<1x128x128xbf16> to vector<128x128xbf16>
    %cst_37 = arith.constant dense<0.000000e+00> : vector<24x128xf32>
    %39 = tpu.matmul %36, %38, %cst_37 {dimension_numbers = #tpu.dot_dimension_numbers<[1], [0], [0], [1], [0, 0, 1, 1], [], []>} : vector<24x128xbf16>, vector<128x128xbf16>, vector<24x128xf32> -> vector<24x128xf32>
    %40 = arith.addf %34, %39 : vector<24x128xf32>
    %c0_38 = arith.constant 0 : index
    %c13 = arith.constant 13 : index
    %c0_39 = arith.constant 0 : index
    %41 = vector.load %arg1[%c0_38, %c13, %c0_39] : memref<1x42x128xbf16, #tpu.memory_space<vmem>>, vector<1x24x128xbf16>
    %42 = vector.shape_cast %41 : vector<1x24x128xbf16> to vector<24x128xbf16>
    %c7_40 = arith.constant 7 : index
    %c0_41 = arith.constant 0 : index
    %c0_42 = arith.constant 0 : index
    %43 = vector.load %arg2[%c7_40, %c0_41, %c0_42] : memref<9x128x128xbf16, #tpu.memory_space<vmem>>, vector<1x128x128xbf16>
    %44 = vector.shape_cast %43 : vector<1x128x128xbf16> to vector<128x128xbf16>
    %cst_43 = arith.constant dense<0.000000e+00> : vector<24x128xf32>
    %45 = tpu.matmul %42, %44, %cst_43 {dimension_numbers = #tpu.dot_dimension_numbers<[1], [0], [0], [1], [0, 0, 1, 1], [], []>} : vector<24x128xbf16>, vector<128x128xbf16>, vector<24x128xf32> -> vector<24x128xf32>
    %46 = arith.addf %40, %45 : vector<24x128xf32>
    %c0_44 = arith.constant 0 : index
    %c14 = arith.constant 14 : index
    %c0_45 = arith.constant 0 : index
    %47 = vector.load %arg1[%c0_44, %c14, %c0_45] : memref<1x42x128xbf16, #tpu.memory_space<vmem>>, vector<1x24x128xbf16>
    %48 = vector.shape_cast %47 : vector<1x24x128xbf16> to vector<24x128xbf16>
    %c8_46 = arith.constant 8 : index
    %c0_47 = arith.constant 0 : index
    %c0_48 = arith.constant 0 : index
    %49 = vector.load %arg2[%c8_46, %c0_47, %c0_48] : memref<9x128x128xbf16, #tpu.memory_space<vmem>>, vector<1x128x128xbf16>
    %50 = vector.shape_cast %49 : vector<1x128x128xbf16> to vector<128x128xbf16>
    %cst_49 = arith.constant dense<0.000000e+00> : vector<24x128xf32>
    %51 = tpu.matmul %48, %50, %cst_49 {dimension_numbers = #tpu.dot_dimension_numbers<[1], [0], [0], [1], [0, 0, 1, 1], [], []>} : vector<24x128xbf16>, vector<128x128xbf16>, vector<24x128xf32> -> vector<24x128xf32>
    %52 = arith.addf %46, %51 : vector<24x128xf32>
    %c0_50 = arith.constant 0 : index
    %c0_51 = arith.constant 0 : index
    %c0_52 = arith.constant 0 : index
    %53 = vector.load %arg5[%c0_50, %c0_51, %c0_52] : memref<1x24x1xf32, #tpu.memory_space<vmem>>, vector<1x24x1xf32>
    %54 = vector.shape_cast %53 : vector<1x24x1xf32> to vector<24x1xf32>
    %55 = vector.broadcast %54 : vector<24x1xf32> to vector<24x128xf32>
    %56 = arith.mulf %52, %55 : vector<24x128xf32>
    %cst_53 = arith.constant dense<0.000000e+00> : vector<128xf32>
    %57 = vector.multi_reduction <add>, %56, %cst_53 [0] : vector<24x128xf32> to vector<128xf32>
    %58 = vector.shape_cast %57 : vector<128xf32> to vector<1x128xf32>
    %cst_54 = arith.constant 6.250000e-02 : f32
    %59 = vector.broadcast %cst_54 : f32 to vector<1x128xf32>
    %60 = arith.mulf %58, %59 : vector<1x128xf32>
    %61 = vector.broadcast %60 : vector<1x128xf32> to vector<24x128xf32>
    %62 = arith.subf %52, %61 : vector<24x128xf32>
    %63 = arith.mulf %62, %62 : vector<24x128xf32>
    %64 = vector.broadcast %54 : vector<24x1xf32> to vector<24x128xf32>
    %65 = arith.mulf %63, %64 : vector<24x128xf32>
    %cst_55 = arith.constant dense<0.000000e+00> : vector<128xf32>
    %66 = vector.multi_reduction <add>, %65, %cst_55 [0] : vector<24x128xf32> to vector<128xf32>
    %67 = vector.shape_cast %66 : vector<128xf32> to vector<1x128xf32>
    %cst_56 = arith.constant 6.250000e-02 : f32
    %68 = vector.broadcast %cst_56 : f32 to vector<1x128xf32>
    %69 = arith.mulf %67, %68 : vector<1x128xf32>
    %cst_57 = arith.constant 9.99999974E-6 : f32
    %70 = vector.broadcast %cst_57 : f32 to vector<1x128xf32>
    %71 = arith.addf %69, %70 : vector<1x128xf32>
    %72 = math.rsqrt %71 : vector<1x128xf32>
    %73 = vector.broadcast %72 : vector<1x128xf32> to vector<24x128xf32>
    %74 = arith.mulf %62, %73 : vector<24x128xf32>
    %c0_58 = arith.constant 0 : index
    %c0_59 = arith.constant 0 : index
    %75 = vector.load %arg3[%c0_58, %c0_59] : memref<1x128xf32, #tpu.memory_space<vmem>>, vector<1x128xf32>
    %76 = vector.broadcast %75 : vector<1x128xf32> to vector<24x128xf32>
    %77 = arith.mulf %74, %76 : vector<24x128xf32>
    %c0_60 = arith.constant 0 : index
    %c0_61 = arith.constant 0 : index
    %78 = vector.load %arg4[%c0_60, %c0_61] : memref<1x128xf32, #tpu.memory_space<vmem>>, vector<1x128xf32>
    %79 = vector.broadcast %78 : vector<1x128xf32> to vector<24x128xf32>
    %80 = arith.addf %77, %79 : vector<24x128xf32>
    %cst_62 = arith.constant 0.000000e+00 : f32
    %81 = vector.broadcast %cst_62 : f32 to vector<24x128xf32>
    %82 = arith.maximumf %80, %81 : vector<24x128xf32>
    %83 = arith.truncf %82 : vector<24x128xf32> to vector<24x128xbf16>
    %c0_63 = arith.constant 0 : index
    %c0_64 = arith.constant 0 : index
    %c0_65 = arith.constant 0 : index
    %84 = vector.load %arg6[%c0_63, %c0_64, %c0_65] : memref<1x24x128xbf16, #tpu.memory_space<vmem>>, vector<1x24x128xbf16>
    %85 = vector.shape_cast %84 : vector<1x24x128xbf16> to vector<24x128xbf16>
    %86 = vector.shape_cast %83 : vector<24x128xbf16> to vector<1x24x128xbf16>
    tpu.vector_store %arg6[%c0_63, %c0_64, %c0_65], %86 {strides = array<i32>} : memref<1x24x128xbf16, #tpu.memory_space<vmem>>, vector<1x24x128xbf16>,
    return
  }
  func.func @transform_0(%arg0: i32) -> (i32, i32, i32) {
    %c0_i32 = arith.constant 0 : i32
    %c0_i32_0 = arith.constant 0 : i32
    %c0_i32_1 = arith.constant 0 : i32
    return %arg0, %c0_i32, %c0_i32_0 : i32, i32, i32
  }
  func.func @transform_1(%arg0: i32) -> (i32, i32, i32) {
    %c0_i32 = arith.constant 0 : i32
    %c0_i32_0 = arith.constant 0 : i32
    %c0_i32_1 = arith.constant 0 : i32
    %c0_i32_2 = arith.constant 0 : i32
    return %c0_i32, %c0_i32_0, %c0_i32_1 : i32, i32, i32
  }
  func.func @transform_2(%arg0: i32) -> (i32, i32) {
    %c0_i32 = arith.constant 0 : i32
    %c0_i32_0 = arith.constant 0 : i32
    %c0_i32_1 = arith.constant 0 : i32
    return %c0_i32, %c0_i32_0 : i32, i32
  }
  func.func @transform_3(%arg0: i32) -> (i32, i32) {
    %c0_i32 = arith.constant 0 : i32
    %c0_i32_0 = arith.constant 0 : i32
    %c0_i32_1 = arith.constant 0 : i32
    return %c0_i32, %c0_i32_0 : i32, i32
  }
  func.func @transform_4(%arg0: i32) -> (i32, i32, i32) {
    %c0_i32 = arith.constant 0 : i32
    %c0_i32_0 = arith.constant 0 : i32
    %c0_i32_1 = arith.constant 0 : i32
    %c0_i32_2 = arith.constant 0 : i32
    return %c0_i32, %c0_i32_0, %c0_i32_1 : i32, i32, i32
  }
  func.func @transform_5(%arg0: i32) -> (i32, i32, i32) {
    %c0_i32 = arith.constant 0 : i32
    %c0_i32_0 = arith.constant 0 : i32
    %c0_i32_1 = arith.constant 0 : i32
    return %arg0, %c0_i32, %c0_i32_0 : i32, i32, i32
  }
}

module attributes {stable_mosaic.version = 11 : i64} {
  func.func @_res_conv_in_kernel(%arg0: i32, %arg1: memref<1x42x128xbf16, #tpu.memory_space<vmem>>, %arg2: memref<9x128x128xbf16, #tpu.memory_space<vmem>>, %arg3: memref<1x128xf32, #tpu.memory_space<vmem>>, %arg4: memref<1x128xf32, #tpu.memory_space<vmem>>, %arg5: memref<1x24x1xf32, #tpu.memory_space<vmem>>, %arg6: memref<1x24x128xbf16, #tpu.memory_space<vmem>>) attributes {dimension_semantics = [#tpu.dimension_semantics<parallel>], iteration_bounds = array<i64: 2>, scalar_prefetch = 0 : i64, scratch_operands = 0 : i64, tpu.core_type = #tpu.core_type<tc>, window_params = [{transform_indices = @transform_0, window_bounds = array<i64: 1, 42, 128>}, {pipeline_mode = #tpu.pipeline_mode<synchronous>, transform_indices = @transform_1, window_bounds = array<i64: 9, 128, 128>}, {pipeline_mode = #tpu.pipeline_mode<synchronous>, transform_indices = @transform_2, window_bounds = array<i64: 1, 128>}, {pipeline_mode = #tpu.pipeline_mode<synchronous>, transform_indices = @transform_3, window_bounds = array<i64: 1, 128>}, {pipeline_mode = #tpu.pipeline_mode<synchronous>, transform_indices = @transform_4, window_bounds = array<i64: 1, 24, 1>}, {transform_indices = @transform_5, window_bounds = array<i64: 1, 24, 128>}]} {
    %c0 = arith.constant 0 : index
    %c0_0 = arith.constant 0 : index
    %c0_1 = arith.constant 0 : index
    %0 = vector.load %arg1[%c0, %c0_0, %c0_1] : memref<1x42x128xbf16, #tpu.memory_space<vmem>>, vector<1x24x128xbf16>
    %1 = vector.shape_cast %0 : vector<1x24x128xbf16> to vector<24x128xbf16>
    %c0_2 = arith.constant 0 : index
    %c0_3 = arith.constant 0 : index
    %c0_4 = arith.constant 0 : index
    %2 = vector.load %arg2[%c0_2, %c0_3, %c0_4] : memref<9x128x128xbf16, #tpu.memory_space<vmem>>, vector<1x128x128xbf16>
    %3 = vector.shape_cast %2 : vector<1x128x128xbf16> to vector<128x128xbf16>
    %cst = arith.constant dense<0.000000e+00> : vector<24x128xf32>
    %4 = tpu.matmul %1, %3, %cst {dimension_numbers = #tpu.dot_dimension_numbers<[1], [0], [0], [1], [0, 0, 1, 1], [], []>} : vector<24x128xbf16>, vector<128x128xbf16>, vector<24x128xf32> -> vector<24x128xf32>
    %c0_5 = arith.constant 0 : index
    %c1 = arith.constant 1 : index
    %c0_6 = arith.constant 0 : index
    %5 = vector.load %arg1[%c0_5, %c1, %c0_6] : memref<1x42x128xbf16, #tpu.memory_space<vmem>>, vector<1x24x128xbf16>
    %6 = vector.shape_cast %5 : vector<1x24x128xbf16> to vector<24x128xbf16>
    %c1_7 = arith.constant 1 : index
    %c0_8 = arith.constant 0 : index
    %c0_9 = arith.constant 0 : index
    %7 = vector.load %arg2[%c1_7, %c0_8, %c0_9] : memref<9x128x128xbf16, #tpu.memory_space<vmem>>, vector<1x128x128xbf16>
    %8 = vector.shape_cast %7 : vector<1x128x128xbf16> to vector<128x128xbf16>
    %cst_10 = arith.constant dense<0.000000e+00> : vector<24x128xf32>
    %9 = tpu.matmul %6, %8, %cst_10 {dimension_numbers = #tpu.dot_dimension_numbers<[1], [0], [0], [1], [0, 0, 1, 1], [], []>} : vector<24x128xbf16>, vector<128x128xbf16>, vector<24x128xf32> -> vector<24x128xf32>
    %10 = arith.addf %4, %9 : vector<24x128xf32>
    %c0_11 = arith.constant 0 : index
    %c2 = arith.constant 2 : index
    %c0_12 = arith.constant 0 : index
    %11 = vector.load %arg1[%c0_11, %c2, %c0_12] : memref<1x42x128xbf16, #tpu.memory_space<vmem>>, vector<1x24x128xbf16>
    %12 = vector.shape_cast %11 : vector<1x24x128xbf16> to vector<24x128xbf16>
    %c2_13 = arith.constant 2 : index
    %c0_14 = arith.constant 0 : index
    %c0_15 = arith.constant 0 : index
    %13 = vector.load %arg2[%c2_13, %c0_14, %c0_15] : memref<9x128x128xbf16, #tpu.memory_space<vmem>>, vector<1x128x128xbf16>
    %14 = vector.shape_cast %13 : vector<1x128x128xbf16> to vector<128x128xbf16>
    %cst_16 = arith.constant dense<0.000000e+00> : vector<24x128xf32>
    %15 = tpu.matmul %12, %14, %cst_16 {dimension_numbers = #tpu.dot_dimension_numbers<[1], [0], [0], [1], [0, 0, 1, 1], [], []>} : vector<24x128xbf16>, vector<128x128xbf16>, vector<24x128xf32> -> vector<24x128xf32>
    %16 = arith.addf %10, %15 : vector<24x128xf32>
    %c0_17 = arith.constant 0 : index
    %c6 = arith.constant 6 : index
    %c0_18 = arith.constant 0 : index
    %17 = vector.load %arg1[%c0_17, %c6, %c0_18] : memref<1x42x128xbf16, #tpu.memory_space<vmem>>, vector<1x24x128xbf16>
    %18 = vector.shape_cast %17 : vector<1x24x128xbf16> to vector<24x128xbf16>
    %c3 = arith.constant 3 : index
    %c0_19 = arith.constant 0 : index
    %c0_20 = arith.constant 0 : index
    %19 = vector.load %arg2[%c3, %c0_19, %c0_20] : memref<9x128x128xbf16, #tpu.memory_space<vmem>>, vector<1x128x128xbf16>
    %20 = vector.shape_cast %19 : vector<1x128x128xbf16> to vector<128x128xbf16>
    %cst_21 = arith.constant dense<0.000000e+00> : vector<24x128xf32>
    %21 = tpu.matmul %18, %20, %cst_21 {dimension_numbers = #tpu.dot_dimension_numbers<[1], [0], [0], [1], [0, 0, 1, 1], [], []>} : vector<24x128xbf16>, vector<128x128xbf16>, vector<24x128xf32> -> vector<24x128xf32>
    %22 = arith.addf %16, %21 : vector<24x128xf32>
    %c0_22 = arith.constant 0 : index
    %c7 = arith.constant 7 : index
    %c0_23 = arith.constant 0 : index
    %23 = vector.load %arg1[%c0_22, %c7, %c0_23] : memref<1x42x128xbf16, #tpu.memory_space<vmem>>, vector<1x24x128xbf16>
    %24 = vector.shape_cast %23 : vector<1x24x128xbf16> to vector<24x128xbf16>
    %c4 = arith.constant 4 : index
    %c0_24 = arith.constant 0 : index
    %c0_25 = arith.constant 0 : index
    %25 = vector.load %arg2[%c4, %c0_24, %c0_25] : memref<9x128x128xbf16, #tpu.memory_space<vmem>>, vector<1x128x128xbf16>
    %26 = vector.shape_cast %25 : vector<1x128x128xbf16> to vector<128x128xbf16>
    %cst_26 = arith.constant dense<0.000000e+00> : vector<24x128xf32>
    %27 = tpu.matmul %24, %26, %cst_26 {dimension_numbers = #tpu.dot_dimension_numbers<[1], [0], [0], [1], [0, 0, 1, 1], [], []>} : vector<24x128xbf16>, vector<128x128xbf16>, vector<24x128xf32> -> vector<24x128xf32>
    %28 = arith.addf %22, %27 : vector<24x128xf32>
    %c0_27 = arith.constant 0 : index
    %c8 = arith.constant 8 : index
    %c0_28 = arith.constant 0 : index
    %29 = vector.load %arg1[%c0_27, %c8, %c0_28] : memref<1x42x128xbf16, #tpu.memory_space<vmem>>, vector<1x24x128xbf16>
    %30 = vector.shape_cast %29 : vector<1x24x128xbf16> to vector<24x128xbf16>
    %c5 = arith.constant 5 : index
    %c0_29 = arith.constant 0 : index
    %c0_30 = arith.constant 0 : index
    %31 = vector.load %arg2[%c5, %c0_29, %c0_30] : memref<9x128x128xbf16, #tpu.memory_space<vmem>>, vector<1x128x128xbf16>
    %32 = vector.shape_cast %31 : vector<1x128x128xbf16> to vector<128x128xbf16>
    %cst_31 = arith.constant dense<0.000000e+00> : vector<24x128xf32>
    %33 = tpu.matmul %30, %32, %cst_31 {dimension_numbers = #tpu.dot_dimension_numbers<[1], [0], [0], [1], [0, 0, 1, 1], [], []>} : vector<24x128xbf16>, vector<128x128xbf16>, vector<24x128xf32> -> vector<24x128xf32>
    %34 = arith.addf %28, %33 : vector<24x128xf32>
    %c0_32 = arith.constant 0 : index
    %c12 = arith.constant 12 : index
    %c0_33 = arith.constant 0 : index
    %35 = vector.load %arg1[%c0_32, %c12, %c0_33] : memref<1x42x128xbf16, #tpu.memory_space<vmem>>, vector<1x24x128xbf16>
    %36 = vector.shape_cast %35 : vector<1x24x128xbf16> to vector<24x128xbf16>
    %c6_34 = arith.constant 6 : index
    %c0_35 = arith.constant 0 : index
    %c0_36 = arith.constant 0 : index
    %37 = vector.load %arg2[%c6_34, %c0_35, %c0_36] : memref<9x128x128xbf16, #tpu.memory_space<vmem>>, vector<1x128x128xbf16>
    %38 = vector.shape_cast %37 : vector<1x128x128xbf16> to vector<128x128xbf16>
    %cst_37 = arith.constant dense<0.000000e+00> : vector<24x128xf32>
    %39 = tpu.matmul %36, %38, %cst_37 {dimension_numbers = #tpu.dot_dimension_numbers<[1], [0], [0], [1], [0, 0, 1, 1], [], []>} : vector<24x128xbf16>, vector<128x128xbf16>, vector<24x128xf32> -> vector<24x128xf32>
    %40 = arith.addf %34, %39 : vector<24x128xf32>
    %c0_38 = arith.constant 0 : index
    %c13 = arith.constant 13 : index
    %c0_39 = arith.constant 0 : index
    %41 = vector.load %arg1[%c0_38, %c13, %c0_39] : memref<1x42x128xbf16, #tpu.memory_space<vmem>>, vector<1x24x128xbf16>
    %42 = vector.shape_cast %41 : vector<1x24x128xbf16> to vector<24x128xbf16>
    %c7_40 = arith.constant 7 : index
    %c0_41 = arith.constant 0 : index
    %c0_42 = arith.constant 0 : index
    %43 = vector.load %arg2[%c7_40, %c0_41, %c0_42] : memref<9x128x128xbf16, #tpu.memory_space<vmem>>, vector<1x128x128xbf16>
    %44 = vector.shape_cast %43 : vector<1x128x128xbf16> to vector<128x128xbf16>
    %cst_43 = arith.constant dense<0.000000e+00> : vector<24x128xf32>
    %45 = tpu.matmul %42, %44, %cst_43 {dimension_numbers = #tpu.dot_dimension_numbers<[1], [0], [0], [1], [0, 0, 1, 1], [], []>} : vector<24x128xbf16>, vector<128x128xbf16>, vector<24x128xf32> -> vector<24x128xf32>
    %46 = arith.addf %40, %45 : vector<24x128xf32>
    %c0_44 = arith.constant 0 : index
    %c14 = arith.constant 14 : index
    %c0_45 = arith.constant 0 : index
    %47 = vector.load %arg1[%c0_44, %c14, %c0_45] : memref<1x42x128xbf16, #tpu.memory_space<vmem>>, vector<1x24x128xbf16>
    %48 = vector.shape_cast %47 : vector<1x24x128xbf16> to vector<24x128xbf16>
    %c8_46 = arith.constant 8 : index
    %c0_47 = arith.constant 0 : index
    %c0_48 = arith.constant 0 : index
    %49 = vector.load %arg2[%c8_46, %c0_47, %c0_48] : memref<9x128x128xbf16, #tpu.memory_space<vmem>>, vector<1x128x128xbf16>
    %50 = vector.shape_cast %49 : vector<1x128x128xbf16> to vector<128x128xbf16>
    %cst_49 = arith.constant dense<0.000000e+00> : vector<24x128xf32>
    %51 = tpu.matmul %48, %50, %cst_49 {dimension_numbers = #tpu.dot_dimension_numbers<[1], [0], [0], [1], [0, 0, 1, 1], [], []>} : vector<24x128xbf16>, vector<128x128xbf16>, vector<24x128xf32> -> vector<24x128xf32>
    %52 = arith.addf %46, %51 : vector<24x128xf32>
    %c0_50 = arith.constant 0 : index
    %c0_51 = arith.constant 0 : index
    %c0_52 = arith.constant 0 : index
    %53 = vector.load %arg5[%c0_50, %c0_51, %c0_52] : memref<1x24x1xf32, #tpu.memory_space<vmem>>, vector<1x24x1xf32>
    %54 = vector.shape_cast %53 : vector<1x24x1xf32> to vector<24x1xf32>
    %55 = vector.broadcast %54 : vector<24x1xf32> to vector<24x128xf32>
    %56 = arith.mulf %52, %55 : vector<24x128xf32>
    %cst_53 = arith.constant dense<0.000000e+00> : vector<128xf32>
    %57 = vector.multi_reduction <add>, %56, %cst_53 [0] : vector<24x128xf32> to vector<128xf32>
    %58 = vector.shape_cast %57 : vector<128xf32> to vector<1x128xf32>
    %cst_54 = arith.constant 6.250000e-02 : f32
    %59 = vector.broadcast %cst_54 : f32 to vector<1x128xf32>
    %60 = arith.mulf %58, %59 : vector<1x128xf32>
    %61 = vector.broadcast %60 : vector<1x128xf32> to vector<24x128xf32>
    %62 = arith.subf %52, %61 : vector<24x128xf32>
    %63 = arith.mulf %62, %62 : vector<24x128xf32>
    %64 = vector.broadcast %54 : vector<24x1xf32> to vector<24x128xf32>
    %65 = arith.mulf %63, %64 : vector<24x128xf32>
    %cst_55 = arith.constant dense<0.000000e+00> : vector<128xf32>
    %66 = vector.multi_reduction <add>, %65, %cst_55 [0] : vector<24x128xf32> to vector<128xf32>
    %67 = vector.shape_cast %66 : vector<128xf32> to vector<1x128xf32>
    %cst_56 = arith.constant 6.250000e-02 : f32
    %68 = vector.broadcast %cst_56 : f32 to vector<1x128xf32>
    %69 = arith.mulf %67, %68 : vector<1x128xf32>
    %cst_57 = arith.constant 9.99999974E-6 : f32
    %70 = vector.broadcast %cst_57 : f32 to vector<1x128xf32>
    %71 = arith.addf %69, %70 : vector<1x128xf32>
    %72 = math.rsqrt %71 : vector<1x128xf32>
    %73 = vector.broadcast %72 : vector<1x128xf32> to vector<24x128xf32>
    %74 = arith.mulf %62, %73 : vector<24x128xf32>
    %c0_58 = arith.constant 0 : index
    %c0_59 = arith.constant 0 : index
    %75 = vector.load %arg3[%c0_58, %c0_59] : memref<1x128xf32, #tpu.memory_space<vmem>>, vector<1x128xf32>
    %76 = vector.broadcast %75 : vector<1x128xf32> to vector<24x128xf32>
    %77 = arith.mulf %74, %76 : vector<24x128xf32>
    %c0_60 = arith.constant 0 : index
    %c0_61 = arith.constant 0 : index
    %78 = vector.load %arg4[%c0_60, %c0_61] : memref<1x128xf32, #tpu.memory_space<vmem>>, vector<1x128xf32>
    %79 = vector.broadcast %78 : vector<1x128xf32> to vector<24x128xf32>
    %80 = arith.addf %77, %79 : vector<24x128xf32>
    %81 = arith.truncf %80 : vector<24x128xf32> to vector<24x128xbf16>
    %c0_62 = arith.constant 0 : index
    %c0_63 = arith.constant 0 : index
    %c0_64 = arith.constant 0 : index
    %82 = vector.load %arg6[%c0_62, %c0_63, %c0_64] : memref<1x24x128xbf16, #tpu.memory_space<vmem>>, vector<1x24x128xbf16>
    %83 = vector.shape_cast %82 : vector<1x24x128xbf16> to vector<24x128xbf16>
    %84 = vector.shape_cast %81 : vector<24x128xbf16> to vector<1x24x128xbf16>
    tpu.vector_store %arg6[%c0_62, %c0_63, %c0_64], %84 {strides = array<i32>} : memref<1x24x128xbf16, #tpu.memory_space<vmem>>, vector<1x24x128xbf16>,
    return
  }
  func.func @transform_0(%arg0: i32) -> (i32, i32, i32) {
    %c0_i32 = arith.constant 0 : i32
    %c0_i32_0 = arith.constant 0 : i32
    %c0_i32_1 = arith.constant 0 : i32
    return %arg0, %c0_i32, %c0_i32_0 : i32, i32, i32
  }
  func.func @transform_1(%arg0: i32) -> (i32, i32, i32) {
    %c0_i32 = arith.constant 0 : i32
    %c0_i32_0 = arith.constant 0 : i32
    %c0_i32_1 = arith.constant 0 : i32
    %c0_i32_2 = arith.constant 0 : i32
    return %c0_i32, %c0_i32_0, %c0_i32_1 : i32, i32, i32
  }
  func.func @transform_2(%arg0: i32) -> (i32, i32) {
    %c0_i32 = arith.constant 0 : i32
    %c0_i32_0 = arith.constant 0 : i32
    %c0_i32_1 = arith.constant 0 : i32
    return %c0_i32, %c0_i32_0 : i32, i32
  }
  func.func @transform_3(%arg0: i32) -> (i32, i32) {
    %c0_i32 = arith.constant 0 : i32
    %c0_i32_0 = arith.constant 0 : i32
    %c0_i32_1 = arith.constant 0 : i32
    return %c0_i32, %c0_i32_0 : i32, i32
  }
  func.func @transform_4(%arg0: i32) -> (i32, i32, i32) {
    %c0_i32 = arith.constant 0 : i32
    %c0_i32_0 = arith.constant 0 : i32
    %c0_i32_1 = arith.constant 0 : i32
    %c0_i32_2 = arith.constant 0 : i32
    return %c0_i32, %c0_i32_0, %c0_i32_1 : i32, i32, i32
  }
  func.func @transform_5(%arg0: i32) -> (i32, i32, i32) {
    %c0_i32 = arith.constant 0 : i32
    %c0_i32_0 = arith.constant 0 : i32
    %c0_i32_1 = arith.constant 0 : i32
    return %arg0, %c0_i32, %c0_i32_0 : i32, i32, i32
  }
}

module attributes {stable_mosaic.version = 11 : i64} {
  func.func @_res_conv_in_kernel(%arg0: i32, %arg1: memref<1x42x128xbf16, #tpu.memory_space<vmem>>, %arg2: memref<9x128x128xbf16, #tpu.memory_space<vmem>>, %arg3: memref<1x128xf32, #tpu.memory_space<vmem>>, %arg4: memref<1x128xf32, #tpu.memory_space<vmem>>, %arg5: memref<1x24x1xf32, #tpu.memory_space<vmem>>, %arg6: memref<1x24x128xbf16, #tpu.memory_space<vmem>>, %arg7: memref<1x24x128xbf16, #tpu.memory_space<vmem>>) attributes {dimension_semantics = [#tpu.dimension_semantics<parallel>], iteration_bounds = array<i64: 2>, scalar_prefetch = 0 : i64, scratch_operands = 0 : i64, tpu.core_type = #tpu.core_type<tc>, window_params = [{transform_indices = @transform_0, window_bounds = array<i64: 1, 42, 128>}, {pipeline_mode = #tpu.pipeline_mode<synchronous>, transform_indices = @transform_1, window_bounds = array<i64: 9, 128, 128>}, {pipeline_mode = #tpu.pipeline_mode<synchronous>, transform_indices = @transform_2, window_bounds = array<i64: 1, 128>}, {pipeline_mode = #tpu.pipeline_mode<synchronous>, transform_indices = @transform_3, window_bounds = array<i64: 1, 128>}, {pipeline_mode = #tpu.pipeline_mode<synchronous>, transform_indices = @transform_4, window_bounds = array<i64: 1, 24, 1>}, {transform_indices = @transform_5, window_bounds = array<i64: 1, 24, 128>}, {transform_indices = @transform_6, window_bounds = array<i64: 1, 24, 128>}]} {
    %c0 = arith.constant 0 : index
    %c0_0 = arith.constant 0 : index
    %c0_1 = arith.constant 0 : index
    %0 = vector.load %arg1[%c0, %c0_0, %c0_1] : memref<1x42x128xbf16, #tpu.memory_space<vmem>>, vector<1x24x128xbf16>
    %1 = vector.shape_cast %0 : vector<1x24x128xbf16> to vector<24x128xbf16>
    %c0_2 = arith.constant 0 : index
    %c0_3 = arith.constant 0 : index
    %c0_4 = arith.constant 0 : index
    %2 = vector.load %arg2[%c0_2, %c0_3, %c0_4] : memref<9x128x128xbf16, #tpu.memory_space<vmem>>, vector<1x128x128xbf16>
    %3 = vector.shape_cast %2 : vector<1x128x128xbf16> to vector<128x128xbf16>
    %cst = arith.constant dense<0.000000e+00> : vector<24x128xf32>
    %4 = tpu.matmul %1, %3, %cst {dimension_numbers = #tpu.dot_dimension_numbers<[1], [0], [0], [1], [0, 0, 1, 1], [], []>} : vector<24x128xbf16>, vector<128x128xbf16>, vector<24x128xf32> -> vector<24x128xf32>
    %c0_5 = arith.constant 0 : index
    %c1 = arith.constant 1 : index
    %c0_6 = arith.constant 0 : index
    %5 = vector.load %arg1[%c0_5, %c1, %c0_6] : memref<1x42x128xbf16, #tpu.memory_space<vmem>>, vector<1x24x128xbf16>
    %6 = vector.shape_cast %5 : vector<1x24x128xbf16> to vector<24x128xbf16>
    %c1_7 = arith.constant 1 : index
    %c0_8 = arith.constant 0 : index
    %c0_9 = arith.constant 0 : index
    %7 = vector.load %arg2[%c1_7, %c0_8, %c0_9] : memref<9x128x128xbf16, #tpu.memory_space<vmem>>, vector<1x128x128xbf16>
    %8 = vector.shape_cast %7 : vector<1x128x128xbf16> to vector<128x128xbf16>
    %cst_10 = arith.constant dense<0.000000e+00> : vector<24x128xf32>
    %9 = tpu.matmul %6, %8, %cst_10 {dimension_numbers = #tpu.dot_dimension_numbers<[1], [0], [0], [1], [0, 0, 1, 1], [], []>} : vector<24x128xbf16>, vector<128x128xbf16>, vector<24x128xf32> -> vector<24x128xf32>
    %10 = arith.addf %4, %9 : vector<24x128xf32>
    %c0_11 = arith.constant 0 : index
    %c2 = arith.constant 2 : index
    %c0_12 = arith.constant 0 : index
    %11 = vector.load %arg1[%c0_11, %c2, %c0_12] : memref<1x42x128xbf16, #tpu.memory_space<vmem>>, vector<1x24x128xbf16>
    %12 = vector.shape_cast %11 : vector<1x24x128xbf16> to vector<24x128xbf16>
    %c2_13 = arith.constant 2 : index
    %c0_14 = arith.constant 0 : index
    %c0_15 = arith.constant 0 : index
    %13 = vector.load %arg2[%c2_13, %c0_14, %c0_15] : memref<9x128x128xbf16, #tpu.memory_space<vmem>>, vector<1x128x128xbf16>
    %14 = vector.shape_cast %13 : vector<1x128x128xbf16> to vector<128x128xbf16>
    %cst_16 = arith.constant dense<0.000000e+00> : vector<24x128xf32>
    %15 = tpu.matmul %12, %14, %cst_16 {dimension_numbers = #tpu.dot_dimension_numbers<[1], [0], [0], [1], [0, 0, 1, 1], [], []>} : vector<24x128xbf16>, vector<128x128xbf16>, vector<24x128xf32> -> vector<24x128xf32>
    %16 = arith.addf %10, %15 : vector<24x128xf32>
    %c0_17 = arith.constant 0 : index
    %c6 = arith.constant 6 : index
    %c0_18 = arith.constant 0 : index
    %17 = vector.load %arg1[%c0_17, %c6, %c0_18] : memref<1x42x128xbf16, #tpu.memory_space<vmem>>, vector<1x24x128xbf16>
    %18 = vector.shape_cast %17 : vector<1x24x128xbf16> to vector<24x128xbf16>
    %c3 = arith.constant 3 : index
    %c0_19 = arith.constant 0 : index
    %c0_20 = arith.constant 0 : index
    %19 = vector.load %arg2[%c3, %c0_19, %c0_20] : memref<9x128x128xbf16, #tpu.memory_space<vmem>>, vector<1x128x128xbf16>
    %20 = vector.shape_cast %19 : vector<1x128x128xbf16> to vector<128x128xbf16>
    %cst_21 = arith.constant dense<0.000000e+00> : vector<24x128xf32>
    %21 = tpu.matmul %18, %20, %cst_21 {dimension_numbers = #tpu.dot_dimension_numbers<[1], [0], [0], [1], [0, 0, 1, 1], [], []>} : vector<24x128xbf16>, vector<128x128xbf16>, vector<24x128xf32> -> vector<24x128xf32>
    %22 = arith.addf %16, %21 : vector<24x128xf32>
    %c0_22 = arith.constant 0 : index
    %c7 = arith.constant 7 : index
    %c0_23 = arith.constant 0 : index
    %23 = vector.load %arg1[%c0_22, %c7, %c0_23] : memref<1x42x128xbf16, #tpu.memory_space<vmem>>, vector<1x24x128xbf16>
    %24 = vector.shape_cast %23 : vector<1x24x128xbf16> to vector<24x128xbf16>
    %c4 = arith.constant 4 : index
    %c0_24 = arith.constant 0 : index
    %c0_25 = arith.constant 0 : index
    %25 = vector.load %arg2[%c4, %c0_24, %c0_25] : memref<9x128x128xbf16, #tpu.memory_space<vmem>>, vector<1x128x128xbf16>
    %26 = vector.shape_cast %25 : vector<1x128x128xbf16> to vector<128x128xbf16>
    %cst_26 = arith.constant dense<0.000000e+00> : vector<24x128xf32>
    %27 = tpu.matmul %24, %26, %cst_26 {dimension_numbers = #tpu.dot_dimension_numbers<[1], [0], [0], [1], [0, 0, 1, 1], [], []>} : vector<24x128xbf16>, vector<128x128xbf16>, vector<24x128xf32> -> vector<24x128xf32>
    %28 = arith.addf %22, %27 : vector<24x128xf32>
    %c0_27 = arith.constant 0 : index
    %c8 = arith.constant 8 : index
    %c0_28 = arith.constant 0 : index
    %29 = vector.load %arg1[%c0_27, %c8, %c0_28] : memref<1x42x128xbf16, #tpu.memory_space<vmem>>, vector<1x24x128xbf16>
    %30 = vector.shape_cast %29 : vector<1x24x128xbf16> to vector<24x128xbf16>
    %c5 = arith.constant 5 : index
    %c0_29 = arith.constant 0 : index
    %c0_30 = arith.constant 0 : index
    %31 = vector.load %arg2[%c5, %c0_29, %c0_30] : memref<9x128x128xbf16, #tpu.memory_space<vmem>>, vector<1x128x128xbf16>
    %32 = vector.shape_cast %31 : vector<1x128x128xbf16> to vector<128x128xbf16>
    %cst_31 = arith.constant dense<0.000000e+00> : vector<24x128xf32>
    %33 = tpu.matmul %30, %32, %cst_31 {dimension_numbers = #tpu.dot_dimension_numbers<[1], [0], [0], [1], [0, 0, 1, 1], [], []>} : vector<24x128xbf16>, vector<128x128xbf16>, vector<24x128xf32> -> vector<24x128xf32>
    %34 = arith.addf %28, %33 : vector<24x128xf32>
    %c0_32 = arith.constant 0 : index
    %c12 = arith.constant 12 : index
    %c0_33 = arith.constant 0 : index
    %35 = vector.load %arg1[%c0_32, %c12, %c0_33] : memref<1x42x128xbf16, #tpu.memory_space<vmem>>, vector<1x24x128xbf16>
    %36 = vector.shape_cast %35 : vector<1x24x128xbf16> to vector<24x128xbf16>
    %c6_34 = arith.constant 6 : index
    %c0_35 = arith.constant 0 : index
    %c0_36 = arith.constant 0 : index
    %37 = vector.load %arg2[%c6_34, %c0_35, %c0_36] : memref<9x128x128xbf16, #tpu.memory_space<vmem>>, vector<1x128x128xbf16>
    %38 = vector.shape_cast %37 : vector<1x128x128xbf16> to vector<128x128xbf16>
    %cst_37 = arith.constant dense<0.000000e+00> : vector<24x128xf32>
    %39 = tpu.matmul %36, %38, %cst_37 {dimension_numbers = #tpu.dot_dimension_numbers<[1], [0], [0], [1], [0, 0, 1, 1], [], []>} : vector<24x128xbf16>, vector<128x128xbf16>, vector<24x128xf32> -> vector<24x128xf32>
    %40 = arith.addf %34, %39 : vector<24x128xf32>
    %c0_38 = arith.constant 0 : index
    %c13 = arith.constant 13 : index
    %c0_39 = arith.constant 0 : index
    %41 = vector.load %arg1[%c0_38, %c13, %c0_39] : memref<1x42x128xbf16, #tpu.memory_space<vmem>>, vector<1x24x128xbf16>
    %42 = vector.shape_cast %41 : vector<1x24x128xbf16> to vector<24x128xbf16>
    %c7_40 = arith.constant 7 : index
    %c0_41 = arith.constant 0 : index
    %c0_42 = arith.constant 0 : index
    %43 = vector.load %arg2[%c7_40, %c0_41, %c0_42] : memref<9x128x128xbf16, #tpu.memory_space<vmem>>, vector<1x128x128xbf16>
    %44 = vector.shape_cast %43 : vector<1x128x128xbf16> to vector<128x128xbf16>
    %cst_43 = arith.constant dense<0.000000e+00> : vector<24x128xf32>
    %45 = tpu.matmul %42, %44, %cst_43 {dimension_numbers = #tpu.dot_dimension_numbers<[1], [0], [0], [1], [0, 0, 1, 1], [], []>} : vector<24x128xbf16>, vector<128x128xbf16>, vector<24x128xf32> -> vector<24x128xf32>
    %46 = arith.addf %40, %45 : vector<24x128xf32>
    %c0_44 = arith.constant 0 : index
    %c14 = arith.constant 14 : index
    %c0_45 = arith.constant 0 : index
    %47 = vector.load %arg1[%c0_44, %c14, %c0_45] : memref<1x42x128xbf16, #tpu.memory_space<vmem>>, vector<1x24x128xbf16>
    %48 = vector.shape_cast %47 : vector<1x24x128xbf16> to vector<24x128xbf16>
    %c8_46 = arith.constant 8 : index
    %c0_47 = arith.constant 0 : index
    %c0_48 = arith.constant 0 : index
    %49 = vector.load %arg2[%c8_46, %c0_47, %c0_48] : memref<9x128x128xbf16, #tpu.memory_space<vmem>>, vector<1x128x128xbf16>
    %50 = vector.shape_cast %49 : vector<1x128x128xbf16> to vector<128x128xbf16>
    %cst_49 = arith.constant dense<0.000000e+00> : vector<24x128xf32>
    %51 = tpu.matmul %48, %50, %cst_49 {dimension_numbers = #tpu.dot_dimension_numbers<[1], [0], [0], [1], [0, 0, 1, 1], [], []>} : vector<24x128xbf16>, vector<128x128xbf16>, vector<24x128xf32> -> vector<24x128xf32>
    %52 = arith.addf %46, %51 : vector<24x128xf32>
    %c0_50 = arith.constant 0 : index
    %c0_51 = arith.constant 0 : index
    %c0_52 = arith.constant 0 : index
    %53 = vector.load %arg5[%c0_50, %c0_51, %c0_52] : memref<1x24x1xf32, #tpu.memory_space<vmem>>, vector<1x24x1xf32>
    %54 = vector.shape_cast %53 : vector<1x24x1xf32> to vector<24x1xf32>
    %55 = vector.broadcast %54 : vector<24x1xf32> to vector<24x128xf32>
    %56 = arith.mulf %52, %55 : vector<24x128xf32>
    %cst_53 = arith.constant dense<0.000000e+00> : vector<128xf32>
    %57 = vector.multi_reduction <add>, %56, %cst_53 [0] : vector<24x128xf32> to vector<128xf32>
    %58 = vector.shape_cast %57 : vector<128xf32> to vector<1x128xf32>
    %cst_54 = arith.constant 6.250000e-02 : f32
    %59 = vector.broadcast %cst_54 : f32 to vector<1x128xf32>
    %60 = arith.mulf %58, %59 : vector<1x128xf32>
    %61 = vector.broadcast %60 : vector<1x128xf32> to vector<24x128xf32>
    %62 = arith.subf %52, %61 : vector<24x128xf32>
    %63 = arith.mulf %62, %62 : vector<24x128xf32>
    %64 = vector.broadcast %54 : vector<24x1xf32> to vector<24x128xf32>
    %65 = arith.mulf %63, %64 : vector<24x128xf32>
    %cst_55 = arith.constant dense<0.000000e+00> : vector<128xf32>
    %66 = vector.multi_reduction <add>, %65, %cst_55 [0] : vector<24x128xf32> to vector<128xf32>
    %67 = vector.shape_cast %66 : vector<128xf32> to vector<1x128xf32>
    %cst_56 = arith.constant 6.250000e-02 : f32
    %68 = vector.broadcast %cst_56 : f32 to vector<1x128xf32>
    %69 = arith.mulf %67, %68 : vector<1x128xf32>
    %cst_57 = arith.constant 9.99999974E-6 : f32
    %70 = vector.broadcast %cst_57 : f32 to vector<1x128xf32>
    %71 = arith.addf %69, %70 : vector<1x128xf32>
    %72 = math.rsqrt %71 : vector<1x128xf32>
    %73 = vector.broadcast %72 : vector<1x128xf32> to vector<24x128xf32>
    %74 = arith.mulf %62, %73 : vector<24x128xf32>
    %c0_58 = arith.constant 0 : index
    %c0_59 = arith.constant 0 : index
    %75 = vector.load %arg3[%c0_58, %c0_59] : memref<1x128xf32, #tpu.memory_space<vmem>>, vector<1x128xf32>
    %76 = vector.broadcast %75 : vector<1x128xf32> to vector<24x128xf32>
    %77 = arith.mulf %74, %76 : vector<24x128xf32>
    %c0_60 = arith.constant 0 : index
    %c0_61 = arith.constant 0 : index
    %78 = vector.load %arg4[%c0_60, %c0_61] : memref<1x128xf32, #tpu.memory_space<vmem>>, vector<1x128xf32>
    %79 = vector.broadcast %78 : vector<1x128xf32> to vector<24x128xf32>
    %80 = arith.addf %77, %79 : vector<24x128xf32>
    %c0_62 = arith.constant 0 : index
    %c0_63 = arith.constant 0 : index
    %c0_64 = arith.constant 0 : index
    %81 = vector.load %arg6[%c0_62, %c0_63, %c0_64] : memref<1x24x128xbf16, #tpu.memory_space<vmem>>, vector<1x24x128xbf16>
    %82 = vector.shape_cast %81 : vector<1x24x128xbf16> to vector<24x128xbf16>
    %83 = arith.extf %82 : vector<24x128xbf16> to vector<24x128xf32>
    %84 = arith.addf %80, %83 : vector<24x128xf32>
    %85 = arith.truncf %84 : vector<24x128xf32> to vector<24x128xbf16>
    %c0_65 = arith.constant 0 : index
    %c0_66 = arith.constant 0 : index
    %c0_67 = arith.constant 0 : index
    %86 = vector.load %arg7[%c0_65, %c0_66, %c0_67] : memref<1x24x128xbf16, #tpu.memory_space<vmem>>, vector<1x24x128xbf16>
    %87 = vector.shape_cast %86 : vector<1x24x128xbf16> to vector<24x128xbf16>
    %88 = vector.shape_cast %85 : vector<24x128xbf16> to vector<1x24x128xbf16>
    tpu.vector_store %arg7[%c0_65, %c0_66, %c0_67], %88 {strides = array<i32>} : memref<1x24x128xbf16, #tpu.memory_space<vmem>>, vector<1x24x128xbf16>,
    return
  }
  func.func @transform_0(%arg0: i32) -> (i32, i32, i32) {
    %c0_i32 = arith.constant 0 : i32
    %c0_i32_0 = arith.constant 0 : i32
    %c0_i32_1 = arith.constant 0 : i32
    return %arg0, %c0_i32, %c0_i32_0 : i32, i32, i32
  }
  func.func @transform_1(%arg0: i32) -> (i32, i32, i32) {
    %c0_i32 = arith.constant 0 : i32
    %c0_i32_0 = arith.constant 0 : i32
    %c0_i32_1 = arith.constant 0 : i32
    %c0_i32_2 = arith.constant 0 : i32
    return %c0_i32, %c0_i32_0, %c0_i32_1 : i32, i32, i32
  }
  func.func @transform_2(%arg0: i32) -> (i32, i32) {
    %c0_i32 = arith.constant 0 : i32
    %c0_i32_0 = arith.constant 0 : i32
    %c0_i32_1 = arith.constant 0 : i32
    return %c0_i32, %c0_i32_0 : i32, i32
  }
  func.func @transform_3(%arg0: i32) -> (i32, i32) {
    %c0_i32 = arith.constant 0 : i32
    %c0_i32_0 = arith.constant 0 : i32
    %c0_i32_1 = arith.constant 0 : i32
    return %c0_i32, %c0_i32_0 : i32, i32
  }
  func.func @transform_4(%arg0: i32) -> (i32, i32, i32) {
    %c0_i32 = arith.constant 0 : i32
    %c0_i32_0 = arith.constant 0 : i32
    %c0_i32_1 = arith.constant 0 : i32
    %c0_i32_2 = arith.constant 0 : i32
    return %c0_i32, %c0_i32_0, %c0_i32_1 : i32, i32, i32
  }
  func.func @transform_5(%arg0: i32) -> (i32, i32, i32) {
    %c0_i32 = arith.constant 0 : i32
    %c0_i32_0 = arith.constant 0 : i32
    %c0_i32_1 = arith.constant 0 : i32
    return %arg0, %c0_i32, %c0_i32_0 : i32, i32, i32
  }
  func.func @transform_6(%arg0: i32) -> (i32, i32, i32) {
    %c0_i32 = arith.constant 0 : i32
    %c0_i32_0 = arith.constant 0 : i32
    %c0_i32_1 = arith.constant 0 : i32
    return %arg0, %c0_i32, %c0_i32_0 : i32, i32, i32
  }
}

module attributes {stable_mosaic.version = 11 : i64} {
  func.func @_mm_bias_act_kernel(%arg0: i32, %arg1: memref<32x256xbf16, #tpu.memory_space<vmem>>, %arg2: memref<256x128xbf16, #tpu.memory_space<vmem>>, %arg3: memref<1x128xf32, #tpu.memory_space<vmem>>, %arg4: memref<32x128xbf16, #tpu.memory_space<vmem>>) attributes {dimension_semantics = [#tpu.dimension_semantics<parallel>], iteration_bounds = array<i64: 1>, scalar_prefetch = 0 : i64, scratch_operands = 0 : i64, tpu.core_type = #tpu.core_type<tc>, window_params = [{transform_indices = @transform_0, window_bounds = array<i64: 32, 256>}, {pipeline_mode = #tpu.pipeline_mode<synchronous>, transform_indices = @transform_1, window_bounds = array<i64: 256, 128>}, {pipeline_mode = #tpu.pipeline_mode<synchronous>, transform_indices = @transform_2, window_bounds = array<i64: 1, 128>}, {transform_indices = @transform_3, window_bounds = array<i64: 32, 128>}]} {
    %c0 = arith.constant 0 : index
    %c0_0 = arith.constant 0 : index
    %0 = vector.load %arg1[%c0, %c0_0] : memref<32x256xbf16, #tpu.memory_space<vmem>>, vector<32x256xbf16>
    %c0_1 = arith.constant 0 : index
    %c0_2 = arith.constant 0 : index
    %1 = vector.load %arg2[%c0_1, %c0_2] : memref<256x128xbf16, #tpu.memory_space<vmem>>, vector<256x128xbf16>
    %cst = arith.constant dense<0.000000e+00> : vector<32x128xf32>
    %2 = tpu.matmul %0, %1, %cst {dimension_numbers = #tpu.dot_dimension_numbers<[1], [0], [0], [1], [0, 0, 1, 1], [], []>} : vector<32x256xbf16>, vector<256x128xbf16>, vector<32x128xf32> -> vector<32x128xf32>
    %c0_3 = arith.constant 0 : index
    %c0_4 = arith.constant 0 : index
    %3 = vector.load %arg3[%c0_3, %c0_4] : memref<1x128xf32, #tpu.memory_space<vmem>>, vector<1x128xf32>
    %4 = vector.broadcast %3 : vector<1x128xf32> to vector<32x128xf32>
    %5 = arith.addf %2, %4 : vector<32x128xf32>
    %cst_5 = arith.constant 0.000000e+00 : f32
    %6 = vector.broadcast %cst_5 : f32 to vector<32x128xf32>
    %7 = arith.maximumf %5, %6 : vector<32x128xf32>
    %8 = arith.truncf %7 : vector<32x128xf32> to vector<32x128xbf16>
    %c0_6 = arith.constant 0 : index
    %c0_7 = arith.constant 0 : index
    %9 = vector.load %arg4[%c0_6, %c0_7] : memref<32x128xbf16, #tpu.memory_space<vmem>>, vector<32x128xbf16>
    tpu.vector_store %arg4[%c0_6, %c0_7], %8 {strides = array<i32>} : memref<32x128xbf16, #tpu.memory_space<vmem>>, vector<32x128xbf16>,
    return
  }
  func.func @transform_0(%arg0: i32) -> (i32, i32) {
    %c0_i32 = arith.constant 0 : i32
    %c0_i32_0 = arith.constant 0 : i32
    return %arg0, %c0_i32 : i32, i32
  }
  func.func @transform_1(%arg0: i32) -> (i32, i32) {
    %c0_i32 = arith.constant 0 : i32
    %c0_i32_0 = arith.constant 0 : i32
    %c0_i32_1 = arith.constant 0 : i32
    return %c0_i32, %c0_i32_0 : i32, i32
  }
  func.func @transform_2(%arg0: i32) -> (i32, i32) {
    %c0_i32 = arith.constant 0 : i32
    %c0_i32_0 = arith.constant 0 : i32
    %c0_i32_1 = arith.constant 0 : i32
    return %c0_i32, %c0_i32_0 : i32, i32
  }
  func.func @transform_3(%arg0: i32) -> (i32, i32) {
    %c0_i32 = arith.constant 0 : i32
    %c0_i32_0 = arith.constant 0 : i32
    return %arg0, %c0_i32 : i32, i32
  }
}

module attributes {stable_mosaic.version = 11 : i64} {
  func.func @_mm_bias_act_kernel(%arg0: i32, %arg1: memref<32x128xbf16, #tpu.memory_space<vmem>>, %arg2: memref<128x128xbf16, #tpu.memory_space<vmem>>, %arg3: memref<1x128xf32, #tpu.memory_space<vmem>>, %arg4: memref<32x128xbf16, #tpu.memory_space<vmem>>) attributes {dimension_semantics = [#tpu.dimension_semantics<parallel>], iteration_bounds = array<i64: 1>, scalar_prefetch = 0 : i64, scratch_operands = 0 : i64, tpu.core_type = #tpu.core_type<tc>, window_params = [{transform_indices = @transform_0, window_bounds = array<i64: 32, 128>}, {pipeline_mode = #tpu.pipeline_mode<synchronous>, transform_indices = @transform_1, window_bounds = array<i64: 128, 128>}, {pipeline_mode = #tpu.pipeline_mode<synchronous>, transform_indices = @transform_2, window_bounds = array<i64: 1, 128>}, {transform_indices = @transform_3, window_bounds = array<i64: 32, 128>}]} {
    %c0 = arith.constant 0 : index
    %c0_0 = arith.constant 0 : index
    %0 = vector.load %arg1[%c0, %c0_0] : memref<32x128xbf16, #tpu.memory_space<vmem>>, vector<32x128xbf16>
    %c0_1 = arith.constant 0 : index
    %c0_2 = arith.constant 0 : index
    %1 = vector.load %arg2[%c0_1, %c0_2] : memref<128x128xbf16, #tpu.memory_space<vmem>>, vector<128x128xbf16>
    %cst = arith.constant dense<0.000000e+00> : vector<32x128xf32>
    %2 = tpu.matmul %0, %1, %cst {dimension_numbers = #tpu.dot_dimension_numbers<[1], [0], [0], [1], [0, 0, 1, 1], [], []>} : vector<32x128xbf16>, vector<128x128xbf16>, vector<32x128xf32> -> vector<32x128xf32>
    %c0_3 = arith.constant 0 : index
    %c0_4 = arith.constant 0 : index
    %3 = vector.load %arg3[%c0_3, %c0_4] : memref<1x128xf32, #tpu.memory_space<vmem>>, vector<1x128xf32>
    %4 = vector.broadcast %3 : vector<1x128xf32> to vector<32x128xf32>
    %5 = arith.addf %2, %4 : vector<32x128xf32>
    %cst_5 = arith.constant 0.000000e+00 : f32
    %6 = vector.broadcast %cst_5 : f32 to vector<32x128xf32>
    %7 = arith.maximumf %5, %6 : vector<32x128xf32>
    %8 = arith.truncf %7 : vector<32x128xf32> to vector<32x128xbf16>
    %c0_6 = arith.constant 0 : index
    %c0_7 = arith.constant 0 : index
    %9 = vector.load %arg4[%c0_6, %c0_7] : memref<32x128xbf16, #tpu.memory_space<vmem>>, vector<32x128xbf16>
    tpu.vector_store %arg4[%c0_6, %c0_7], %8 {strides = array<i32>} : memref<32x128xbf16, #tpu.memory_space<vmem>>, vector<32x128xbf16>,
    return
  }
  func.func @transform_0(%arg0: i32) -> (i32, i32) {
    %c0_i32 = arith.constant 0 : i32
    %c0_i32_0 = arith.constant 0 : i32
    return %arg0, %c0_i32 : i32, i32
  }
  func.func @transform_1(%arg0: i32) -> (i32, i32) {
    %c0_i32 = arith.constant 0 : i32
    %c0_i32_0 = arith.constant 0 : i32
    %c0_i32_1 = arith.constant 0 : i32
    return %c0_i32, %c0_i32_0 : i32, i32
  }
  func.func @transform_2(%arg0: i32) -> (i32, i32) {
    %c0_i32 = arith.constant 0 : i32
    %c0_i32_0 = arith.constant 0 : i32
    %c0_i32_1 = arith.constant 0 : i32
    return %c0_i32, %c0_i32_0 : i32, i32
  }
  func.func @transform_3(%arg0: i32) -> (i32, i32) {
    %c0_i32 = arith.constant 0 : i32
    %c0_i32_0 = arith.constant 0 : i32
    return %arg0, %c0_i32 : i32, i32
  }
}

module attributes {stable_mosaic.version = 11 : i64} {
  func.func @_mm_bias_act_kernel(%arg0: i32, %arg1: memref<32x512xbf16, #tpu.memory_space<vmem>>, %arg2: memref<512x128xbf16, #tpu.memory_space<vmem>>, %arg3: memref<1x128xf32, #tpu.memory_space<vmem>>, %arg4: memref<32x128xbf16, #tpu.memory_space<vmem>>) attributes {dimension_semantics = [#tpu.dimension_semantics<parallel>], iteration_bounds = array<i64: 1>, scalar_prefetch = 0 : i64, scratch_operands = 0 : i64, tpu.core_type = #tpu.core_type<tc>, window_params = [{transform_indices = @transform_0, window_bounds = array<i64: 32, 512>}, {pipeline_mode = #tpu.pipeline_mode<synchronous>, transform_indices = @transform_1, window_bounds = array<i64: 512, 128>}, {pipeline_mode = #tpu.pipeline_mode<synchronous>, transform_indices = @transform_2, window_bounds = array<i64: 1, 128>}, {transform_indices = @transform_3, window_bounds = array<i64: 32, 128>}]} {
    %c0 = arith.constant 0 : index
    %c0_0 = arith.constant 0 : index
    %0 = vector.load %arg1[%c0, %c0_0] : memref<32x512xbf16, #tpu.memory_space<vmem>>, vector<32x512xbf16>
    %c0_1 = arith.constant 0 : index
    %c0_2 = arith.constant 0 : index
    %1 = vector.load %arg2[%c0_1, %c0_2] : memref<512x128xbf16, #tpu.memory_space<vmem>>, vector<512x128xbf16>
    %cst = arith.constant dense<0.000000e+00> : vector<32x128xf32>
    %2 = tpu.matmul %0, %1, %cst {dimension_numbers = #tpu.dot_dimension_numbers<[1], [0], [0], [1], [0, 0, 1, 1], [], []>} : vector<32x512xbf16>, vector<512x128xbf16>, vector<32x128xf32> -> vector<32x128xf32>
    %c0_3 = arith.constant 0 : index
    %c0_4 = arith.constant 0 : index
    %3 = vector.load %arg3[%c0_3, %c0_4] : memref<1x128xf32, #tpu.memory_space<vmem>>, vector<1x128xf32>
    %4 = vector.broadcast %3 : vector<1x128xf32> to vector<32x128xf32>
    %5 = arith.addf %2, %4 : vector<32x128xf32>
    %cst_5 = arith.constant 0.000000e+00 : f32
    %6 = vector.broadcast %cst_5 : f32 to vector<32x128xf32>
    %7 = arith.maximumf %5, %6 : vector<32x128xf32>
    %8 = arith.truncf %7 : vector<32x128xf32> to vector<32x128xbf16>
    %c0_6 = arith.constant 0 : index
    %c0_7 = arith.constant 0 : index
    %9 = vector.load %arg4[%c0_6, %c0_7] : memref<32x128xbf16, #tpu.memory_space<vmem>>, vector<32x128xbf16>
    tpu.vector_store %arg4[%c0_6, %c0_7], %8 {strides = array<i32>} : memref<32x128xbf16, #tpu.memory_space<vmem>>, vector<32x128xbf16>,
    return
  }
  func.func @transform_0(%arg0: i32) -> (i32, i32) {
    %c0_i32 = arith.constant 0 : i32
    %c0_i32_0 = arith.constant 0 : i32
    return %arg0, %c0_i32 : i32, i32
  }
  func.func @transform_1(%arg0: i32) -> (i32, i32) {
    %c0_i32 = arith.constant 0 : i32
    %c0_i32_0 = arith.constant 0 : i32
    %c0_i32_1 = arith.constant 0 : i32
    return %c0_i32, %c0_i32_0 : i32, i32
  }
  func.func @transform_2(%arg0: i32) -> (i32, i32) {
    %c0_i32 = arith.constant 0 : i32
    %c0_i32_0 = arith.constant 0 : i32
    %c0_i32_1 = arith.constant 0 : i32
    return %c0_i32, %c0_i32_0 : i32, i32
  }
  func.func @transform_3(%arg0: i32) -> (i32, i32) {
    %c0_i32 = arith.constant 0 : i32
    %c0_i32_0 = arith.constant 0 : i32
    return %arg0, %c0_i32 : i32, i32
  }
}

module attributes {stable_mosaic.version = 11 : i64} {
  func.func @_mm_bias_act_kernel(%arg0: i32, %arg1: memref<128x128xbf16, #tpu.memory_space<vmem>>, %arg2: memref<128x128xbf16, #tpu.memory_space<vmem>>, %arg3: memref<1x128xf32, #tpu.memory_space<vmem>>, %arg4: memref<128x128xbf16, #tpu.memory_space<vmem>>) attributes {dimension_semantics = [#tpu.dimension_semantics<parallel>], iteration_bounds = array<i64: 1>, scalar_prefetch = 0 : i64, scratch_operands = 0 : i64, tpu.core_type = #tpu.core_type<tc>, window_params = [{transform_indices = @transform_0, window_bounds = array<i64: 128, 128>}, {pipeline_mode = #tpu.pipeline_mode<synchronous>, transform_indices = @transform_1, window_bounds = array<i64: 128, 128>}, {pipeline_mode = #tpu.pipeline_mode<synchronous>, transform_indices = @transform_2, window_bounds = array<i64: 1, 128>}, {transform_indices = @transform_3, window_bounds = array<i64: 128, 128>}]} {
    %c0 = arith.constant 0 : index
    %c0_0 = arith.constant 0 : index
    %0 = vector.load %arg1[%c0, %c0_0] : memref<128x128xbf16, #tpu.memory_space<vmem>>, vector<128x128xbf16>
    %c0_1 = arith.constant 0 : index
    %c0_2 = arith.constant 0 : index
    %1 = vector.load %arg2[%c0_1, %c0_2] : memref<128x128xbf16, #tpu.memory_space<vmem>>, vector<128x128xbf16>
    %cst = arith.constant dense<0.000000e+00> : vector<128x128xf32>
    %2 = tpu.matmul %0, %1, %cst {dimension_numbers = #tpu.dot_dimension_numbers<[1], [0], [0], [1], [0, 0, 1, 1], [], []>} : vector<128x128xbf16>, vector<128x128xbf16>, vector<128x128xf32> -> vector<128x128xf32>
    %c0_3 = arith.constant 0 : index
    %c0_4 = arith.constant 0 : index
    %3 = vector.load %arg3[%c0_3, %c0_4] : memref<1x128xf32, #tpu.memory_space<vmem>>, vector<1x128xf32>
    %4 = vector.broadcast %3 : vector<1x128xf32> to vector<128x128xf32>
    %5 = arith.addf %2, %4 : vector<128x128xf32>
    %cst_5 = arith.constant 0.000000e+00 : f32
    %6 = vector.broadcast %cst_5 : f32 to vector<128x128xf32>
    %7 = arith.maximumf %5, %6 : vector<128x128xf32>
    %8 = arith.truncf %7 : vector<128x128xf32> to vector<128x128xbf16>
    %c0_6 = arith.constant 0 : index
    %c0_7 = arith.constant 0 : index
    %9 = vector.load %arg4[%c0_6, %c0_7] : memref<128x128xbf16, #tpu.memory_space<vmem>>, vector<128x128xbf16>
    tpu.vector_store %arg4[%c0_6, %c0_7], %8 {strides = array<i32>} : memref<128x128xbf16, #tpu.memory_space<vmem>>, vector<128x128xbf16>,
    return
  }
  func.func @transform_0(%arg0: i32) -> (i32, i32) {
    %c0_i32 = arith.constant 0 : i32
    %c0_i32_0 = arith.constant 0 : i32
    return %arg0, %c0_i32 : i32, i32
  }
  func.func @transform_1(%arg0: i32) -> (i32, i32) {
    %c0_i32 = arith.constant 0 : i32
    %c0_i32_0 = arith.constant 0 : i32
    %c0_i32_1 = arith.constant 0 : i32
    return %c0_i32, %c0_i32_0 : i32, i32
  }
  func.func @transform_2(%arg0: i32) -> (i32, i32) {
    %c0_i32 = arith.constant 0 : i32
    %c0_i32_0 = arith.constant 0 : i32
    %c0_i32_1 = arith.constant 0 : i32
    return %c0_i32, %c0_i32_0 : i32, i32
  }
  func.func @transform_3(%arg0: i32) -> (i32, i32) {
    %c0_i32 = arith.constant 0 : i32
    %c0_i32_0 = arith.constant 0 : i32
    return %arg0, %c0_i32 : i32, i32
  }
}

module attributes {stable_mosaic.version = 11 : i64} {
  func.func @_mm_bias_act_kernel(%arg0: i32, %arg1: memref<128x256xbf16, #tpu.memory_space<vmem>>, %arg2: memref<256x128xbf16, #tpu.memory_space<vmem>>, %arg3: memref<1x128xf32, #tpu.memory_space<vmem>>, %arg4: memref<128x128xbf16, #tpu.memory_space<vmem>>) attributes {dimension_semantics = [#tpu.dimension_semantics<parallel>], iteration_bounds = array<i64: 1>, scalar_prefetch = 0 : i64, scratch_operands = 0 : i64, tpu.core_type = #tpu.core_type<tc>, window_params = [{transform_indices = @transform_0, window_bounds = array<i64: 128, 256>}, {pipeline_mode = #tpu.pipeline_mode<synchronous>, transform_indices = @transform_1, window_bounds = array<i64: 256, 128>}, {pipeline_mode = #tpu.pipeline_mode<synchronous>, transform_indices = @transform_2, window_bounds = array<i64: 1, 128>}, {transform_indices = @transform_3, window_bounds = array<i64: 128, 128>}]} {
    %c0 = arith.constant 0 : index
    %c0_0 = arith.constant 0 : index
    %0 = vector.load %arg1[%c0, %c0_0] : memref<128x256xbf16, #tpu.memory_space<vmem>>, vector<128x256xbf16>
    %c0_1 = arith.constant 0 : index
    %c0_2 = arith.constant 0 : index
    %1 = vector.load %arg2[%c0_1, %c0_2] : memref<256x128xbf16, #tpu.memory_space<vmem>>, vector<256x128xbf16>
    %cst = arith.constant dense<0.000000e+00> : vector<128x128xf32>
    %2 = tpu.matmul %0, %1, %cst {dimension_numbers = #tpu.dot_dimension_numbers<[1], [0], [0], [1], [0, 0, 1, 1], [], []>} : vector<128x256xbf16>, vector<256x128xbf16>, vector<128x128xf32> -> vector<128x128xf32>
    %c0_3 = arith.constant 0 : index
    %c0_4 = arith.constant 0 : index
    %3 = vector.load %arg3[%c0_3, %c0_4] : memref<1x128xf32, #tpu.memory_space<vmem>>, vector<1x128xf32>
    %4 = vector.broadcast %3 : vector<1x128xf32> to vector<128x128xf32>
    %5 = arith.addf %2, %4 : vector<128x128xf32>
    %cst_5 = arith.constant 0.000000e+00 : f32
    %6 = vector.broadcast %cst_5 : f32 to vector<128x128xf32>
    %7 = arith.maximumf %5, %6 : vector<128x128xf32>
    %8 = arith.truncf %7 : vector<128x128xf32> to vector<128x128xbf16>
    %c0_6 = arith.constant 0 : index
    %c0_7 = arith.constant 0 : index
    %9 = vector.load %arg4[%c0_6, %c0_7] : memref<128x128xbf16, #tpu.memory_space<vmem>>, vector<128x128xbf16>
    tpu.vector_store %arg4[%c0_6, %c0_7], %8 {strides = array<i32>} : memref<128x128xbf16, #tpu.memory_space<vmem>>, vector<128x128xbf16>,
    return
  }
  func.func @transform_0(%arg0: i32) -> (i32, i32) {
    %c0_i32 = arith.constant 0 : i32
    %c0_i32_0 = arith.constant 0 : i32
    return %arg0, %c0_i32 : i32, i32
  }
  func.func @transform_1(%arg0: i32) -> (i32, i32) {
    %c0_i32 = arith.constant 0 : i32
    %c0_i32_0 = arith.constant 0 : i32
    %c0_i32_1 = arith.constant 0 : i32
    return %c0_i32, %c0_i32_0 : i32, i32
  }
  func.func @transform_2(%arg0: i32) -> (i32, i32) {
    %c0_i32 = arith.constant 0 : i32
    %c0_i32_0 = arith.constant 0 : i32
    %c0_i32_1 = arith.constant 0 : i32
    return %c0_i32, %c0_i32_0 : i32, i32
  }
  func.func @transform_3(%arg0: i32) -> (i32, i32) {
    %c0_i32 = arith.constant 0 : i32
    %c0_i32_0 = arith.constant 0 : i32
    return %arg0, %c0_i32 : i32, i32
  }
}

module attributes {stable_mosaic.version = 11 : i64} {
  func.func @_mm_bias_act_kernel(%arg0: i32, %arg1: memref<128x2688xbf16, #tpu.memory_space<vmem>>, %arg2: memref<2688x128xbf16, #tpu.memory_space<vmem>>, %arg3: memref<1x128xf32, #tpu.memory_space<vmem>>, %arg4: memref<128x128xf32, #tpu.memory_space<vmem>>) attributes {dimension_semantics = [#tpu.dimension_semantics<parallel>], iteration_bounds = array<i64: 4>, scalar_prefetch = 0 : i64, scratch_operands = 0 : i64, tpu.core_type = #tpu.core_type<tc>, window_params = [{transform_indices = @transform_0, window_bounds = array<i64: 128, 2688>}, {pipeline_mode = #tpu.pipeline_mode<synchronous>, transform_indices = @transform_1, window_bounds = array<i64: 2688, 128>}, {pipeline_mode = #tpu.pipeline_mode<synchronous>, transform_indices = @transform_2, window_bounds = array<i64: 1, 128>}, {transform_indices = @transform_3, window_bounds = array<i64: 128, 128>}]} {
    %c0 = arith.constant 0 : index
    %c0_0 = arith.constant 0 : index
    %0 = vector.load %arg1[%c0, %c0_0] : memref<128x2688xbf16, #tpu.memory_space<vmem>>, vector<128x2688xbf16>
    %c0_1 = arith.constant 0 : index
    %c0_2 = arith.constant 0 : index
    %1 = vector.load %arg2[%c0_1, %c0_2] : memref<2688x128xbf16, #tpu.memory_space<vmem>>, vector<2688x128xbf16>
    %cst = arith.constant dense<0.000000e+00> : vector<128x128xf32>
    %2 = tpu.matmul %0, %1, %cst {dimension_numbers = #tpu.dot_dimension_numbers<[1], [0], [0], [1], [0, 0, 1, 1], [], []>} : vector<128x2688xbf16>, vector<2688x128xbf16>, vector<128x128xf32> -> vector<128x128xf32>
    %c0_3 = arith.constant 0 : index
    %c0_4 = arith.constant 0 : index
    %3 = vector.load %arg3[%c0_3, %c0_4] : memref<1x128xf32, #tpu.memory_space<vmem>>, vector<1x128xf32>
    %4 = vector.broadcast %3 : vector<1x128xf32> to vector<128x128xf32>
    %5 = arith.addf %2, %4 : vector<128x128xf32>
    %6 = math.tanh %5 : vector<128x128xf32>
    %cst_5 = arith.constant 1.000000e+00 : f32
    %7 = vector.broadcast %cst_5 : f32 to vector<128x128xf32>
    %8 = arith.addf %6, %7 : vector<128x128xf32>
    %cst_6 = arith.constant 5.000000e-01 : f32
    %9 = vector.broadcast %cst_6 : f32 to vector<128x128xf32>
    %10 = arith.mulf %8, %9 : vector<128x128xf32>
    %c0_7 = arith.constant 0 : index
    %c0_8 = arith.constant 0 : index
    %11 = vector.load %arg4[%c0_7, %c0_8] : memref<128x128xf32, #tpu.memory_space<vmem>>, vector<128x128xf32>
    tpu.vector_store %arg4[%c0_7, %c0_8], %10 {strides = array<i32>} : memref<128x128xf32, #tpu.memory_space<vmem>>, vector<128x128xf32>,
    return
  }
  func.func @transform_0(%arg0: i32) -> (i32, i32) {
    %c0_i32 = arith.constant 0 : i32
    %c0_i32_0 = arith.constant 0 : i32
    return %arg0, %c0_i32 : i32, i32
  }
  func.func @transform_1(%arg0: i32) -> (i32, i32) {
    %c0_i32 = arith.constant 0 : i32
    %c0_i32_0 = arith.constant 0 : i32
    %c0_i32_1 = arith.constant 0 : i32
    return %c0_i32, %c0_i32_0 : i32, i32
  }
  func.func @transform_2(%arg0: i32) -> (i32, i32) {
    %c0_i32 = arith.constant 0 : i32
    %c0_i32_0 = arith.constant 0 : i32
    %c0_i32_1 = arith.constant 0 : i32
    return %c0_i32, %c0_i32_0 : i32, i32
  }
  func.func @transform_3(%arg0: i32) -> (i32, i32) {
    %c0_i32 = arith.constant 0 : i32
    %c0_i32_0 = arith.constant 0 : i32
    return %arg0, %c0_i32 : i32, i32
  }
}

</mosaic_0001>

<bundles_post_ra>
// kernel: transformer_net.22
= control target key start
LH: loop header
LB: loop body
LE: loop exit
PB: predicated region body
PF: predicated region fallthrough
CT: control target
= control target key end

     0   :  { %s939_s12 = smov 0   ;;  %s1057_s0 = inlined_call_operand.vmem [shape: bf16[512,256], index: 0, kind: input, shape index: {}]   ;;  %s1058_s1 = inlined_call_operand.vmem [shape: bf16[256,128], index: 1, kind: input, shape index: {}]   ;;  %s1059_s2 = inlined_call_operand.vmem [shape: f32[1,128], index: 2, kind: input, shape index: {}]   ;;  %s1060_s3 = inlined_call_operand.vmem [shape: bf16[512,128], index: 3, kind: output, shape index: {}]  }
   0x1 LB: > { %s658_s13 = sadd.s32 4294967295, %s917_s12   ;;  %p662_p0 = scmp.ge.s32.totalorder %s917_s12, 1  ;;  %s917_s12 = sphi %s939_s12, %s13_s12  }
   0x2   : > { %p139_p1 = scmp.lt.s32.totalorder %s917_s12, 5 }
   0x4   : > { %p140_p2 = pnand %p662_p0, %p139_p1 }
   0x5   : > { %v871_v0 = vld [vmem:[%s1058_s1 + $0x40] sm:$0xff] (!%p140_p2)   ;;  %s663_s16 = sshll.u32 (!%p140_p2), %s658_s13, 4  ;;  %v873_v2 = vld [vmem:[%s1058_s1 + $0x48] sm:$0xff] (!%p140_p2)   ;;  %v875_v4 = vld [vmem:[%s1058_s1 + $0x50] sm:$0xff] (!%p140_p2)  }
   0x6   : > { %143 = sbr.rel (%p140_p2) target bundleno = 287 (0x11f), region = 32  ;;  %v872_v1 = vld [vmem:[%s1058_s1] sm:$0xff] (!%p140_p2)   ;;  %783 = vmatprep.subr.bf16.mxu0 (!%p140_p2), %v871_v0  ;;  %847 = vmatprep.subr.bf16.mxu1 (!%p140_p2), %v871_v0  ;;  %v874_v3 = vld [vmem:[%s1058_s1 + $0x8] sm:$0xff] (!%p140_p2)   ;;  %p165_p3 = scmp.lt.s32.totalorder (!%p140_p2), %s663_s16, 63  ;;  %v876_v5 = vld [vmem:[%s1058_s1 + $0x10] sm:$0xff] (!%p140_p2)  }
   0x7   : > { %784 = vmatpush3.bf16.msra.mxu0 (!%p140_p2), %v872_v1  ;;  %855 = vmatpush3.bf16.msra.mxu1 (!%p140_p2), %v872_v1  ;;  %v877_v6 = vld [vmem:[%s1058_s1 + $0x58] sm:$0xff] (!%p140_p2)   ;;  %v879_v8 = vld [vmem:[%s1058_s1 + $0x60] sm:$0xff] (!%p140_p2)   ;;  %v881_v10 = vld [vmem:[%s1058_s1 + $0x68] sm:$0xff] (!%p140_p2)  }
   0x8   : > { %785 = vmatprep.subr.bf16.mxu0 (!%p140_p2), %v873_v2  ;;  %848 = vmatprep.subr.bf16.mxu1 (!%p140_p2), %v873_v2  ;;  %v878_v7 = vld [vmem:[%s1058_s1 + $0x18] sm:$0xff] (!%p140_p2)   ;;  %v880_v9 = vld [vmem:[%s1058_s1 + $0x20] sm:$0xff] (!%p140_p2)   ;;  %v882_v13 = vld [vmem:[%s1058_s1 + $0x28] sm:$0xff] (!%p140_p2)  }
   0x9   : > { %v883_v14 = vld [vmem:[%s1058_s1 + $0x70] sm:$0xff] (!%p140_p2)   ;;  %v885_v16 = vld [vmem:[%s1058_s1 + $0x78] sm:$0xff] (!%p140_p2)   ;;  %v1022_v34 = vld [vmem:[%s1059_s2] ss:$0 sm:$0xff] (!%p140_p2) }
   0xa   : > { %v884_v15 = vld [vmem:[%s1058_s1 + $0x30] sm:$0xff] (!%p140_p2)   ;;  %v886_v17 = vld [vmem:[%s1058_s1 + $0x38] sm:$0xff] (!%p140_p2)  }
   0xb   : > { %786 = vmatpush3.bf16.msra.mxu0 (!%p140_p2), %v874_v3  ;;  %856 = vmatpush3.bf16.msra.mxu1 (!%p140_p2), %v874_v3 }
   0xc   : > { %787 = vmatprep.subr.bf16.mxu0 (!%p140_p2), %v875_v4  ;;  %849 = vmatprep.subr.bf16.mxu1 (!%p140_p2), %v875_v4 }
   0xd   : > { %s1062_s16 = smov (!%p165_p3, %s663_s16), 63 }
   0xe   : > { %s719_s4 = sshll.u32 %s1062_s16, 3  ;;  %s667_s28 = sshll.u32 %s1062_s16, 2 }
   0xf   : > { %788 = vmatpush3.bf16.msra.mxu0 %v876_v5  ;;  %857 = vmatpush3.bf16.msra.mxu1 %v876_v5  ;;  %s980_s9 = scalar_lea.vmem %s1057_s0, %s719_s4  ;;  %s1032_s4 = scalar_lea.vmem %s1060_s3, %s667_s28 }
  0x10   : > { %789 = vmatprep.subr.bf16.mxu0 %v877_v6  ;;  %850 = vmatprep.subr.bf16.mxu1 %v877_v6  ;;  %v889_v11 = vld [vmem:[%s980_s9 + $0x4] ss:$8 sps:$4 sm:$0xff]   ;;  %v887_v18 = vld [vmem:[%s980_s9] ss:$8 sps:$4 sm:$0xff]   ;;  %v893_v20 = vld [vmem:[%s980_s9 + $0x14] ss:$8 sps:$4 sm:$0xff]  }
  0x11   : > { %v892_v12 = vld [vmem:[%s980_s9 + $0x44] ss:$8 sps:$4 sm:$0xff]   ;;  %441 = vmatprep.mubr.bf16.mxu0 %v889_v11  ;;  %v890_v19 = vld [vmem:[%s980_s9 + $0x40] ss:$8 sps:$4 sm:$0xff]   ;;  %v895_v21 = vld [vmem:[%s980_s9 + $0x54] ss:$8 sps:$4 sm:$0xff]  }
  0x12   : > { %473 = vmatprep.mubr.bf16.mxu1 %v892_v12  ;;  %v897_v22 = vld [vmem:[%s980_s9 + $0x10] ss:$8 sps:$4 sm:$0xff]   ;;  %v899_v24 = vld [vmem:[%s980_s9 + $0x24] ss:$8 sps:$4 sm:$0xff]   ;;  %v903_v26 = vld [vmem:[%s980_s9 + $0x20] ss:$8 sps:$4 sm:$0xff]  }
  0x13   : > { %790 = vmatpush3.bf16.msra.mxu0 %v878_v7  ;;  %858 = vmatpush3.bf16.msra.mxu1 %v878_v7  ;;  %v898_v23 = vld [vmem:[%s980_s9 + $0x50] ss:$8 sps:$4 sm:$0xff]   ;;  %v901_v25 = vld [vmem:[%s980_s9 + $0x64] ss:$8 sps:$4 sm:$0xff]   ;;  %v904_v27 = vld [vmem:[%s980_s9 + $0x60] ss:$8 sps:$4 sm:$0xff]  }
  0x14   : > { %791 = vmatprep.subr.bf16.mxu0 %v879_v8  ;;  %851 = vmatprep.subr.bf16.mxu1 %v879_v8  ;;  %v905_v28 = vld [vmem:[%s980_s9 + $0x34] ss:$8 sps:$4 sm:$0xff]   ;;  %v909_v30 = vld [vmem:[%s980_s9 + $0x30] ss:$8 sps:$4 sm:$0xff]  }
  0x15   : > { %v907_v29 = vld [vmem:[%s980_s9 + $0x74] ss:$8 sps:$4 sm:$0xff]   ;;  %v910_v31 = vld [vmem:[%s980_s9 + $0x70] ss:$8 sps:$4 sm:$0xff]  }
  0x17   : > { %792 = vmatpush3.bf16.msra.mxu0 %v880_v9  ;;  %859 = vmatpush3.bf16.msra.mxu1 %v880_v9 }
  0x18   : > { %793 = vmatprep.subr.bf16.mxu0 %v881_v10  ;;  %852 = vmatprep.subr.bf16.mxu1 %v881_v10 }
  0x1b   : > { %794 = vmatpush3.bf16.msra.mxu0 %v882_v13  ;;  %860 = vmatpush3.bf16.msra.mxu1 %v882_v13 }
  0x1c   : > { %795 = vmatprep.subr.bf16.mxu0 %v883_v14  ;;  %853 = vmatprep.subr.bf16.mxu1 %v883_v14 }
  0x1f   : > { %796 = vmatpush3.bf16.msra.mxu0 %v884_v15  ;;  %861 = vmatpush3.bf16.msra.mxu1 %v884_v15 }
  0x20   : > { %797 = vmatprep.subr.bf16.mxu0 %v885_v16  ;;  %854 = vmatprep.subr.bf16.mxu1 %v885_v16 }
  0x23   : > { %798 = vmatpush3.bf16.msra.mxu0 %v886_v17  ;;  %862 = vmatpush3.bf16.msra.mxu1 %v886_v17 }
  0x26   : > { %442 = vmatmul.mubr.bf16.vlgmr.msra.gmra.mrb[0].mxu0 %v887_v18  ;;  %474 = vmatmul.mubr.bf16.vlgmr.msra.gmra.mrb[0].mxu1 %v890_v19 }
  0x27   : > { %449 = vmatprep.mubr.bf16.mxu0 %v893_v20  ;;  %481 = vmatprep.mubr.bf16.mxu1 %v895_v21 }
  0x2e   : > { %450 = vmatmul.mubr.bf16.gmra.mrb[4].mxu0 %v897_v22  ;;  %482 = vmatmul.mubr.bf16.gmra.mrb[4].mxu1 %v898_v23 }
  0x2f   : > { %457 = vmatprep.mubr.bf16.mxu0 %v899_v24  ;;  %489 = vmatprep.mubr.bf16.mxu1 %v901_v25 }
  0x36   : > { %458 = vmatmul.mubr.bf16.gmra.mrb[8].mxu0 %v903_v26  ;;  %490 = vmatmul.mubr.bf16.gmra.mrb[8].mxu1 %v904_v27 }
  0x37   : > { %465 = vmatprep.mubr.bf16.mxu0 %v905_v28  ;;  %497 = vmatprep.mubr.bf16.mxu1 %v907_v29 }
  0x3e   : > { %466 = vmatmul.mubr.bf16.gmra.mrb[12].mxu0 %v909_v30  ;;  %498 = vmatmul.mubr.bf16.gmra.mrb[12].mxu1 %v910_v31 }
  0xf9   : > { %v799_v32 = vpop.f32.mrb[0].mxu0  ;;  %v823_v33 = vpop.f32.mrb[0].mxu1 }
  0xfa   : > { %v800_v35 = vpop.f32.mrb[1].mxu0  ;;  %v824_v36 = vpop.f32.mrb[1].mxu1 }
  0xfb   : > { %v801_v37 = vadd.f32 %v800_v35, %v799_v32  ;;  %v825_v38 = vadd.f32 %v824_v36, %v823_v33  ;;  %v802_v39 = vpop.f32.mrb[2].mxu0  ;;  %v826_v40 = vpop.f32.mrb[2].mxu1 }
  0xfc   : > { %v803_v41 = vpop.f32.mrb[3].mxu0  ;;  %v827_v42 = vpop.f32.mrb[3].mxu1 }
  0xfd   : > { %v444_v43 = vadd.f32 %v801_v37, %v1022_v34  ;;  %v476_v44 = vadd.f32 %v825_v38, %v1022_v34  ;;  %v804_v45 = vadd.f32 %v803_v41, %v802_v39  ;;  %v828_v46 = vadd.f32 %v827_v42, %v826_v40 }
  0xff   : > { %v447_v47 = vadd.f32 %v804_v45, %v1022_v34  ;;  %v479_v48 = vadd.f32 %v828_v46, %v1022_v34  ;;  %v506_v49 = vmax.f32 %v444_v43, 0.0  ;;  %v514_v50 = vmax.f32 %v476_v44, 0.0 }
 0x101   : > { %v507_v51 = vmax.f32 %v447_v47, 0.0  ;;  %v515_v52 = vmax.f32 %v479_v48, 0.0  ;;  %v805_v53 = vpop.f32.mrb[4].mxu0  ;;  %v829_v54 = vpop.f32.mrb[4].mxu1 }
 0x102   : > { %v806_v55 = vpop.f32.mrb[5].mxu0  ;;  %v830_v56 = vpop.f32.mrb[5].mxu1 }
 0x103   : > { %v739_v57 = vpack.c.bf16 %v507_v51, %v506_v49  ;;  %v759_v58 = vpack.c.bf16 %v515_v52, %v514_v50  ;;  %v807_v59 = vadd.f32 %v806_v55, %v805_v53  ;;  %v831_v60 = vadd.f32 %v830_v56, %v829_v54  ;;  %v808_v61 = vpop.f32.mrb[6].mxu0  ;;  %v832_v62 = vpop.f32.mrb[6].mxu1 }
 0x104   : > { %v809_v63 = vpop.f32.mrb[7].mxu0  ;;  %v833_v0 = vpop.f32.mrb[7].mxu1 }
 0x105   : > { %740 = vst [vmem:[%s1032_s4] sm:$0xff] %v739_v57   ;;  %779 = vst [vmem:[%s1032_s4 + $0x20] sm:$0xff] %v759_v58   ;;  %v452_v1 = vadd.f32 %v807_v59, %v1022_v34  ;;  %v484_v2 = vadd.f32 %v831_v60, %v1022_v34  ;;  %v810_v3 = vadd.f32 %v809_v63, %v808_v61 }
 0x106   : > { %v834_v4 = vadd.f32 %v833_v0, %v832_v62 }
 0x107   : > { %v455_v5 = vadd.f32 %v810_v3, %v1022_v34  ;;  %v508_v7 = vmax.f32 %v452_v1, 0.0  ;;  %v516_v8 = vmax.f32 %v484_v2, 0.0 }
 0x108   : > { %v487_v6 = vadd.f32 %v834_v4, %v1022_v34 }
 0x109   : > { %v509_v9 = vmax.f32 %v455_v5, 0.0  ;;  %v811_v11 = vpop.f32.mrb[8].mxu0  ;;  %v835_v12 = vpop.f32.mrb[8].mxu1 }
 0x10a   : > { %v517_v10 = vmax.f32 %v487_v6, 0.0  ;;  %v812_v13 = vpop.f32.mrb[9].mxu0  ;;  %v836_v14 = vpop.f32.mrb[9].mxu1 }
 0x10b   : > { %v744_v15 = vpack.c.bf16 %v509_v9, %v508_v7  ;;  %v813_v17 = vadd.f32 %v812_v13, %v811_v11  ;;  %v837_v18 = vadd.f32 %v836_v14, %v835_v12  ;;  %v814_v19 = vpop.f32.mrb[10].mxu0  ;;  %v838_v20 = vpop.f32.mrb[10].mxu1 }
 0x10c   : > { %v764_v16 = vpack.c.bf16 %v517_v10, %v516_v8  ;;  %v815_v21 = vpop.f32.mrb[11].mxu0  ;;  %v839_v22 = vpop.f32.mrb[11].mxu1 }
 0x10d   : > { %776 = vst [vmem:[%s1032_s4 + $0x8] sm:$0xff] %v744_v15   ;;  %v460_v23 = vadd.f32 %v813_v17, %v1022_v34  ;;  %v492_v24 = vadd.f32 %v837_v18, %v1022_v34  ;;  %v816_v25 = vadd.f32 %v815_v21, %v814_v19  ;;  %v840_v26 = vadd.f32 %v839_v22, %v838_v20 }
 0x10e   : > { %780 = vst [vmem:[%s1032_s4 + $0x28] sm:$0xff] %v764_v16  }
 0x10f   : > { %v463_v27 = vadd.f32 %v816_v25, %v1022_v34  ;;  %v495_v28 = vadd.f32 %v840_v26, %v1022_v34  ;;  %v510_v29 = vmax.f32 %v460_v23, 0.0  ;;  %v518_v30 = vmax.f32 %v492_v24, 0.0 }
 0x111   : > { %v511_v31 = vmax.f32 %v463_v27, 0.0  ;;  %v519_v32 = vmax.f32 %v495_v28, 0.0  ;;  %v817_v33 = vpop.f32.mrb[12].mxu0  ;;  %v841_v35 = vpop.f32.mrb[12].mxu1 }
 0x112   : > { %v818_v36 = vpop.f32.mrb[13].mxu0  ;;  %v842_v37 = vpop.f32.mrb[13].mxu1 }
 0x113   : > { %v749_v38 = vpack.c.bf16 %v511_v31, %v510_v29  ;;  %v769_v39 = vpack.c.bf16 %v519_v32, %v518_v30  ;;  %v819_v40 = vadd.f32 %v818_v36, %v817_v33  ;;  %v843_v41 = vadd.f32 %v842_v37, %v841_v35  ;;  %v820_v42 = vpop.f32.mrb[14].mxu0  ;;  %v844_v43 = vpop.f32.mrb[14].mxu1 }
 0x114   : > { %v821_v44 = vpop.f32.mrb[15].mxu0  ;;  %v845_v45 = vpop.f32.mrb[15].mxu1 }
 0x115   : > { %777 = vst [vmem:[%s1032_s4 + $0x10] sm:$0xff] %v749_v38   ;;  %781 = vst [vmem:[%s1032_s4 + $0x30] sm:$0xff] %v769_v39   ;;  %v468_v46 = vadd.f32 %v819_v40, %v1022_v34  ;;  %v500_v47 = vadd.f32 %v843_v41, %v1022_v34  ;;  %v822_v48 = vadd.f32 %v821_v44, %v820_v42 }
 0x116   : > { %v846_v49 = vadd.f32 %v845_v45, %v844_v43 }
 0x117   : > { %v471_v50 = vadd.f32 %v822_v48, %v1022_v34  ;;  %v512_v52 = vmax.f32 %v468_v46, 0.0  ;;  %v520_v53 = vmax.f32 %v500_v47, 0.0 }
 0x118   : > { %v503_v51 = vadd.f32 %v846_v49, %v1022_v34 }
 0x119   : > { %v513_v54 = vmax.f32 %v471_v50, 0.0 }
 0x11a   : > { %v521_v55 = vmax.f32 %v503_v51, 0.0 }
 0x11b   : > { %v754_v56 = vpack.c.bf16 %v513_v54, %v512_v52 }
 0x11c   : > { %v774_v57 = vpack.c.bf16 %v521_v55, %v520_v53 }
 0x11d   : > { %778 = vst [vmem:[%s1032_s4 + $0x18] sm:$0xff] %v754_v56  }
 0x11e   : > { %782 = vst [vmem:[%s1032_s4 + $0x38] sm:$0xff] %v774_v57  }
 0x11f PF: > { %s13_s12 = sadd.s32 1, %s917_s12  }
 0x120   : > { %p10_p4 = scmp.ge.s32.totalorder %s13_s12, 6  }
 0x122   :  { %12 = sbr.rel (!%p10_p4) target bundleno = 1 (0x1), region = 62 }

// kernel: transformer_net.23
= control target key start
LH: loop header
LB: loop body
LE: loop exit
PB: predicated region body
PF: predicated region fallthrough
CT: control target
= control target key end

     0   :  { %s1176_s1 = inlined_call_operand.vmem [shape: bf16[384,128], index: 1, kind: input, shape index: {}]   ;;  %s1177_s0 = inlined_call_operand.vmem [shape: bf16[128,384], index: 0, kind: input, shape index: {}]   ;;  %s1178_s2 = inlined_call_operand.vmem [shape: f32[1,128], index: 2, kind: input, shape index: {}]   ;;  %s1179_s3 = inlined_call_operand.vmem [shape: bf16[128,128], index: 3, kind: output, shape index: {}]  }
   0x1   :  { %v908_v0 = vld [vmem:[%s1176_s1 + $0x40] sm:$0xff]   ;;  %v910_v2 = vld [vmem:[%s1176_s1 + $0x48] sm:$0xff]   ;;  %v913_v5 = vld [vmem:[%s1176_s1 + $0x50] sm:$0xff]  }
   0x2   :  { %v909_v1 = vld [vmem:[%s1176_s1] sm:$0xff]   ;;  %796 = vmatprep.subr.bf16.mxu0 %v908_v0  ;;  %v912_v4 = vld [vmem:[%s1176_s1 + $0x8] sm:$0xff]   ;;  %v915_v7 = vld [vmem:[%s1176_s1 + $0x10] sm:$0xff]  }
   0x3   :  { %797 = vmatpush3.bf16.msra.mxu0 %v909_v1  ;;  %v911_v3 = vld [vmem:[%s1176_s1 + $0x80] sm:$0xff]   ;;  %v914_v6 = vld [vmem:[%s1176_s1 + $0x88] sm:$0xff]   ;;  %v916_v8 = vld [vmem:[%s1176_s1 + $0x58] sm:$0xff]  }
   0x4   :  { %798 = vmatprep.subr.bf16.mxu0 %v910_v2  ;;  %876 = vmatprep.subr.bf16.mxu1 %v911_v3  ;;  %v917_v9 = vld [vmem:[%s1176_s1 + $0x90] sm:$0xff]   ;;  %v918_v10 = vld [vmem:[%s1176_s1 + $0x18] sm:$0xff]   ;;  %v919_v11 = vld [vmem:[%s1176_s1 + $0x60] sm:$0xff]  }
   0x5   :  { %877 = vmatpush3.bf16.msra.mxu1 %v911_v3  ;;  %v920_v12 = vld [vmem:[%s1176_s1 + $0x98] sm:$0xff]   ;;  %v921_v13 = vld [vmem:[%s1176_s1 + $0x20] sm:$0xff]   ;;  %v922_v15 = vld [vmem:[%s1176_s1 + $0x68] sm:$0xff]  }
   0x6   :  { %878 = vmatprep.subr.bf16.mxu1 %v914_v6  ;;  %v923_v14 = vld [vmem:[%s1176_s1 + $0xa0] sm:$0xff]   ;;  %v924_v16 = vld [vmem:[%s1176_s1 + $0x28] sm:$0xff]   ;;  %v925_v18 = vld [vmem:[%s1176_s1 + $0x70] sm:$0xff]  }
   0x7   :  { %799 = vmatpush3.bf16.msra.mxu0 %v912_v4  ;;  %v926_v17 = vld [vmem:[%s1176_s1 + $0xa8] sm:$0xff]   ;;  %v927_v19 = vld [vmem:[%s1176_s1 + $0x30] sm:$0xff]   ;;  %v928_v20 = vld [vmem:[%s1176_s1 + $0x78] sm:$0xff]  }
   0x8   :  { %800 = vmatprep.subr.bf16.mxu0 %v913_v5  ;;  %v929_v21 = vld [vmem:[%s1176_s1 + $0xb0] sm:$0xff]   ;;  %v930_v23 = vld [vmem:[%s1176_s1 + $0x38] sm:$0xff]   ;;  %v931_v26 = vld [vmem:[%s1177_s0] ss:$12 sps:$4 sm:$0xff]  }
   0x9   :  { %879 = vmatpush3.bf16.msra.mxu1 %v914_v6  ;;  %v933_v22 = vld [vmem:[%s1177_s0 + $0x4] ss:$12 sps:$4 sm:$0xff]   ;;  %v935_v24 = vld [vmem:[%s1177_s0 + $0x8] ss:$12 sps:$4 sm:$0xff]   ;;  %v934_v25 = vld [vmem:[%s1176_s1 + $0xb8] sm:$0xff]  }
   0xa   :  { %880 = vmatprep.subr.bf16.mxu1 %v917_v9  ;;  %406 = vmatprep.mubr.bf16.mxu0 %v933_v22  ;;  %v937_v27 = vld [vmem:[%s1177_s0 + $0x1c] ss:$12 sps:$4 sm:$0xff]   ;;  %v936_v28 = vld [vmem:[%s1177_s0 + $0x20] ss:$12 sps:$4 sm:$0xff]   ;;  %v943_v29 = vld [vmem:[%s1177_s0 + $0x38] ss:$12 sps:$4 sm:$0xff]  }
   0xb   :  { %801 = vmatpush3.bf16.msra.mxu0 %v915_v7  ;;  %892 = vmatprep.mubr.bf16.mxu1 %v935_v24  ;;  %v939_v30 = vld [vmem:[%s1177_s0 + $0x18] ss:$12 sps:$4 sm:$0xff]   ;;  %v940_v31 = vld [vmem:[%s1177_s0 + $0x34] ss:$12 sps:$4 sm:$0xff]   ;;  %v944_v32 = vld [vmem:[%s1177_s0 + $0x50] ss:$12 sps:$4 sm:$0xff]  }
   0xc   :  { %802 = vmatprep.subr.bf16.mxu0 %v916_v8  ;;  %v951_v33 = vld [vmem:[%s1177_s0 + $0x68] ss:$12 sps:$4 sm:$0xff]   ;;  %v942_v34 = vld [vmem:[%s1177_s0 + $0x30] ss:$12 sps:$4 sm:$0xff]   ;;  %v945_v35 = vld [vmem:[%s1177_s0 + $0x4c] ss:$12 sps:$4 sm:$0xff]  }
   0xd   :  { %881 = vmatpush3.bf16.msra.mxu1 %v917_v9  ;;  %v952_v36 = vld [vmem:[%s1177_s0 + $0x80] ss:$12 sps:$4 sm:$0xff]   ;;  %v959_v37 = vld [vmem:[%s1177_s0 + $0x98] ss:$12 sps:$4 sm:$0xff]   ;;  %v947_v38 = vld [vmem:[%s1177_s0 + $0x48] ss:$12 sps:$4 sm:$0xff]  }
   0xe   :  { %882 = vmatprep.subr.bf16.mxu1 %v920_v12  ;;  %v948_v39 = vld [vmem:[%s1177_s0 + $0x64] ss:$12 sps:$4 sm:$0xff]   ;;  %v950_v41 = vld [vmem:[%s1177_s0 + $0x60] ss:$12 sps:$4 sm:$0xff]   ;;  %v953_v42 = vld [vmem:[%s1177_s0 + $0x7c] ss:$12 sps:$4 sm:$0xff]  }
   0xf   :  { %803 = vmatpush3.bf16.msra.mxu0 %v918_v10  ;;  %v960_v40 = vld [vmem:[%s1177_s0 + $0xb0] ss:$12 sps:$4 sm:$0xff]   ;;  %v955_v43 = vld [vmem:[%s1177_s0 + $0x78] ss:$12 sps:$4 sm:$0xff]   ;;  %v956_v44 = vld [vmem:[%s1177_s0 + $0x94] ss:$12 sps:$4 sm:$0xff]  }
  0x10   :  { %804 = vmatprep.subr.bf16.mxu0 %v919_v11  ;;  %v958_v45 = vld [vmem:[%s1177_s0 + $0x90] ss:$12 sps:$4 sm:$0xff]   ;;  %v961_v46 = vld [vmem:[%s1177_s0 + $0xac] ss:$12 sps:$4 sm:$0xff]   ;;  %v963_v47 = vld [vmem:[%s1177_s0 + $0xa8] ss:$12 sps:$4 sm:$0xff]  }
  0x11   :  { %883 = vmatpush3.bf16.msra.mxu1 %v920_v12  ;;  %v1131_v50 = vld [vmem:[%s1178_s2] ss:$0 sm:$0xff] }
  0x12   :  { %884 = vmatprep.subr.bf16.mxu1 %v923_v14 }
  0x13   :  { %805 = vmatpush3.bf16.msra.mxu0 %v921_v13 }
  0x14   :  { %806 = vmatprep.subr.bf16.mxu0 %v922_v15 }
  0x15   :  { %885 = vmatpush3.bf16.msra.mxu1 %v923_v14 }
  0x16   :  { %886 = vmatprep.subr.bf16.mxu1 %v926_v17 }
  0x17   :  { %807 = vmatpush3.bf16.msra.mxu0 %v924_v16 }
  0x18   :  { %808 = vmatprep.subr.bf16.mxu0 %v925_v18 }
  0x19   :  { %887 = vmatpush3.bf16.msra.mxu1 %v926_v17 }
  0x1a   :  { %888 = vmatprep.subr.bf16.mxu1 %v929_v21 }
  0x1b   :  { %809 = vmatpush3.bf16.msra.mxu0 %v927_v19 }
  0x1c   :  { %810 = vmatprep.subr.bf16.mxu0 %v928_v20 }
  0x1d   :  { %889 = vmatpush3.bf16.msra.mxu1 %v929_v21 }
  0x1e   :  { %890 = vmatprep.subr.bf16.mxu1 %v934_v25 }
  0x1f   :  { %811 = vmatpush3.bf16.msra.mxu0 %v930_v23 }
  0x21   :  { %891 = vmatpush3.bf16.msra.mxu1 %v934_v25 }
  0x22   :  { %407 = vmatmul.mubr.bf16.vlgmr.msra.gmra.mrb[0].mxu0 %v931_v26 }
  0x23   :  { %414 = vmatprep.mubr.bf16.mxu0 %v937_v27 }
  0x24   :  { %893 = vmatmul.mubr.bf16.vlgmr.msra.gmra.mrb[0].mxu1 %v936_v28 }
  0x25   :  { %896 = vmatprep.mubr.bf16.mxu1 %v943_v29 }
  0x2a   :  { %415 = vmatmul.mubr.bf16.gmra.mrb[4].mxu0 %v939_v30 }
  0x2b   :  { %422 = vmatprep.mubr.bf16.mxu0 %v940_v31 }
  0x2c   :  { %897 = vmatmul.mubr.bf16.gmra.mrb[4].mxu1 %v944_v32 }
  0x2d   :  { %900 = vmatprep.mubr.bf16.mxu1 %v951_v33 }
  0x32   :  { %423 = vmatmul.mubr.bf16.gmra.mrb[8].mxu0 %v942_v34 }
  0x33   :  { %430 = vmatprep.mubr.bf16.mxu0 %v945_v35 }
  0x34   :  { %901 = vmatmul.mubr.bf16.gmra.mrb[8].mxu1 %v952_v36 }
  0x35   :  { %904 = vmatprep.mubr.bf16.mxu1 %v959_v37 }
  0x3a   :  { %431 = vmatmul.mubr.bf16.gmra.mrb[12].mxu0 %v947_v38 }
  0x3b   :  { %438 = vmatprep.mubr.bf16.mxu0 %v948_v39 }
  0x3c   :  { %905 = vmatmul.mubr.bf16.gmra.mrb[12].mxu1 %v960_v40 }
  0x42   :  { %439 = vmatmul.mubr.bf16.gmra.mrb[16].mxu0 %v950_v41 }
  0x43   :  { %446 = vmatprep.mubr.bf16.mxu0 %v953_v42 }
  0x4a   :  { %447 = vmatmul.mubr.bf16.gmra.mrb[20].mxu0 %v955_v43 }
  0x4b   :  { %454 = vmatprep.mubr.bf16.mxu0 %v956_v44 }
  0x52   :  { %455 = vmatmul.mubr.bf16.gmra.mrb[24].mxu0 %v958_v45 }
  0x53   :  { %462 = vmatprep.mubr.bf16.mxu0 %v961_v46 }
  0x5a   :  { %463 = vmatmul.mubr.bf16.gmra.mrb[28].mxu0 %v963_v47 }
  0xf5   :  { %v812_v48 = vpop.f32.mrb[0].mxu0 }
  0xf6   :  { %v813_v49 = vpop.f32.mrb[1].mxu0 }
  0xf7   :  { %v814_v51 = vadd.f32 %v813_v49, %v812_v48  ;;  %v815_v52 = vpop.f32.mrb[2].mxu0  ;;  %v894_v54 = vpop.f32.mrb[0].mxu1 }
  0xf8   :  { %v816_v53 = vpop.f32.mrb[3].mxu0  ;;  %v505_v57 = vpop.f32.mrb[1].mxu1 }
  0xf9   :  { %v817_v55 = vadd.f32 %v816_v53, %v815_v52  ;;  %v409_v56 = vadd.f32 %v814_v51, %v1131_v50  ;;  %v895_v58 = vpop.f32.mrb[2].mxu1 }
  0xfa   :  { %v508_v61 = vpop.f32.mrb[3].mxu1 }
  0xfb   :  { %v506_v59 = vadd.f32 %v505_v57, %v409_v56  ;;  %v412_v60 = vadd.f32 %v817_v55, %v1131_v50 }
  0xfd   :  { %v509_v62 = vadd.f32 %v508_v61, %v412_v60  ;;  %v818_v63 = vpop.f32.mrb[4].mxu0  ;;  %v568_v1 = vmax.f32 %v506_v59, 0.0 }
  0xfe   :  { %v819_v0 = vpop.f32.mrb[5].mxu0 }
  0xff   :  { %v569_v2 = vmax.f32 %v509_v62, 0.0  ;;  %v820_v3 = vadd.f32 %v819_v0, %v818_v63  ;;  %v821_v4 = vpop.f32.mrb[6].mxu0  ;;  %v898_v6 = vpop.f32.mrb[4].mxu1 }
 0x100   :  { %v822_v5 = vpop.f32.mrb[7].mxu0  ;;  %v521_v10 = vpop.f32.mrb[5].mxu1 }
 0x101   :  { %v752_v7 = vpack.c.bf16 %v569_v2, %v568_v1  ;;  %v417_v8 = vadd.f32 %v820_v3, %v1131_v50  ;;  %v823_v9 = vadd.f32 %v822_v5, %v821_v4  ;;  %v899_v11 = vpop.f32.mrb[6].mxu1 }
 0x102   :  { %v524_v14 = vpop.f32.mrb[7].mxu1 }
 0x103   :  { %753 = vst [vmem:[%s1179_s3] sm:$0xff] %v752_v7   ;;  %v514_v12 = vadd.f32 %v894_v54, %v417_v8  ;;  %v420_v13 = vadd.f32 %v823_v9, %v1131_v50 }
 0x105   :  { %v517_v15 = vadd.f32 %v895_v58, %v420_v13  ;;  %v824_v16 = vpop.f32.mrb[8].mxu0  ;;  %v570_v18 = vmax.f32 %v514_v12, 0.0 }
 0x106   :  { %v825_v17 = vpop.f32.mrb[9].mxu0 }
 0x107   :  { %v571_v19 = vmax.f32 %v517_v15, 0.0  ;;  %v826_v20 = vadd.f32 %v825_v17, %v824_v16  ;;  %v827_v21 = vpop.f32.mrb[10].mxu0  ;;  %v902_v23 = vpop.f32.mrb[8].mxu1 }
 0x108   :  { %v828_v22 = vpop.f32.mrb[11].mxu0  ;;  %v537_v27 = vpop.f32.mrb[9].mxu1 }
 0x109   :  { %v757_v24 = vpack.c.bf16 %v571_v19, %v570_v18  ;;  %v829_v25 = vadd.f32 %v828_v22, %v827_v21  ;;  %v425_v26 = vadd.f32 %v826_v20, %v1131_v50  ;;  %v903_v28 = vpop.f32.mrb[10].mxu1 }
 0x10a   :  { %v540_v31 = vpop.f32.mrb[11].mxu1 }
 0x10b   :  { %789 = vst [vmem:[%s1179_s3 + $0x8] sm:$0xff] %v757_v24   ;;  %v522_v29 = vadd.f32 %v521_v10, %v425_v26  ;;  %v428_v30 = vadd.f32 %v829_v25, %v1131_v50 }
 0x10d   :  { %v525_v32 = vadd.f32 %v524_v14, %v428_v30  ;;  %v830_v33 = vpop.f32.mrb[12].mxu0  ;;  %v572_v35 = vmax.f32 %v522_v29, 0.0 }
 0x10e   :  { %v831_v34 = vpop.f32.mrb[13].mxu0 }
 0x10f   :  { %v573_v36 = vmax.f32 %v525_v32, 0.0  ;;  %v832_v37 = vadd.f32 %v831_v34, %v830_v33  ;;  %v833_v38 = vpop.f32.mrb[14].mxu0  ;;  %v1145_v40 = vpop.f32.mrb[12].mxu1 }
 0x110   :  { %v834_v39 = vpop.f32.mrb[15].mxu0  ;;  %v553_v44 = vpop.f32.mrb[13].mxu1 }
 0x111   :  { %v762_v41 = vpack.c.bf16 %v573_v36, %v572_v35  ;;  %v433_v42 = vadd.f32 %v832_v37, %v1131_v50  ;;  %v835_v43 = vadd.f32 %v834_v39, %v833_v38  ;;  %v907_v45 = vpop.f32.mrb[14].mxu1 }
 0x112   :  { %v556_v48 = vpop.f32.mrb[15].mxu1 }
 0x113   :  { %790 = vst [vmem:[%s1179_s3 + $0x10] sm:$0xff] %v762_v41   ;;  %v530_v46 = vadd.f32 %v898_v6, %v433_v42  ;;  %v436_v47 = vadd.f32 %v835_v43, %v1131_v50 }
 0x115   :  { %v533_v49 = vadd.f32 %v899_v11, %v436_v47  ;;  %v836_v51 = vpop.f32.mrb[16].mxu0  ;;  %v574_v53 = vmax.f32 %v530_v46, 0.0 }
 0x116   :  { %v837_v52 = vpop.f32.mrb[17].mxu0 }
 0x117   :  { %v575_v54 = vmax.f32 %v533_v49, 0.0  ;;  %v838_v55 = vadd.f32 %v837_v52, %v836_v51  ;;  %v839_v56 = vpop.f32.mrb[18].mxu0 }
 0x118   :  { %v840_v57 = vpop.f32.mrb[19].mxu0 }
 0x119   :  { %v767_v58 = vpack.c.bf16 %v575_v54, %v574_v53  ;;  %v841_v59 = vadd.f32 %v840_v57, %v839_v56  ;;  %v441_v60 = vadd.f32 %v838_v55, %v1131_v50 }
 0x11b   :  { %791 = vst [vmem:[%s1179_s3 + $0x18] sm:$0xff] %v767_v58   ;;  %v538_v61 = vadd.f32 %v537_v27, %v441_v60  ;;  %v444_v62 = vadd.f32 %v841_v59, %v1131_v50 }
 0x11d   :  { %v541_v63 = vadd.f32 %v540_v31, %v444_v62  ;;  %v842_v0 = vpop.f32.mrb[20].mxu0  ;;  %v576_v2 = vmax.f32 %v538_v61, 0.0 }
 0x11e   :  { %v843_v1 = vpop.f32.mrb[21].mxu0 }
 0x11f   :  { %v577_v3 = vmax.f32 %v541_v63, 0.0  ;;  %v844_v4 = vadd.f32 %v843_v1, %v842_v0  ;;  %v845_v5 = vpop.f32.mrb[22].mxu0 }
 0x120   :  { %v846_v6 = vpop.f32.mrb[23].mxu0 }
 0x121   :  { %v772_v7 = vpack.c.bf16 %v577_v3, %v576_v2  ;;  %v449_v8 = vadd.f32 %v844_v4, %v1131_v50  ;;  %v847_v9 = vadd.f32 %v846_v6, %v845_v5 }
 0x123   :  { %792 = vst [vmem:[%s1179_s3 + $0x20] sm:$0xff] %v772_v7   ;;  %v546_v10 = vadd.f32 %v902_v23, %v449_v8  ;;  %v452_v11 = vadd.f32 %v847_v9, %v1131_v50 }
 0x125   :  { %v549_v12 = vadd.f32 %v903_v28, %v452_v11  ;;  %v848_v13 = vpop.f32.mrb[24].mxu0  ;;  %v578_v15 = vmax.f32 %v546_v10, 0.0 }
 0x126   :  { %v849_v14 = vpop.f32.mrb[25].mxu0 }
 0x127   :  { %v579_v16 = vmax.f32 %v549_v12, 0.0  ;;  %v850_v17 = vadd.f32 %v849_v14, %v848_v13  ;;  %v851_v18 = vpop.f32.mrb[26].mxu0 }
 0x128   :  { %v852_v19 = vpop.f32.mrb[27].mxu0 }
 0x129   :  { %v777_v20 = vpack.c.bf16 %v579_v16, %v578_v15  ;;  %v853_v21 = vadd.f32 %v852_v19, %v851_v18  ;;  %v457_v22 = vadd.f32 %v850_v17, %v1131_v50 }
 0x12b   :  { %793 = vst [vmem:[%s1179_s3 + $0x28] sm:$0xff] %v777_v20   ;;  %v554_v24 = vadd.f32 %v553_v44, %v457_v22  ;;  %v460_v23 = vadd.f32 %v853_v21, %v1131_v50 }
 0x12d   :  { %v557_v25 = vadd.f32 %v556_v48, %v460_v23  ;;  %v854_v26 = vpop.f32.mrb[28].mxu0  ;;  %v580_v28 = vmax.f32 %v554_v24, 0.0 }
 0x12e   :  { %v855_v27 = vpop.f32.mrb[29].mxu0 }
 0x12f   :  { %v581_v29 = vmax.f32 %v557_v25, 0.0  ;;  %v856_v30 = vadd.f32 %v855_v27, %v854_v26  ;;  %v857_v31 = vpop.f32.mrb[30].mxu0 }
 0x130   :  { %v858_v32 = vpop.f32.mrb[31].mxu0 }
 0x131   :  { %v782_v33 = vpack.c.bf16 %v581_v29, %v580_v28  ;;  %v465_v34 = vadd.f32 %v856_v30, %v1131_v50  ;;  %v859_v35 = vadd.f32 %v858_v32, %v857_v31 }
 0x133   :  { %794 = vst [vmem:[%s1179_s3 + $0x30] sm:$0xff] %v782_v33   ;;  %v562_v36 = vadd.f32 %v1145_v40, %v465_v34  ;;  %v468_v37 = vadd.f32 %v859_v35, %v1131_v50 }
 0x135   :  { %v565_v38 = vadd.f32 %v907_v45, %v468_v37  ;;  %v582_v39 = vmax.f32 %v562_v36, 0.0 }
 0x137   :  { %v583_v41 = vmax.f32 %v565_v38, 0.0 }
 0x139   :  { %v787_v42 = vpack.c.bf16 %v583_v41, %v582_v39 }
 0x13b   :  { %795 = vst [vmem:[%s1179_s3 + $0x38] sm:$0xff] %v787_v42  }

// kernel: transformer_net.24
= control target key start
LH: loop header
LB: loop body
LE: loop exit
PB: predicated region body
PF: predicated region fallthrough
CT: control target
= control target key end

     0   :  { %s970_s1 = inlined_call_operand.vmem [shape: bf16[640,128], index: 1, kind: input, shape index: {}]   ;;  %s971_s0 = inlined_call_operand.vmem [shape: bf16[32,640], index: 0, kind: input, shape index: {}]   ;;  %s972_s2 = inlined_call_operand.vmem [shape: f32[1,128], index: 2, kind: input, shape index: {}]   ;;  %s973_s3 = inlined_call_operand.vmem [shape: bf16[32,128], index: 3, kind: output, shape index: {}]  }
   0x1   :  { %v737_v0 = vld [vmem:[%s970_s1 + $0x40] sm:$0xff]   ;;  %v741_v4 = vld [vmem:[%s970_s1 + $0x48] sm:$0xff]   ;;  %v745_v8 = vld [vmem:[%s970_s1 + $0x50] sm:$0xff]  }
   0x2   :  { %v738_v1 = vld [vmem:[%s970_s1] sm:$0xff]   ;;  %651 = vmatprep.subr.bf16.mxu0 %v737_v0  ;;  %v742_v5 = vld [vmem:[%s970_s1 + $0x8] sm:$0xff]   ;;  %v746_v9 = vld [vmem:[%s970_s1 + $0x10] sm:$0xff]  }
   0x3   :  { %v739_v2 = vld [vmem:[%s970_s1 + $0xc0] sm:$0xff]   ;;  %652 = vmatpush3.bf16.msra.mxu0 %v738_v1  ;;  %v743_v6 = vld [vmem:[%s970_s1 + $0xc8] sm:$0xff]   ;;  %v747_v10 = vld [vmem:[%s970_s1 + $0xd0] sm:$0xff]  }
   0x4   :  { %v740_v3 = vld [vmem:[%s970_s1 + $0x80] sm:$0xff]   ;;  %679 = vmatprep.subr.bf16.mxu1 %v739_v2  ;;  %653 = vmatprep.subr.bf16.mxu0 %v741_v4  ;;  %v744_v7 = vld [vmem:[%s970_s1 + $0x88] sm:$0xff]   ;;  %v748_v11 = vld [vmem:[%s970_s1 + $0x90] sm:$0xff]  }
   0x5   :  { %680 = vmatpush3.bf16.msra.mxu1 %v740_v3  ;;  %v749_v12 = vld [vmem:[%s970_s1 + $0x58] sm:$0xff]   ;;  %v753_v16 = vld [vmem:[%s970_s1 + $0x60] sm:$0xff]   ;;  %v757_v20 = vld [vmem:[%s970_s1 + $0x68] sm:$0xff]  }
   0x6   :  { %681 = vmatprep.subr.bf16.mxu1 %v743_v6  ;;  %v750_v13 = vld [vmem:[%s970_s1 + $0x18] sm:$0xff]   ;;  %v754_v17 = vld [vmem:[%s970_s1 + $0x20] sm:$0xff]   ;;  %v758_v21 = vld [vmem:[%s970_s1 + $0x28] sm:$0xff]  }
   0x7   :  { %654 = vmatpush3.bf16.msra.mxu0 %v742_v5  ;;  %v751_v14 = vld [vmem:[%s970_s1 + $0xd8] sm:$0xff]   ;;  %v755_v18 = vld [vmem:[%s970_s1 + $0xe0] sm:$0xff]   ;;  %v759_v22 = vld [vmem:[%s970_s1 + $0xe8] sm:$0xff]  }
   0x8   :  { %655 = vmatprep.subr.bf16.mxu0 %v745_v8  ;;  %v752_v15 = vld [vmem:[%s970_s1 + $0x98] sm:$0xff]   ;;  %v756_v19 = vld [vmem:[%s970_s1 + $0xa0] sm:$0xff]   ;;  %v760_v23 = vld [vmem:[%s970_s1 + $0xa8] sm:$0xff]  }
   0x9   :  { %682 = vmatpush3.bf16.msra.mxu1 %v744_v7  ;;  %v761_v24 = vld [vmem:[%s970_s1 + $0x70] sm:$0xff]   ;;  %v765_v28 = vld [vmem:[%s970_s1 + $0x78] sm:$0xff]   ;;  %v772_v34 = vld [vmem:[%s970_s1 + $0x100] sm:$0xff]  }
   0xa   :  { %683 = vmatprep.subr.bf16.mxu1 %v747_v10  ;;  %v762_v25 = vld [vmem:[%s970_s1 + $0x30] sm:$0xff]   ;;  %v766_v29 = vld [vmem:[%s970_s1 + $0x38] sm:$0xff]   ;;  %v775_v36 = vld [vmem:[%s971_s0 + $0xc] ss:$20 sps:$4 sm:$0xff]  }
   0xb   :  { %656 = vmatpush3.bf16.msra.mxu0 %v746_v9  ;;  %v763_v26 = vld [vmem:[%s970_s1 + $0xf0] sm:$0xff]   ;;  %v767_v30 = vld [vmem:[%s970_s1 + $0xf8] sm:$0xff]   ;;  %v776_v37 = vld [vmem:[%s970_s1 + $0x108] sm:$0xff]   ;;  %487 = vmatprep.mubr.bf16.mxu1 %v775_v36 }
   0xc   :  { %657 = vmatprep.subr.bf16.mxu0 %v749_v12  ;;  %v764_v27 = vld [vmem:[%s970_s1 + $0xb0] sm:$0xff]   ;;  %v770_v32 = vld [vmem:[%s971_s0 + $0x4] ss:$20 sps:$4 sm:$0xff]   ;;  %v773_v35 = vld [vmem:[%s971_s0 + $0x8] ss:$20 sps:$4 sm:$0xff]  }
   0xd   :  { %684 = vmatpush3.bf16.msra.mxu1 %v748_v11  ;;  %v768_v31 = vld [vmem:[%s971_s0] ss:$20 sps:$4 sm:$0xff]   ;;  %v771_v33 = vld [vmem:[%s970_s1 + $0xb8] sm:$0xff]   ;;  %438 = vmatprep.mubr.bf16.mxu0 %v770_v32  ;;  %v786_v43 = vld [vmem:[%s971_s0 + $0x30] ss:$20 sps:$4 sm:$0xff]  }
   0xe   :  { %685 = vmatprep.subr.bf16.mxu1 %v751_v14  ;;  %v777_v38 = vld [vmem:[%s970_s1 + $0x110] sm:$0xff]   ;;  %v780_v39 = vld [vmem:[%s971_s0 + $0x2c] ss:$20 sps:$4 sm:$0xff]   ;;  %v778_v40 = vld [vmem:[%s970_s1 + $0x118] sm:$0xff]  }
   0xf   :  { %658 = vmatpush3.bf16.msra.mxu0 %v750_v13  ;;  %v783_v41 = vld [vmem:[%s971_s0 + $0x28] ss:$20 sps:$4 sm:$0xff]   ;;  %v779_v44 = vld [vmem:[%s970_s1 + $0x120] sm:$0xff]   ;;  %v787_v47 = vld [vmem:[%s970_s1 + $0x130] sm:$0xff]  }
  0x10   :  { %659 = vmatprep.subr.bf16.mxu0 %v753_v16  ;;  %v784_v42 = vld [vmem:[%s971_s0 + $0x34] ss:$20 sps:$4 sm:$0xff]   ;;  %v789_v45 = vld [vmem:[%s971_s0 + $0x10] ss:$20 sps:$4 sm:$0xff]   ;;  %v788_v48 = vld [vmem:[%s970_s1 + $0x138] sm:$0xff]  }
  0x11   :  { %686 = vmatpush3.bf16.msra.mxu1 %v752_v15  ;;  %v782_v46 = vld [vmem:[%s970_s1 + $0x128] sm:$0xff]   ;;  %v581_v51 = vld [vmem:[%s972_s2] ss:$0 sm:$0xff] }
  0x12   :  { %687 = vmatprep.subr.bf16.mxu1 %v755_v18  ;;  %v790_v49 = vld [vmem:[%s971_s0 + $0x38] ss:$20 sps:$4 sm:$0xff]  }
  0x13   :  { %660 = vmatpush3.bf16.msra.mxu0 %v754_v17 }
  0x14   :  { %661 = vmatprep.subr.bf16.mxu0 %v757_v20 }
  0x15   :  { %688 = vmatpush3.bf16.msra.mxu1 %v756_v19 }
  0x16   :  { %689 = vmatprep.subr.bf16.mxu1 %v759_v22 }
  0x17   :  { %662 = vmatpush3.bf16.msra.mxu0 %v758_v21 }
  0x18   :  { %663 = vmatprep.subr.bf16.mxu0 %v761_v24 }
  0x19   :  { %690 = vmatpush3.bf16.msra.mxu1 %v760_v23 }
  0x1a   :  { %691 = vmatprep.subr.bf16.mxu1 %v763_v26 }
  0x1b   :  { %664 = vmatpush3.bf16.msra.mxu0 %v762_v25 }
  0x1c   :  { %665 = vmatprep.subr.bf16.mxu0 %v765_v28 }
  0x1d   :  { %692 = vmatpush3.bf16.msra.mxu1 %v764_v27 }
  0x1e   :  { %693 = vmatprep.subr.bf16.mxu1 %v767_v30 }
  0x1f   :  { %666 = vmatpush3.bf16.msra.mxu0 %v766_v29 }
  0x20   :  { %717 = vmatprep.subr.bf16.mxu0 %v772_v34 }
  0x21   :  { %694 = vmatpush3.bf16.msra.mxu1 %v771_v33 }
  0x22   :  { %439 = vmatmul.mubr.bf16.vlgmr.msra.gmra.mrb[0].mxu0 %v768_v31 }
  0x23   :  { %718 = vmatpush3.bf16.msra.mxu0 %v772_v34  ;;  %446 = vmatprep.mubr.bf16.mxu0 %v780_v39 }
  0x24   :  { %488 = vmatmul.mubr.bf16.vlgmr.msra.gmra.mrb[0].mxu1 %v773_v35  ;;  %719 = vmatprep.subr.bf16.mxu0 %v776_v37 }
  0x25   :  { %495 = vmatprep.mubr.bf16.mxu1 %v784_v42 }
  0x27   :  { %720 = vmatpush3.bf16.msra.mxu0 %v776_v37 }
  0x28   :  { %721 = vmatprep.subr.bf16.mxu0 %v777_v38 }
  0x2a   :  { %447 = vmatmul.mubr.bf16.gmra.mrb[4].mxu0 %v783_v41 }
  0x2b   :  { %722 = vmatpush3.bf16.msra.mxu0 %v777_v38  ;;  %733 = vmatprep.mubr.bf16.mxu0 %v789_v45 }
  0x2c   :  { %723 = vmatprep.subr.bf16.mxu0 %v778_v40  ;;  %496 = vmatmul.mubr.bf16.gmra.mrb[4].mxu1 %v786_v43 }
  0x2f   :  { %724 = vmatpush3.bf16.msra.mxu0 %v778_v40 }
  0x30   :  { %725 = vmatprep.subr.bf16.mxu0 %v779_v44 }
  0x33   :  { %726 = vmatpush3.bf16.msra.mxu0 %v779_v44 }
  0x34   :  { %727 = vmatprep.subr.bf16.mxu0 %v782_v46 }
  0x37   :  { %728 = vmatpush3.bf16.msra.mxu0 %v782_v46 }
  0x38   :  { %729 = vmatprep.subr.bf16.mxu0 %v787_v47 }
  0x3b   :  { %730 = vmatpush3.bf16.msra.mxu0 %v787_v47 }
  0x3c   :  { %731 = vmatprep.subr.bf16.mxu0 %v788_v48 }
  0x3f   :  { %732 = vmatpush3.bf16.msra.mxu0 %v788_v48 }
  0x42   :  { %734 = vmatmul.mubr.bf16.vlgmr.msra.gmra.mrb[8].mxu0 %v790_v49 }
  0xf5   :  { %v667_v50 = vpop.f32.mrb[0].mxu0 }
  0xf6   :  { %v668_v52 = vpop.f32.mrb[1].mxu0 }
  0xf7   :  { %v669_v53 = vadd.f32 %v668_v52, %v667_v50  ;;  %v670_v54 = vpop.f32.mrb[2].mxu0  ;;  %v695_v55 = vpop.f32.mrb[0].mxu1 }
  0xf8   :  { %v671_v56 = vpop.f32.mrb[3].mxu0  ;;  %v696_v59 = vpop.f32.mrb[1].mxu1 }
  0xf9   :  { %v441_v57 = vadd.f32 %v669_v53, %v581_v51  ;;  %v672_v58 = vadd.f32 %v671_v56, %v670_v54  ;;  %v697_v60 = vadd.f32 %v696_v59, %v695_v55  ;;  %v698_v61 = vpop.f32.mrb[2].mxu1 }
  0xfa   :  { %v699_v63 = vpop.f32.mrb[3].mxu1 }
  0xfb   :  { %v444_v62 = vadd.f32 %v672_v58, %v581_v51  ;;  %v700_v0 = vadd.f32 %v699_v63, %v698_v61  ;;  %v490_v1 = vadd.f32 %v697_v60, %v441_v57 }
  0xfd   :  { %v673_v2 = vpop.f32.mrb[4].mxu0  ;;  %v493_v4 = vadd.f32 %v700_v0, %v444_v62 }
  0xfe   :  { %v674_v3 = vpop.f32.mrb[5].mxu0 }
  0xff   :  { %v675_v5 = vadd.f32 %v674_v3, %v673_v2  ;;  %v676_v6 = vpop.f32.mrb[6].mxu0  ;;  %v701_v7 = vpop.f32.mrb[4].mxu1 }
 0x100   :  { %v677_v8 = vpop.f32.mrb[7].mxu0  ;;  %v702_v11 = vpop.f32.mrb[5].mxu1 }
 0x101   :  { %v449_v9 = vadd.f32 %v675_v5, %v581_v51  ;;  %v678_v10 = vadd.f32 %v677_v8, %v676_v6  ;;  %v703_v12 = vadd.f32 %v702_v11, %v701_v7  ;;  %v704_v13 = vpop.f32.mrb[6].mxu1 }
 0x102   :  { %v705_v15 = vpop.f32.mrb[7].mxu1 }
 0x103   :  { %v452_v14 = vadd.f32 %v678_v10, %v581_v51  ;;  %v706_v16 = vadd.f32 %v705_v15, %v704_v13  ;;  %v498_v17 = vadd.f32 %v703_v12, %v449_v9 }
 0x105   :  { %v501_v18 = vadd.f32 %v706_v16, %v452_v14 }
 0x115   :  { %v735_v19 = vpop.f32.mrb[8].mxu0 }
 0x116   :  { %v547_v20 = vadd.f32 %v735_v19, %v498_v17  ;;  %v538_v21 = vpop.f32.mrb[9].mxu0 }
 0x117   :  { %v539_v22 = vadd.f32 %v538_v21, %v490_v1  ;;  %v736_v23 = vpop.f32.mrb[10].mxu0 }
 0x118   :  { %v550_v24 = vadd.f32 %v736_v23, %v501_v18  ;;  %v541_v25 = vpop.f32.mrb[11].mxu0  ;;  %v555_v27 = vmax.f32 %v547_v20, 0.0 }
 0x119   :  { %v542_v26 = vadd.f32 %v541_v25, %v493_v4  ;;  %v553_v29 = vmax.f32 %v539_v22, 0.0 }
 0x11a   :  { %v556_v28 = vmax.f32 %v550_v24, 0.0 }
 0x11b   :  { %v554_v30 = vmax.f32 %v542_v26, 0.0 }
 0x11c   :  { %v648_v31 = vpack.c.bf16 %v556_v28, %v555_v27 }
 0x11d   :  { %v643_v32 = vpack.c.bf16 %v554_v30, %v553_v29 }
 0x11e   :  { %650 = vst [vmem:[%s973_s3 + $0x8] sm:$0xff] %v648_v31  }
 0x11f   :  { %644 = vst [vmem:[%s973_s3] sm:$0xff] %v643_v32  }

// kernel: transformer_net.26
= control target key start
LH: loop header
LB: loop body
LE: loop exit
PB: predicated region body
PF: predicated region fallthrough
CT: control target
= control target key end

     0   :  { %s2222_s18 = smov 0   ;;  %s2559_s0 = inlined_call_operand.vmem [shape: bf16[2,42,128], index: 0, kind: input, shape index: {}]   ;;  %s2560_s1 = inlined_call_operand.vmem [shape: bf16[9,128,128], index: 1, kind: input, shape index: {}]   ;;  %s2561_s2 = inlined_call_operand.vmem [shape: f32[1,128], index: 2, kind: input, shape index: {}]   ;;  %s2562_s3 = inlined_call_operand.vmem [shape: f32[1,128], index: 3, kind: input, shape index: {}]   ;;  %s2563_s4 = inlined_call_operand.vmem [shape: f32[1,24,1], index: 4, kind: input, shape index: {}]   ;;  %s2564_s5 = inlined_call_operand.vmem [shape: bf16[2,24,128], index: 5, kind: output, shape index: {}]  }
   0x1 LB: > { %s1547_s19 = sadd.s32 4294967295, %s2189_s18   ;;  %p1551_p0 = scmp.ge.s32.totalorder %s2189_s18, 1  ;;  %s2189_s18 = sphi %s2222_s18, %s15_s18  }
   0x2   : > { %p187_p1 = scmp.lt.s32.totalorder %s2189_s18, 3 }
   0x4   : > { %p188_p2 = pnand %p1551_p0, %p187_p1 }
   0x5   : > { %v2096_v0 = vld [vmem:[%s2560_s1 + $0x40] sm:$0xff] (!%p188_p2)   ;;  %p215_p3 = scmp.lt.s32.totalorder (!%p188_p2), %s1547_s19, 1  ;;  %v2098_v2 = vld [vmem:[%s2560_s1 + $0x48] sm:$0xff] (!%p188_p2)   ;;  %v2100_v4 = vld [vmem:[%s2560_s1 + $0x50] sm:$0xff] (!%p188_p2)   ;;  %vm273_vm0 = vsmask.f32 (!%p188_p2), 7424 }
   0x6   : > { %191 = sbr.rel (%p188_p2) target bundleno = 450 (0x1c2), region = 40  ;;  %v2097_v1 = vld [vmem:[%s2560_s1 + $0x100] sm:$0xff] (!%p188_p2)   ;;  %1872 = vmatprep.subr.bf16.mxu1 (!%p188_p2), %v2096_v0  ;;  %v2099_v3 = vld [vmem:[%s2560_s1 + $0x108] sm:$0xff] (!%p188_p2)   ;;  %v2101_v5 = vld [vmem:[%s2560_s1 + $0x110] sm:$0xff] (!%p188_p2)   ;;  %vm763_vm1 = vsmask.f32 (!%p188_p2), 4352 }
   0x7   : > { %1952 = vmatprep.subr.bf16.mxu0 (!%p188_p2), %v2097_v1  ;;  %1873 = vmatpush3.bf16.msra.mxu1 (!%p188_p2), %v2096_v0  ;;  %v2102_v6 = vld [vmem:[%s2560_s1 + $0x58] sm:$0xff] (!%p188_p2)   ;;  %v2104_v8 = vld [vmem:[%s2560_s1 + $0x60] sm:$0xff] (!%p188_p2)   ;;  %v2106_v10 = vld [vmem:[%s2560_s1 + $0x68] sm:$0xff] (!%p188_p2)   ;;  %v2191_v53 = vmov (!%p188_p2), 0   ;;  %vm507_vm2 = vcmask (!%p188_p2), 1046528   ;;  %vm1033_vm3 = vcmask (!%p188_p2), 1045504  }
   0x8   : > { %1953 = vmatpush3.bf16.msra.mxu0 (!%p188_p2), %v2097_v1  ;;  %1874 = vmatprep.subr.bf16.mxu1 (!%p188_p2), %v2098_v2  ;;  %v2103_v7 = vld [vmem:[%s2560_s1 + $0x118] sm:$0xff] (!%p188_p2)   ;;  %v2105_v9 = vld [vmem:[%s2560_s1 + $0x120] sm:$0xff] (!%p188_p2)   ;;  %v2107_v11 = vld [vmem:[%s2560_s1 + $0x128] sm:$0xff] (!%p188_p2)   ;;  %vm637_vm4 = vcmask (!%p188_p2), 1044480   ;;  %vm1159_vm5 = vsmask.f32 (!%p188_p2), 5376 }
   0x9   : > { %1954 = vmatprep.subr.bf16.mxu0 (!%p188_p2), %v2099_v3  ;;  %v2108_v23 = vld [vmem:[%s2560_s1 + $0x70] sm:$0xff] (!%p188_p2)   ;;  %v2110_v30 = vld [vmem:[%s2560_s1 + $0x78] sm:$0xff] (!%p188_p2)   ;;  %v2114_v44 = vld [vmem:[%s2560_s1] sm:$0xff] (!%p188_p2)   ;;  %2094 = vset.pattern.permute.xlu0 (!%p188_p2), %v2191_v53 }
   0xa   : > { %v2109_v26 = vld [vmem:[%s2560_s1 + $0x130] sm:$0xff] (!%p188_p2)   ;;  %v2111_v34 = vld [vmem:[%s2560_s1 + $0x138] sm:$0xff] (!%p188_p2)   ;;  %v2117_v46 = vld [vmem:[%s2560_s1 + $0x140] sm:$0xff] (!%p188_p2)   ;;  %2095 = vset.pattern.permute.xlu1 (!%p188_p2), %v2191_v53 }
   0xb   : > { %1875 = vmatpush3.bf16.msra.mxu1 (!%p188_p2), %v2098_v2  ;;  %v2118_v48 = vld [vmem:[%s2560_s1 + $0x8] sm:$0xff] (!%p188_p2)   ;;  %v2120_v51 = vld [vmem:[%s2560_s1 + $0x10] sm:$0xff] (!%p188_p2)   ;;  %v2122_v54 = vld [vmem:[%s2560_s1 + $0x18] sm:$0xff] (!%p188_p2)  }
   0xc   : > { %1955 = vmatpush3.bf16.msra.mxu0 (!%p188_p2), %v2099_v3  ;;  %1876 = vmatprep.subr.bf16.mxu1 (!%p188_p2), %v2100_v4  ;;  %v2119_v49 = vld [vmem:[%s2560_s1 + $0x148] sm:$0xff] (!%p188_p2)   ;;  %v2121_v52 = vld [vmem:[%s2560_s1 + $0x150] sm:$0xff] (!%p188_p2)   ;;  %v2123_v55 = vld [vmem:[%s2560_s1 + $0x158] sm:$0xff] (!%p188_p2)  }
   0xd   : > { %s2566_s19 = smov (!%p215_p3, %s1547_s19), 1  ;;  %1956 = vmatprep.subr.bf16.mxu0 %v2101_v5  ;;  %v2124_v56 = vld [vmem:[%s2560_s1 + $0x20] sm:$0xff]   ;;  %v2126_v58 = vld [vmem:[%s2560_s1 + $0x28] sm:$0xff]   ;;  %v2128_v60 = vld [vmem:[%s2560_s1 + $0x30] sm:$0xff]  }
   0xe   : > { %s2083_s11 = smul.u32 24, %s2566_s19  ;;  %v2125_v57 = vld [vmem:[%s2560_s1 + $0x160] sm:$0xff]   ;;  %v2127_v59 = vld [vmem:[%s2560_s1 + $0x168] sm:$0xff]   ;;  %v2129_v61 = vld [vmem:[%s2560_s1 + $0x170] sm:$0xff]  }
   0xf   : > { %1877 = vmatpush3.bf16.msra.mxu1 %v2100_v4  ;;  %v2130_v62 = vld [vmem:[%s2560_s1 + $0x38] sm:$0xff]   ;;  %s2084_s17 = smul.u32 12, %s2566_s19 }
  0x10   : > { %1957 = vmatpush3.bf16.msra.mxu0 %v2101_v5  ;;  %1878 = vmatprep.subr.bf16.mxu1 %v2102_v6  ;;  %s2266_s20 = scalar_lea.vmem %s2559_s0, %s2083_s11  ;;  %v2131_v4 = vld [vmem:[%s2560_s1 + $0x178] sm:$0xff]  }
  0x11   : > { %1958 = vmatprep.subr.bf16.mxu0 %v2103_v7  ;;  %v226_v12 = vld [vmem:[%s2266_s20] sm:$0xf]  ;;  %v2276_v13 = vld [vmem:[%s2266_s20 + $0x4] sm:$0xf]  ;;  %v2279_v14 = vld [vmem:[%s2266_s20 + $0x8] sm:$0xf]  ;;  %s224_s25 = scalar_lea.vmem %s2564_s5, %s2084_s17 }
  0x12   : > { %v245_v15 = vld [vmem:[%s2266_s20 + $0xc] sm:$0x1]  ;;  %v1570_v16 = vcombine.low %v226_v12, %v2276_v13  ;;  %v612_v18 = vld [vmem:[%s2266_s20] sm:$0x8]  ;;  %v1681_v50 = vcombine.low %v2276_v13, %v2279_v14  ;;  %v1002_v0 = vld [vmem:[%s2266_s20 + $0x4] sm:$0xc] }
  0x13   : > { %1879 = vmatpush3.bf16.msra.mxu1 %v2102_v6  ;;  %v2284_v17 = vcombine.low %v2279_v14, %v245_v15  ;;  %v2288_v21 = vcombine.low %v612_v18, %v2276_v13  ;;  %v2291_v22 = vld [vmem:[%s2266_s20 + $0xc] sm:$0xf]  ;;  %v486_v63 = vld [vmem:[%s2266_s20] sm:$0xe]  ;;  %v2362_v1 = vld [vmem:[%s2266_s20 + $0x8] sm:$0xf] }
  0x14   : > { %1959 = vmatpush3.bf16.msra.mxu0 %v2103_v7  ;;  %1880 = vmatprep.subr.bf16.mxu1 %v2104_v8  ;;  %v275_v19 = vshrl.u32 %v1570_v16, 16  ;;  %v277_v20 = vshll.u32 %v1570_v16, 16  ;;  %v1656_v25 = vcombine.low %v2279_v14, %v2291_v22  ;;  %v2365_v2 = vld [vmem:[%s2266_s20 + $0xc] sm:$0xf]  ;;  %v1005_v3 = vld [vmem:[%s2266_s20 + $0x10] sm:$0x3]  ;;  %v1605_v5 = vcombine.low %v486_v63, %v2276_v13 }
  0x15   : > { %1960 = vmatprep.subr.bf16.mxu0 %v2105_v9  ;;  %v282_v24 = vshll.u32 %v2284_v17, 16  ;;  %v765_v28 = vshrl.u32 %v2288_v21, 16  ;;  %v768_v29 = vshll.u32 %v2288_v21, 16  ;;  %v286_v43 = vshrl.u32 %v2284_v17, 16  ;;  %v2137_v18 = vld [vmem:[%s2560_s1 + $0x88] sm:$0xff]  }
  0x16   : > { %v279_v27 = vrot.slane %v277_v20, 1  ;;  %v773_v32 = vshrl.u32 %v1656_v25, 16  ;;  %v776_v33 = vshll.u32 %v1656_v25, 16  ;;  %v2373_v6 = vcombine.low %v1002_v0, %v2362_v1  ;;  %v613_v25 = vld [vmem:[%s2266_s20 + $0xc] sm:$0x7] }
  0x17   : > { %1881 = vmatpush3.bf16.msra.mxu1 %v2104_v8  ;;  %v284_v31 = vrot.slane %v282_v24, 1  ;;  %v767_v36 = vrot.slane %v765_v28, 3  ;;  %v770_v37 = vrot.slane %v768_v29, 4  ;;  %v1708_v7 = vcombine.low %v2365_v2, %v1005_v3  ;;  %v2132_v8 = vld [vmem:[%s2560_s1 + $0x80] sm:$0xff]   ;;  %v2140_v24 = vld [vmem:[%s2560_s1 + $0x190] sm:$0xff]   ;;  %v2141_v28 = vld [vmem:[%s2560_s1 + $0x98] sm:$0xff]  }
  0x18   : > { %1961 = vmatpush3.bf16.msra.mxu0 %v2105_v9  ;;  %1882 = vmatprep.subr.bf16.mxu1 %v2106_v10  ;;  %v280_v35 = vor.u32 %v279_v27, %v275_v19  ;;  %v775_v38 = vrot.slane %v773_v32, 3  ;;  %v778_v39 = vrot.slane %v776_v33, 4  ;;  %v2134_v9 = vld [vmem:[%s2560_s1 + $0x180] sm:$0xff]   ;;  %v509_v12 = vrot.slane %v2284_v17, 1  ;;  %v2138_v19 = vld [vmem:[%s2560_s1 + $0x188] sm:$0xff]   ;;  %v2142_v29 = vld [vmem:[%s2560_s1 + $0x198] sm:$0xff]  }
  0x19   : > { %1962 = vmatprep.subr.bf16.mxu0 %v2107_v11  ;;  %v771_v41 = vor.u32 %v770_v37, %v767_v36  ;;  %v288_v47 = vor.u32 %v286_v43, %v284_v31  ;;  %v1682_v13 = vcombine.low %v2291_v22, %v2291_v22  ;;  %v1034_v15 = vrot.slane %v2373_v6, 2  ;;  %v1403_v32 = vld [vmem:[%s2563_s4] sm:$0xff]  ;;  %v1405_v33 = vld [vmem:[%s2563_s4 + $0x10] sm:$0xff]  ;;  %v2146_v36 = vld [vmem:[%s2560_s1 + $0x1a8] sm:$0xff]  }
  0x1a   : > { %v285_v40 = vsel %vm273_vm0, %v280_v35, %v284_v31  ;;  %v779_v42 = vor.u32 %v778_v39, %v775_v38  ;;  %v1631_v27 = vcombine.low %v2279_v14, %v613_v25  ;;  %v2144_v31 = vld [vmem:[%s2560_s1 + $0x1a0] sm:$0xff]   ;;  %v1138_v35 = vld [vmem:[%s2266_s20 + $0x10] sm:$0x7]  ;;  %1408 = vperm.xlu0 %2094, %v1403_v32   ;;  %v1404_v37 = vld [vmem:[%s2563_s4 + $0x8] sm:$0xff]  ;;  %1418 = vperm.xlu1 %2095, %v1405_v33  }
  0x1b   : > { %1883 = vmatpush3.bf16.msra.mxu1 %v2106_v10  ;;  %1888 = vmatprep.mubr.bf16.mxu1 %v285_v40  ;;  %v1580_v10 = vcombine.low %v2279_v14, %v2279_v14  ;;  %v2143_v14 = vld [vmem:[%s2560_s1 + $0xa0] sm:$0xff]   ;;  %v2443_v38 = vcombine.low %v2365_v2, %v1138_v35  ;;  %v2147_v39 = vld [vmem:[%s2560_s1 + $0xb0] sm:$0xff]   ;;  %v2161_v17 = vld [vmem:[%s2560_s1 + $0xd8] sm:$0xff]  }
  0x1c   : > { %1963 = vmatpush3.bf16.msra.mxu0 %v2107_v11  ;;  %1884 = vmatprep.subr.bf16.mxu1 %v2108_v23  ;;  %v780_v45 = vsel %vm763_vm1, %v771_v41, %v779_v42  ;;  %v508_v11 = vrot.slane %v1605_v5, 1  ;;  %v2148_v40 = vld [vmem:[%s2560_s1 + $0x1b0] sm:$0xff]   ;;  %v1161_v41 = vshrl.u32 %v2373_v6, 16  ;;  %v2165_v63 = vld [vmem:[%s2560_s1 + $0xe8] sm:$0xff]   ;;  %v2169_v5 = vld [vmem:[%s2560_s1 + $0xf8] sm:$0xff]  }
  0x1d   : > { %1964 = vmatprep.subr.bf16.mxu0 %v2109_v26  ;;  %1968 = vmatprep.mubr.bf16.mxu0 %v780_v45  ;;  %v1169_v43 = vshrl.u32 %v2443_v38, 16  ;;  %v2149_v45 = vld [vmem:[%s2560_s1 + $0xb8] sm:$0xff]   ;;  %v2166_v0 = vld [vmem:[%s2560_s1 + $0x1e8] sm:$0xff]   ;;  %v2167_v2 = vld [vmem:[%s2560_s1 + $0xf0] sm:$0xff]  }
  0x1e   : > { %v510_v20 = vsel %vm507_vm2, %v508_v11, %v509_v12  ;;  %1413 = vperm.xlu0 %2094, %v1404_v37   ;;  %v2168_v3 = vld [vmem:[%s2560_s1 + $0x1f0] sm:$0xff]   ;;  %v2173_v11 = vld [vmem:[%s2560_s1 + $0x208] sm:$0xff]  }
  0x1f   : > { %1885 = vmatpush3.bf16.msra.mxu1 %v2108_v23  ;;  %v2139_v23 = vld [vmem:[%s2560_s1 + $0x90] sm:$0xff]  }
  0x20   : > { %1965 = vmatpush3.bf16.msra.mxu0 %v2109_v26  ;;  %1886 = vmatprep.subr.bf16.mxu1 %v2110_v30  ;;  %v638_v26 = vrot.slane %v2288_v21, 3 }
  0x21   : > { %1966 = vmatprep.subr.bf16.mxu0 %v2111_v34 }
  0x23   : > { %1887 = vmatpush3.bf16.msra.mxu1 %v2110_v30  ;;  %v2414_v30 = vrot.slane %v1631_v27, 3 }
  0x24   : > { %1967 = vmatpush3.bf16.msra.mxu0 %v2111_v34  ;;  %1892 = vmatprep.subr.bf16.mxu1 %v2114_v44  ;;  %v2145_v34 = vld [vmem:[%s2560_s1 + $0xa8] sm:$0xff]  }
  0x25   : > { %1972 = vmatprep.subr.bf16.mxu0 %v2117_v46  ;;  %v2418_v21 = vsel %vm637_vm4, %v638_v26, %v2414_v30 }
  0x26   : > { %1889 = vmatmul.mubr.bf16.vlgmr.msra.gmra.mrb[0].mxu1 %v288_v47  ;;  %v1163_v47 = vrot.slane %v1161_v41, 2 }
  0x27   : > { %1893 = vmatpush3.bf16.msra.mxu1 %v2114_v44  ;;  %1969 = vmatmul.mubr.bf16.vlgmr.msra.gmra.mrb[0].mxu0 %v779_v42  ;;  %v1164_v42 = vshll.u32 %v2373_v6, 16  ;;  %v1172_v44 = vshll.u32 %v2443_v38, 16  ;;  %v2170_v6 = vld [vmem:[%s2560_s1 + $0x1f8] sm:$0xff]  }
  0x28   : > { %1973 = vmatpush3.bf16.msra.mxu0 %v2117_v46  ;;  %1894 = vmatprep.subr.bf16.mxu1 %v2118_v48  ;;  %v2150_v46 = vld [vmem:[%s2560_s1 + $0x1b8] sm:$0xff]  }
  0x29   : > { %1974 = vmatprep.subr.bf16.mxu0 %v2119_v49  ;;  %1908 = vmatprep.mubr.bf16.mxu1 %v1570_v16  ;;  %v2388_v16 = vrot.slane %v1708_v7, 2 }
  0x2a   : > { %1988 = vmatprep.mubr.bf16.mxu0 %v1681_v50  ;;  %v1174_v50 = vrot.slane %v1172_v44, 3 }
  0x2b   : > { %1895 = vmatpush3.bf16.msra.mxu1 %v2118_v48  ;;  %v1036_v22 = vsel %vm1033_vm3, %v1034_v15, %v2388_v16  ;;  %v1166_v48 = vrot.slane %v1164_v42, 3  ;;  %v2176_v15 = vld [vmem:[%s2560_s1 + $0x220] sm:$0xff]  }
  0x2c   : > { %1975 = vmatpush3.bf16.msra.mxu0 %v2119_v49  ;;  %1896 = vmatprep.subr.bf16.mxu1 %v2120_v51  ;;  %v1171_v49 = vrot.slane %v1169_v43, 2 }
  0x2d   : > { %1976 = vmatprep.subr.bf16.mxu0 %v2121_v52  ;;  %v1167_v53 = vor.u32 %v1166_v48, %v1163_v47 }
  0x2f   : > { %1897 = vmatpush3.bf16.msra.mxu1 %v2120_v51  ;;  %v2152_v51 = vld [vmem:[%s2560_s1 + $0xc0] sm:$0xff]  }
  0x30   : > { %1977 = vmatpush3.bf16.msra.mxu0 %v2121_v52  ;;  %1898 = vmatprep.subr.bf16.mxu1 %v2122_v54  ;;  %v2156_v52 = vld [vmem:[%s2560_s1 + $0x1c0] sm:$0xff]  }
  0x31   : > { %1978 = vmatprep.subr.bf16.mxu0 %v2123_v55 }
  0x33   : > { %1899 = vmatpush3.bf16.msra.mxu1 %v2122_v54  ;;  %v2467_v54 = vor.u32 %v1174_v50, %v1171_v49 }
  0x34   : > { %1979 = vmatpush3.bf16.msra.mxu0 %v2123_v55  ;;  %1900 = vmatprep.subr.bf16.mxu1 %v2124_v56  ;;  %v2157_v55 = vld [vmem:[%s2560_s1 + $0xc8] sm:$0xff]  }
  0x35   : > { %1980 = vmatprep.subr.bf16.mxu0 %v2125_v57 }
  0x37   : > { %1901 = vmatpush3.bf16.msra.mxu1 %v2124_v56  ;;  %v2158_v56 = vld [vmem:[%s2560_s1 + $0x1c8] sm:$0xff]  }
  0x38   : > { %1981 = vmatpush3.bf16.msra.mxu0 %v2125_v57  ;;  %1902 = vmatprep.subr.bf16.mxu1 %v2126_v58  ;;  %v1176_v57 = vsel %vm1159_vm5, %v1167_v53, %v2467_v54 }
  0x39   : > { %1982 = vmatprep.subr.bf16.mxu0 %v2127_v59 }
  0x3b   : > { %1903 = vmatpush3.bf16.msra.mxu1 %v2126_v58  ;;  %v2159_v58 = vld [vmem:[%s2560_s1 + $0xd0] sm:$0xff]  }
  0x3c   : > { %1983 = vmatpush3.bf16.msra.mxu0 %v2127_v59  ;;  %1904 = vmatprep.subr.bf16.mxu1 %v2128_v60  ;;  %v2160_v59 = vld [vmem:[%s2560_s1 + $0x1d0] sm:$0xff]  }
  0x3d   : > { %1984 = vmatprep.subr.bf16.mxu0 %v2129_v61 }
  0x3f   : > { %1905 = vmatpush3.bf16.msra.mxu1 %v2128_v60  ;;  %v2162_v60 = vld [vmem:[%s2560_s1 + $0x1d8] sm:$0xff]  }
  0x40   : > { %1985 = vmatpush3.bf16.msra.mxu0 %v2129_v61  ;;  %1906 = vmatprep.subr.bf16.mxu1 %v2130_v62  ;;  %v2163_v61 = vld [vmem:[%s2560_s1 + $0xe0] sm:$0xff]  }
  0x41   : > { %1986 = vmatprep.subr.bf16.mxu0 %v2131_v4 }
  0x43   : > { %1907 = vmatpush3.bf16.msra.mxu1 %v2130_v62  ;;  %v2164_v62 = vld [vmem:[%s2560_s1 + $0x1e0] sm:$0xff]  }
  0x44   : > { %1987 = vmatpush3.bf16.msra.mxu0 %v2131_v4  ;;  %1912 = vmatprep.subr.bf16.mxu1 %v2132_v8  ;;  %v1278_v4 = vld [vmem:[%s2266_s20 + $0x4] sm:$0x8] }
  0x45   : > { %1992 = vmatprep.subr.bf16.mxu0 %v2134_v9  ;;  %v1758_v7 = vcombine.low %v1278_v4, %v2362_v1 }
  0x46   : > { %1909 = vmatmul.mubr.bf16.vlgmr.msra.gmra.mrb[0].mxu1 %v1580_v10  ;;  %v1300_v10 = vrot.slane %v2443_v38, 3 }
  0x47   : > { %1913 = vmatpush3.bf16.msra.mxu1 %v2132_v8  ;;  %1989 = vmatmul.mubr.bf16.vlgmr.msra.gmra.mrb[0].mxu0 %v1682_v13  ;;  %v2172_v8 = vld [vmem:[%s2560_s1 + $0x200] sm:$0xff]   ;;  %v2175_v13 = vld [vmem:[%s2560_s1 + $0x218] sm:$0xff]  }
  0x48   : > { %1993 = vmatpush3.bf16.msra.mxu0 %v2134_v9  ;;  %1914 = vmatprep.subr.bf16.mxu1 %v2137_v18  ;;  %v1299_v9 = vrot.slane %v1758_v7, 3 }
  0x49   : > { %1994 = vmatprep.subr.bf16.mxu0 %v2138_v19  ;;  %1928 = vmatprep.mubr.bf16.mxu1 %v510_v20 }
  0x4a   : > { %2008 = vmatprep.mubr.bf16.mxu0 %v1036_v22  ;;  %v1301_v1 = vsel %vm637_vm4, %v1299_v9, %v1300_v10 }
  0x4b   : > { %1915 = vmatpush3.bf16.msra.mxu1 %v2137_v18  ;;  %v2178_v18 = vld [vmem:[%s2560_s1 + $0x230] sm:$0xff]  }
  0x4c   : > { %1995 = vmatpush3.bf16.msra.mxu0 %v2138_v19  ;;  %1916 = vmatprep.subr.bf16.mxu1 %v2139_v23  ;;  %v2179_v19 = vld [vmem:[%s2560_s1 + $0x238] sm:$0xff]  }
  0x4d   : > { %1996 = vmatprep.subr.bf16.mxu0 %v2140_v24 }
  0x4f   : > { %1917 = vmatpush3.bf16.msra.mxu1 %v2139_v23 }
  0x50   : > { %1997 = vmatpush3.bf16.msra.mxu0 %v2140_v24  ;;  %1918 = vmatprep.subr.bf16.mxu1 %v2141_v28 }
  0x51   : > { %1998 = vmatprep.subr.bf16.mxu0 %v2142_v29 }
  0x53   : > { %1919 = vmatpush3.bf16.msra.mxu1 %v2141_v28 }
  0x54   : > { %1999 = vmatpush3.bf16.msra.mxu0 %v2142_v29  ;;  %1920 = vmatprep.subr.bf16.mxu1 %v2143_v14 }
  0x55   : > { %2000 = vmatprep.subr.bf16.mxu0 %v2144_v31 }
  0x57   : > { %1921 = vmatpush3.bf16.msra.mxu1 %v2143_v14 }
  0x58   : > { %2001 = vmatpush3.bf16.msra.mxu0 %v2144_v31  ;;  %1922 = vmatprep.subr.bf16.mxu1 %v2145_v34 }
  0x59   : > { %2002 = vmatprep.subr.bf16.mxu0 %v2146_v36 }
  0x5b   : > { %1923 = vmatpush3.bf16.msra.mxu1 %v2145_v34 }
  0x5c   : > { %2003 = vmatpush3.bf16.msra.mxu0 %v2146_v36  ;;  %1924 = vmatprep.subr.bf16.mxu1 %v2147_v39 }
  0x5d   : > { %2004 = vmatprep.subr.bf16.mxu0 %v2148_v40 }
  0x5f   : > { %1925 = vmatpush3.bf16.msra.mxu1 %v2147_v39 }
  0x60   : > { %2005 = vmatpush3.bf16.msra.mxu0 %v2148_v40  ;;  %1926 = vmatprep.subr.bf16.mxu1 %v2149_v45 }
  0x61   : > { %2006 = vmatprep.subr.bf16.mxu0 %v2150_v46 }
  0x63   : > { %1927 = vmatpush3.bf16.msra.mxu1 %v2149_v45 }
  0x64   : > { %2007 = vmatpush3.bf16.msra.mxu0 %v2150_v46  ;;  %1932 = vmatprep.subr.bf16.mxu1 %v2152_v51 }
  0x65   : > { %2012 = vmatprep.subr.bf16.mxu0 %v2156_v52 }
  0x66   : > { %1929 = vmatmul.mubr.bf16.vlgmr.msra.gmra.mrb[0].mxu1 %v509_v12  ;;  %v2174_v12 = vld [vmem:[%s2560_s1 + $0x210] sm:$0xff]  }
  0x67   : > { %1933 = vmatpush3.bf16.msra.mxu1 %v2152_v51  ;;  %2009 = vmatmul.mubr.bf16.vlgmr.msra.gmra.mrb[0].mxu0 %v2388_v16  ;;  %v2177_v16 = vld [vmem:[%s2560_s1 + $0x228] sm:$0xff]  }
  0x68   : > { %2013 = vmatpush3.bf16.msra.mxu0 %v2156_v52  ;;  %1934 = vmatprep.subr.bf16.mxu1 %v2157_v55 }
  0x69   : > { %2014 = vmatprep.subr.bf16.mxu0 %v2158_v56  ;;  %1948 = vmatprep.mubr.bf16.mxu1 %v2418_v21 }
  0x6a   : > { %2028 = vmatprep.mubr.bf16.mxu0 %v1176_v57 }
  0x6b   : > { %1935 = vmatpush3.bf16.msra.mxu1 %v2157_v55 }
  0x6c   : > { %2015 = vmatpush3.bf16.msra.mxu0 %v2158_v56  ;;  %1936 = vmatprep.subr.bf16.mxu1 %v2159_v58 }
  0x6d   : > { %2016 = vmatprep.subr.bf16.mxu0 %v2160_v59 }
  0x6f   : > { %1937 = vmatpush3.bf16.msra.mxu1 %v2159_v58 }
  0x70   : > { %2017 = vmatpush3.bf16.msra.mxu0 %v2160_v59  ;;  %1938 = vmatprep.subr.bf16.mxu1 %v2161_v17 }
  0x71   : > { %2018 = vmatprep.subr.bf16.mxu0 %v2162_v60 }
  0x73   : > { %1939 = vmatpush3.bf16.msra.mxu1 %v2161_v17 }
  0x74   : > { %2019 = vmatpush3.bf16.msra.mxu0 %v2162_v60  ;;  %1940 = vmatprep.subr.bf16.mxu1 %v2163_v61 }
  0x75   : > { %2020 = vmatprep.subr.bf16.mxu0 %v2164_v62 }
  0x77   : > { %1941 = vmatpush3.bf16.msra.mxu1 %v2163_v61 }
  0x78   : > { %2021 = vmatpush3.bf16.msra.mxu0 %v2164_v62  ;;  %1942 = vmatprep.subr.bf16.mxu1 %v2165_v63 }
  0x79   : > { %2022 = vmatprep.subr.bf16.mxu0 %v2166_v0 }
  0x7b   : > { %1943 = vmatpush3.bf16.msra.mxu1 %v2165_v63 }
  0x7c   : > { %2023 = vmatpush3.bf16.msra.mxu0 %v2166_v0  ;;  %1944 = vmatprep.subr.bf16.mxu1 %v2167_v2  ;;  %v1767_v0 = vld [vmem:[%s2561_s2] ss:$0 sm:$0xff] }
  0x7d   : > { %2024 = vmatprep.subr.bf16.mxu0 %v2168_v3 }
  0x7f   : > { %1945 = vmatpush3.bf16.msra.mxu1 %v2167_v2 }
  0x80   : > { %2025 = vmatpush3.bf16.msra.mxu0 %v2168_v3  ;;  %1946 = vmatprep.subr.bf16.mxu1 %v2169_v5 }
  0x81   : > { %2026 = vmatprep.subr.bf16.mxu0 %v2170_v6 }
  0x83   : > { %1947 = vmatpush3.bf16.msra.mxu1 %v2169_v5  ;;  %v1768_v5 = vld [vmem:[%s2562_s3] ss:$0 sm:$0xff] }
  0x84   : > { %2027 = vmatpush3.bf16.msra.mxu0 %v2170_v6 }
  0x85   : > { %2032 = vmatprep.subr.bf16.mxu0 %v2172_v8 }
  0x86   : > { %1949 = vmatmul.mubr.bf16.vlgmr.msra.gmra.mrb[0].mxu1 %v2414_v30 }
  0x87   : > { %2029 = vmatmul.mubr.bf16.vlgmr.msra.gmra.mrb[0].mxu0 %v2467_v54 }
  0x88   : > { %2033 = vmatpush3.bf16.msra.mxu0 %v2172_v8  ;;  %2048 = vmatprep.mubr.bf16.mxu0 %v1301_v1 }
  0x89   : > { %2034 = vmatprep.subr.bf16.mxu0 %v2173_v11 }
  0x8c   : > { %2035 = vmatpush3.bf16.msra.mxu0 %v2173_v11 }
  0x8d   : > { %2036 = vmatprep.subr.bf16.mxu0 %v2174_v12 }
  0x90   : > { %2037 = vmatpush3.bf16.msra.mxu0 %v2174_v12 }
  0x91   : > { %2038 = vmatprep.subr.bf16.mxu0 %v2175_v13 }
  0x94   : > { %2039 = vmatpush3.bf16.msra.mxu0 %v2175_v13 }
  0x95   : > { %2040 = vmatprep.subr.bf16.mxu0 %v2176_v15 }
  0x98   : > { %2041 = vmatpush3.bf16.msra.mxu0 %v2176_v15 }
  0x99   : > { %2042 = vmatprep.subr.bf16.mxu0 %v2177_v16  ;;  %v1409_v25 = vpop.permute.xlu0 %1408  ;;  %v1419_v32 = vpop.permute.xlu1 %1418 }
  0x9c   : > { %2043 = vmatpush3.bf16.msra.mxu0 %v2177_v16 }
  0x9d   : > { %2044 = vmatprep.subr.bf16.mxu0 %v2178_v18  ;;  %v1414_v31 = vpop.permute.xlu0 %1413 }
  0xa0   : > { %2045 = vmatpush3.bf16.msra.mxu0 %v2178_v18 }
  0xa1   : > { %2046 = vmatprep.subr.bf16.mxu0 %v2179_v19 }
  0xa4   : > { %2047 = vmatpush3.bf16.msra.mxu0 %v2179_v19 }
  0xa7   : > { %2049 = vmatmul.mubr.bf16.vlgmr.msra.gmra.mrb[0].mxu0 %v1300_v10 }
 0x159   : > { %v1950_v20 = vpop.f32.mrb[0].mxu1 }
 0x15a   : > { %v725_v22 = vpop.f32.mrb[1].mxu1 }
 0x15b   : > { %v1951_v23 = vpop.f32.mrb[2].mxu1 }
 0x15c   : > { %v728_v24 = vpop.f32.mrb[3].mxu1 }
 0x17a   : > { %v2050_v26 = vpop.f32.mrb[0].mxu0 }
 0x17b   : > { %v2052_v27 = vadd.f32 %v2050_v26, %v1950_v20  ;;  %v1386_v28 = vpop.f32.mrb[1].mxu0 }
 0x17c   : > { %v2053_v29 = vadd.f32 %v1386_v28, %v725_v22  ;;  %v2051_v30 = vpop.f32.mrb[2].mxu0 }
 0x17d   : > { %v1389_v21 = vpop.f32.mrb[3].mxu0  ;;  %v1423_v35 = vmul.f32 %v2052_v27, %v1419_v32 }
 0x17e   : > { %v2054_v14 = vadd.f32 %v1389_v21, %v728_v24  ;;  %v1421_v33 = vmul.f32 %v2053_v29, %v1409_v25 }
 0x180   : > { %v1422_v34 = vmul.f32 %v2054_v14, %v1414_v31 }
 0x182   : > { %v1424_v36 = vadd.f32 %v1422_v34, %v1421_v33 }
 0x184   : > { %v1425_v37 = vadd.f32 %v1424_v36, %v1423_v35 }
 0x186   : > { %v1426_v38 = vrot.slane %v1425_v37, 4 }
 0x188   : > { %v1427_v39 = vadd.f32 %v1426_v38, %v1425_v37 }
 0x18a   : > { %v1428_v40 = vrot.slane %v1427_v39, 2 }
 0x18c   : > { %v1429_v41 = vadd.f32 %v1428_v40, %v1427_v39 }
 0x18e   : > { %v1430_v42 = vrot.slane %v1429_v41, 1 }
 0x190   : > { %v1431_v43 = vadd.f32 %v1430_v42, %v1429_v41 }
 0x192   : > { %v1432_v44 = vmul.f32 0.0625, %v1431_v43 }
 0x194   : > { %v1433_v45 = vsub.f32 %v2053_v29, %v1432_v44  ;;  %v1434_v46 = vsub.f32 %v2054_v14, %v1432_v44  ;;  %v1435_v47 = vsub.f32 %v2052_v27, %v1432_v44 }
 0x196   : > { %v1436_v48 = vmul.f32 %v1433_v45, %v1433_v45  ;;  %v1437_v49 = vmul.f32 %v1434_v46, %v1434_v46  ;;  %v1438_v50 = vmul.f32 %v1435_v47, %v1435_v47 }
 0x198   : > { %v1439_v51 = vmul.f32 %v1436_v48, %v1409_v25  ;;  %v1440_v52 = vmul.f32 %v1437_v49, %v1414_v31  ;;  %v1441_v53 = vmul.f32 %v1438_v50, %v1419_v32 }
 0x19a   : > { %v1442_v54 = vadd.f32 %v1440_v52, %v1439_v51 }
 0x19c   : > { %v1443_v55 = vadd.f32 %v1442_v54, %v1441_v53 }
 0x19e   : > { %v1444_v56 = vrot.slane %v1443_v55, 4 }
 0x1a0   : > { %v1445_v57 = vadd.f32 %v1444_v56, %v1443_v55 }
 0x1a2   : > { %v1446_v58 = vrot.slane %v1445_v57, 2 }
 0x1a4   : > { %v1447_v59 = vadd.f32 %v1446_v58, %v1445_v57 }
 0x1a6   : > { %v1448_v17 = vrot.slane %v1447_v59, 1 }
 0x1a8   : > { %v1449_v60 = vadd.f32 %v1448_v17, %v1447_v59 }
 0x1aa   : > { %v1450_v61 = vmul.f32 0.0625, %v1449_v60 }
 0x1ac   : > { %v1451_v62 = vadd.f32 1e-05, %v1450_v61 }
 0x1ae   : > { %2181 = vrsqrt.f32 %v1451_v62 }
 0x1b8   : > { %v2182_v63 = vpop.eup %2181 }
 0x1b9   : > { %v1453_v2 = vmul.f32 %v2182_v63, %v1433_v45  ;;  %v1454_v3 = vmul.f32 %v2182_v63, %v1434_v46  ;;  %v1455_v4 = vmul.f32 %v2182_v63, %v1435_v47 }
 0x1bb   : > { %v1463_v6 = vmul.f32 %v1767_v0, %v1453_v2  ;;  %v1464_v7 = vmul.f32 %v1767_v0, %v1454_v3  ;;  %v1465_v8 = vmul.f32 %v1767_v0, %v1455_v4 }
 0x1bd   : > { %v1473_v9 = vadd.f32 %v1768_v5, %v1463_v6  ;;  %v1474_v10 = vadd.f32 %v1768_v5, %v1464_v7  ;;  %v1475_v11 = vadd.f32 %v1768_v5, %v1465_v8 }
 0x1bf   : > { %v1776_v1 = vpack.c.bf16 %v1475_v11, %v1475_v11  ;;  %v1780_v12 = vpack.c.bf16 %v1474_v10, %v1473_v9 }
 0x1c1   : > { %1781 = vst [vmem:[%s224_s25] sm:$0xff] %v1780_v12   ;;  %1491 = vst [vmem:[%s224_s25 + $0x8] sm:$0xf] %v1776_v1 }
 0x1c2 PF: > { %s15_s18 = sadd.s32 1, %s2189_s18  }
 0x1c3   : > { %p12_p4 = scmp.ge.s32.totalorder %s15_s18, 4  }
 0x1c5   :  { %14 = sbr.rel (!%p12_p4) target bundleno = 1 (0x1), region = 78 }

// kernel: transformer_net.25
= control target key start
LH: loop header
LB: loop body
LE: loop exit
PB: predicated region body
PF: predicated region fallthrough
CT: control target
= control target key end

     0   :  { %s2225_s18 = smov 0   ;;  %s2562_s0 = inlined_call_operand.vmem [shape: bf16[2,42,128], index: 0, kind: input, shape index: {}]   ;;  %s2563_s1 = inlined_call_operand.vmem [shape: bf16[9,128,128], index: 1, kind: input, shape index: {}]   ;;  %s2564_s2 = inlined_call_operand.vmem [shape: f32[1,128], index: 2, kind: input, shape index: {}]   ;;  %s2565_s3 = inlined_call_operand.vmem [shape: f32[1,128], index: 3, kind: input, shape index: {}]   ;;  %s2566_s4 = inlined_call_operand.vmem [shape: f32[1,24,1], index: 4, kind: input, shape index: {}]   ;;  %s2567_s5 = inlined_call_operand.vmem [shape: bf16[2,24,128], index: 5, kind: output, shape index: {}]  }
   0x1 LB: > { %s1550_s19 = sadd.s32 4294967295, %s2192_s18   ;;  %p1554_p0 = scmp.ge.s32.totalorder %s2192_s18, 1  ;;  %s2192_s18 = sphi %s2225_s18, %s15_s18  }
   0x2   : > { %p187_p1 = scmp.lt.s32.totalorder %s2192_s18, 3 }
   0x4   : > { %p188_p2 = pnand %p1554_p0, %p187_p1 }
   0x5   : > { %v2099_v0 = vld [vmem:[%s2563_s1 + $0x40] sm:$0xff] (!%p188_p2)   ;;  %p215_p3 = scmp.lt.s32.totalorder (!%p188_p2), %s1550_s19, 1  ;;  %v2101_v2 = vld [vmem:[%s2563_s1 + $0x48] sm:$0xff] (!%p188_p2)   ;;  %v2103_v4 = vld [vmem:[%s2563_s1 + $0x50] sm:$0xff] (!%p188_p2)   ;;  %vm273_vm0 = vsmask.f32 (!%p188_p2), 7424 }
   0x6   : > { %191 = sbr.rel (%p188_p2) target bundleno = 452 (0x1c4), region = 40  ;;  %v2100_v1 = vld [vmem:[%s2563_s1 + $0x100] sm:$0xff] (!%p188_p2)   ;;  %1875 = vmatprep.subr.bf16.mxu1 (!%p188_p2), %v2099_v0  ;;  %v2102_v3 = vld [vmem:[%s2563_s1 + $0x108] sm:$0xff] (!%p188_p2)   ;;  %v2104_v5 = vld [vmem:[%s2563_s1 + $0x110] sm:$0xff] (!%p188_p2)   ;;  %vm763_vm1 = vsmask.f32 (!%p188_p2), 4352 }
   0x7   : > { %1955 = vmatprep.subr.bf16.mxu0 (!%p188_p2), %v2100_v1  ;;  %1876 = vmatpush3.bf16.msra.mxu1 (!%p188_p2), %v2099_v0  ;;  %v2105_v6 = vld [vmem:[%s2563_s1 + $0x58] sm:$0xff] (!%p188_p2)   ;;  %v2107_v8 = vld [vmem:[%s2563_s1 + $0x60] sm:$0xff] (!%p188_p2)   ;;  %v2109_v10 = vld [vmem:[%s2563_s1 + $0x68] sm:$0xff] (!%p188_p2)   ;;  %v2194_v53 = vmov (!%p188_p2), 0   ;;  %vm507_vm2 = vcmask (!%p188_p2), 1046528   ;;  %vm1033_vm3 = vcmask (!%p188_p2), 1045504  }
   0x8   : > { %1956 = vmatpush3.bf16.msra.mxu0 (!%p188_p2), %v2100_v1  ;;  %1877 = vmatprep.subr.bf16.mxu1 (!%p188_p2), %v2101_v2  ;;  %v2106_v7 = vld [vmem:[%s2563_s1 + $0x118] sm:$0xff] (!%p188_p2)   ;;  %v2108_v9 = vld [vmem:[%s2563_s1 + $0x120] sm:$0xff] (!%p188_p2)   ;;  %v2110_v11 = vld [vmem:[%s2563_s1 + $0x128] sm:$0xff] (!%p188_p2)   ;;  %vm637_vm4 = vcmask (!%p188_p2), 1044480   ;;  %vm1159_vm5 = vsmask.f32 (!%p188_p2), 5376 }
   0x9   : > { %1957 = vmatprep.subr.bf16.mxu0 (!%p188_p2), %v2102_v3  ;;  %v2111_v23 = vld [vmem:[%s2563_s1 + $0x70] sm:$0xff] (!%p188_p2)   ;;  %v2113_v30 = vld [vmem:[%s2563_s1 + $0x78] sm:$0xff] (!%p188_p2)   ;;  %v2117_v44 = vld [vmem:[%s2563_s1] sm:$0xff] (!%p188_p2)   ;;  %2097 = vset.pattern.permute.xlu0 (!%p188_p2), %v2194_v53 }
   0xa   : > { %v2112_v26 = vld [vmem:[%s2563_s1 + $0x130] sm:$0xff] (!%p188_p2)   ;;  %v2114_v34 = vld [vmem:[%s2563_s1 + $0x138] sm:$0xff] (!%p188_p2)   ;;  %v2120_v46 = vld [vmem:[%s2563_s1 + $0x140] sm:$0xff] (!%p188_p2)   ;;  %2098 = vset.pattern.permute.xlu1 (!%p188_p2), %v2194_v53 }
   0xb   : > { %1878 = vmatpush3.bf16.msra.mxu1 (!%p188_p2), %v2101_v2  ;;  %v2121_v48 = vld [vmem:[%s2563_s1 + $0x8] sm:$0xff] (!%p188_p2)   ;;  %v2123_v51 = vld [vmem:[%s2563_s1 + $0x10] sm:$0xff] (!%p188_p2)   ;;  %v2125_v54 = vld [vmem:[%s2563_s1 + $0x18] sm:$0xff] (!%p188_p2)  }
   0xc   : > { %1958 = vmatpush3.bf16.msra.mxu0 (!%p188_p2), %v2102_v3  ;;  %1879 = vmatprep.subr.bf16.mxu1 (!%p188_p2), %v2103_v4  ;;  %v2122_v49 = vld [vmem:[%s2563_s1 + $0x148] sm:$0xff] (!%p188_p2)   ;;  %v2124_v52 = vld [vmem:[%s2563_s1 + $0x150] sm:$0xff] (!%p188_p2)   ;;  %v2126_v55 = vld [vmem:[%s2563_s1 + $0x158] sm:$0xff] (!%p188_p2)  }
   0xd   : > { %s2569_s19 = smov (!%p215_p3, %s1550_s19), 1  ;;  %1959 = vmatprep.subr.bf16.mxu0 %v2104_v5  ;;  %v2127_v56 = vld [vmem:[%s2563_s1 + $0x20] sm:$0xff]   ;;  %v2129_v58 = vld [vmem:[%s2563_s1 + $0x28] sm:$0xff]   ;;  %v2131_v60 = vld [vmem:[%s2563_s1 + $0x30] sm:$0xff]  }
   0xe   : > { %s2086_s11 = smul.u32 24, %s2569_s19  ;;  %v2128_v57 = vld [vmem:[%s2563_s1 + $0x160] sm:$0xff]   ;;  %v2130_v59 = vld [vmem:[%s2563_s1 + $0x168] sm:$0xff]   ;;  %v2132_v61 = vld [vmem:[%s2563_s1 + $0x170] sm:$0xff]  }
   0xf   : > { %1880 = vmatpush3.bf16.msra.mxu1 %v2103_v4  ;;  %v2133_v62 = vld [vmem:[%s2563_s1 + $0x38] sm:$0xff]   ;;  %s2087_s22 = smul.u32 12, %s2569_s19 }
  0x10   : > { %1960 = vmatpush3.bf16.msra.mxu0 %v2104_v5  ;;  %1881 = vmatprep.subr.bf16.mxu1 %v2105_v6  ;;  %s2269_s20 = scalar_lea.vmem %s2562_s0, %s2086_s11  ;;  %v2134_v4 = vld [vmem:[%s2563_s1 + $0x178] sm:$0xff]  }
  0x11   : > { %1961 = vmatprep.subr.bf16.mxu0 %v2106_v7  ;;  %v226_v12 = vld [vmem:[%s2269_s20] sm:$0xf]  ;;  %v2279_v13 = vld [vmem:[%s2269_s20 + $0x4] sm:$0xf]  ;;  %v2282_v14 = vld [vmem:[%s2269_s20 + $0x8] sm:$0xf]  ;;  %s224_s25 = scalar_lea.vmem %s2567_s5, %s2087_s22 }
  0x12   : > { %v245_v15 = vld [vmem:[%s2269_s20 + $0xc] sm:$0x1]  ;;  %v1573_v16 = vcombine.low %v226_v12, %v2279_v13  ;;  %v612_v18 = vld [vmem:[%s2269_s20] sm:$0x8]  ;;  %v1684_v50 = vcombine.low %v2279_v13, %v2282_v14  ;;  %v1002_v0 = vld [vmem:[%s2269_s20 + $0x4] sm:$0xc] }
  0x13   : > { %1882 = vmatpush3.bf16.msra.mxu1 %v2105_v6  ;;  %v2287_v17 = vcombine.low %v2282_v14, %v245_v15  ;;  %v2291_v21 = vcombine.low %v612_v18, %v2279_v13  ;;  %v2294_v22 = vld [vmem:[%s2269_s20 + $0xc] sm:$0xf]  ;;  %v486_v63 = vld [vmem:[%s2269_s20] sm:$0xe]  ;;  %v2365_v1 = vld [vmem:[%s2269_s20 + $0x8] sm:$0xf] }
  0x14   : > { %1962 = vmatpush3.bf16.msra.mxu0 %v2106_v7  ;;  %1883 = vmatprep.subr.bf16.mxu1 %v2107_v8  ;;  %v275_v19 = vshrl.u32 %v1573_v16, 16  ;;  %v277_v20 = vshll.u32 %v1573_v16, 16  ;;  %v1659_v25 = vcombine.low %v2282_v14, %v2294_v22  ;;  %v2368_v2 = vld [vmem:[%s2269_s20 + $0xc] sm:$0xf]  ;;  %v1005_v3 = vld [vmem:[%s2269_s20 + $0x10] sm:$0x3]  ;;  %v1608_v5 = vcombine.low %v486_v63, %v2279_v13 }
  0x15   : > { %1963 = vmatprep.subr.bf16.mxu0 %v2108_v9  ;;  %v282_v24 = vshll.u32 %v2287_v17, 16  ;;  %v765_v28 = vshrl.u32 %v2291_v21, 16  ;;  %v768_v29 = vshll.u32 %v2291_v21, 16  ;;  %v286_v43 = vshrl.u32 %v2287_v17, 16  ;;  %v2140_v18 = vld [vmem:[%s2563_s1 + $0x88] sm:$0xff]  }
  0x16   : > { %v279_v27 = vrot.slane %v277_v20, 1  ;;  %v773_v32 = vshrl.u32 %v1659_v25, 16  ;;  %v776_v33 = vshll.u32 %v1659_v25, 16  ;;  %v2376_v6 = vcombine.low %v1002_v0, %v2365_v1  ;;  %v613_v25 = vld [vmem:[%s2269_s20 + $0xc] sm:$0x7] }
  0x17   : > { %1884 = vmatpush3.bf16.msra.mxu1 %v2107_v8  ;;  %v284_v31 = vrot.slane %v282_v24, 1  ;;  %v767_v36 = vrot.slane %v765_v28, 3  ;;  %v770_v37 = vrot.slane %v768_v29, 4  ;;  %v1711_v7 = vcombine.low %v2368_v2, %v1005_v3  ;;  %v2135_v8 = vld [vmem:[%s2563_s1 + $0x80] sm:$0xff]   ;;  %v2143_v24 = vld [vmem:[%s2563_s1 + $0x190] sm:$0xff]   ;;  %v2144_v28 = vld [vmem:[%s2563_s1 + $0x98] sm:$0xff]  }
  0x18   : > { %1964 = vmatpush3.bf16.msra.mxu0 %v2108_v9  ;;  %1885 = vmatprep.subr.bf16.mxu1 %v2109_v10  ;;  %v280_v35 = vor.u32 %v279_v27, %v275_v19  ;;  %v775_v38 = vrot.slane %v773_v32, 3  ;;  %v778_v39 = vrot.slane %v776_v33, 4  ;;  %v2137_v9 = vld [vmem:[%s2563_s1 + $0x180] sm:$0xff]   ;;  %v509_v12 = vrot.slane %v2287_v17, 1  ;;  %v2141_v19 = vld [vmem:[%s2563_s1 + $0x188] sm:$0xff]   ;;  %v2145_v29 = vld [vmem:[%s2563_s1 + $0x198] sm:$0xff]  }
  0x19   : > { %1965 = vmatprep.subr.bf16.mxu0 %v2110_v11  ;;  %v771_v41 = vor.u32 %v770_v37, %v767_v36  ;;  %v288_v47 = vor.u32 %v286_v43, %v284_v31  ;;  %v1685_v13 = vcombine.low %v2294_v22, %v2294_v22  ;;  %v1034_v15 = vrot.slane %v2376_v6, 2  ;;  %v1403_v32 = vld [vmem:[%s2566_s4] sm:$0xff]  ;;  %v1405_v33 = vld [vmem:[%s2566_s4 + $0x10] sm:$0xff]  ;;  %v2149_v36 = vld [vmem:[%s2563_s1 + $0x1a8] sm:$0xff]  }
  0x1a   : > { %v285_v40 = vsel %vm273_vm0, %v280_v35, %v284_v31  ;;  %v779_v42 = vor.u32 %v778_v39, %v775_v38  ;;  %v1634_v27 = vcombine.low %v2282_v14, %v613_v25  ;;  %v2147_v31 = vld [vmem:[%s2563_s1 + $0x1a0] sm:$0xff]   ;;  %v1138_v35 = vld [vmem:[%s2269_s20 + $0x10] sm:$0x7]  ;;  %1408 = vperm.xlu0 %2097, %v1403_v32   ;;  %v1404_v37 = vld [vmem:[%s2566_s4 + $0x8] sm:$0xff]  ;;  %1418 = vperm.xlu1 %2098, %v1405_v33  }
  0x1b   : > { %1886 = vmatpush3.bf16.msra.mxu1 %v2109_v10  ;;  %1891 = vmatprep.mubr.bf16.mxu1 %v285_v40  ;;  %v1583_v10 = vcombine.low %v2282_v14, %v2282_v14  ;;  %v2146_v14 = vld [vmem:[%s2563_s1 + $0xa0] sm:$0xff]   ;;  %v2446_v38 = vcombine.low %v2368_v2, %v1138_v35  ;;  %v2150_v39 = vld [vmem:[%s2563_s1 + $0xb0] sm:$0xff]   ;;  %v2164_v17 = vld [vmem:[%s2563_s1 + $0xd8] sm:$0xff]  }
  0x1c   : > { %1966 = vmatpush3.bf16.msra.mxu0 %v2110_v11  ;;  %1887 = vmatprep.subr.bf16.mxu1 %v2111_v23  ;;  %v780_v45 = vsel %vm763_vm1, %v771_v41, %v779_v42  ;;  %v508_v11 = vrot.slane %v1608_v5, 1  ;;  %v2151_v40 = vld [vmem:[%s2563_s1 + $0x1b0] sm:$0xff]   ;;  %v1161_v41 = vshrl.u32 %v2376_v6, 16  ;;  %v2168_v63 = vld [vmem:[%s2563_s1 + $0xe8] sm:$0xff]   ;;  %v2172_v5 = vld [vmem:[%s2563_s1 + $0xf8] sm:$0xff]  }
  0x1d   : > { %1967 = vmatprep.subr.bf16.mxu0 %v2112_v26  ;;  %1971 = vmatprep.mubr.bf16.mxu0 %v780_v45  ;;  %v1169_v43 = vshrl.u32 %v2446_v38, 16  ;;  %v2152_v45 = vld [vmem:[%s2563_s1 + $0xb8] sm:$0xff]   ;;  %v2169_v0 = vld [vmem:[%s2563_s1 + $0x1e8] sm:$0xff]   ;;  %v2170_v2 = vld [vmem:[%s2563_s1 + $0xf0] sm:$0xff]  }
  0x1e   : > { %v510_v20 = vsel %vm507_vm2, %v508_v11, %v509_v12  ;;  %1413 = vperm.xlu0 %2097, %v1404_v37   ;;  %v2171_v3 = vld [vmem:[%s2563_s1 + $0x1f0] sm:$0xff]   ;;  %v2176_v11 = vld [vmem:[%s2563_s1 + $0x208] sm:$0xff]  }
  0x1f   : > { %1888 = vmatpush3.bf16.msra.mxu1 %v2111_v23  ;;  %v2142_v23 = vld [vmem:[%s2563_s1 + $0x90] sm:$0xff]  }
  0x20   : > { %1968 = vmatpush3.bf16.msra.mxu0 %v2112_v26  ;;  %1889 = vmatprep.subr.bf16.mxu1 %v2113_v30  ;;  %v638_v26 = vrot.slane %v2291_v21, 3 }
  0x21   : > { %1969 = vmatprep.subr.bf16.mxu0 %v2114_v34 }
  0x23   : > { %1890 = vmatpush3.bf16.msra.mxu1 %v2113_v30  ;;  %v2417_v30 = vrot.slane %v1634_v27, 3 }
  0x24   : > { %1970 = vmatpush3.bf16.msra.mxu0 %v2114_v34  ;;  %1895 = vmatprep.subr.bf16.mxu1 %v2117_v44  ;;  %v2148_v34 = vld [vmem:[%s2563_s1 + $0xa8] sm:$0xff]  }
  0x25   : > { %1975 = vmatprep.subr.bf16.mxu0 %v2120_v46  ;;  %v2421_v21 = vsel %vm637_vm4, %v638_v26, %v2417_v30 }
  0x26   : > { %1892 = vmatmul.mubr.bf16.vlgmr.msra.gmra.mrb[0].mxu1 %v288_v47  ;;  %v1163_v47 = vrot.slane %v1161_v41, 2 }
  0x27   : > { %1896 = vmatpush3.bf16.msra.mxu1 %v2117_v44  ;;  %1972 = vmatmul.mubr.bf16.vlgmr.msra.gmra.mrb[0].mxu0 %v779_v42  ;;  %v1164_v42 = vshll.u32 %v2376_v6, 16  ;;  %v1172_v44 = vshll.u32 %v2446_v38, 16  ;;  %v2173_v6 = vld [vmem:[%s2563_s1 + $0x1f8] sm:$0xff]  }
  0x28   : > { %1976 = vmatpush3.bf16.msra.mxu0 %v2120_v46  ;;  %1897 = vmatprep.subr.bf16.mxu1 %v2121_v48  ;;  %v2153_v46 = vld [vmem:[%s2563_s1 + $0x1b8] sm:$0xff]  }
  0x29   : > { %1977 = vmatprep.subr.bf16.mxu0 %v2122_v49  ;;  %1911 = vmatprep.mubr.bf16.mxu1 %v1573_v16  ;;  %v2391_v16 = vrot.slane %v1711_v7, 2 }
  0x2a   : > { %1991 = vmatprep.mubr.bf16.mxu0 %v1684_v50  ;;  %v1174_v50 = vrot.slane %v1172_v44, 3 }
  0x2b   : > { %1898 = vmatpush3.bf16.msra.mxu1 %v2121_v48  ;;  %v1036_v22 = vsel %vm1033_vm3, %v1034_v15, %v2391_v16  ;;  %v1166_v48 = vrot.slane %v1164_v42, 3  ;;  %v2179_v15 = vld [vmem:[%s2563_s1 + $0x220] sm:$0xff]  }
  0x2c   : > { %1978 = vmatpush3.bf16.msra.mxu0 %v2122_v49  ;;  %1899 = vmatprep.subr.bf16.mxu1 %v2123_v51  ;;  %v1171_v49 = vrot.slane %v1169_v43, 2 }
  0x2d   : > { %1979 = vmatprep.subr.bf16.mxu0 %v2124_v52  ;;  %v1167_v53 = vor.u32 %v1166_v48, %v1163_v47 }
  0x2f   : > { %1900 = vmatpush3.bf16.msra.mxu1 %v2123_v51  ;;  %v2155_v51 = vld [vmem:[%s2563_s1 + $0xc0] sm:$0xff]  }
  0x30   : > { %1980 = vmatpush3.bf16.msra.mxu0 %v2124_v52  ;;  %1901 = vmatprep.subr.bf16.mxu1 %v2125_v54  ;;  %v2159_v52 = vld [vmem:[%s2563_s1 + $0x1c0] sm:$0xff]  }
  0x31   : > { %1981 = vmatprep.subr.bf16.mxu0 %v2126_v55 }
  0x33   : > { %1902 = vmatpush3.bf16.msra.mxu1 %v2125_v54  ;;  %v2470_v54 = vor.u32 %v1174_v50, %v1171_v49 }
  0x34   : > { %1982 = vmatpush3.bf16.msra.mxu0 %v2126_v55  ;;  %1903 = vmatprep.subr.bf16.mxu1 %v2127_v56  ;;  %v2160_v55 = vld [vmem:[%s2563_s1 + $0xc8] sm:$0xff]  }
  0x35   : > { %1983 = vmatprep.subr.bf16.mxu0 %v2128_v57 }
  0x37   : > { %1904 = vmatpush3.bf16.msra.mxu1 %v2127_v56  ;;  %v2161_v56 = vld [vmem:[%s2563_s1 + $0x1c8] sm:$0xff]  }
  0x38   : > { %1984 = vmatpush3.bf16.msra.mxu0 %v2128_v57  ;;  %1905 = vmatprep.subr.bf16.mxu1 %v2129_v58  ;;  %v1176_v57 = vsel %vm1159_vm5, %v1167_v53, %v2470_v54 }
  0x39   : > { %1985 = vmatprep.subr.bf16.mxu0 %v2130_v59 }
  0x3b   : > { %1906 = vmatpush3.bf16.msra.mxu1 %v2129_v58  ;;  %v2162_v58 = vld [vmem:[%s2563_s1 + $0xd0] sm:$0xff]  }
  0x3c   : > { %1986 = vmatpush3.bf16.msra.mxu0 %v2130_v59  ;;  %1907 = vmatprep.subr.bf16.mxu1 %v2131_v60  ;;  %v2163_v59 = vld [vmem:[%s2563_s1 + $0x1d0] sm:$0xff]  }
  0x3d   : > { %1987 = vmatprep.subr.bf16.mxu0 %v2132_v61 }
  0x3f   : > { %1908 = vmatpush3.bf16.msra.mxu1 %v2131_v60  ;;  %v2165_v60 = vld [vmem:[%s2563_s1 + $0x1d8] sm:$0xff]  }
  0x40   : > { %1988 = vmatpush3.bf16.msra.mxu0 %v2132_v61  ;;  %1909 = vmatprep.subr.bf16.mxu1 %v2133_v62  ;;  %v2166_v61 = vld [vmem:[%s2563_s1 + $0xe0] sm:$0xff]  }
  0x41   : > { %1989 = vmatprep.subr.bf16.mxu0 %v2134_v4 }
  0x43   : > { %1910 = vmatpush3.bf16.msra.mxu1 %v2133_v62  ;;  %v2167_v62 = vld [vmem:[%s2563_s1 + $0x1e0] sm:$0xff]  }
  0x44   : > { %1990 = vmatpush3.bf16.msra.mxu0 %v2134_v4  ;;  %1915 = vmatprep.subr.bf16.mxu1 %v2135_v8  ;;  %v1278_v4 = vld [vmem:[%s2269_s20 + $0x4] sm:$0x8] }
  0x45   : > { %1995 = vmatprep.subr.bf16.mxu0 %v2137_v9  ;;  %v1761_v7 = vcombine.low %v1278_v4, %v2365_v1 }
  0x46   : > { %1912 = vmatmul.mubr.bf16.vlgmr.msra.gmra.mrb[0].mxu1 %v1583_v10  ;;  %v1300_v10 = vrot.slane %v2446_v38, 3 }
  0x47   : > { %1916 = vmatpush3.bf16.msra.mxu1 %v2135_v8  ;;  %1992 = vmatmul.mubr.bf16.vlgmr.msra.gmra.mrb[0].mxu0 %v1685_v13  ;;  %v2175_v8 = vld [vmem:[%s2563_s1 + $0x200] sm:$0xff]   ;;  %v2178_v13 = vld [vmem:[%s2563_s1 + $0x218] sm:$0xff]  }
  0x48   : > { %1996 = vmatpush3.bf16.msra.mxu0 %v2137_v9  ;;  %1917 = vmatprep.subr.bf16.mxu1 %v2140_v18  ;;  %v1299_v9 = vrot.slane %v1761_v7, 3 }
  0x49   : > { %1997 = vmatprep.subr.bf16.mxu0 %v2141_v19  ;;  %1931 = vmatprep.mubr.bf16.mxu1 %v510_v20 }
  0x4a   : > { %2011 = vmatprep.mubr.bf16.mxu0 %v1036_v22  ;;  %v1301_v1 = vsel %vm637_vm4, %v1299_v9, %v1300_v10 }
  0x4b   : > { %1918 = vmatpush3.bf16.msra.mxu1 %v2140_v18  ;;  %v2181_v18 = vld [vmem:[%s2563_s1 + $0x230] sm:$0xff]  }
  0x4c   : > { %1998 = vmatpush3.bf16.msra.mxu0 %v2141_v19  ;;  %1919 = vmatprep.subr.bf16.mxu1 %v2142_v23  ;;  %v2182_v19 = vld [vmem:[%s2563_s1 + $0x238] sm:$0xff]  }
  0x4d   : > { %1999 = vmatprep.subr.bf16.mxu0 %v2143_v24 }
  0x4f   : > { %1920 = vmatpush3.bf16.msra.mxu1 %v2142_v23 }
  0x50   : > { %2000 = vmatpush3.bf16.msra.mxu0 %v2143_v24  ;;  %1921 = vmatprep.subr.bf16.mxu1 %v2144_v28 }
  0x51   : > { %2001 = vmatprep.subr.bf16.mxu0 %v2145_v29 }
  0x53   : > { %1922 = vmatpush3.bf16.msra.mxu1 %v2144_v28 }
  0x54   : > { %2002 = vmatpush3.bf16.msra.mxu0 %v2145_v29  ;;  %1923 = vmatprep.subr.bf16.mxu1 %v2146_v14 }
  0x55   : > { %2003 = vmatprep.subr.bf16.mxu0 %v2147_v31 }
  0x57   : > { %1924 = vmatpush3.bf16.msra.mxu1 %v2146_v14 }
  0x58   : > { %2004 = vmatpush3.bf16.msra.mxu0 %v2147_v31  ;;  %1925 = vmatprep.subr.bf16.mxu1 %v2148_v34 }
  0x59   : > { %2005 = vmatprep.subr.bf16.mxu0 %v2149_v36 }
  0x5b   : > { %1926 = vmatpush3.bf16.msra.mxu1 %v2148_v34 }
  0x5c   : > { %2006 = vmatpush3.bf16.msra.mxu0 %v2149_v36  ;;  %1927 = vmatprep.subr.bf16.mxu1 %v2150_v39 }
  0x5d   : > { %2007 = vmatprep.subr.bf16.mxu0 %v2151_v40 }
  0x5f   : > { %1928 = vmatpush3.bf16.msra.mxu1 %v2150_v39 }
  0x60   : > { %2008 = vmatpush3.bf16.msra.mxu0 %v2151_v40  ;;  %1929 = vmatprep.subr.bf16.mxu1 %v2152_v45 }
  0x61   : > { %2009 = vmatprep.subr.bf16.mxu0 %v2153_v46 }
  0x63   : > { %1930 = vmatpush3.bf16.msra.mxu1 %v2152_v45 }
  0x64   : > { %2010 = vmatpush3.bf16.msra.mxu0 %v2153_v46  ;;  %1935 = vmatprep.subr.bf16.mxu1 %v2155_v51 }
  0x65   : > { %2015 = vmatprep.subr.bf16.mxu0 %v2159_v52 }
  0x66   : > { %1932 = vmatmul.mubr.bf16.vlgmr.msra.gmra.mrb[0].mxu1 %v509_v12  ;;  %v2177_v12 = vld [vmem:[%s2563_s1 + $0x210] sm:$0xff]  }
  0x67   : > { %1936 = vmatpush3.bf16.msra.mxu1 %v2155_v51  ;;  %2012 = vmatmul.mubr.bf16.vlgmr.msra.gmra.mrb[0].mxu0 %v2391_v16  ;;  %v2180_v16 = vld [vmem:[%s2563_s1 + $0x228] sm:$0xff]  }
  0x68   : > { %2016 = vmatpush3.bf16.msra.mxu0 %v2159_v52  ;;  %1937 = vmatprep.subr.bf16.mxu1 %v2160_v55 }
  0x69   : > { %2017 = vmatprep.subr.bf16.mxu0 %v2161_v56  ;;  %1951 = vmatprep.mubr.bf16.mxu1 %v2421_v21 }
  0x6a   : > { %2031 = vmatprep.mubr.bf16.mxu0 %v1176_v57 }
  0x6b   : > { %1938 = vmatpush3.bf16.msra.mxu1 %v2160_v55 }
  0x6c   : > { %2018 = vmatpush3.bf16.msra.mxu0 %v2161_v56  ;;  %1939 = vmatprep.subr.bf16.mxu1 %v2162_v58 }
  0x6d   : > { %2019 = vmatprep.subr.bf16.mxu0 %v2163_v59 }
  0x6f   : > { %1940 = vmatpush3.bf16.msra.mxu1 %v2162_v58 }
  0x70   : > { %2020 = vmatpush3.bf16.msra.mxu0 %v2163_v59  ;;  %1941 = vmatprep.subr.bf16.mxu1 %v2164_v17 }
  0x71   : > { %2021 = vmatprep.subr.bf16.mxu0 %v2165_v60 }
  0x73   : > { %1942 = vmatpush3.bf16.msra.mxu1 %v2164_v17 }
  0x74   : > { %2022 = vmatpush3.bf16.msra.mxu0 %v2165_v60  ;;  %1943 = vmatprep.subr.bf16.mxu1 %v2166_v61 }
  0x75   : > { %2023 = vmatprep.subr.bf16.mxu0 %v2167_v62 }
  0x77   : > { %1944 = vmatpush3.bf16.msra.mxu1 %v2166_v61 }
  0x78   : > { %2024 = vmatpush3.bf16.msra.mxu0 %v2167_v62  ;;  %1945 = vmatprep.subr.bf16.mxu1 %v2168_v63 }
  0x79   : > { %2025 = vmatprep.subr.bf16.mxu0 %v2169_v0 }
  0x7b   : > { %1946 = vmatpush3.bf16.msra.mxu1 %v2168_v63 }
  0x7c   : > { %2026 = vmatpush3.bf16.msra.mxu0 %v2169_v0  ;;  %1947 = vmatprep.subr.bf16.mxu1 %v2170_v2  ;;  %v1770_v0 = vld [vmem:[%s2564_s2] ss:$0 sm:$0xff] }
  0x7d   : > { %2027 = vmatprep.subr.bf16.mxu0 %v2171_v3 }
  0x7f   : > { %1948 = vmatpush3.bf16.msra.mxu1 %v2170_v2 }
  0x80   : > { %2028 = vmatpush3.bf16.msra.mxu0 %v2171_v3  ;;  %1949 = vmatprep.subr.bf16.mxu1 %v2172_v5 }
  0x81   : > { %2029 = vmatprep.subr.bf16.mxu0 %v2173_v6 }
  0x83   : > { %1950 = vmatpush3.bf16.msra.mxu1 %v2172_v5  ;;  %v1771_v5 = vld [vmem:[%s2565_s3] ss:$0 sm:$0xff] }
  0x84   : > { %2030 = vmatpush3.bf16.msra.mxu0 %v2173_v6 }
  0x85   : > { %2035 = vmatprep.subr.bf16.mxu0 %v2175_v8 }
  0x86   : > { %1952 = vmatmul.mubr.bf16.vlgmr.msra.gmra.mrb[0].mxu1 %v2417_v30 }
  0x87   : > { %2032 = vmatmul.mubr.bf16.vlgmr.msra.gmra.mrb[0].mxu0 %v2470_v54 }
  0x88   : > { %2036 = vmatpush3.bf16.msra.mxu0 %v2175_v8  ;;  %2051 = vmatprep.mubr.bf16.mxu0 %v1301_v1 }
  0x89   : > { %2037 = vmatprep.subr.bf16.mxu0 %v2176_v11 }
  0x8c   : > { %2038 = vmatpush3.bf16.msra.mxu0 %v2176_v11 }
  0x8d   : > { %2039 = vmatprep.subr.bf16.mxu0 %v2177_v12 }
  0x90   : > { %2040 = vmatpush3.bf16.msra.mxu0 %v2177_v12 }
  0x91   : > { %2041 = vmatprep.subr.bf16.mxu0 %v2178_v13 }
  0x94   : > { %2042 = vmatpush3.bf16.msra.mxu0 %v2178_v13 }
  0x95   : > { %2043 = vmatprep.subr.bf16.mxu0 %v2179_v15 }
  0x98   : > { %2044 = vmatpush3.bf16.msra.mxu0 %v2179_v15 }
  0x99   : > { %2045 = vmatprep.subr.bf16.mxu0 %v2180_v16  ;;  %v1409_v25 = vpop.permute.xlu0 %1408  ;;  %v1419_v32 = vpop.permute.xlu1 %1418 }
  0x9c   : > { %2046 = vmatpush3.bf16.msra.mxu0 %v2180_v16 }
  0x9d   : > { %2047 = vmatprep.subr.bf16.mxu0 %v2181_v18  ;;  %v1414_v31 = vpop.permute.xlu0 %1413 }
  0xa0   : > { %2048 = vmatpush3.bf16.msra.mxu0 %v2181_v18 }
  0xa1   : > { %2049 = vmatprep.subr.bf16.mxu0 %v2182_v19 }
  0xa4   : > { %2050 = vmatpush3.bf16.msra.mxu0 %v2182_v19 }
  0xa7   : > { %2052 = vmatmul.mubr.bf16.vlgmr.msra.gmra.mrb[0].mxu0 %v1300_v10 }
 0x159   : > { %v1953_v20 = vpop.f32.mrb[0].mxu1 }
 0x15a   : > { %v725_v22 = vpop.f32.mrb[1].mxu1 }
 0x15b   : > { %v1954_v23 = vpop.f32.mrb[2].mxu1 }
 0x15c   : > { %v728_v24 = vpop.f32.mrb[3].mxu1 }
 0x17a   : > { %v2053_v26 = vpop.f32.mrb[0].mxu0 }
 0x17b   : > { %v2055_v27 = vadd.f32 %v2053_v26, %v1953_v20  ;;  %v1386_v28 = vpop.f32.mrb[1].mxu0 }
 0x17c   : > { %v2056_v29 = vadd.f32 %v1386_v28, %v725_v22  ;;  %v2054_v30 = vpop.f32.mrb[2].mxu0 }
 0x17d   : > { %v1389_v21 = vpop.f32.mrb[3].mxu0  ;;  %v1423_v35 = vmul.f32 %v2055_v27, %v1419_v32 }
 0x17e   : > { %v2057_v14 = vadd.f32 %v1389_v21, %v728_v24  ;;  %v1421_v33 = vmul.f32 %v2056_v29, %v1409_v25 }
 0x180   : > { %v1422_v34 = vmul.f32 %v2057_v14, %v1414_v31 }
 0x182   : > { %v1424_v36 = vadd.f32 %v1422_v34, %v1421_v33 }
 0x184   : > { %v1425_v37 = vadd.f32 %v1424_v36, %v1423_v35 }
 0x186   : > { %v1426_v38 = vrot.slane %v1425_v37, 4 }
 0x188   : > { %v1427_v39 = vadd.f32 %v1426_v38, %v1425_v37 }
 0x18a   : > { %v1428_v40 = vrot.slane %v1427_v39, 2 }
 0x18c   : > { %v1429_v41 = vadd.f32 %v1428_v40, %v1427_v39 }
 0x18e   : > { %v1430_v42 = vrot.slane %v1429_v41, 1 }
 0x190   : > { %v1431_v43 = vadd.f32 %v1430_v42, %v1429_v41 }
 0x192   : > { %v1432_v44 = vmul.f32 0.0625, %v1431_v43 }
 0x194   : > { %v1433_v45 = vsub.f32 %v2056_v29, %v1432_v44  ;;  %v1434_v46 = vsub.f32 %v2057_v14, %v1432_v44  ;;  %v1435_v47 = vsub.f32 %v2055_v27, %v1432_v44 }
 0x196   : > { %v1436_v48 = vmul.f32 %v1433_v45, %v1433_v45  ;;  %v1437_v49 = vmul.f32 %v1434_v46, %v1434_v46  ;;  %v1438_v50 = vmul.f32 %v1435_v47, %v1435_v47 }
 0x198   : > { %v1439_v51 = vmul.f32 %v1436_v48, %v1409_v25  ;;  %v1440_v52 = vmul.f32 %v1437_v49, %v1414_v31  ;;  %v1441_v53 = vmul.f32 %v1438_v50, %v1419_v32 }
 0x19a   : > { %v1442_v54 = vadd.f32 %v1440_v52, %v1439_v51 }
 0x19c   : > { %v1443_v55 = vadd.f32 %v1442_v54, %v1441_v53 }
 0x19e   : > { %v1444_v56 = vrot.slane %v1443_v55, 4 }
 0x1a0   : > { %v1445_v57 = vadd.f32 %v1444_v56, %v1443_v55 }
 0x1a2   : > { %v1446_v58 = vrot.slane %v1445_v57, 2 }
 0x1a4   : > { %v1447_v59 = vadd.f32 %v1446_v58, %v1445_v57 }
 0x1a6   : > { %v1448_v17 = vrot.slane %v1447_v59, 1 }
 0x1a8   : > { %v1449_v60 = vadd.f32 %v1448_v17, %v1447_v59 }
 0x1aa   : > { %v1450_v61 = vmul.f32 0.0625, %v1449_v60 }
 0x1ac   : > { %v1451_v62 = vadd.f32 1e-05, %v1450_v61 }
 0x1ae   : > { %2184 = vrsqrt.f32 %v1451_v62 }
 0x1b8   : > { %v2185_v63 = vpop.eup %2184 }
 0x1b9   : > { %v1453_v2 = vmul.f32 %v2185_v63, %v1433_v45  ;;  %v1454_v3 = vmul.f32 %v2185_v63, %v1434_v46  ;;  %v1455_v4 = vmul.f32 %v2185_v63, %v1435_v47 }
 0x1bb   : > { %v1463_v6 = vmul.f32 %v1770_v0, %v1453_v2  ;;  %v1464_v7 = vmul.f32 %v1770_v0, %v1454_v3  ;;  %v1465_v8 = vmul.f32 %v1770_v0, %v1455_v4 }
 0x1bd   : > { %v1473_v9 = vadd.f32 %v1771_v5, %v1463_v6  ;;  %v1474_v10 = vadd.f32 %v1771_v5, %v1464_v7  ;;  %v1475_v11 = vadd.f32 %v1771_v5, %v1465_v8 }
 0x1bf   : > { %v1476_v1 = vmax.f32 %v1473_v9, 0.0  ;;  %v1477_v12 = vmax.f32 %v1474_v10, 0.0  ;;  %v1478_v13 = vmax.f32 %v1475_v11, 0.0 }
 0x1c1   : > { %v1779_v15 = vpack.c.bf16 %v1478_v13, %v1478_v13  ;;  %v1783_v16 = vpack.c.bf16 %v1477_v12, %v1476_v1 }
 0x1c3   : > { %1784 = vst [vmem:[%s224_s25] sm:$0xff] %v1783_v16   ;;  %1494 = vst [vmem:[%s224_s25 + $0x8] sm:$0xf] %v1779_v15 }
 0x1c4 PF: > { %s15_s18 = sadd.s32 1, %s2192_s18  }
 0x1c5   : > { %p12_p4 = scmp.ge.s32.totalorder %s15_s18, 4  }
 0x1c7   :  { %14 = sbr.rel (!%p12_p4) target bundleno = 1 (0x1), region = 78 }

// kernel: transformer_net.34
= control target key start
LH: loop header
LB: loop body
LE: loop exit
PB: predicated region body
PF: predicated region fallthrough
CT: control target
= control target key end

     0   :  { %s2300_s21 = smov 0   ;;  %s2640_s0 = inlined_call_operand.vmem [shape: bf16[2,42,128], index: 0, kind: input, shape index: {}]   ;;  %s2641_s1 = inlined_call_operand.vmem [shape: bf16[9,128,128], index: 1, kind: input, shape index: {}]   ;;  %s2642_s2 = inlined_call_operand.vmem [shape: f32[1,128], index: 2, kind: input, shape index: {}]   ;;  %s2643_s3 = inlined_call_operand.vmem [shape: f32[1,128], index: 3, kind: input, shape index: {}]   ;;  %s2644_s4 = inlined_call_operand.vmem [shape: f32[1,24,1], index: 4, kind: input, shape index: {}]   ;;  %s2645_s5 = inlined_call_operand.vmem [shape: bf16[2,24,128], index: 5, kind: input, shape index: {}]   ;;  %s2646_s6 = inlined_call_operand.vmem [shape: bf16[2,24,128], index: 6, kind: output, shape index: {}]  }
   0x1 LB: > { %s1615_s22 = sadd.s32 4294967295, %s2262_s21   ;;  %p1619_p0 = scmp.ge.s32.totalorder %s2262_s21, 1  ;;  %s2262_s21 = sphi %s2300_s21, %s16_s21  }
   0x2   : > { %p222_p1 = scmp.lt.s32.totalorder %s2262_s21, 3 }
   0x4   : > { %p223_p2 = pnand %p1619_p0, %p222_p1 }
   0x5   : > { %v2169_v0 = vld [vmem:[%s2641_s1 + $0x40] sm:$0xff] (!%p223_p2)   ;;  %p257_p3 = scmp.lt.s32.totalorder (!%p223_p2), %s1615_s22, 1  ;;  %v2171_v2 = vld [vmem:[%s2641_s1 + $0x48] sm:$0xff] (!%p223_p2)   ;;  %v2173_v4 = vld [vmem:[%s2641_s1 + $0x50] sm:$0xff] (!%p223_p2)   ;;  %vm320_vm0 = vsmask.f32 (!%p223_p2), 7424 }
   0x6   : > { %226 = sbr.rel (%p223_p2) target bundleno = 452 (0x1c4), region = 44  ;;  %v2170_v1 = vld [vmem:[%s2641_s1 + $0x100] sm:$0xff] (!%p223_p2)   ;;  %1945 = vmatprep.subr.bf16.mxu1 (!%p223_p2), %v2169_v0  ;;  %v2172_v3 = vld [vmem:[%s2641_s1 + $0x108] sm:$0xff] (!%p223_p2)   ;;  %v2174_v5 = vld [vmem:[%s2641_s1 + $0x110] sm:$0xff] (!%p223_p2)   ;;  %vm810_vm1 = vsmask.f32 (!%p223_p2), 4352 }
   0x7   : > { %2025 = vmatprep.subr.bf16.mxu0 (!%p223_p2), %v2170_v1  ;;  %1946 = vmatpush3.bf16.msra.mxu1 (!%p223_p2), %v2169_v0  ;;  %v2175_v6 = vld [vmem:[%s2641_s1 + $0x58] sm:$0xff] (!%p223_p2)   ;;  %v2177_v8 = vld [vmem:[%s2641_s1 + $0x60] sm:$0xff] (!%p223_p2)   ;;  %v2179_v10 = vld [vmem:[%s2641_s1 + $0x68] sm:$0xff] (!%p223_p2)   ;;  %v2264_v53 = vmov (!%p223_p2), 0   ;;  %vm554_vm2 = vcmask (!%p223_p2), 1046528   ;;  %vm1080_vm3 = vcmask (!%p223_p2), 1045504  }
   0x8   : > { %2026 = vmatpush3.bf16.msra.mxu0 (!%p223_p2), %v2170_v1  ;;  %1947 = vmatprep.subr.bf16.mxu1 (!%p223_p2), %v2171_v2  ;;  %v2176_v7 = vld [vmem:[%s2641_s1 + $0x118] sm:$0xff] (!%p223_p2)   ;;  %v2178_v9 = vld [vmem:[%s2641_s1 + $0x120] sm:$0xff] (!%p223_p2)   ;;  %v2180_v11 = vld [vmem:[%s2641_s1 + $0x128] sm:$0xff] (!%p223_p2)   ;;  %vm684_vm4 = vcmask (!%p223_p2), 1044480   ;;  %vm1206_vm5 = vsmask.f32 (!%p223_p2), 5376 }
   0x9   : > { %2027 = vmatprep.subr.bf16.mxu0 (!%p223_p2), %v2172_v3  ;;  %v2181_v23 = vld [vmem:[%s2641_s1 + $0x70] sm:$0xff] (!%p223_p2)   ;;  %v2183_v30 = vld [vmem:[%s2641_s1 + $0x78] sm:$0xff] (!%p223_p2)   ;;  %v2187_v44 = vld [vmem:[%s2641_s1] sm:$0xff] (!%p223_p2)   ;;  %2167 = vset.pattern.permute.xlu0 (!%p223_p2), %v2264_v53 }
   0xa   : > { %v2182_v26 = vld [vmem:[%s2641_s1 + $0x130] sm:$0xff] (!%p223_p2)   ;;  %v2184_v34 = vld [vmem:[%s2641_s1 + $0x138] sm:$0xff] (!%p223_p2)   ;;  %v2190_v46 = vld [vmem:[%s2641_s1 + $0x140] sm:$0xff] (!%p223_p2)   ;;  %2168 = vset.pattern.permute.xlu1 (!%p223_p2), %v2264_v53 }
   0xb   : > { %1948 = vmatpush3.bf16.msra.mxu1 (!%p223_p2), %v2171_v2  ;;  %v2191_v48 = vld [vmem:[%s2641_s1 + $0x8] sm:$0xff] (!%p223_p2)   ;;  %v2193_v51 = vld [vmem:[%s2641_s1 + $0x10] sm:$0xff] (!%p223_p2)   ;;  %v2195_v54 = vld [vmem:[%s2641_s1 + $0x18] sm:$0xff] (!%p223_p2)  }
   0xc   : > { %2028 = vmatpush3.bf16.msra.mxu0 (!%p223_p2), %v2172_v3  ;;  %1949 = vmatprep.subr.bf16.mxu1 (!%p223_p2), %v2173_v4  ;;  %v2192_v49 = vld [vmem:[%s2641_s1 + $0x148] sm:$0xff] (!%p223_p2)   ;;  %v2194_v52 = vld [vmem:[%s2641_s1 + $0x150] sm:$0xff] (!%p223_p2)   ;;  %v2196_v55 = vld [vmem:[%s2641_s1 + $0x158] sm:$0xff] (!%p223_p2)  }
   0xd   : > { %s2648_s22 = smov (!%p257_p3, %s1615_s22), 1  ;;  %2029 = vmatprep.subr.bf16.mxu0 %v2174_v5  ;;  %v2197_v56 = vld [vmem:[%s2641_s1 + $0x20] sm:$0xff]   ;;  %v2199_v58 = vld [vmem:[%s2641_s1 + $0x28] sm:$0xff]   ;;  %v2201_v60 = vld [vmem:[%s2641_s1 + $0x30] sm:$0xff]  }
   0xe   : > { %s2156_s15 = smul.u32 24, %s2648_s22  ;;  %v2198_v57 = vld [vmem:[%s2641_s1 + $0x160] sm:$0xff]   ;;  %v2200_v59 = vld [vmem:[%s2641_s1 + $0x168] sm:$0xff]   ;;  %v2202_v61 = vld [vmem:[%s2641_s1 + $0x170] sm:$0xff]  }
   0xf   : > { %1950 = vmatpush3.bf16.msra.mxu1 %v2173_v4  ;;  %v2203_v62 = vld [vmem:[%s2641_s1 + $0x38] sm:$0xff]   ;;  %s2157_s28 = smul.u32 12, %s2648_s22 }
  0x10   : > { %2030 = vmatpush3.bf16.msra.mxu0 %v2174_v5  ;;  %1951 = vmatprep.subr.bf16.mxu1 %v2175_v6  ;;  %s2344_s24 = scalar_lea.vmem %s2640_s0, %s2156_s15  ;;  %v2204_v4 = vld [vmem:[%s2641_s1 + $0x178] sm:$0xff]  }
  0x11   : > { %2031 = vmatprep.subr.bf16.mxu0 %v2176_v7  ;;  %v273_v12 = vld [vmem:[%s2344_s24] sm:$0xf]  ;;  %v2354_v13 = vld [vmem:[%s2344_s24 + $0x4] sm:$0xf]  ;;  %v2357_v14 = vld [vmem:[%s2344_s24 + $0x8] sm:$0xf]  ;;  %s266_s7 = scalar_lea.vmem %s2645_s5, %s2157_s28  ;;  %s271_s12 = scalar_lea.vmem %s2646_s6, %s2157_s28 }
  0x12   : > { %v292_v15 = vld [vmem:[%s2344_s24 + $0xc] sm:$0x1]  ;;  %v1639_v16 = vcombine.low %v273_v12, %v2354_v13  ;;  %v659_v18 = vld [vmem:[%s2344_s24] sm:$0x8]  ;;  %v1750_v50 = vcombine.low %v2354_v13, %v2357_v14  ;;  %v1049_v0 = vld [vmem:[%s2344_s24 + $0x4] sm:$0xc] }
  0x13   : > { %1952 = vmatpush3.bf16.msra.mxu1 %v2175_v6  ;;  %v2362_v17 = vcombine.low %v2357_v14, %v292_v15  ;;  %v2366_v21 = vcombine.low %v659_v18, %v2354_v13  ;;  %v2369_v22 = vld [vmem:[%s2344_s24 + $0xc] sm:$0xf]  ;;  %v533_v63 = vld [vmem:[%s2344_s24] sm:$0xe]  ;;  %v2440_v1 = vld [vmem:[%s2344_s24 + $0x8] sm:$0xf] }
  0x14   : > { %2032 = vmatpush3.bf16.msra.mxu0 %v2176_v7  ;;  %1953 = vmatprep.subr.bf16.mxu1 %v2177_v8  ;;  %v322_v19 = vshrl.u32 %v1639_v16, 16  ;;  %v324_v20 = vshll.u32 %v1639_v16, 16  ;;  %v1725_v25 = vcombine.low %v2357_v14, %v2369_v22  ;;  %v2443_v2 = vld [vmem:[%s2344_s24 + $0xc] sm:$0xf]  ;;  %v1052_v3 = vld [vmem:[%s2344_s24 + $0x10] sm:$0x3]  ;;  %v1674_v5 = vcombine.low %v533_v63, %v2354_v13 }
  0x15   : > { %2033 = vmatprep.subr.bf16.mxu0 %v2178_v9  ;;  %v329_v24 = vshll.u32 %v2362_v17, 16  ;;  %v812_v28 = vshrl.u32 %v2366_v21, 16  ;;  %v815_v29 = vshll.u32 %v2366_v21, 16  ;;  %v333_v43 = vshrl.u32 %v2362_v17, 16  ;;  %v2210_v18 = vld [vmem:[%s2641_s1 + $0x88] sm:$0xff]  }
  0x16   : > { %v326_v27 = vrot.slane %v324_v20, 1  ;;  %v820_v32 = vshrl.u32 %v1725_v25, 16  ;;  %v823_v33 = vshll.u32 %v1725_v25, 16  ;;  %v2451_v6 = vcombine.low %v1049_v0, %v2440_v1  ;;  %v660_v25 = vld [vmem:[%s2344_s24 + $0xc] sm:$0x7] }
  0x17   : > { %1954 = vmatpush3.bf16.msra.mxu1 %v2177_v8  ;;  %v331_v31 = vrot.slane %v329_v24, 1  ;;  %v814_v36 = vrot.slane %v812_v28, 3  ;;  %v817_v37 = vrot.slane %v815_v29, 4  ;;  %v1777_v7 = vcombine.low %v2443_v2, %v1052_v3  ;;  %v2205_v8 = vld [vmem:[%s2641_s1 + $0x80] sm:$0xff]   ;;  %v2213_v24 = vld [vmem:[%s2641_s1 + $0x190] sm:$0xff]   ;;  %v2214_v28 = vld [vmem:[%s2641_s1 + $0x98] sm:$0xff]  }
  0x18   : > { %2034 = vmatpush3.bf16.msra.mxu0 %v2178_v9  ;;  %1955 = vmatprep.subr.bf16.mxu1 %v2179_v10  ;;  %v327_v35 = vor.u32 %v326_v27, %v322_v19  ;;  %v822_v38 = vrot.slane %v820_v32, 3  ;;  %v825_v39 = vrot.slane %v823_v33, 4  ;;  %v2207_v9 = vld [vmem:[%s2641_s1 + $0x180] sm:$0xff]   ;;  %v556_v12 = vrot.slane %v2362_v17, 1  ;;  %v2211_v19 = vld [vmem:[%s2641_s1 + $0x188] sm:$0xff]   ;;  %v2215_v29 = vld [vmem:[%s2641_s1 + $0x198] sm:$0xff]  }
  0x19   : > { %2035 = vmatprep.subr.bf16.mxu0 %v2180_v11  ;;  %v818_v41 = vor.u32 %v817_v37, %v814_v36  ;;  %v335_v47 = vor.u32 %v333_v43, %v331_v31  ;;  %v1751_v13 = vcombine.low %v2369_v22, %v2369_v22  ;;  %v1081_v15 = vrot.slane %v2451_v6, 2  ;;  %v1450_v32 = vld [vmem:[%s2644_s4] sm:$0xff]  ;;  %v1452_v33 = vld [vmem:[%s2644_s4 + $0x10] sm:$0xff]  ;;  %v2219_v36 = vld [vmem:[%s2641_s1 + $0x1a8] sm:$0xff]  }
  0x1a   : > { %v332_v40 = vsel %vm320_vm0, %v327_v35, %v331_v31  ;;  %v826_v42 = vor.u32 %v825_v39, %v822_v38  ;;  %v1700_v27 = vcombine.low %v2357_v14, %v660_v25  ;;  %v2217_v31 = vld [vmem:[%s2641_s1 + $0x1a0] sm:$0xff]   ;;  %v1185_v35 = vld [vmem:[%s2344_s24 + $0x10] sm:$0x7]  ;;  %1455 = vperm.xlu0 %2167, %v1450_v32   ;;  %v1451_v37 = vld [vmem:[%s2644_s4 + $0x8] sm:$0xff]  ;;  %1465 = vperm.xlu1 %2168, %v1452_v33  }
  0x1b   : > { %1956 = vmatpush3.bf16.msra.mxu1 %v2179_v10  ;;  %1961 = vmatprep.mubr.bf16.mxu1 %v332_v40  ;;  %v1649_v10 = vcombine.low %v2357_v14, %v2357_v14  ;;  %v2216_v14 = vld [vmem:[%s2641_s1 + $0xa0] sm:$0xff]   ;;  %v2521_v38 = vcombine.low %v2443_v2, %v1185_v35  ;;  %v2220_v39 = vld [vmem:[%s2641_s1 + $0xb0] sm:$0xff]   ;;  %v2234_v17 = vld [vmem:[%s2641_s1 + $0xd8] sm:$0xff]  }
  0x1c   : > { %2036 = vmatpush3.bf16.msra.mxu0 %v2180_v11  ;;  %1957 = vmatprep.subr.bf16.mxu1 %v2181_v23  ;;  %v827_v45 = vsel %vm810_vm1, %v818_v41, %v826_v42  ;;  %v555_v11 = vrot.slane %v1674_v5, 1  ;;  %v2221_v40 = vld [vmem:[%s2641_s1 + $0x1b0] sm:$0xff]   ;;  %v1208_v41 = vshrl.u32 %v2451_v6, 16  ;;  %v2238_v63 = vld [vmem:[%s2641_s1 + $0xe8] sm:$0xff]   ;;  %v2242_v5 = vld [vmem:[%s2641_s1 + $0xf8] sm:$0xff]  }
  0x1d   : > { %2037 = vmatprep.subr.bf16.mxu0 %v2182_v26  ;;  %2041 = vmatprep.mubr.bf16.mxu0 %v827_v45  ;;  %v1216_v43 = vshrl.u32 %v2521_v38, 16  ;;  %v2222_v45 = vld [vmem:[%s2641_s1 + $0xb8] sm:$0xff]   ;;  %v2239_v0 = vld [vmem:[%s2641_s1 + $0x1e8] sm:$0xff]   ;;  %v2240_v2 = vld [vmem:[%s2641_s1 + $0xf0] sm:$0xff]  }
  0x1e   : > { %v557_v20 = vsel %vm554_vm2, %v555_v11, %v556_v12  ;;  %1460 = vperm.xlu0 %2167, %v1451_v37   ;;  %v2241_v3 = vld [vmem:[%s2641_s1 + $0x1f0] sm:$0xff]   ;;  %v2246_v11 = vld [vmem:[%s2641_s1 + $0x208] sm:$0xff]  }
  0x1f   : > { %1958 = vmatpush3.bf16.msra.mxu1 %v2181_v23  ;;  %v2212_v23 = vld [vmem:[%s2641_s1 + $0x90] sm:$0xff]  }
  0x20   : > { %2038 = vmatpush3.bf16.msra.mxu0 %v2182_v26  ;;  %1959 = vmatprep.subr.bf16.mxu1 %v2183_v30  ;;  %v685_v26 = vrot.slane %v2366_v21, 3 }
  0x21   : > { %2039 = vmatprep.subr.bf16.mxu0 %v2184_v34 }
  0x23   : > { %1960 = vmatpush3.bf16.msra.mxu1 %v2183_v30  ;;  %v2492_v30 = vrot.slane %v1700_v27, 3 }
  0x24   : > { %2040 = vmatpush3.bf16.msra.mxu0 %v2184_v34  ;;  %1965 = vmatprep.subr.bf16.mxu1 %v2187_v44  ;;  %v2218_v34 = vld [vmem:[%s2641_s1 + $0xa8] sm:$0xff]  }
  0x25   : > { %2045 = vmatprep.subr.bf16.mxu0 %v2190_v46  ;;  %v2496_v21 = vsel %vm684_vm4, %v685_v26, %v2492_v30 }
  0x26   : > { %1962 = vmatmul.mubr.bf16.vlgmr.msra.gmra.mrb[0].mxu1 %v335_v47  ;;  %v1210_v47 = vrot.slane %v1208_v41, 2 }
  0x27   : > { %1966 = vmatpush3.bf16.msra.mxu1 %v2187_v44  ;;  %2042 = vmatmul.mubr.bf16.vlgmr.msra.gmra.mrb[0].mxu0 %v826_v42  ;;  %v1211_v42 = vshll.u32 %v2451_v6, 16  ;;  %v1219_v44 = vshll.u32 %v2521_v38, 16  ;;  %v2243_v6 = vld [vmem:[%s2641_s1 + $0x1f8] sm:$0xff]  }
  0x28   : > { %2046 = vmatpush3.bf16.msra.mxu0 %v2190_v46  ;;  %1967 = vmatprep.subr.bf16.mxu1 %v2191_v48  ;;  %v2223_v46 = vld [vmem:[%s2641_s1 + $0x1b8] sm:$0xff]  }
  0x29   : > { %2047 = vmatprep.subr.bf16.mxu0 %v2192_v49  ;;  %1981 = vmatprep.mubr.bf16.mxu1 %v1639_v16  ;;  %v2466_v16 = vrot.slane %v1777_v7, 2 }
  0x2a   : > { %2061 = vmatprep.mubr.bf16.mxu0 %v1750_v50  ;;  %v1221_v50 = vrot.slane %v1219_v44, 3 }
  0x2b   : > { %1968 = vmatpush3.bf16.msra.mxu1 %v2191_v48  ;;  %v1083_v22 = vsel %vm1080_vm3, %v1081_v15, %v2466_v16  ;;  %v1213_v48 = vrot.slane %v1211_v42, 3  ;;  %v2249_v15 = vld [vmem:[%s2641_s1 + $0x220] sm:$0xff]  }
  0x2c   : > { %2048 = vmatpush3.bf16.msra.mxu0 %v2192_v49  ;;  %1969 = vmatprep.subr.bf16.mxu1 %v2193_v51  ;;  %v1218_v49 = vrot.slane %v1216_v43, 2 }
  0x2d   : > { %2049 = vmatprep.subr.bf16.mxu0 %v2194_v52  ;;  %v1214_v53 = vor.u32 %v1213_v48, %v1210_v47 }
  0x2f   : > { %1970 = vmatpush3.bf16.msra.mxu1 %v2193_v51  ;;  %v2225_v51 = vld [vmem:[%s2641_s1 + $0xc0] sm:$0xff]  }
  0x30   : > { %2050 = vmatpush3.bf16.msra.mxu0 %v2194_v52  ;;  %1971 = vmatprep.subr.bf16.mxu1 %v2195_v54  ;;  %v2229_v52 = vld [vmem:[%s2641_s1 + $0x1c0] sm:$0xff]  }
  0x31   : > { %2051 = vmatprep.subr.bf16.mxu0 %v2196_v55 }
  0x33   : > { %1972 = vmatpush3.bf16.msra.mxu1 %v2195_v54  ;;  %v2545_v54 = vor.u32 %v1221_v50, %v1218_v49 }
  0x34   : > { %2052 = vmatpush3.bf16.msra.mxu0 %v2196_v55  ;;  %1973 = vmatprep.subr.bf16.mxu1 %v2197_v56  ;;  %v2230_v55 = vld [vmem:[%s2641_s1 + $0xc8] sm:$0xff]  }
  0x35   : > { %2053 = vmatprep.subr.bf16.mxu0 %v2198_v57 }
  0x37   : > { %1974 = vmatpush3.bf16.msra.mxu1 %v2197_v56  ;;  %v2231_v56 = vld [vmem:[%s2641_s1 + $0x1c8] sm:$0xff]  }
  0x38   : > { %2054 = vmatpush3.bf16.msra.mxu0 %v2198_v57  ;;  %1975 = vmatprep.subr.bf16.mxu1 %v2199_v58  ;;  %v1223_v57 = vsel %vm1206_vm5, %v1214_v53, %v2545_v54 }
  0x39   : > { %2055 = vmatprep.subr.bf16.mxu0 %v2200_v59 }
  0x3b   : > { %1976 = vmatpush3.bf16.msra.mxu1 %v2199_v58  ;;  %v2232_v58 = vld [vmem:[%s2641_s1 + $0xd0] sm:$0xff]  }
  0x3c   : > { %2056 = vmatpush3.bf16.msra.mxu0 %v2200_v59  ;;  %1977 = vmatprep.subr.bf16.mxu1 %v2201_v60  ;;  %v2233_v59 = vld [vmem:[%s2641_s1 + $0x1d0] sm:$0xff]  }
  0x3d   : > { %2057 = vmatprep.subr.bf16.mxu0 %v2202_v61 }
  0x3f   : > { %1978 = vmatpush3.bf16.msra.mxu1 %v2201_v60  ;;  %v2235_v60 = vld [vmem:[%s2641_s1 + $0x1d8] sm:$0xff]  }
  0x40   : > { %2058 = vmatpush3.bf16.msra.mxu0 %v2202_v61  ;;  %1979 = vmatprep.subr.bf16.mxu1 %v2203_v62  ;;  %v2236_v61 = vld [vmem:[%s2641_s1 + $0xe0] sm:$0xff]  }
  0x41   : > { %2059 = vmatprep.subr.bf16.mxu0 %v2204_v4 }
  0x43   : > { %1980 = vmatpush3.bf16.msra.mxu1 %v2203_v62  ;;  %v2237_v62 = vld [vmem:[%s2641_s1 + $0x1e0] sm:$0xff]  }
  0x44   : > { %2060 = vmatpush3.bf16.msra.mxu0 %v2204_v4  ;;  %1985 = vmatprep.subr.bf16.mxu1 %v2205_v8  ;;  %v1325_v4 = vld [vmem:[%s2344_s24 + $0x4] sm:$0x8] }
  0x45   : > { %2065 = vmatprep.subr.bf16.mxu0 %v2207_v9  ;;  %v1827_v7 = vcombine.low %v1325_v4, %v2440_v1 }
  0x46   : > { %1982 = vmatmul.mubr.bf16.vlgmr.msra.gmra.mrb[0].mxu1 %v1649_v10  ;;  %v1347_v10 = vrot.slane %v2521_v38, 3 }
  0x47   : > { %1986 = vmatpush3.bf16.msra.mxu1 %v2205_v8  ;;  %2062 = vmatmul.mubr.bf16.vlgmr.msra.gmra.mrb[0].mxu0 %v1751_v13  ;;  %v2245_v8 = vld [vmem:[%s2641_s1 + $0x200] sm:$0xff]   ;;  %v2248_v13 = vld [vmem:[%s2641_s1 + $0x218] sm:$0xff]  }
  0x48   : > { %2066 = vmatpush3.bf16.msra.mxu0 %v2207_v9  ;;  %1987 = vmatprep.subr.bf16.mxu1 %v2210_v18  ;;  %v1346_v9 = vrot.slane %v1827_v7, 3  ;;  %v1837_v7 = vld [vmem:[%s2643_s3] ss:$0 sm:$0xff] }
  0x49   : > { %2067 = vmatprep.subr.bf16.mxu0 %v2211_v19  ;;  %2001 = vmatprep.mubr.bf16.mxu1 %v557_v20 }
  0x4a   : > { %2081 = vmatprep.mubr.bf16.mxu0 %v1083_v22  ;;  %v1348_v1 = vsel %vm684_vm4, %v1346_v9, %v1347_v10 }
  0x4b   : > { %1988 = vmatpush3.bf16.msra.mxu1 %v2210_v18  ;;  %v2251_v18 = vld [vmem:[%s2641_s1 + $0x230] sm:$0xff]  }
  0x4c   : > { %2068 = vmatpush3.bf16.msra.mxu0 %v2211_v19  ;;  %1989 = vmatprep.subr.bf16.mxu1 %v2212_v23  ;;  %v2252_v19 = vld [vmem:[%s2641_s1 + $0x238] sm:$0xff]  }
  0x4d   : > { %2069 = vmatprep.subr.bf16.mxu0 %v2213_v24 }
  0x4f   : > { %1990 = vmatpush3.bf16.msra.mxu1 %v2212_v23 }
  0x50   : > { %2070 = vmatpush3.bf16.msra.mxu0 %v2213_v24  ;;  %1991 = vmatprep.subr.bf16.mxu1 %v2214_v28 }
  0x51   : > { %2071 = vmatprep.subr.bf16.mxu0 %v2215_v29 }
  0x53   : > { %1992 = vmatpush3.bf16.msra.mxu1 %v2214_v28 }
  0x54   : > { %2072 = vmatpush3.bf16.msra.mxu0 %v2215_v29  ;;  %1993 = vmatprep.subr.bf16.mxu1 %v2216_v14 }
  0x55   : > { %2073 = vmatprep.subr.bf16.mxu0 %v2217_v31 }
  0x57   : > { %1994 = vmatpush3.bf16.msra.mxu1 %v2216_v14 }
  0x58   : > { %2074 = vmatpush3.bf16.msra.mxu0 %v2217_v31  ;;  %1995 = vmatprep.subr.bf16.mxu1 %v2218_v34 }
  0x59   : > { %2075 = vmatprep.subr.bf16.mxu0 %v2219_v36 }
  0x5b   : > { %1996 = vmatpush3.bf16.msra.mxu1 %v2218_v34 }
  0x5c   : > { %2076 = vmatpush3.bf16.msra.mxu0 %v2219_v36  ;;  %1997 = vmatprep.subr.bf16.mxu1 %v2220_v39 }
  0x5d   : > { %2077 = vmatprep.subr.bf16.mxu0 %v2221_v40 }
  0x5f   : > { %1998 = vmatpush3.bf16.msra.mxu1 %v2220_v39 }
  0x60   : > { %2078 = vmatpush3.bf16.msra.mxu0 %v2221_v40  ;;  %1999 = vmatprep.subr.bf16.mxu1 %v2222_v45 }
  0x61   : > { %2079 = vmatprep.subr.bf16.mxu0 %v2223_v46 }
  0x63   : > { %2000 = vmatpush3.bf16.msra.mxu1 %v2222_v45 }
  0x64   : > { %2080 = vmatpush3.bf16.msra.mxu0 %v2223_v46  ;;  %2005 = vmatprep.subr.bf16.mxu1 %v2225_v51 }
  0x65   : > { %2085 = vmatprep.subr.bf16.mxu0 %v2229_v52 }
  0x66   : > { %2002 = vmatmul.mubr.bf16.vlgmr.msra.gmra.mrb[0].mxu1 %v556_v12  ;;  %v2247_v12 = vld [vmem:[%s2641_s1 + $0x210] sm:$0xff]  }
  0x67   : > { %2006 = vmatpush3.bf16.msra.mxu1 %v2225_v51  ;;  %2082 = vmatmul.mubr.bf16.vlgmr.msra.gmra.mrb[0].mxu0 %v2466_v16  ;;  %v2250_v16 = vld [vmem:[%s2641_s1 + $0x228] sm:$0xff]  }
  0x68   : > { %2086 = vmatpush3.bf16.msra.mxu0 %v2229_v52  ;;  %2007 = vmatprep.subr.bf16.mxu1 %v2230_v55 }
  0x69   : > { %2087 = vmatprep.subr.bf16.mxu0 %v2231_v56  ;;  %2021 = vmatprep.mubr.bf16.mxu1 %v2496_v21 }
  0x6a   : > { %2101 = vmatprep.mubr.bf16.mxu0 %v1223_v57 }
  0x6b   : > { %2008 = vmatpush3.bf16.msra.mxu1 %v2230_v55 }
  0x6c   : > { %2088 = vmatpush3.bf16.msra.mxu0 %v2231_v56  ;;  %2009 = vmatprep.subr.bf16.mxu1 %v2232_v58 }
  0x6d   : > { %2089 = vmatprep.subr.bf16.mxu0 %v2233_v59 }
  0x6f   : > { %2010 = vmatpush3.bf16.msra.mxu1 %v2232_v58 }
  0x70   : > { %2090 = vmatpush3.bf16.msra.mxu0 %v2233_v59  ;;  %2011 = vmatprep.subr.bf16.mxu1 %v2234_v17 }
  0x71   : > { %2091 = vmatprep.subr.bf16.mxu0 %v2235_v60 }
  0x73   : > { %2012 = vmatpush3.bf16.msra.mxu1 %v2234_v17 }
  0x74   : > { %2092 = vmatpush3.bf16.msra.mxu0 %v2235_v60  ;;  %2013 = vmatprep.subr.bf16.mxu1 %v2236_v61 }
  0x75   : > { %2093 = vmatprep.subr.bf16.mxu0 %v2237_v62 }
  0x77   : > { %2014 = vmatpush3.bf16.msra.mxu1 %v2236_v61 }
  0x78   : > { %2094 = vmatpush3.bf16.msra.mxu0 %v2237_v62  ;;  %2015 = vmatprep.subr.bf16.mxu1 %v2238_v63 }
  0x79   : > { %2095 = vmatprep.subr.bf16.mxu0 %v2239_v0 }
  0x7b   : > { %2016 = vmatpush3.bf16.msra.mxu1 %v2238_v63  ;;  %v1847_v63 = vld [vmem:[%s266_s7] sm:$0xff]  }
  0x7c   : > { %2096 = vmatpush3.bf16.msra.mxu0 %v2239_v0  ;;  %2017 = vmatprep.subr.bf16.mxu1 %v2240_v2  ;;  %v1849_v9 = vunpack.c.h.bf16 %v1847_v63 }
  0x7d   : > { %2097 = vmatprep.subr.bf16.mxu0 %v2241_v3 }
  0x7f   : > { %2018 = vmatpush3.bf16.msra.mxu1 %v2240_v2  ;;  %v1836_v2 = vld [vmem:[%s2642_s2] ss:$0 sm:$0xff] }
  0x80   : > { %2098 = vmatpush3.bf16.msra.mxu0 %v2241_v3  ;;  %2019 = vmatprep.subr.bf16.mxu1 %v2242_v5  ;;  %v1525_v3 = vld [vmem:[%s266_s7 + $0x8] sm:$0xf] }
  0x81   : > { %2099 = vmatprep.subr.bf16.mxu0 %v2243_v6 }
  0x83   : > { %2020 = vmatpush3.bf16.msra.mxu1 %v2242_v5 }
  0x84   : > { %2100 = vmatpush3.bf16.msra.mxu0 %v2243_v6 }
  0x85   : > { %2105 = vmatprep.subr.bf16.mxu0 %v2245_v8 }
  0x86   : > { %2022 = vmatmul.mubr.bf16.vlgmr.msra.gmra.mrb[0].mxu1 %v2492_v30 }
  0x87   : > { %2102 = vmatmul.mubr.bf16.vlgmr.msra.gmra.mrb[0].mxu0 %v2545_v54 }
  0x88   : > { %2106 = vmatpush3.bf16.msra.mxu0 %v2245_v8  ;;  %2121 = vmatprep.mubr.bf16.mxu0 %v1348_v1  ;;  %v1848_v8 = vunpack.c.l.bf16 %v1847_v63 }
  0x89   : > { %2107 = vmatprep.subr.bf16.mxu0 %v2246_v11 }
  0x8c   : > { %2108 = vmatpush3.bf16.msra.mxu0 %v2246_v11 }
  0x8d   : > { %2109 = vmatprep.subr.bf16.mxu0 %v2247_v12 }
  0x90   : > { %2110 = vmatpush3.bf16.msra.mxu0 %v2247_v12  ;;  %v1528_v12 = vunpack.c.l.bf16 %v1525_v3 }
  0x91   : > { %2111 = vmatprep.subr.bf16.mxu0 %v2248_v13 }
  0x94   : > { %2112 = vmatpush3.bf16.msra.mxu0 %v2248_v13 }
  0x95   : > { %2113 = vmatprep.subr.bf16.mxu0 %v2249_v15 }
  0x98   : > { %2114 = vmatpush3.bf16.msra.mxu0 %v2249_v15 }
  0x99   : > { %2115 = vmatprep.subr.bf16.mxu0 %v2250_v16  ;;  %v1456_v25 = vpop.permute.xlu0 %1455  ;;  %v1466_v32 = vpop.permute.xlu1 %1465 }
  0x9c   : > { %2116 = vmatpush3.bf16.msra.mxu0 %v2250_v16 }
  0x9d   : > { %2117 = vmatprep.subr.bf16.mxu0 %v2251_v18  ;;  %v1461_v31 = vpop.permute.xlu0 %1460 }
  0xa0   : > { %2118 = vmatpush3.bf16.msra.mxu0 %v2251_v18 }
  0xa1   : > { %2119 = vmatprep.subr.bf16.mxu0 %v2252_v19 }
  0xa4   : > { %2120 = vmatpush3.bf16.msra.mxu0 %v2252_v19 }
  0xa7   : > { %2122 = vmatmul.mubr.bf16.vlgmr.msra.gmra.mrb[0].mxu0 %v1347_v10 }
 0x159   : > { %v2023_v20 = vpop.f32.mrb[0].mxu1 }
 0x15a   : > { %v772_v22 = vpop.f32.mrb[1].mxu1 }
 0x15b   : > { %v2024_v23 = vpop.f32.mrb[2].mxu1 }
 0x15c   : > { %v775_v24 = vpop.f32.mrb[3].mxu1 }
 0x17a   : > { %v2123_v26 = vpop.f32.mrb[0].mxu0 }
 0x17b   : > { %v2125_v27 = vadd.f32 %v2123_v26, %v2023_v20  ;;  %v1433_v28 = vpop.f32.mrb[1].mxu0 }
 0x17c   : > { %v2126_v29 = vadd.f32 %v1433_v28, %v772_v22  ;;  %v2124_v30 = vpop.f32.mrb[2].mxu0 }
 0x17d   : > { %v1436_v21 = vpop.f32.mrb[3].mxu0  ;;  %v1470_v35 = vmul.f32 %v2125_v27, %v1466_v32 }
 0x17e   : > { %v2127_v14 = vadd.f32 %v1436_v21, %v775_v24  ;;  %v1468_v33 = vmul.f32 %v2126_v29, %v1456_v25 }
 0x180   : > { %v1469_v34 = vmul.f32 %v2127_v14, %v1461_v31 }
 0x182   : > { %v1471_v36 = vadd.f32 %v1469_v34, %v1468_v33 }
 0x184   : > { %v1472_v37 = vadd.f32 %v1471_v36, %v1470_v35 }
 0x186   : > { %v1473_v38 = vrot.slane %v1472_v37, 4 }
 0x188   : > { %v1474_v39 = vadd.f32 %v1473_v38, %v1472_v37 }
 0x18a   : > { %v1475_v40 = vrot.slane %v1474_v39, 2 }
 0x18c   : > { %v1476_v41 = vadd.f32 %v1475_v40, %v1474_v39 }
 0x18e   : > { %v1477_v42 = vrot.slane %v1476_v41, 1 }
 0x190   : > { %v1478_v43 = vadd.f32 %v1477_v42, %v1476_v41 }
 0x192   : > { %v1479_v44 = vmul.f32 0.0625, %v1478_v43 }
 0x194   : > { %v1480_v45 = vsub.f32 %v2126_v29, %v1479_v44  ;;  %v1481_v46 = vsub.f32 %v2127_v14, %v1479_v44  ;;  %v1482_v47 = vsub.f32 %v2125_v27, %v1479_v44 }
 0x196   : > { %v1483_v48 = vmul.f32 %v1480_v45, %v1480_v45  ;;  %v1484_v49 = vmul.f32 %v1481_v46, %v1481_v46  ;;  %v1485_v50 = vmul.f32 %v1482_v47, %v1482_v47 }
 0x198   : > { %v1486_v51 = vmul.f32 %v1483_v48, %v1456_v25  ;;  %v1487_v52 = vmul.f32 %v1484_v49, %v1461_v31  ;;  %v1488_v53 = vmul.f32 %v1485_v50, %v1466_v32 }
 0x19a   : > { %v1489_v54 = vadd.f32 %v1487_v52, %v1486_v51 }
 0x19c   : > { %v1490_v55 = vadd.f32 %v1489_v54, %v1488_v53 }
 0x19e   : > { %v1491_v56 = vrot.slane %v1490_v55, 4 }
 0x1a0   : > { %v1492_v57 = vadd.f32 %v1491_v56, %v1490_v55 }
 0x1a2   : > { %v1493_v58 = vrot.slane %v1492_v57, 2 }
 0x1a4   : > { %v1494_v59 = vadd.f32 %v1493_v58, %v1492_v57 }
 0x1a6   : > { %v1495_v17 = vrot.slane %v1494_v59, 1 }
 0x1a8   : > { %v1496_v60 = vadd.f32 %v1495_v17, %v1494_v59 }
 0x1aa   : > { %v1497_v61 = vmul.f32 0.0625, %v1496_v60 }
 0x1ac   : > { %v1498_v62 = vadd.f32 1e-05, %v1497_v61 }
 0x1ae   : > { %2254 = vrsqrt.f32 %v1498_v62 }
 0x1b8   : > { %v2255_v0 = vpop.eup %2254 }
 0x1b9   : > { %v1500_v4 = vmul.f32 %v2255_v0, %v1480_v45  ;;  %v1501_v5 = vmul.f32 %v2255_v0, %v1481_v46  ;;  %v1502_v6 = vmul.f32 %v2255_v0, %v1482_v47 }
 0x1bb   : > { %v1510_v10 = vmul.f32 %v1836_v2, %v1500_v4  ;;  %v1511_v11 = vmul.f32 %v1836_v2, %v1501_v5  ;;  %v1512_v1 = vmul.f32 %v1836_v2, %v1502_v6 }
 0x1bd   : > { %v1520_v13 = vadd.f32 %v1837_v7, %v1510_v10  ;;  %v1521_v15 = vadd.f32 %v1837_v7, %v1511_v11  ;;  %v1522_v16 = vadd.f32 %v1837_v7, %v1512_v1 }
 0x1bf   : > { %v1529_v18 = vadd.f32 %v1848_v8, %v1520_v13  ;;  %v1530_v19 = vadd.f32 %v1849_v9, %v1521_v15  ;;  %v1531_v20 = vadd.f32 %v1528_v12, %v1522_v16 }
 0x1c1   : > { %v1845_v22 = vpack.c.bf16 %v1531_v20, %v1531_v20  ;;  %v1853_v23 = vpack.c.bf16 %v1530_v19, %v1529_v18 }
 0x1c3   : > { %1854 = vst [vmem:[%s271_s12] sm:$0xff] %v1853_v23   ;;  %1547 = vst [vmem:[%s271_s12 + $0x8] sm:$0xf] %v1845_v22 }
 0x1c4 PF: > { %s16_s21 = sadd.s32 1, %s2262_s21  }
 0x1c5   : > { %p13_p4 = scmp.ge.s32.totalorder %s16_s21, 4  }
 0x1c7   :  { %15 = sbr.rel (!%p13_p4) target bundleno = 1 (0x1), region = 85 }

// kernel: transformer_net.36
= control target key start
LH: loop header
LB: loop body
LE: loop exit
PB: predicated region body
PF: predicated region fallthrough
CT: control target
= control target key end

     0   :  { %s446_s1 = inlined_call_operand.vmem [shape: bf16[256,128], index: 1, kind: input, shape index: {}]   ;;  %s447_s0 = inlined_call_operand.vmem [shape: bf16[32,256], index: 0, kind: input, shape index: {}]   ;;  %s448_s2 = inlined_call_operand.vmem [shape: f32[1,128], index: 2, kind: input, shape index: {}]   ;;  %s449_s3 = inlined_call_operand.vmem [shape: bf16[32,128], index: 3, kind: output, shape index: {}]  }
   0x1   :  { %v335_v0 = vld [vmem:[%s446_s1 + $0x40] sm:$0xff]   ;;  %v337_v2 = vld [vmem:[%s446_s1 + $0x48] sm:$0xff]   ;;  %v339_v4 = vld [vmem:[%s446_s1 + $0x50] sm:$0xff]  }
   0x2   :  { %v336_v1 = vld [vmem:[%s446_s1] sm:$0xff]   ;;  %291 = vmatprep.subr.bf16.mxu0 %v335_v0  ;;  %319 = vmatprep.subr.bf16.mxu1 %v335_v0  ;;  %v338_v3 = vld [vmem:[%s446_s1 + $0x8] sm:$0xff]   ;;  %v340_v5 = vld [vmem:[%s446_s1 + $0x10] sm:$0xff]  }
   0x3   :  { %292 = vmatpush3.bf16.msra.mxu0 %v336_v1  ;;  %327 = vmatpush3.bf16.msra.mxu1 %v336_v1  ;;  %v341_v6 = vld [vmem:[%s446_s1 + $0x58] sm:$0xff]   ;;  %v343_v8 = vld [vmem:[%s446_s1 + $0x60] sm:$0xff]   ;;  %v345_v10 = vld [vmem:[%s446_s1 + $0x68] sm:$0xff]  }
   0x4   :  { %293 = vmatprep.subr.bf16.mxu0 %v337_v2  ;;  %320 = vmatprep.subr.bf16.mxu1 %v337_v2  ;;  %v342_v7 = vld [vmem:[%s446_s1 + $0x18] sm:$0xff]   ;;  %v344_v9 = vld [vmem:[%s446_s1 + $0x20] sm:$0xff]   ;;  %v346_v13 = vld [vmem:[%s446_s1 + $0x28] sm:$0xff]  }
   0x5   :  { %v353_v11 = vld [vmem:[%s447_s0 + $0x4] ss:$8 sps:$4 sm:$0xff]   ;;  %v356_v12 = vld [vmem:[%s447_s0 + $0x14] ss:$8 sps:$4 sm:$0xff]   ;;  %v351_v18 = vld [vmem:[%s447_s0] ss:$8 sps:$4 sm:$0xff]  }
   0x6   :  { %v347_v14 = vld [vmem:[%s446_s1 + $0x70] sm:$0xff]   ;;  %206 = vmatprep.mubr.bf16.mxu0 %v353_v11  ;;  %214 = vmatprep.mubr.bf16.mxu1 %v356_v12  ;;  %v349_v16 = vld [vmem:[%s446_s1 + $0x78] sm:$0xff]   ;;  %v251_v22 = vld [vmem:[%s448_s2] ss:$0 sm:$0xff] }
   0x7   :  { %294 = vmatpush3.bf16.msra.mxu0 %v338_v3  ;;  %328 = vmatpush3.bf16.msra.mxu1 %v338_v3  ;;  %v348_v15 = vld [vmem:[%s446_s1 + $0x30] sm:$0xff]   ;;  %v350_v17 = vld [vmem:[%s446_s1 + $0x38] sm:$0xff]  }
   0x8   :  { %295 = vmatprep.subr.bf16.mxu0 %v339_v4  ;;  %321 = vmatprep.subr.bf16.mxu1 %v339_v4  ;;  %v354_v19 = vld [vmem:[%s447_s0 + $0x10] ss:$8 sps:$4 sm:$0xff]  }
   0xb   :  { %296 = vmatpush3.bf16.msra.mxu0 %v340_v5  ;;  %329 = vmatpush3.bf16.msra.mxu1 %v340_v5 }
   0xc   :  { %297 = vmatprep.subr.bf16.mxu0 %v341_v6  ;;  %322 = vmatprep.subr.bf16.mxu1 %v341_v6 }
   0xf   :  { %298 = vmatpush3.bf16.msra.mxu0 %v342_v7  ;;  %330 = vmatpush3.bf16.msra.mxu1 %v342_v7 }
  0x10   :  { %299 = vmatprep.subr.bf16.mxu0 %v343_v8  ;;  %323 = vmatprep.subr.bf16.mxu1 %v343_v8 }
  0x13   :  { %300 = vmatpush3.bf16.msra.mxu0 %v344_v9  ;;  %331 = vmatpush3.bf16.msra.mxu1 %v344_v9 }
  0x14   :  { %301 = vmatprep.subr.bf16.mxu0 %v345_v10  ;;  %324 = vmatprep.subr.bf16.mxu1 %v345_v10 }
  0x17   :  { %302 = vmatpush3.bf16.msra.mxu0 %v346_v13  ;;  %332 = vmatpush3.bf16.msra.mxu1 %v346_v13 }
  0x18   :  { %303 = vmatprep.subr.bf16.mxu0 %v347_v14  ;;  %325 = vmatprep.subr.bf16.mxu1 %v347_v14 }
  0x1b   :  { %304 = vmatpush3.bf16.msra.mxu0 %v348_v15  ;;  %333 = vmatpush3.bf16.msra.mxu1 %v348_v15 }
  0x1c   :  { %305 = vmatprep.subr.bf16.mxu0 %v349_v16  ;;  %326 = vmatprep.subr.bf16.mxu1 %v349_v16 }
  0x1f   :  { %306 = vmatpush3.bf16.msra.mxu0 %v350_v17  ;;  %334 = vmatpush3.bf16.msra.mxu1 %v350_v17 }
  0x22   :  { %207 = vmatmul.mubr.bf16.vlgmr.msra.gmra.mrb[0].mxu0 %v351_v18  ;;  %215 = vmatmul.mubr.bf16.vlgmr.msra.gmra.mrb[0].mxu1 %v354_v19 }
  0xf5   :  { %v307_v20 = vpop.f32.mrb[0].mxu0  ;;  %v313_v21 = vpop.f32.mrb[0].mxu1 }
  0xf6   :  { %v308_v23 = vpop.f32.mrb[1].mxu0  ;;  %v314_v24 = vpop.f32.mrb[1].mxu1 }
  0xf7   :  { %v309_v25 = vadd.f32 %v308_v23, %v307_v20  ;;  %v315_v26 = vadd.f32 %v314_v24, %v313_v21  ;;  %v310_v27 = vpop.f32.mrb[2].mxu0  ;;  %v316_v28 = vpop.f32.mrb[2].mxu1 }
  0xf8   :  { %v311_v29 = vpop.f32.mrb[3].mxu0  ;;  %v317_v30 = vpop.f32.mrb[3].mxu1 }
  0xf9   :  { %v209_v31 = vadd.f32 %v309_v25, %v251_v22  ;;  %v217_v32 = vadd.f32 %v315_v26, %v251_v22  ;;  %v312_v33 = vadd.f32 %v311_v29, %v310_v27  ;;  %v318_v34 = vadd.f32 %v317_v30, %v316_v28 }
  0xfb   :  { %v212_v35 = vadd.f32 %v312_v33, %v251_v22  ;;  %v220_v36 = vadd.f32 %v318_v34, %v251_v22  ;;  %v223_v37 = vmax.f32 %v209_v31, 0.0  ;;  %v225_v38 = vmax.f32 %v217_v32, 0.0 }
  0xfd   :  { %v224_v39 = vmax.f32 %v212_v35, 0.0  ;;  %v226_v40 = vmax.f32 %v220_v36, 0.0 }
  0xff   :  { %v283_v41 = vpack.c.bf16 %v224_v39, %v223_v37  ;;  %v288_v42 = vpack.c.bf16 %v226_v40, %v225_v38 }
 0x101   :  { %284 = vst [vmem:[%s449_s3] sm:$0xff] %v283_v41   ;;  %290 = vst [vmem:[%s449_s3 + $0x8] sm:$0xff] %v288_v42  }

// kernel: transformer_net.35
= control target key start
LH: loop header
LB: loop body
LE: loop exit
PB: predicated region body
PF: predicated region fallthrough
CT: control target
= control target key end

     0   :  { %s308_s1 = inlined_call_operand.vmem [shape: bf16[128,128], index: 1, kind: input, shape index: {}]   ;;  %s309_s0 = inlined_call_operand.vmem [shape: bf16[32,128], index: 0, kind: input, shape index: {}]   ;;  %s310_s2 = inlined_call_operand.vmem [shape: f32[1,128], index: 2, kind: input, shape index: {}]   ;;  %s311_s3 = inlined_call_operand.vmem [shape: bf16[32,128], index: 3, kind: output, shape index: {}]  }
   0x1   :  { %v239_v0 = vld [vmem:[%s308_s1] sm:$0xff]   ;;  %v240_v1 = vld [vmem:[%s308_s1 + $0x8] sm:$0xff]   ;;  %v241_v2 = vld [vmem:[%s308_s1 + $0x10] sm:$0xff]  }
   0x2   :  { %219 = vmatprep.subr.bf16.mxu0 %v239_v0  ;;  %v242_v3 = vld [vmem:[%s308_s1 + $0x18] sm:$0xff]   ;;  %v247_v4 = vld [vmem:[%s309_s0] sm:$0xff]   ;;  %v244_v6 = vld [vmem:[%s308_s1 + $0x28] sm:$0xff]  }
   0x3   :  { %220 = vmatpush3.bf16.msra.mxu0 %v239_v0  ;;  %235 = vmatprep.mubr.bf16.mxu0 %v247_v4  ;;  %v243_v5 = vld [vmem:[%s308_s1 + $0x20] sm:$0xff]   ;;  %v245_v7 = vld [vmem:[%s308_s1 + $0x30] sm:$0xff]   ;;  %v246_v8 = vld [vmem:[%s308_s1 + $0x38] sm:$0xff]  }
   0x4   :  { %221 = vmatprep.subr.bf16.mxu0 %v240_v1  ;;  %v248_v9 = vld [vmem:[%s309_s0 + $0x8] sm:$0xff]   ;;  %v179_v10 = vld [vmem:[%s310_s2] ss:$0 sm:$0xff] }
   0x7   :  { %222 = vmatpush3.bf16.msra.mxu0 %v240_v1 }
   0x8   :  { %223 = vmatprep.subr.bf16.mxu0 %v241_v2 }
   0xb   :  { %224 = vmatpush3.bf16.msra.mxu0 %v241_v2 }
   0xc   :  { %225 = vmatprep.subr.bf16.mxu0 %v242_v3 }
   0xf   :  { %226 = vmatpush3.bf16.msra.mxu0 %v242_v3 }
  0x10   :  { %227 = vmatprep.subr.bf16.mxu0 %v243_v5 }
  0x13   :  { %228 = vmatpush3.bf16.msra.mxu0 %v243_v5 }
  0x14   :  { %229 = vmatprep.subr.bf16.mxu0 %v244_v6 }
  0x17   :  { %230 = vmatpush3.bf16.msra.mxu0 %v244_v6 }
  0x18   :  { %231 = vmatprep.subr.bf16.mxu0 %v245_v7 }
  0x1b   :  { %232 = vmatpush3.bf16.msra.mxu0 %v245_v7 }
  0x1c   :  { %233 = vmatprep.subr.bf16.mxu0 %v246_v8 }
  0x1f   :  { %234 = vmatpush3.bf16.msra.mxu0 %v246_v8 }
  0x22   :  { %236 = vmatmul.mubr.bf16.vlgmr.msra.gmra.mrb[0].mxu0 %v248_v9 }
  0xf5   :  { %v237_v11 = vpop.f32.mrb[0].mxu0 }
  0xf6   :  { %v145_v12 = vadd.f32 %v237_v11, %v179_v10  ;;  %v136_v13 = vpop.f32.mrb[1].mxu0 }
  0xf7   :  { %v137_v14 = vadd.f32 %v179_v10, %v136_v13  ;;  %v238_v15 = vpop.f32.mrb[2].mxu0 }
  0xf8   :  { %v148_v16 = vadd.f32 %v238_v15, %v179_v10  ;;  %v139_v17 = vpop.f32.mrb[3].mxu0  ;;  %v153_v19 = vmax.f32 %v145_v12, 0.0 }
  0xf9   :  { %v140_v18 = vadd.f32 %v179_v10, %v139_v17  ;;  %v151_v21 = vmax.f32 %v137_v14, 0.0 }
  0xfa   :  { %v154_v20 = vmax.f32 %v148_v16, 0.0 }
  0xfb   :  { %v152_v22 = vmax.f32 %v140_v18, 0.0 }
  0xfc   :  { %v206_v23 = vpack.c.bf16 %v154_v20, %v153_v19 }
  0xfd   :  { %v201_v24 = vpack.c.bf16 %v152_v22, %v151_v21 }
  0xfe   :  { %208 = vst [vmem:[%s311_s3 + $0x8] sm:$0xff] %v206_v23  }
  0xff   :  { %202 = vst [vmem:[%s311_s3] sm:$0xff] %v201_v24  }

// kernel: transformer_net.38
= control target key start
LH: loop header
LB: loop body
LE: loop exit
PB: predicated region body
PF: predicated region fallthrough
CT: control target
= control target key end

     0   :  { %s761_s1 = inlined_call_operand.vmem [shape: bf16[512,128], index: 1, kind: input, shape index: {}]   ;;  %s762_s0 = inlined_call_operand.vmem [shape: bf16[32,512], index: 0, kind: input, shape index: {}]   ;;  %s763_s2 = inlined_call_operand.vmem [shape: f32[1,128], index: 2, kind: input, shape index: {}]   ;;  %s764_s3 = inlined_call_operand.vmem [shape: bf16[32,128], index: 3, kind: output, shape index: {}]  }
   0x1   :  { %v568_v0 = vld [vmem:[%s761_s1 + $0x40] sm:$0xff]   ;;  %v572_v4 = vld [vmem:[%s761_s1 + $0x48] sm:$0xff]   ;;  %v576_v8 = vld [vmem:[%s761_s1 + $0x50] sm:$0xff]  }
   0x2   :  { %v569_v1 = vld [vmem:[%s761_s1 + $0xc0] sm:$0xff]   ;;  %512 = vmatprep.subr.bf16.mxu0 %v568_v0  ;;  %v573_v5 = vld [vmem:[%s761_s1 + $0xc8] sm:$0xff]   ;;  %v577_v9 = vld [vmem:[%s761_s1 + $0xd0] sm:$0xff]  }
   0x3   :  { %v570_v2 = vld [vmem:[%s761_s1] sm:$0xff]   ;;  %540 = vmatprep.subr.bf16.mxu1 %v569_v1  ;;  %v574_v6 = vld [vmem:[%s761_s1 + $0x8] sm:$0xff]   ;;  %v578_v10 = vld [vmem:[%s761_s1 + $0x10] sm:$0xff]  }
   0x4   :  { %v571_v3 = vld [vmem:[%s761_s1 + $0x80] sm:$0xff]   ;;  %513 = vmatpush3.bf16.msra.mxu0 %v570_v2  ;;  %v575_v7 = vld [vmem:[%s761_s1 + $0x88] sm:$0xff]   ;;  %v579_v11 = vld [vmem:[%s761_s1 + $0x90] sm:$0xff]  }
   0x5   :  { %541 = vmatpush3.bf16.msra.mxu1 %v571_v3  ;;  %514 = vmatprep.subr.bf16.mxu0 %v572_v4  ;;  %v580_v12 = vld [vmem:[%s761_s1 + $0x58] sm:$0xff]   ;;  %v584_v16 = vld [vmem:[%s761_s1 + $0x60] sm:$0xff]   ;;  %v588_v20 = vld [vmem:[%s761_s1 + $0x68] sm:$0xff]  }
   0x6   :  { %542 = vmatprep.subr.bf16.mxu1 %v573_v5  ;;  %v581_v13 = vld [vmem:[%s761_s1 + $0xd8] sm:$0xff]   ;;  %v585_v17 = vld [vmem:[%s761_s1 + $0xe0] sm:$0xff]   ;;  %v589_v21 = vld [vmem:[%s761_s1 + $0xe8] sm:$0xff]  }
   0x7   :  { %v582_v14 = vld [vmem:[%s761_s1 + $0x18] sm:$0xff]   ;;  %v586_v18 = vld [vmem:[%s761_s1 + $0x20] sm:$0xff]   ;;  %v590_v22 = vld [vmem:[%s761_s1 + $0x28] sm:$0xff]  }
   0x8   :  { %515 = vmatpush3.bf16.msra.mxu0 %v574_v6  ;;  %v583_v15 = vld [vmem:[%s761_s1 + $0x98] sm:$0xff]   ;;  %v587_v19 = vld [vmem:[%s761_s1 + $0xa0] sm:$0xff]   ;;  %v591_v23 = vld [vmem:[%s761_s1 + $0xa8] sm:$0xff]  }
   0x9   :  { %543 = vmatpush3.bf16.msra.mxu1 %v575_v7  ;;  %516 = vmatprep.subr.bf16.mxu0 %v576_v8  ;;  %v592_v24 = vld [vmem:[%s761_s1 + $0x70] sm:$0xff]   ;;  %v596_v28 = vld [vmem:[%s761_s1 + $0x78] sm:$0xff]   ;;  %v452_v42 = vld [vmem:[%s763_s2] ss:$0 sm:$0xff] }
   0xa   :  { %544 = vmatprep.subr.bf16.mxu1 %v577_v9  ;;  %v593_v25 = vld [vmem:[%s761_s1 + $0xf0] sm:$0xff]   ;;  %v597_v29 = vld [vmem:[%s761_s1 + $0xf8] sm:$0xff]  }
   0xb   :  { %v594_v26 = vld [vmem:[%s761_s1 + $0x30] sm:$0xff]   ;;  %v598_v30 = vld [vmem:[%s761_s1 + $0x38] sm:$0xff]  }
   0xc   :  { %517 = vmatpush3.bf16.msra.mxu0 %v578_v10  ;;  %v595_v27 = vld [vmem:[%s761_s1 + $0xb0] sm:$0xff]   ;;  %v599_v31 = vld [vmem:[%s761_s1 + $0xb8] sm:$0xff]  }
   0xd   :  { %545 = vmatpush3.bf16.msra.mxu1 %v579_v11  ;;  %518 = vmatprep.subr.bf16.mxu0 %v580_v12  ;;  %v600_v32 = vld [vmem:[%s762_s0] ss:$16 sps:$4 sm:$0xff]   ;;  %v602_v33 = vld [vmem:[%s762_s0 + $0x4] ss:$16 sps:$4 sm:$0xff]   ;;  %v603_v34 = vld [vmem:[%s762_s0 + $0x8] ss:$16 sps:$4 sm:$0xff]  }
   0xe   :  { %546 = vmatprep.subr.bf16.mxu1 %v581_v13  ;;  %v605_v35 = vld [vmem:[%s762_s0 + $0xc] ss:$16 sps:$4 sm:$0xff]   ;;  %358 = vmatprep.mubr.bf16.mxu0 %v602_v33  ;;  %v606_v36 = vld [vmem:[%s762_s0 + $0x24] ss:$16 sps:$4 sm:$0xff]   ;;  %v610_v38 = vld [vmem:[%s762_s0 + $0x20] ss:$16 sps:$4 sm:$0xff]  }
   0xf   :  { %407 = vmatprep.mubr.bf16.mxu1 %v605_v35  ;;  %v608_v37 = vld [vmem:[%s762_s0 + $0x2c] ss:$16 sps:$4 sm:$0xff]   ;;  %v611_v39 = vld [vmem:[%s762_s0 + $0x28] ss:$16 sps:$4 sm:$0xff]  }
  0x10   :  { %519 = vmatpush3.bf16.msra.mxu0 %v582_v14 }
  0x11   :  { %547 = vmatpush3.bf16.msra.mxu1 %v583_v15  ;;  %520 = vmatprep.subr.bf16.mxu0 %v584_v16 }
  0x12   :  { %548 = vmatprep.subr.bf16.mxu1 %v585_v17 }
  0x14   :  { %521 = vmatpush3.bf16.msra.mxu0 %v586_v18 }
  0x15   :  { %549 = vmatpush3.bf16.msra.mxu1 %v587_v19  ;;  %522 = vmatprep.subr.bf16.mxu0 %v588_v20 }
  0x16   :  { %550 = vmatprep.subr.bf16.mxu1 %v589_v21 }
  0x18   :  { %523 = vmatpush3.bf16.msra.mxu0 %v590_v22 }
  0x19   :  { %551 = vmatpush3.bf16.msra.mxu1 %v591_v23  ;;  %524 = vmatprep.subr.bf16.mxu0 %v592_v24 }
  0x1a   :  { %552 = vmatprep.subr.bf16.mxu1 %v593_v25 }
  0x1c   :  { %525 = vmatpush3.bf16.msra.mxu0 %v594_v26 }
  0x1d   :  { %553 = vmatpush3.bf16.msra.mxu1 %v595_v27  ;;  %526 = vmatprep.subr.bf16.mxu0 %v596_v28 }
  0x1e   :  { %554 = vmatprep.subr.bf16.mxu1 %v597_v29 }
  0x20   :  { %527 = vmatpush3.bf16.msra.mxu0 %v598_v30 }
  0x21   :  { %555 = vmatpush3.bf16.msra.mxu1 %v599_v31 }
  0x23   :  { %359 = vmatmul.mubr.bf16.vlgmr.msra.gmra.mrb[0].mxu0 %v600_v32 }
  0x24   :  { %408 = vmatmul.mubr.bf16.vlgmr.msra.gmra.mrb[0].mxu1 %v603_v34  ;;  %366 = vmatprep.mubr.bf16.mxu0 %v606_v36 }
  0x25   :  { %415 = vmatprep.mubr.bf16.mxu1 %v608_v37 }
  0x2b   :  { %367 = vmatmul.mubr.bf16.gmra.mrb[4].mxu0 %v610_v38 }
  0x2c   :  { %416 = vmatmul.mubr.bf16.gmra.mrb[4].mxu1 %v611_v39 }
  0xf6   :  { %v528_v40 = vpop.f32.mrb[0].mxu0 }
  0xf7   :  { %v556_v41 = vpop.f32.mrb[0].mxu1  ;;  %v529_v43 = vpop.f32.mrb[1].mxu0 }
  0xf8   :  { %v530_v44 = vadd.f32 %v529_v43, %v528_v40  ;;  %v557_v45 = vpop.f32.mrb[1].mxu1  ;;  %v531_v46 = vpop.f32.mrb[2].mxu0 }
  0xf9   :  { %v558_v47 = vadd.f32 %v557_v45, %v556_v41  ;;  %v559_v48 = vpop.f32.mrb[2].mxu1  ;;  %v532_v49 = vpop.f32.mrb[3].mxu0 }
  0xfa   :  { %v361_v50 = vadd.f32 %v530_v44, %v452_v42  ;;  %v533_v51 = vadd.f32 %v532_v49, %v531_v46  ;;  %v560_v52 = vpop.f32.mrb[3].mxu1 }
  0xfb   :  { %v561_v53 = vadd.f32 %v560_v52, %v559_v48 }
  0xfc   :  { %v410_v54 = vadd.f32 %v558_v47, %v361_v50  ;;  %v364_v55 = vadd.f32 %v533_v51, %v452_v42 }
  0xfe   :  { %v413_v56 = vadd.f32 %v561_v53, %v364_v55  ;;  %v534_v57 = vpop.f32.mrb[4].mxu0  ;;  %v424_v60 = vmax.f32 %v410_v54, 0.0 }
  0xff   :  { %v562_v58 = vpop.f32.mrb[4].mxu1  ;;  %v535_v59 = vpop.f32.mrb[5].mxu0 }
 0x100   :  { %v425_v61 = vmax.f32 %v413_v56, 0.0  ;;  %v536_v62 = vadd.f32 %v535_v59, %v534_v57  ;;  %v563_v63 = vpop.f32.mrb[5].mxu1  ;;  %v537_v0 = vpop.f32.mrb[6].mxu0 }
 0x101   :  { %v564_v1 = vadd.f32 %v563_v63, %v562_v58  ;;  %v565_v2 = vpop.f32.mrb[6].mxu1  ;;  %v538_v3 = vpop.f32.mrb[7].mxu0 }
 0x102   :  { %v504_v4 = vpack.c.bf16 %v425_v61, %v424_v60  ;;  %v369_v5 = vadd.f32 %v536_v62, %v452_v42  ;;  %v539_v6 = vadd.f32 %v538_v3, %v537_v0  ;;  %v566_v7 = vpop.f32.mrb[7].mxu1 }
 0x103   :  { %v567_v8 = vadd.f32 %v566_v7, %v565_v2 }
 0x104   :  { %505 = vst [vmem:[%s764_s3] sm:$0xff] %v504_v4   ;;  %v418_v9 = vadd.f32 %v564_v1, %v369_v5  ;;  %v372_v10 = vadd.f32 %v539_v6, %v452_v42 }
 0x106   :  { %v421_v11 = vadd.f32 %v567_v8, %v372_v10  ;;  %v426_v12 = vmax.f32 %v418_v9, 0.0 }
 0x108   :  { %v427_v13 = vmax.f32 %v421_v11, 0.0 }
 0x10a   :  { %v509_v14 = vpack.c.bf16 %v427_v13, %v426_v12 }
 0x10c   :  { %511 = vst [vmem:[%s764_s3 + $0x8] sm:$0xff] %v509_v14  }

// kernel: transformer_net.39
= control target key start
LH: loop header
LB: loop body
LE: loop exit
PB: predicated region body
PF: predicated region fallthrough
CT: control target
= control target key end

     0   :  { %s618_s1 = inlined_call_operand.vmem [shape: bf16[128,128], index: 1, kind: input, shape index: {}]   ;;  %s619_s0 = inlined_call_operand.vmem [shape: bf16[128,128], index: 0, kind: input, shape index: {}]   ;;  %s620_s2 = inlined_call_operand.vmem [shape: f32[1,128], index: 2, kind: input, shape index: {}]   ;;  %s621_s3 = inlined_call_operand.vmem [shape: bf16[128,128], index: 3, kind: output, shape index: {}]  }
   0x1   :  { %v507_v0 = vld [vmem:[%s618_s1] sm:$0xff]   ;;  %v508_v1 = vld [vmem:[%s618_s1 + $0x8] sm:$0xff]   ;;  %v509_v2 = vld [vmem:[%s618_s1 + $0x10] sm:$0xff]  }
   0x2   :  { %459 = vmatprep.subr.bf16.mxu0 %v507_v0  ;;  %491 = vmatprep.subr.bf16.mxu1 %v507_v0  ;;  %v510_v3 = vld [vmem:[%s618_s1 + $0x18] sm:$0xff]   ;;  %v515_v4 = vld [vmem:[%s619_s0] sm:$0xff]   ;;  %v512_v7 = vld [vmem:[%s618_s1 + $0x28] sm:$0xff]  }
   0x3   :  { %460 = vmatpush3.bf16.msra.mxu0 %v507_v0  ;;  %499 = vmatpush3.bf16.msra.mxu1 %v507_v0  ;;  %v516_v5 = vld [vmem:[%s619_s0 + $0x20] sm:$0xff]   ;;  %v513_v8 = vld [vmem:[%s618_s1 + $0x30] sm:$0xff]   ;;  %v514_v9 = vld [vmem:[%s618_s1 + $0x38] sm:$0xff]  }
   0x4   :  { %461 = vmatprep.subr.bf16.mxu0 %v508_v1  ;;  %492 = vmatprep.subr.bf16.mxu1 %v508_v1  ;;  %v511_v6 = vld [vmem:[%s618_s1 + $0x20] sm:$0xff]   ;;  %v517_v10 = vld [vmem:[%s619_s0 + $0x8] sm:$0xff]   ;;  %v519_v12 = vld [vmem:[%s619_s0 + $0x10] sm:$0xff]  }
   0x5   :  { %475 = vmatprep.mubr.bf16.mxu0 %v515_v4  ;;  %483 = vmatprep.mubr.bf16.mxu1 %v516_v5  ;;  %v518_v11 = vld [vmem:[%s619_s0 + $0x28] sm:$0xff]   ;;  %v520_v13 = vld [vmem:[%s619_s0 + $0x30] sm:$0xff]   ;;  %v521_v14 = vld [vmem:[%s619_s0 + $0x18] sm:$0xff]  }
   0x6   :  { %v522_v15 = vld [vmem:[%s619_s0 + $0x38] sm:$0xff]   ;;  %v347_v16 = vld [vmem:[%s620_s2] ss:$0 sm:$0xff] }
   0x7   :  { %462 = vmatpush3.bf16.msra.mxu0 %v508_v1  ;;  %500 = vmatpush3.bf16.msra.mxu1 %v508_v1 }
   0x8   :  { %463 = vmatprep.subr.bf16.mxu0 %v509_v2  ;;  %493 = vmatprep.subr.bf16.mxu1 %v509_v2 }
   0xb   :  { %464 = vmatpush3.bf16.msra.mxu0 %v509_v2  ;;  %501 = vmatpush3.bf16.msra.mxu1 %v509_v2 }
   0xc   :  { %465 = vmatprep.subr.bf16.mxu0 %v510_v3  ;;  %494 = vmatprep.subr.bf16.mxu1 %v510_v3 }
   0xf   :  { %466 = vmatpush3.bf16.msra.mxu0 %v510_v3  ;;  %502 = vmatpush3.bf16.msra.mxu1 %v510_v3 }
  0x10   :  { %467 = vmatprep.subr.bf16.mxu0 %v511_v6  ;;  %495 = vmatprep.subr.bf16.mxu1 %v511_v6 }
  0x13   :  { %468 = vmatpush3.bf16.msra.mxu0 %v511_v6  ;;  %503 = vmatpush3.bf16.msra.mxu1 %v511_v6 }
  0x14   :  { %469 = vmatprep.subr.bf16.mxu0 %v512_v7  ;;  %496 = vmatprep.subr.bf16.mxu1 %v512_v7 }
  0x17   :  { %470 = vmatpush3.bf16.msra.mxu0 %v512_v7  ;;  %504 = vmatpush3.bf16.msra.mxu1 %v512_v7 }
  0x18   :  { %471 = vmatprep.subr.bf16.mxu0 %v513_v8  ;;  %497 = vmatprep.subr.bf16.mxu1 %v513_v8 }
  0x1b   :  { %472 = vmatpush3.bf16.msra.mxu0 %v513_v8  ;;  %505 = vmatpush3.bf16.msra.mxu1 %v513_v8 }
  0x1c   :  { %473 = vmatprep.subr.bf16.mxu0 %v514_v9  ;;  %498 = vmatprep.subr.bf16.mxu1 %v514_v9 }
  0x1f   :  { %474 = vmatpush3.bf16.msra.mxu0 %v514_v9  ;;  %506 = vmatpush3.bf16.msra.mxu1 %v514_v9 }
  0x22   :  { %476 = vmatmul.mubr.bf16.vlgmr.msra.gmra.mrb[0].mxu0 %v517_v10  ;;  %484 = vmatmul.mubr.bf16.vlgmr.msra.gmra.mrb[0].mxu1 %v518_v11 }
  0x23   :  { %479 = vmatprep.mubr.bf16.mxu0 %v519_v12  ;;  %487 = vmatprep.mubr.bf16.mxu1 %v520_v13 }
  0x2a   :  { %480 = vmatmul.mubr.bf16.gmra.mrb[4].mxu0 %v521_v14  ;;  %488 = vmatmul.mubr.bf16.gmra.mrb[4].mxu1 %v522_v15 }
  0xf5   :  { %v477_v17 = vpop.f32.mrb[0].mxu0  ;;  %v485_v18 = vpop.f32.mrb[0].mxu1 }
  0xf6   :  { %v193_v19 = vadd.f32 %v477_v17, %v347_v16  ;;  %v225_v20 = vadd.f32 %v485_v18, %v347_v16  ;;  %v184_v21 = vpop.f32.mrb[1].mxu0  ;;  %v216_v22 = vpop.f32.mrb[1].mxu1 }
  0xf7   :  { %v185_v23 = vadd.f32 %v347_v16, %v184_v21  ;;  %v217_v24 = vadd.f32 %v347_v16, %v216_v22  ;;  %v478_v25 = vpop.f32.mrb[2].mxu0  ;;  %v486_v26 = vpop.f32.mrb[2].mxu1 }
  0xf8   :  { %v196_v27 = vadd.f32 %v478_v25, %v347_v16  ;;  %v228_v28 = vadd.f32 %v486_v26, %v347_v16  ;;  %v187_v29 = vpop.f32.mrb[3].mxu0  ;;  %v219_v30 = vpop.f32.mrb[3].mxu1  ;;  %v249_v33 = vmax.f32 %v193_v19, 0.0  ;;  %v257_v34 = vmax.f32 %v225_v20, 0.0 }
  0xf9   :  { %v188_v31 = vadd.f32 %v347_v16, %v187_v29  ;;  %v220_v32 = vadd.f32 %v347_v16, %v219_v30  ;;  %v247_v37 = vmax.f32 %v185_v23, 0.0  ;;  %v255_v38 = vmax.f32 %v217_v24, 0.0 }
  0xfa   :  { %v250_v35 = vmax.f32 %v196_v27, 0.0  ;;  %v258_v36 = vmax.f32 %v228_v28, 0.0 }
  0xfb   :  { %v248_v39 = vmax.f32 %v188_v31, 0.0  ;;  %v256_v40 = vmax.f32 %v220_v32, 0.0 }
  0xfc   :  { %v404_v41 = vpack.c.bf16 %v250_v35, %v249_v33  ;;  %v424_v42 = vpack.c.bf16 %v258_v36, %v257_v34 }
  0xfd   :  { %v399_v43 = vpack.c.bf16 %v248_v39, %v247_v37  ;;  %v419_v44 = vpack.c.bf16 %v256_v40, %v255_v38  ;;  %v481_v45 = vpop.f32.mrb[4].mxu0  ;;  %v489_v46 = vpop.f32.mrb[4].mxu1 }
  0xfe   :  { %436 = vst [vmem:[%s621_s3 + $0x8] sm:$0xff] %v404_v41   ;;  %440 = vst [vmem:[%s621_s3 + $0x28] sm:$0xff] %v424_v42   ;;  %v209_v47 = vadd.f32 %v481_v45, %v347_v16  ;;  %v241_v48 = vadd.f32 %v489_v46, %v347_v16  ;;  %v200_v49 = vpop.f32.mrb[5].mxu0  ;;  %v232_v50 = vpop.f32.mrb[5].mxu1 }
  0xff   :  { %400 = vst [vmem:[%s621_s3] sm:$0xff] %v399_v43   ;;  %439 = vst [vmem:[%s621_s3 + $0x20] sm:$0xff] %v419_v44   ;;  %v201_v51 = vadd.f32 %v347_v16, %v200_v49  ;;  %v233_v52 = vadd.f32 %v347_v16, %v232_v50  ;;  %v482_v53 = vpop.f32.mrb[6].mxu0  ;;  %v490_v54 = vpop.f32.mrb[6].mxu1 }
 0x100   :  { %v212_v55 = vadd.f32 %v482_v53, %v347_v16  ;;  %v244_v56 = vadd.f32 %v490_v54, %v347_v16  ;;  %v203_v57 = vpop.f32.mrb[7].mxu0  ;;  %v235_v58 = vpop.f32.mrb[7].mxu1  ;;  %v253_v61 = vmax.f32 %v209_v47, 0.0  ;;  %v261_v62 = vmax.f32 %v241_v48, 0.0 }
 0x101   :  { %v204_v59 = vadd.f32 %v347_v16, %v203_v57  ;;  %v236_v60 = vadd.f32 %v347_v16, %v235_v58  ;;  %v251_v1 = vmax.f32 %v201_v51, 0.0  ;;  %v259_v2 = vmax.f32 %v233_v52, 0.0 }
 0x102   :  { %v254_v63 = vmax.f32 %v212_v55, 0.0  ;;  %v262_v0 = vmax.f32 %v244_v56, 0.0 }
 0x103   :  { %v252_v3 = vmax.f32 %v204_v59, 0.0  ;;  %v260_v4 = vmax.f32 %v236_v60, 0.0 }
 0x104   :  { %v414_v5 = vpack.c.bf16 %v254_v63, %v253_v61  ;;  %v434_v6 = vpack.c.bf16 %v262_v0, %v261_v62 }
 0x105   :  { %v409_v7 = vpack.c.bf16 %v252_v3, %v251_v1  ;;  %v429_v8 = vpack.c.bf16 %v260_v4, %v259_v2 }
 0x106   :  { %438 = vst [vmem:[%s621_s3 + $0x18] sm:$0xff] %v414_v5   ;;  %442 = vst [vmem:[%s621_s3 + $0x38] sm:$0xff] %v434_v6  }
 0x107   :  { %437 = vst [vmem:[%s621_s3 + $0x10] sm:$0xff] %v409_v7   ;;  %441 = vst [vmem:[%s621_s3 + $0x30] sm:$0xff] %v429_v8  }

// kernel: transformer_net.42
= control target key start
LH: loop header
LB: loop body
LE: loop exit
PB: predicated region body
PF: predicated region fallthrough
CT: control target
= control target key end

     0   :  { %s836_s1 = inlined_call_operand.vmem [shape: bf16[256,128], index: 1, kind: input, shape index: {}]   ;;  %s837_s0 = inlined_call_operand.vmem [shape: bf16[128,256], index: 0, kind: input, shape index: {}]   ;;  %s838_s2 = inlined_call_operand.vmem [shape: f32[1,128], index: 2, kind: input, shape index: {}]   ;;  %s839_s3 = inlined_call_operand.vmem [shape: bf16[128,128], index: 3, kind: output, shape index: {}]  }
   0x1   :  { %v635_v0 = vld [vmem:[%s836_s1 + $0x40] sm:$0xff]   ;;  %v637_v2 = vld [vmem:[%s836_s1 + $0x48] sm:$0xff]   ;;  %v639_v4 = vld [vmem:[%s836_s1 + $0x50] sm:$0xff]  }
   0x2   :  { %v636_v1 = vld [vmem:[%s836_s1] sm:$0xff]   ;;  %555 = vmatprep.subr.bf16.mxu0 %v635_v0  ;;  %619 = vmatprep.subr.bf16.mxu1 %v635_v0  ;;  %v638_v3 = vld [vmem:[%s836_s1 + $0x8] sm:$0xff]   ;;  %v640_v5 = vld [vmem:[%s836_s1 + $0x10] sm:$0xff]  }
   0x3   :  { %556 = vmatpush3.bf16.msra.mxu0 %v636_v1  ;;  %627 = vmatpush3.bf16.msra.mxu1 %v636_v1  ;;  %v641_v6 = vld [vmem:[%s836_s1 + $0x58] sm:$0xff]   ;;  %v643_v8 = vld [vmem:[%s836_s1 + $0x60] sm:$0xff]   ;;  %v645_v10 = vld [vmem:[%s836_s1 + $0x68] sm:$0xff]  }
   0x4   :  { %557 = vmatprep.subr.bf16.mxu0 %v637_v2  ;;  %620 = vmatprep.subr.bf16.mxu1 %v637_v2  ;;  %v642_v7 = vld [vmem:[%s836_s1 + $0x18] sm:$0xff]   ;;  %v644_v9 = vld [vmem:[%s836_s1 + $0x20] sm:$0xff]   ;;  %v646_v13 = vld [vmem:[%s836_s1 + $0x28] sm:$0xff]  }
   0x5   :  { %v653_v11 = vld [vmem:[%s837_s0 + $0x4] ss:$8 sps:$4 sm:$0xff]   ;;  %v647_v14 = vld [vmem:[%s836_s1 + $0x70] sm:$0xff]   ;;  %v649_v16 = vld [vmem:[%s836_s1 + $0x78] sm:$0xff]  }
   0x6   :  { %v656_v12 = vld [vmem:[%s837_s0 + $0x44] ss:$8 sps:$4 sm:$0xff]   ;;  %278 = vmatprep.mubr.bf16.mxu0 %v653_v11  ;;  %v648_v15 = vld [vmem:[%s836_s1 + $0x30] sm:$0xff]   ;;  %v650_v17 = vld [vmem:[%s836_s1 + $0x38] sm:$0xff]  }
   0x7   :  { %558 = vmatpush3.bf16.msra.mxu0 %v638_v3  ;;  %628 = vmatpush3.bf16.msra.mxu1 %v638_v3  ;;  %v651_v18 = vld [vmem:[%s837_s0] ss:$8 sps:$4 sm:$0xff]   ;;  %v657_v20 = vld [vmem:[%s837_s0 + $0x14] ss:$8 sps:$4 sm:$0xff]   ;;  %v661_v22 = vld [vmem:[%s837_s0 + $0x10] ss:$8 sps:$4 sm:$0xff]  }
   0x8   :  { %559 = vmatprep.subr.bf16.mxu0 %v639_v4  ;;  %621 = vmatprep.subr.bf16.mxu1 %v639_v4  ;;  %v654_v19 = vld [vmem:[%s837_s0 + $0x40] ss:$8 sps:$4 sm:$0xff]   ;;  %v659_v21 = vld [vmem:[%s837_s0 + $0x54] ss:$8 sps:$4 sm:$0xff]   ;;  %v662_v23 = vld [vmem:[%s837_s0 + $0x50] ss:$8 sps:$4 sm:$0xff]  }
   0x9   :  { %310 = vmatprep.mubr.bf16.mxu1 %v656_v12  ;;  %v663_v24 = vld [vmem:[%s837_s0 + $0x24] ss:$8 sps:$4 sm:$0xff]   ;;  %v667_v26 = vld [vmem:[%s837_s0 + $0x20] ss:$8 sps:$4 sm:$0xff]   ;;  %v669_v28 = vld [vmem:[%s837_s0 + $0x34] ss:$8 sps:$4 sm:$0xff]  }
   0xa   :  { %v665_v25 = vld [vmem:[%s837_s0 + $0x64] ss:$8 sps:$4 sm:$0xff]   ;;  %v668_v27 = vld [vmem:[%s837_s0 + $0x60] ss:$8 sps:$4 sm:$0xff]   ;;  %v671_v29 = vld [vmem:[%s837_s0 + $0x74] ss:$8 sps:$4 sm:$0xff]  }
   0xb   :  { %560 = vmatpush3.bf16.msra.mxu0 %v640_v5  ;;  %629 = vmatpush3.bf16.msra.mxu1 %v640_v5  ;;  %v673_v30 = vld [vmem:[%s837_s0 + $0x30] ss:$8 sps:$4 sm:$0xff]   ;;  %v794_v34 = vld [vmem:[%s838_s2] ss:$0 sm:$0xff] }
   0xc   :  { %561 = vmatprep.subr.bf16.mxu0 %v641_v6  ;;  %622 = vmatprep.subr.bf16.mxu1 %v641_v6  ;;  %v674_v31 = vld [vmem:[%s837_s0 + $0x70] ss:$8 sps:$4 sm:$0xff]  }
   0xf   :  { %562 = vmatpush3.bf16.msra.mxu0 %v642_v7  ;;  %630 = vmatpush3.bf16.msra.mxu1 %v642_v7 }
  0x10   :  { %563 = vmatprep.subr.bf16.mxu0 %v643_v8  ;;  %623 = vmatprep.subr.bf16.mxu1 %v643_v8 }
  0x13   :  { %564 = vmatpush3.bf16.msra.mxu0 %v644_v9  ;;  %631 = vmatpush3.bf16.msra.mxu1 %v644_v9 }
  0x14   :  { %565 = vmatprep.subr.bf16.mxu0 %v645_v10  ;;  %624 = vmatprep.subr.bf16.mxu1 %v645_v10 }
  0x17   :  { %566 = vmatpush3.bf16.msra.mxu0 %v646_v13  ;;  %632 = vmatpush3.bf16.msra.mxu1 %v646_v13 }
  0x18   :  { %567 = vmatprep.subr.bf16.mxu0 %v647_v14  ;;  %625 = vmatprep.subr.bf16.mxu1 %v647_v14 }
  0x1b   :  { %568 = vmatpush3.bf16.msra.mxu0 %v648_v15  ;;  %633 = vmatpush3.bf16.msra.mxu1 %v648_v15 }
  0x1c   :  { %569 = vmatprep.subr.bf16.mxu0 %v649_v16  ;;  %626 = vmatprep.subr.bf16.mxu1 %v649_v16 }
  0x1f   :  { %570 = vmatpush3.bf16.msra.mxu0 %v650_v17  ;;  %634 = vmatpush3.bf16.msra.mxu1 %v650_v17 }
  0x22   :  { %279 = vmatmul.mubr.bf16.vlgmr.msra.gmra.mrb[0].mxu0 %v651_v18  ;;  %311 = vmatmul.mubr.bf16.vlgmr.msra.gmra.mrb[0].mxu1 %v654_v19 }
  0x23   :  { %286 = vmatprep.mubr.bf16.mxu0 %v657_v20  ;;  %318 = vmatprep.mubr.bf16.mxu1 %v659_v21 }
  0x2a   :  { %287 = vmatmul.mubr.bf16.gmra.mrb[4].mxu0 %v661_v22  ;;  %319 = vmatmul.mubr.bf16.gmra.mrb[4].mxu1 %v662_v23 }
  0x2b   :  { %294 = vmatprep.mubr.bf16.mxu0 %v663_v24  ;;  %326 = vmatprep.mubr.bf16.mxu1 %v665_v25 }
  0x32   :  { %295 = vmatmul.mubr.bf16.gmra.mrb[8].mxu0 %v667_v26  ;;  %327 = vmatmul.mubr.bf16.gmra.mrb[8].mxu1 %v668_v27 }
  0x33   :  { %302 = vmatprep.mubr.bf16.mxu0 %v669_v28  ;;  %334 = vmatprep.mubr.bf16.mxu1 %v671_v29 }
  0x3a   :  { %303 = vmatmul.mubr.bf16.gmra.mrb[12].mxu0 %v673_v30  ;;  %335 = vmatmul.mubr.bf16.gmra.mrb[12].mxu1 %v674_v31 }
  0xf5   :  { %v571_v32 = vpop.f32.mrb[0].mxu0  ;;  %v595_v33 = vpop.f32.mrb[0].mxu1 }
  0xf6   :  { %v572_v35 = vpop.f32.mrb[1].mxu0  ;;  %v596_v36 = vpop.f32.mrb[1].mxu1 }
  0xf7   :  { %v573_v37 = vadd.f32 %v572_v35, %v571_v32  ;;  %v597_v38 = vadd.f32 %v596_v36, %v595_v33  ;;  %v574_v39 = vpop.f32.mrb[2].mxu0  ;;  %v598_v40 = vpop.f32.mrb[2].mxu1 }
  0xf8   :  { %v575_v41 = vpop.f32.mrb[3].mxu0  ;;  %v599_v42 = vpop.f32.mrb[3].mxu1 }
  0xf9   :  { %v281_v43 = vadd.f32 %v573_v37, %v794_v34  ;;  %v313_v44 = vadd.f32 %v597_v38, %v794_v34  ;;  %v576_v45 = vadd.f32 %v575_v41, %v574_v39  ;;  %v600_v46 = vadd.f32 %v599_v42, %v598_v40 }
  0xfb   :  { %v284_v47 = vadd.f32 %v576_v45, %v794_v34  ;;  %v316_v48 = vadd.f32 %v600_v46, %v794_v34  ;;  %v343_v49 = vmax.f32 %v281_v43, 0.0  ;;  %v351_v50 = vmax.f32 %v313_v44, 0.0 }
  0xfd   :  { %v344_v51 = vmax.f32 %v284_v47, 0.0  ;;  %v352_v52 = vmax.f32 %v316_v48, 0.0  ;;  %v577_v53 = vpop.f32.mrb[4].mxu0  ;;  %v601_v54 = vpop.f32.mrb[4].mxu1 }
  0xfe   :  { %v578_v55 = vpop.f32.mrb[5].mxu0  ;;  %v602_v56 = vpop.f32.mrb[5].mxu1 }
  0xff   :  { %v511_v57 = vpack.c.bf16 %v344_v51, %v343_v49  ;;  %v531_v58 = vpack.c.bf16 %v352_v52, %v351_v50  ;;  %v579_v59 = vadd.f32 %v578_v55, %v577_v53  ;;  %v603_v60 = vadd.f32 %v602_v56, %v601_v54  ;;  %v580_v61 = vpop.f32.mrb[6].mxu0  ;;  %v604_v62 = vpop.f32.mrb[6].mxu1 }
 0x100   :  { %v581_v63 = vpop.f32.mrb[7].mxu0  ;;  %v605_v0 = vpop.f32.mrb[7].mxu1 }
 0x101   :  { %512 = vst [vmem:[%s839_s3] sm:$0xff] %v511_v57   ;;  %551 = vst [vmem:[%s839_s3 + $0x20] sm:$0xff] %v531_v58   ;;  %v289_v1 = vadd.f32 %v579_v59, %v794_v34  ;;  %v321_v2 = vadd.f32 %v603_v60, %v794_v34  ;;  %v582_v3 = vadd.f32 %v581_v63, %v580_v61 }
 0x102   :  { %v606_v4 = vadd.f32 %v605_v0, %v604_v62 }
 0x103   :  { %v292_v5 = vadd.f32 %v582_v3, %v794_v34  ;;  %v345_v7 = vmax.f32 %v289_v1, 0.0  ;;  %v353_v8 = vmax.f32 %v321_v2, 0.0 }
 0x104   :  { %v324_v6 = vadd.f32 %v606_v4, %v794_v34 }
 0x105   :  { %v346_v9 = vmax.f32 %v292_v5, 0.0  ;;  %v583_v11 = vpop.f32.mrb[8].mxu0  ;;  %v607_v12 = vpop.f32.mrb[8].mxu1 }
 0x106   :  { %v354_v10 = vmax.f32 %v324_v6, 0.0  ;;  %v584_v13 = vpop.f32.mrb[9].mxu0  ;;  %v608_v14 = vpop.f32.mrb[9].mxu1 }
 0x107   :  { %v516_v15 = vpack.c.bf16 %v346_v9, %v345_v7  ;;  %v585_v17 = vadd.f32 %v584_v13, %v583_v11  ;;  %v609_v18 = vadd.f32 %v608_v14, %v607_v12  ;;  %v586_v19 = vpop.f32.mrb[10].mxu0  ;;  %v610_v20 = vpop.f32.mrb[10].mxu1 }
 0x108   :  { %v536_v16 = vpack.c.bf16 %v354_v10, %v353_v8  ;;  %v587_v21 = vpop.f32.mrb[11].mxu0  ;;  %v611_v22 = vpop.f32.mrb[11].mxu1 }
 0x109   :  { %548 = vst [vmem:[%s839_s3 + $0x8] sm:$0xff] %v516_v15   ;;  %v297_v23 = vadd.f32 %v585_v17, %v794_v34  ;;  %v329_v24 = vadd.f32 %v609_v18, %v794_v34  ;;  %v588_v25 = vadd.f32 %v587_v21, %v586_v19  ;;  %v612_v26 = vadd.f32 %v611_v22, %v610_v20 }
 0x10a   :  { %552 = vst [vmem:[%s839_s3 + $0x28] sm:$0xff] %v536_v16  }
 0x10b   :  { %v300_v27 = vadd.f32 %v588_v25, %v794_v34  ;;  %v332_v28 = vadd.f32 %v612_v26, %v794_v34  ;;  %v347_v29 = vmax.f32 %v297_v23, 0.0  ;;  %v355_v30 = vmax.f32 %v329_v24, 0.0 }
 0x10d   :  { %v348_v31 = vmax.f32 %v300_v27, 0.0  ;;  %v356_v32 = vmax.f32 %v332_v28, 0.0  ;;  %v589_v33 = vpop.f32.mrb[12].mxu0  ;;  %v613_v35 = vpop.f32.mrb[12].mxu1 }
 0x10e   :  { %v590_v36 = vpop.f32.mrb[13].mxu0  ;;  %v614_v37 = vpop.f32.mrb[13].mxu1 }
 0x10f   :  { %v521_v38 = vpack.c.bf16 %v348_v31, %v347_v29  ;;  %v541_v39 = vpack.c.bf16 %v356_v32, %v355_v30  ;;  %v591_v40 = vadd.f32 %v590_v36, %v589_v33  ;;  %v615_v41 = vadd.f32 %v614_v37, %v613_v35  ;;  %v592_v42 = vpop.f32.mrb[14].mxu0  ;;  %v616_v43 = vpop.f32.mrb[14].mxu1 }
 0x110   :  { %v593_v44 = vpop.f32.mrb[15].mxu0  ;;  %v617_v45 = vpop.f32.mrb[15].mxu1 }
 0x111   :  { %549 = vst [vmem:[%s839_s3 + $0x10] sm:$0xff] %v521_v38   ;;  %553 = vst [vmem:[%s839_s3 + $0x30] sm:$0xff] %v541_v39   ;;  %v305_v46 = vadd.f32 %v591_v40, %v794_v34  ;;  %v337_v47 = vadd.f32 %v615_v41, %v794_v34  ;;  %v594_v48 = vadd.f32 %v593_v44, %v592_v42 }
 0x112   :  { %v618_v49 = vadd.f32 %v617_v45, %v616_v43 }
 0x113   :  { %v308_v50 = vadd.f32 %v594_v48, %v794_v34  ;;  %v349_v52 = vmax.f32 %v305_v46, 0.0  ;;  %v357_v53 = vmax.f32 %v337_v47, 0.0 }
 0x114   :  { %v340_v51 = vadd.f32 %v618_v49, %v794_v34 }
 0x115   :  { %v350_v54 = vmax.f32 %v308_v50, 0.0 }
 0x116   :  { %v358_v55 = vmax.f32 %v340_v51, 0.0 }
 0x117   :  { %v526_v56 = vpack.c.bf16 %v350_v54, %v349_v52 }
 0x118   :  { %v546_v57 = vpack.c.bf16 %v358_v55, %v357_v53 }
 0x119   :  { %550 = vst [vmem:[%s839_s3 + $0x18] sm:$0xff] %v526_v56  }
 0x11a   :  { %554 = vst [vmem:[%s839_s3 + $0x38] sm:$0xff] %v546_v57  }

// kernel: transformer_net.43
= control target key start
LH: loop header
LB: loop body
LE: loop exit
PB: predicated region body
PF: predicated region fallthrough
CT: control target
= control target key end

     0   :  { %s5277_s12 = smov 0   ;;  %s6238_s0 = inlined_call_operand.vmem [shape: bf16[512,2688], index: 0, kind: input, shape index: {}]   ;;  %s6239_s1 = inlined_call_operand.vmem [shape: bf16[2688,128], index: 1, kind: input, shape index: {}]   ;;  %s6240_s2 = inlined_call_operand.vmem [shape: f32[1,128], index: 2, kind: input, shape index: {}]   ;;  %s6241_s3 = inlined_call_operand.vmem [shape: f32[512,128], index: 3, kind: output, shape index: {}]  }
   0x1 LB: > { %s3740_s13 = sadd.s32 4294967295, %s5255_s12   ;;  %p3744_p0 = scmp.ge.s32.totalorder %s5255_s12, 1  ;;  %s5255_s12 = sphi %s5277_s12, %s13_s12  }
   0x2   : > { %p139_p1 = scmp.lt.s32.totalorder %s5255_s12, 5 }
   0x4   : > { %p140_p2 = pnand %p3744_p0, %p139_p1 }
   0x5   : > { %v4801_v0 = vld [vmem:[%s6239_s1 + $0x40] sm:$0xff] (!%p140_p2)   ;;  %v4805_v4 = vld [vmem:[%s6239_s1 + $0x48] sm:$0xff] (!%p140_p2)   ;;  %v4809_v8 = vld [vmem:[%s6239_s1 + $0x50] sm:$0xff] (!%p140_p2)   ;;  %s3745_s19 = sshll.u32 (!%p140_p2), %s3740_s13, 4 }
   0x6   : > { %143 = sbr.rel (%p140_p2) target bundleno = 604 (0x25c), region = 32  ;;  %v4802_v1 = vld [vmem:[%s6239_s1 + $0xc0] sm:$0xff] (!%p140_p2)   ;;  %4088 = vmatprep.subr.bf16.mxu0 (!%p140_p2), %v4801_v0  ;;  %v4806_v5 = vld [vmem:[%s6239_s1 + $0xc8] sm:$0xff] (!%p140_p2)   ;;  %v4810_v9 = vld [vmem:[%s6239_s1 + $0xd0] sm:$0xff] (!%p140_p2)   ;;  %p165_p3 = scmp.lt.s32.totalorder (!%p140_p2), %s3745_s19, 63 }
   0x7   : > { %v4803_v2 = vld [vmem:[%s6239_s1] sm:$0xff] (!%p140_p2)   ;;  %4152 = vmatprep.subr.bf16.mxu1 (!%p140_p2), %v4802_v1  ;;  %v4807_v6 = vld [vmem:[%s6239_s1 + $0x8] sm:$0xff] (!%p140_p2)   ;;  %v4811_v10 = vld [vmem:[%s6239_s1 + $0x10] sm:$0xff] (!%p140_p2)  }
   0x8   : > { %v4804_v3 = vld [vmem:[%s6239_s1 + $0x80] sm:$0xff] (!%p140_p2)   ;;  %4089 = vmatpush3.bf16.msra.mxu0 (!%p140_p2), %v4803_v2  ;;  %v4808_v7 = vld [vmem:[%s6239_s1 + $0x88] sm:$0xff] (!%p140_p2)   ;;  %v4812_v11 = vld [vmem:[%s6239_s1 + $0x90] sm:$0xff] (!%p140_p2)  }
   0x9   : > { %4153 = vmatpush3.bf16.msra.mxu1 (!%p140_p2), %v4804_v3  ;;  %4090 = vmatprep.subr.bf16.mxu0 (!%p140_p2), %v4805_v4  ;;  %v4813_v12 = vld [vmem:[%s6239_s1 + $0x58] sm:$0xff] (!%p140_p2)   ;;  %v4817_v16 = vld [vmem:[%s6239_s1 + $0x60] sm:$0xff] (!%p140_p2)   ;;  %v4821_v20 = vld [vmem:[%s6239_s1 + $0x68] sm:$0xff] (!%p140_p2)  }
   0xa   : > { %4154 = vmatprep.subr.bf16.mxu1 (!%p140_p2), %v4806_v5  ;;  %v4814_v13 = vld [vmem:[%s6239_s1 + $0xd8] sm:$0xff] (!%p140_p2)   ;;  %v4818_v17 = vld [vmem:[%s6239_s1 + $0xe0] sm:$0xff] (!%p140_p2)   ;;  %v4822_v21 = vld [vmem:[%s6239_s1 + $0xe8] sm:$0xff] (!%p140_p2)  }
   0xb   : > { %v4815_v14 = vld [vmem:[%s6239_s1 + $0x18] sm:$0xff] (!%p140_p2)   ;;  %v4819_v18 = vld [vmem:[%s6239_s1 + $0x20] sm:$0xff] (!%p140_p2)   ;;  %v4823_v22 = vld [vmem:[%s6239_s1 + $0x28] sm:$0xff] (!%p140_p2)  }
   0xc   : > { %4091 = vmatpush3.bf16.msra.mxu0 (!%p140_p2), %v4807_v6  ;;  %v4816_v15 = vld [vmem:[%s6239_s1 + $0x98] sm:$0xff] (!%p140_p2)   ;;  %v4820_v19 = vld [vmem:[%s6239_s1 + $0xa0] sm:$0xff] (!%p140_p2)   ;;  %v4824_v23 = vld [vmem:[%s6239_s1 + $0xa8] sm:$0xff] (!%p140_p2)  }
   0xd   : > { %4155 = vmatpush3.bf16.msra.mxu1 %v4808_v7  ;;  %4092 = vmatprep.subr.bf16.mxu0 %v4809_v8  ;;  %s6243_s19 = smov (!%p165_p3, %s3745_s19), 63  ;;  %v4825_v24 = vld [vmem:[%s6239_s1 + $0x70] sm:$0xff]   ;;  %v4829_v28 = vld [vmem:[%s6239_s1 + $0x78] sm:$0xff]   ;;  %v4839_v36 = vld [vmem:[%s6239_s1 + $0x140] sm:$0xff]  }
   0xe   : > { %4156 = vmatprep.subr.bf16.mxu1 %v4810_v9  ;;  %v4826_v25 = vld [vmem:[%s6239_s1 + $0xf0] sm:$0xff]   ;;  %s4792_s16 = smul.u32 84, %s6243_s19  ;;  %v4830_v29 = vld [vmem:[%s6239_s1 + $0xf8] sm:$0xff]   ;;  %v4840_v37 = vld [vmem:[%s6239_s1 + $0x1c0] sm:$0xff]  }
   0xf   : > { %v4827_v26 = vld [vmem:[%s6239_s1 + $0x30] sm:$0xff]   ;;  %v4831_v30 = vld [vmem:[%s6239_s1 + $0x38] sm:$0xff]   ;;  %v4841_v38 = vld [vmem:[%s6239_s1 + $0x100] sm:$0xff]  }
  0x10   : > { %4093 = vmatpush3.bf16.msra.mxu0 %v4811_v10  ;;  %v4828_v27 = vld [vmem:[%s6239_s1 + $0xb0] sm:$0xff]   ;;  %s5383_s13 = scalar_lea.vmem %s6238_s0, %s4792_s16  ;;  %v4832_v31 = vld [vmem:[%s6239_s1 + $0xb8] sm:$0xff]   ;;  %v4842_v39 = vld [vmem:[%s6239_s1 + $0x180] sm:$0xff]  }
  0x11   : > { %4157 = vmatpush3.bf16.msra.mxu1 %v4812_v11  ;;  %4094 = vmatprep.subr.bf16.mxu0 %v4813_v12  ;;  %v4833_v32 = vld [vmem:[%s5383_s13] ss:$84 sps:$4 sm:$0xff]   ;;  %v4835_v33 = vld [vmem:[%s5383_s13 + $0x4] ss:$84 sps:$4 sm:$0xff]   ;;  %v4836_v34 = vld [vmem:[%s5383_s13 + $0x8] ss:$84 sps:$4 sm:$0xff]  }
  0x12   : > { %4158 = vmatprep.subr.bf16.mxu1 %v4814_v13  ;;  %v4838_v35 = vld [vmem:[%s5383_s13 + $0xc] ss:$84 sps:$4 sm:$0xff]   ;;  %2585 = vmatprep.mubr.bf16.mxu0 %v4835_v33  ;;  %v4845_v41 = vld [vmem:[%s5383_s13 + $0xb4] ss:$84 sps:$4 sm:$0xff]   ;;  %v4848_v43 = vld [vmem:[%s5383_s13 + $0xb0] ss:$84 sps:$4 sm:$0xff]  }
  0x13   : > { %2682 = vmatprep.mubr.bf16.mxu1 %v4838_v35  ;;  %v4843_v40 = vld [vmem:[%s5383_s13 + $0xac] ss:$84 sps:$4 sm:$0xff]   ;;  %v4847_v42 = vld [vmem:[%s5383_s13 + $0xa8] ss:$84 sps:$4 sm:$0xff]   ;;  %v4857_v50 = vld [vmem:[%s5383_s13 + $0x150] ss:$84 sps:$4 sm:$0xff]  }
  0x14   : > { %4095 = vmatpush3.bf16.msra.mxu0 %v4815_v14  ;;  %v4849_v44 = vld [vmem:[%s6239_s1 + $0x148] sm:$0xff]   ;;  %v4855_v49 = vld [vmem:[%s5383_s13 + $0x15c] ss:$84 sps:$4 sm:$0xff]   ;;  %v4865_v57 = vld [vmem:[%s5383_s13 + $0x204] ss:$84 sps:$4 sm:$0xff]  }
  0x15   : > { %4159 = vmatpush3.bf16.msra.mxu1 %v4816_v15  ;;  %4096 = vmatprep.subr.bf16.mxu0 %v4817_v16  ;;  %v4850_v45 = vld [vmem:[%s6239_s1 + $0x1c8] sm:$0xff]   ;;  %v4859_v52 = vld [vmem:[%s6239_s1 + $0x150] sm:$0xff]   ;;  %v4869_v60 = vld [vmem:[%s6239_s1 + $0x158] sm:$0xff]  }
  0x16   : > { %4160 = vmatprep.subr.bf16.mxu1 %v4818_v17  ;;  %v4851_v46 = vld [vmem:[%s6239_s1 + $0x108] sm:$0xff]   ;;  %v4860_v53 = vld [vmem:[%s6239_s1 + $0x1d0] sm:$0xff]   ;;  %v4870_v61 = vld [vmem:[%s6239_s1 + $0x1d8] sm:$0xff]  }
  0x17   : > { %v4852_v47 = vld [vmem:[%s6239_s1 + $0x188] sm:$0xff]   ;;  %v4861_v54 = vld [vmem:[%s6239_s1 + $0x110] sm:$0xff]   ;;  %v4871_v62 = vld [vmem:[%s6239_s1 + $0x118] sm:$0xff]  }
  0x18   : > { %4097 = vmatpush3.bf16.msra.mxu0 %v4819_v18  ;;  %v4853_v48 = vld [vmem:[%s5383_s13 + $0x154] ss:$84 sps:$4 sm:$0xff]   ;;  %v4858_v51 = vld [vmem:[%s5383_s13 + $0x158] ss:$84 sps:$4 sm:$0xff]   ;;  %v4863_v56 = vld [vmem:[%s5383_s13 + $0x1fc] ss:$84 sps:$4 sm:$0xff]  }
  0x19   : > { %4161 = vmatpush3.bf16.msra.mxu1 %v4820_v19  ;;  %4098 = vmatprep.subr.bf16.mxu0 %v4821_v20  ;;  %v4862_v55 = vld [vmem:[%s6239_s1 + $0x190] sm:$0xff]   ;;  %v4867_v58 = vld [vmem:[%s5383_s13 + $0x1f8] ss:$84 sps:$4 sm:$0xff]   ;;  %v4879_v3 = vld [vmem:[%s6239_s1 + $0x160] sm:$0xff]  }
  0x1a   : > { %4162 = vmatprep.subr.bf16.mxu1 %v4822_v21  ;;  %v4868_v59 = vld [vmem:[%s5383_s13 + $0x200] ss:$84 sps:$4 sm:$0xff]   ;;  %v4872_v63 = vld [vmem:[%s6239_s1 + $0x198] sm:$0xff]   ;;  %v4889_v10 = vld [vmem:[%s6239_s1 + $0x168] sm:$0xff]  }
  0x1b   : > { %v4873_v0 = vld [vmem:[%s5383_s13 + $0x2a4] ss:$84 sps:$4 sm:$0xff]   ;;  %v4875_v1 = vld [vmem:[%s5383_s13 + $0x2ac] ss:$84 sps:$4 sm:$0xff]   ;;  %v4878_v4 = vld [vmem:[%s5383_s13 + $0x2a8] ss:$84 sps:$4 sm:$0xff]  }
  0x1c   : > { %4099 = vmatpush3.bf16.msra.mxu0 %v4823_v22  ;;  %v4877_v2 = vld [vmem:[%s5383_s13 + $0x2a0] ss:$84 sps:$4 sm:$0xff]   ;;  %v4890_v11 = vld [vmem:[%s6239_s1 + $0x1e8] sm:$0xff]   ;;  %v4888_v15 = vld [vmem:[%s5383_s13 + $0x350] ss:$84 sps:$4 sm:$0xff]  }
  0x1d   : > { %4163 = vmatpush3.bf16.msra.mxu1 %v4824_v23  ;;  %4100 = vmatprep.subr.bf16.mxu0 %v4825_v24  ;;  %v4880_v5 = vld [vmem:[%s6239_s1 + $0x1e0] sm:$0xff]   ;;  %v4885_v9 = vld [vmem:[%s5383_s13 + $0x354] ss:$84 sps:$4 sm:$0xff]   ;;  %v4895_v17 = vld [vmem:[%s5383_s13 + $0x3fc] ss:$84 sps:$4 sm:$0xff]  }
  0x1e   : > { %4164 = vmatprep.subr.bf16.mxu1 %v4826_v25  ;;  %v4881_v6 = vld [vmem:[%s6239_s1 + $0x120] sm:$0xff]   ;;  %v4887_v12 = vld [vmem:[%s5383_s13 + $0x348] ss:$84 sps:$4 sm:$0xff]   ;;  %v4899_v18 = vld [vmem:[%s6239_s1 + $0x170] sm:$0xff]  }
  0x1f   : > { %v4882_v7 = vld [vmem:[%s6239_s1 + $0x1a0] sm:$0xff]   ;;  %v4891_v13 = vld [vmem:[%s6239_s1 + $0x128] sm:$0xff]   ;;  %v4900_v19 = vld [vmem:[%s6239_s1 + $0x1f0] sm:$0xff]  }
  0x20   : > { %4101 = vmatpush3.bf16.msra.mxu0 %v4827_v26  ;;  %v4883_v8 = vld [vmem:[%s5383_s13 + $0x34c] ss:$84 sps:$4 sm:$0xff]   ;;  %v4893_v16 = vld [vmem:[%s5383_s13 + $0x3f4] ss:$84 sps:$4 sm:$0xff]   ;;  %v4897_v22 = vld [vmem:[%s5383_s13 + $0x3f0] ss:$84 sps:$4 sm:$0xff]  }
  0x21   : > { %4165 = vmatpush3.bf16.msra.mxu1 %v4828_v27  ;;  %4102 = vmatprep.subr.bf16.mxu0 %v4829_v28  ;;  %v4892_v14 = vld [vmem:[%s6239_s1 + $0x1a8] sm:$0xff]   ;;  %v4901_v20 = vld [vmem:[%s6239_s1 + $0x130] sm:$0xff]   ;;  %v4905_v25 = vld [vmem:[%s5383_s13 + $0x4a4] ss:$84 sps:$4 sm:$0xff]  }
  0x22   : > { %4166 = vmatprep.subr.bf16.mxu1 %v4830_v29  ;;  %v4902_v21 = vld [vmem:[%s6239_s1 + $0x1b0] sm:$0xff]   ;;  %v4898_v23 = vld [vmem:[%s5383_s13 + $0x3f8] ss:$84 sps:$4 sm:$0xff]   ;;  %v4919_v33 = vld [vmem:[%s6239_s1 + $0x240] sm:$0xff]  }
  0x23   : > { %v4903_v24 = vld [vmem:[%s5383_s13 + $0x49c] ss:$84 sps:$4 sm:$0xff]  }
  0x24   : > { %4103 = vmatpush3.bf16.msra.mxu0 %v4831_v30  ;;  %v4909_v26 = vld [vmem:[%s6239_s1 + $0x178] sm:$0xff]  }
  0x25   : > { %4167 = vmatpush3.bf16.msra.mxu1 %v4832_v31  ;;  %4216 = vmatprep.subr.bf16.mxu0 %v4839_v36  ;;  %v4910_v27 = vld [vmem:[%s6239_s1 + $0x1f8] sm:$0xff]   ;;  %v4908_v31 = vld [vmem:[%s5383_s13 + $0x4a0] ss:$84 sps:$4 sm:$0xff]   ;;  %v4913_v36 = vld [vmem:[%s5383_s13 + $0x10] ss:$84 sps:$4 sm:$0xff]  }
  0x26   : > { %4280 = vmatprep.subr.bf16.mxu1 %v4840_v37  ;;  %v4911_v28 = vld [vmem:[%s6239_s1 + $0x138] sm:$0xff]  }
  0x27   : > { %2586 = vmatmul.mubr.bf16.vlgmr.msra.gmra.mrb[0].mxu0 %v4833_v32  ;;  %v4912_v29 = vld [vmem:[%s6239_s1 + $0x1b8] sm:$0xff]   ;;  %v4915_v32 = vld [vmem:[%s5383_s13 + $0x14] ss:$84 sps:$4 sm:$0xff]  }
  0x28   : > { %2683 = vmatmul.mubr.bf16.vlgmr.msra.gmra.mrb[0].mxu1 %v4836_v34  ;;  %4217 = vmatpush3.bf16.msra.mxu0 %v4841_v38  ;;  %v4907_v30 = vld [vmem:[%s5383_s13 + $0x498] ss:$84 sps:$4 sm:$0xff]   ;;  %v4920_v34 = vld [vmem:[%s6239_s1 + $0x2c0] sm:$0xff]   ;;  %v4918_v35 = vld [vmem:[%s5383_s13 + $0x1c] ss:$84 sps:$4 sm:$0xff]  }
  0x29   : > { %4281 = vmatpush3.bf16.msra.mxu1 %v4842_v39  ;;  %2593 = vmatprep.mubr.bf16.mxu0 %v4843_v40  ;;  %v4916_v37 = vld [vmem:[%s5383_s13 + $0x18] ss:$84 sps:$4 sm:$0xff]   ;;  %v4921_v38 = vld [vmem:[%s6239_s1 + $0x200] sm:$0xff]   ;;  %v4923_v40 = vld [vmem:[%s5383_s13 + $0xbc] ss:$84 sps:$4 sm:$0xff]  }
  0x2a   : > { %2690 = vmatprep.mubr.bf16.mxu1 %v4845_v41  ;;  %4218 = vmatprep.subr.bf16.mxu0 %v4849_v44  ;;  %v4922_v39 = vld [vmem:[%s6239_s1 + $0x280] sm:$0xff]   ;;  %v4931_v44 = vld [vmem:[%s6239_s1 + $0x208] sm:$0xff]  }
  0x2b   : > { %4282 = vmatprep.subr.bf16.mxu1 %v4850_v45  ;;  %v4925_v41 = vld [vmem:[%s5383_s13 + $0xc4] ss:$84 sps:$4 sm:$0xff]   ;;  %v4932_v45 = vld [vmem:[%s6239_s1 + $0x288] sm:$0xff]  }
  0x2c   : > { %4219 = vmatpush3.bf16.msra.mxu0 %v4851_v46  ;;  %v4927_v46 = vld [vmem:[%s5383_s13 + $0xb8] ss:$84 sps:$4 sm:$0xff]  }
  0x2d   : > { %4283 = vmatpush3.bf16.msra.mxu1 %v4852_v47  ;;  %4220 = vmatprep.subr.bf16.mxu0 %v4859_v52  ;;  %v4939_v47 = vld [vmem:[%s6239_s1 + $0x250] sm:$0xff]  }
  0x2e   : > { %4284 = vmatprep.subr.bf16.mxu1 %v4860_v53  ;;  %v4941_v52 = vld [vmem:[%s6239_s1 + $0x210] sm:$0xff]  }
  0x2f   : > { %2594 = vmatmul.mubr.bf16.gmra.mrb[4].mxu0 %v4847_v42  ;;  %v4929_v42 = vld [vmem:[%s6239_s1 + $0x248] sm:$0xff]   ;;  %v4942_v53 = vld [vmem:[%s6239_s1 + $0x290] sm:$0xff]  }
  0x30   : > { %2691 = vmatmul.mubr.bf16.gmra.mrb[4].mxu1 %v4848_v43  ;;  %2601 = vmatprep.mubr.bf16.mxu0 %v4853_v48  ;;  %v4930_v43 = vld [vmem:[%s6239_s1 + $0x2c8] sm:$0xff]   ;;  %v4928_v48 = vld [vmem:[%s5383_s13 + $0xc0] ss:$84 sps:$4 sm:$0xff]  }
  0x31   : > { %2698 = vmatprep.mubr.bf16.mxu1 %v4855_v49  ;;  %4221 = vmatpush3.bf16.msra.mxu0 %v4861_v54  ;;  %v4940_v49 = vld [vmem:[%s6239_s1 + $0x2d0] sm:$0xff]   ;;  %v4949_v54 = vld [vmem:[%s6239_s1 + $0x258] sm:$0xff]  }
  0x32   : > { %4285 = vmatpush3.bf16.msra.mxu1 %v4862_v55  ;;  %4222 = vmatprep.subr.bf16.mxu0 %v4869_v60  ;;  %v4950_v55 = vld [vmem:[%s6239_s1 + $0x2d8] sm:$0xff]   ;;  %v4943_v60 = vld [vmem:[%s5383_s13 + $0x20c] ss:$84 sps:$4 sm:$0xff]  }
  0x33   : > { %4286 = vmatprep.subr.bf16.mxu1 %v4870_v61  ;;  %v4945_v61 = vld [vmem:[%s5383_s13 + $0x214] ss:$84 sps:$4 sm:$0xff]  }
  0x35   : > { %4223 = vmatpush3.bf16.msra.mxu0 %v4871_v62  ;;  %v4959_v62 = vld [vmem:[%s6239_s1 + $0x260] sm:$0xff]  }
  0x36   : > { %4287 = vmatpush3.bf16.msra.mxu1 %v4872_v63  ;;  %4224 = vmatprep.subr.bf16.mxu0 %v4879_v3  ;;  %v4960_v63 = vld [vmem:[%s6239_s1 + $0x2e0] sm:$0xff]  }
  0x37   : > { %2602 = vmatmul.mubr.bf16.gmra.mrb[8].mxu0 %v4857_v50  ;;  %4288 = vmatprep.subr.bf16.mxu1 %v4880_v5  ;;  %v4933_v50 = vld [vmem:[%s5383_s13 + $0x164] ss:$84 sps:$4 sm:$0xff]   ;;  %v4955_v5 = vld [vmem:[%s5383_s13 + $0x2bc] ss:$84 sps:$4 sm:$0xff]  }
  0x38   : > { %2699 = vmatmul.mubr.bf16.gmra.mrb[8].mxu1 %v4858_v51  ;;  %2609 = vmatprep.mubr.bf16.mxu0 %v4863_v56  ;;  %v4935_v51 = vld [vmem:[%s5383_s13 + $0x16c] ss:$84 sps:$4 sm:$0xff]   ;;  %v4948_v3 = vld [vmem:[%s5383_s13 + $0x210] ss:$84 sps:$4 sm:$0xff]  }
  0x39   : > { %2706 = vmatprep.mubr.bf16.mxu1 %v4865_v57  ;;  %4225 = vmatpush3.bf16.msra.mxu0 %v4881_v6  ;;  %v4937_v56 = vld [vmem:[%s5383_s13 + $0x160] ss:$84 sps:$4 sm:$0xff]   ;;  %v4951_v57 = vld [vmem:[%s6239_s1 + $0x218] sm:$0xff]   ;;  %v4969_v6 = vld [vmem:[%s6239_s1 + $0x268] sm:$0xff]  }
  0x3a   : > { %4289 = vmatpush3.bf16.msra.mxu1 %v4882_v7  ;;  %4226 = vmatprep.subr.bf16.mxu0 %v4889_v10  ;;  %v4970_v7 = vld [vmem:[%s6239_s1 + $0x2e8] sm:$0xff]   ;;  %v4957_v10 = vld [vmem:[%s5383_s13 + $0x2b0] ss:$84 sps:$4 sm:$0xff]  }
  0x3b   : > { %4290 = vmatprep.subr.bf16.mxu1 %v4890_v11  ;;  %v4958_v11 = vld [vmem:[%s5383_s13 + $0x2b8] ss:$84 sps:$4 sm:$0xff]  }
  0x3d   : > { %4227 = vmatpush3.bf16.msra.mxu0 %v4891_v13  ;;  %v4965_v13 = vld [vmem:[%s5383_s13 + $0x364] ss:$84 sps:$4 sm:$0xff]  }
  0x3e   : > { %4291 = vmatpush3.bf16.msra.mxu1 %v4892_v14  ;;  %4228 = vmatprep.subr.bf16.mxu0 %v4899_v18  ;;  %v4979_v14 = vld [vmem:[%s6239_s1 + $0x270] sm:$0xff]   ;;  %v4967_v18 = vld [vmem:[%s5383_s13 + $0x358] ss:$84 sps:$4 sm:$0xff]  }
  0x3f   : > { %2610 = vmatmul.mubr.bf16.gmra.mrb[12].mxu0 %v4867_v58  ;;  %4292 = vmatprep.subr.bf16.mxu1 %v4900_v19  ;;  %v4952_v58 = vld [vmem:[%s6239_s1 + $0x298] sm:$0xff]   ;;  %v4968_v19 = vld [vmem:[%s5383_s13 + $0x360] ss:$84 sps:$4 sm:$0xff]  }
  0x40   : > { %2707 = vmatmul.mubr.bf16.gmra.mrb[12].mxu1 %v4868_v59  ;;  %2617 = vmatprep.mubr.bf16.mxu0 %v4873_v0  ;;  %v4938_v59 = vld [vmem:[%s5383_s13 + $0x168] ss:$84 sps:$4 sm:$0xff]   ;;  %v4961_v0 = vld [vmem:[%s6239_s1 + $0x220] sm:$0xff]  }
  0x41   : > { %2714 = vmatprep.mubr.bf16.mxu1 %v4875_v1  ;;  %4229 = vmatpush3.bf16.msra.mxu0 %v4901_v20  ;;  %v4962_v1 = vld [vmem:[%s6239_s1 + $0x2a0] sm:$0xff]  }
  0x42   : > { %4293 = vmatpush3.bf16.msra.mxu1 %v4902_v21  ;;  %4230 = vmatprep.subr.bf16.mxu0 %v4909_v26  ;;  %v4973_v20 = vld [vmem:[%s5383_s13 + $0x404] ss:$84 sps:$4 sm:$0xff]   ;;  %v4977_v26 = vld [vmem:[%s5383_s13 + $0x400] ss:$84 sps:$4 sm:$0xff]  }
  0x43   : > { %4294 = vmatprep.subr.bf16.mxu1 %v4910_v27  ;;  %v4989_v21 = vld [vmem:[%s6239_s1 + $0x278] sm:$0xff]   ;;  %v4999_v27 = vld [vmem:[%s6239_s1 + $0x340] sm:$0xff]  }
  0x45   : > { %4231 = vmatpush3.bf16.msra.mxu0 %v4911_v28  ;;  %v5000_v28 = vld [vmem:[%s6239_s1 + $0x3c0] sm:$0xff]  }
  0x46   : > { %4295 = vmatpush3.bf16.msra.mxu1 %v4912_v29  ;;  %4344 = vmatprep.subr.bf16.mxu0 %v4919_v33  ;;  %v4978_v29 = vld [vmem:[%s5383_s13 + $0x408] ss:$84 sps:$4 sm:$0xff]   ;;  %v4988_v33 = vld [vmem:[%s5383_s13 + $0x4b0] ss:$84 sps:$4 sm:$0xff]  }
  0x47   : > { %2618 = vmatmul.mubr.bf16.gmra.mrb[16].mxu0 %v4877_v2  ;;  %4408 = vmatprep.subr.bf16.mxu1 %v4920_v34  ;;  %v4947_v2 = vld [vmem:[%s5383_s13 + $0x208] ss:$84 sps:$4 sm:$0xff]   ;;  %v4995_v34 = vld [vmem:[%s5383_s13 + $0x24] ss:$84 sps:$4 sm:$0xff]  }
  0x48   : > { %2715 = vmatmul.mubr.bf16.gmra.mrb[16].mxu1 %v4878_v4  ;;  %2625 = vmatprep.mubr.bf16.mxu0 %v4883_v8  ;;  %v4953_v4 = vld [vmem:[%s5383_s13 + $0x2b4] ss:$84 sps:$4 sm:$0xff]  }
  0x49   : > { %2722 = vmatprep.mubr.bf16.mxu1 %v4885_v9  ;;  %v4971_v8 = vld [vmem:[%s6239_s1 + $0x228] sm:$0xff]  }
  0x4a   : > { %v4972_v9 = vld [vmem:[%s6239_s1 + $0x2a8] sm:$0xff]  }
  0x4f   : > { %2626 = vmatmul.mubr.bf16.gmra.mrb[20].mxu0 %v4887_v12  ;;  %v4963_v12 = vld [vmem:[%s5383_s13 + $0x35c] ss:$84 sps:$4 sm:$0xff]  }
  0x50   : > { %2723 = vmatmul.mubr.bf16.gmra.mrb[20].mxu1 %v4888_v15  ;;  %2633 = vmatprep.mubr.bf16.mxu0 %v4893_v16  ;;  %v4980_v15 = vld [vmem:[%s6239_s1 + $0x2f0] sm:$0xff]  }
  0x51   : > { %2730 = vmatprep.mubr.bf16.mxu1 %v4895_v17  ;;  %v4981_v16 = vld [vmem:[%s6239_s1 + $0x230] sm:$0xff]  }
  0x52   : > { %v4982_v17 = vld [vmem:[%s6239_s1 + $0x2b0] sm:$0xff]  }
  0x57   : > { %2634 = vmatmul.mubr.bf16.gmra.mrb[24].mxu0 %v4897_v22  ;;  %v4975_v22 = vld [vmem:[%s5383_s13 + $0x40c] ss:$84 sps:$4 sm:$0xff]  }
  0x58   : > { %2731 = vmatmul.mubr.bf16.gmra.mrb[24].mxu1 %v4898_v23  ;;  %2641 = vmatprep.mubr.bf16.mxu0 %v4903_v24  ;;  %v4990_v23 = vld [vmem:[%s6239_s1 + $0x2f8] sm:$0xff]  }
  0x59   : > { %2738 = vmatprep.mubr.bf16.mxu1 %v4905_v25  ;;  %v4991_v24 = vld [vmem:[%s6239_s1 + $0x238] sm:$0xff]  }
  0x5a   : > { %v4992_v25 = vld [vmem:[%s6239_s1 + $0x2b8] sm:$0xff]  }
  0x5f   : > { %2642 = vmatmul.mubr.bf16.gmra.mrb[28].mxu0 %v4907_v30  ;;  %v4983_v30 = vld [vmem:[%s5383_s13 + $0x4ac] ss:$84 sps:$4 sm:$0xff]  }
  0x60   : > { %2739 = vmatmul.mubr.bf16.gmra.mrb[28].mxu1 %v4908_v31  ;;  %2779 = vmatprep.mubr.bf16.mxu0 %v4915_v32  ;;  %v4985_v31 = vld [vmem:[%s5383_s13 + $0x4b4] ss:$84 sps:$4 sm:$0xff]  }
  0x61   : > { %2876 = vmatprep.mubr.bf16.mxu1 %v4918_v35  ;;  %v4987_v32 = vld [vmem:[%s5383_s13 + $0x4a8] ss:$84 sps:$4 sm:$0xff]   ;;  %v4998_v35 = vld [vmem:[%s5383_s13 + $0x2c] ss:$84 sps:$4 sm:$0xff]  }
  0x67   : > { %2780 = vmatmul.mubr.bf16.vlgmr.msra.gmra.mrb[32].mxu0 %v4913_v36  ;;  %v4993_v36 = vld [vmem:[%s5383_s13 + $0x20] ss:$84 sps:$4 sm:$0xff]  }
  0x68   : > { %2877 = vmatmul.mubr.bf16.vlgmr.msra.gmra.mrb[32].mxu1 %v4916_v37  ;;  %4345 = vmatpush3.bf16.msra.mxu0 %v4921_v38  ;;  %v4996_v37 = vld [vmem:[%s5383_s13 + $0x28] ss:$84 sps:$4 sm:$0xff]   ;;  %v5001_v38 = vld [vmem:[%s6239_s1 + $0x300] sm:$0xff]  }
  0x69   : > { %4409 = vmatpush3.bf16.msra.mxu1 %v4922_v39  ;;  %2787 = vmatprep.mubr.bf16.mxu0 %v4923_v40  ;;  %v5002_v39 = vld [vmem:[%s6239_s1 + $0x380] sm:$0xff]  }
  0x6a   : > { %2884 = vmatprep.mubr.bf16.mxu1 %v4925_v41  ;;  %4346 = vmatprep.subr.bf16.mxu0 %v4929_v42  ;;  %v5003_v40 = vld [vmem:[%s5383_s13 + $0xcc] ss:$84 sps:$4 sm:$0xff]   ;;  %v5005_v41 = vld [vmem:[%s5383_s13 + $0xd4] ss:$84 sps:$4 sm:$0xff]  }
  0x6b   : > { %4410 = vmatprep.subr.bf16.mxu1 %v4930_v43  ;;  %v5009_v42 = vld [vmem:[%s6239_s1 + $0x348] sm:$0xff]  }
  0x6c   : > { %4347 = vmatpush3.bf16.msra.mxu0 %v4931_v44  ;;  %v5010_v43 = vld [vmem:[%s6239_s1 + $0x3c8] sm:$0xff]  }
  0x6d   : > { %4411 = vmatpush3.bf16.msra.mxu1 %v4932_v45  ;;  %4348 = vmatprep.subr.bf16.mxu0 %v4939_v47  ;;  %v5011_v44 = vld [vmem:[%s6239_s1 + $0x308] sm:$0xff]   ;;  %v5019_v47 = vld [vmem:[%s6239_s1 + $0x350] sm:$0xff]  }
  0x6e   : > { %4412 = vmatprep.subr.bf16.mxu1 %v4940_v49  ;;  %v5012_v45 = vld [vmem:[%s6239_s1 + $0x388] sm:$0xff]  }
  0x6f   : > { %2788 = vmatmul.mubr.bf16.gmra.mrb[36].mxu0 %v4927_v46  ;;  %v5007_v46 = vld [vmem:[%s5383_s13 + $0xc8] ss:$84 sps:$4 sm:$0xff]  }
  0x70   : > { %2885 = vmatmul.mubr.bf16.gmra.mrb[36].mxu1 %v4928_v48  ;;  %2795 = vmatprep.mubr.bf16.mxu0 %v4933_v50  ;;  %v5008_v48 = vld [vmem:[%s5383_s13 + $0xd0] ss:$84 sps:$4 sm:$0xff]   ;;  %v5013_v49 = vld [vmem:[%s5383_s13 + $0x174] ss:$84 sps:$4 sm:$0xff]  }
  0x71   : > { %2892 = vmatprep.mubr.bf16.mxu1 %v4935_v51  ;;  %4349 = vmatpush3.bf16.msra.mxu0 %v4941_v52  ;;  %v5020_v50 = vld [vmem:[%s6239_s1 + $0x3d0] sm:$0xff]  }
  0x72   : > { %4413 = vmatpush3.bf16.msra.mxu1 %v4942_v53  ;;  %4350 = vmatprep.subr.bf16.mxu0 %v4949_v54  ;;  %v5015_v51 = vld [vmem:[%s5383_s13 + $0x17c] ss:$84 sps:$4 sm:$0xff]  }
  0x73   : > { %4414 = vmatprep.subr.bf16.mxu1 %v4950_v55  ;;  %v5021_v52 = vld [vmem:[%s6239_s1 + $0x310] sm:$0xff]   ;;  %v5029_v54 = vld [vmem:[%s6239_s1 + $0x358] sm:$0xff]  }
  0x74   : > { %v5022_v53 = vld [vmem:[%s6239_s1 + $0x390] sm:$0xff]   ;;  %v5030_v55 = vld [vmem:[%s6239_s1 + $0x3d8] sm:$0xff]  }
  0x75   : > { %4351 = vmatpush3.bf16.msra.mxu0 %v4951_v57  ;;  %v5031_v57 = vld [vmem:[%s6239_s1 + $0x318] sm:$0xff]  }
  0x76   : > { %4415 = vmatpush3.bf16.msra.mxu1 %v4952_v58  ;;  %4352 = vmatprep.subr.bf16.mxu0 %v4959_v62  ;;  %v5032_v58 = vld [vmem:[%s6239_s1 + $0x398] sm:$0xff]  }
  0x77   : > { %2796 = vmatmul.mubr.bf16.gmra.mrb[40].mxu0 %v4937_v56  ;;  %4416 = vmatprep.subr.bf16.mxu1 %v4960_v63  ;;  %v5017_v56 = vld [vmem:[%s5383_s13 + $0x170] ss:$84 sps:$4 sm:$0xff]  }
  0x78   : > { %2893 = vmatmul.mubr.bf16.gmra.mrb[40].mxu1 %v4938_v59  ;;  %2803 = vmatprep.mubr.bf16.mxu0 %v4943_v60  ;;  %v5018_v59 = vld [vmem:[%s5383_s13 + $0x178] ss:$84 sps:$4 sm:$0xff]   ;;  %v5023_v60 = vld [vmem:[%s5383_s13 + $0x21c] ss:$84 sps:$4 sm:$0xff]   ;;  %v5040_v63 = vld [vmem:[%s6239_s1 + $0x3e0] sm:$0xff]  }
  0x79   : > { %2900 = vmatprep.mubr.bf16.mxu1 %v4945_v61  ;;  %4353 = vmatpush3.bf16.msra.mxu0 %v4961_v0  ;;  %v5039_v61 = vld [vmem:[%s6239_s1 + $0x360] sm:$0xff]  }
  0x7a   : > { %4417 = vmatpush3.bf16.msra.mxu1 %v4962_v1  ;;  %4354 = vmatprep.subr.bf16.mxu0 %v4969_v6  ;;  %v5025_v62 = vld [vmem:[%s5383_s13 + $0x224] ss:$84 sps:$4 sm:$0xff]   ;;  %v5052_v6 = vld [vmem:[%s6239_s1 + $0x3a8] sm:$0xff]  }
  0x7b   : > { %4418 = vmatprep.subr.bf16.mxu1 %v4970_v7  ;;  %v5041_v0 = vld [vmem:[%s6239_s1 + $0x320] sm:$0xff]  }
  0x7c   : > { %v5042_v1 = vld [vmem:[%s6239_s1 + $0x3a0] sm:$0xff]  }
  0x7d   : > { %4355 = vmatpush3.bf16.msra.mxu0 %v4971_v8  ;;  %v5028_v7 = vld [vmem:[%s5383_s13 + $0x220] ss:$84 sps:$4 sm:$0xff]   ;;  %v5033_v8 = vld [vmem:[%s5383_s13 + $0x2c4] ss:$84 sps:$4 sm:$0xff]  }
  0x7e   : > { %4419 = vmatpush3.bf16.msra.mxu1 %v4972_v9  ;;  %4356 = vmatprep.subr.bf16.mxu0 %v4979_v14  ;;  %v5059_v9 = vld [vmem:[%s6239_s1 + $0x370] sm:$0xff]   ;;  %v5069_v14 = vld [vmem:[%s6239_s1 + $0x378] sm:$0xff]  }
  0x7f   : > { %2804 = vmatmul.mubr.bf16.gmra.mrb[44].mxu0 %v4947_v2  ;;  %4420 = vmatprep.subr.bf16.mxu1 %v4980_v15  ;;  %v5049_v2 = vld [vmem:[%s6239_s1 + $0x368] sm:$0xff]   ;;  %v5070_v15 = vld [vmem:[%s6239_s1 + $0x3f8] sm:$0xff]  }
  0x80   : > { %2901 = vmatmul.mubr.bf16.gmra.mrb[44].mxu1 %v4948_v3  ;;  %2811 = vmatprep.mubr.bf16.mxu0 %v4953_v4  ;;  %v5050_v3 = vld [vmem:[%s6239_s1 + $0x3e8] sm:$0xff]  }
  0x81   : > { %2908 = vmatprep.mubr.bf16.mxu1 %v4955_v5  ;;  %4357 = vmatpush3.bf16.msra.mxu0 %v4981_v16  ;;  %v5051_v4 = vld [vmem:[%s6239_s1 + $0x328] sm:$0xff]   ;;  %v5037_v16 = vld [vmem:[%s5383_s13 + $0x2c0] ss:$84 sps:$4 sm:$0xff]  }
  0x82   : > { %4421 = vmatpush3.bf16.msra.mxu1 %v4982_v17  ;;  %4358 = vmatprep.subr.bf16.mxu0 %v4989_v21  ;;  %v5027_v5 = vld [vmem:[%s5383_s13 + $0x218] ss:$84 sps:$4 sm:$0xff]   ;;  %v5045_v21 = vld [vmem:[%s5383_s13 + $0x374] ss:$84 sps:$4 sm:$0xff]  }
  0x83   : > { %4422 = vmatprep.subr.bf16.mxu1 %v4990_v23  ;;  %v5071_v17 = vld [vmem:[%s6239_s1 + $0x338] sm:$0xff]   ;;  %v5080_v23 = vld [vmem:[%s6239_s1 + $0x4c0] sm:$0xff]  }
  0x85   : > { %4359 = vmatpush3.bf16.msra.mxu0 %v4991_v24  ;;  %v5047_v24 = vld [vmem:[%s5383_s13 + $0x368] ss:$84 sps:$4 sm:$0xff]  }
  0x86   : > { %4423 = vmatpush3.bf16.msra.mxu1 %v4992_v25  ;;  %4472 = vmatprep.subr.bf16.mxu0 %v4999_v27  ;;  %v5048_v25 = vld [vmem:[%s5383_s13 + $0x370] ss:$84 sps:$4 sm:$0xff]  }
  0x87   : > { %2812 = vmatmul.mubr.bf16.gmra.mrb[48].mxu0 %v4957_v10  ;;  %4536 = vmatprep.subr.bf16.mxu1 %v5000_v28  ;;  %v5060_v10 = vld [vmem:[%s6239_s1 + $0x3f0] sm:$0xff]  }
  0x88   : > { %2909 = vmatmul.mubr.bf16.gmra.mrb[48].mxu1 %v4958_v11  ;;  %2819 = vmatprep.mubr.bf16.mxu0 %v4963_v12  ;;  %v5035_v11 = vld [vmem:[%s5383_s13 + $0x2cc] ss:$84 sps:$4 sm:$0xff]   ;;  %v5061_v12 = vld [vmem:[%s6239_s1 + $0x330] sm:$0xff]  }
  0x89   : > { %2916 = vmatprep.mubr.bf16.mxu1 %v4965_v13  ;;  %v5062_v13 = vld [vmem:[%s6239_s1 + $0x3b0] sm:$0xff]  }
  0x8a   : > { %v5055_v27 = vld [vmem:[%s5383_s13 + $0x41c] ss:$84 sps:$4 sm:$0xff]  }
  0x8b   : > { %v5057_v28 = vld [vmem:[%s5383_s13 + $0x410] ss:$84 sps:$4 sm:$0xff]  }
  0x8f   : > { %2820 = vmatmul.mubr.bf16.gmra.mrb[52].mxu0 %v4967_v18  ;;  %v5072_v18 = vld [vmem:[%s6239_s1 + $0x3b8] sm:$0xff]  }
  0x90   : > { %2917 = vmatmul.mubr.bf16.gmra.mrb[52].mxu1 %v4968_v19  ;;  %2827 = vmatprep.mubr.bf16.mxu0 %v4973_v20  ;;  %v5038_v19 = vld [vmem:[%s5383_s13 + $0x2c8] ss:$84 sps:$4 sm:$0xff]   ;;  %v5043_v20 = vld [vmem:[%s5383_s13 + $0x36c] ss:$84 sps:$4 sm:$0xff]  }
  0x91   : > { %2924 = vmatprep.mubr.bf16.mxu1 %v4975_v22  ;;  %v5079_v22 = vld [vmem:[%s6239_s1 + $0x440] sm:$0xff]  }
  0x97   : > { %2828 = vmatmul.mubr.bf16.gmra.mrb[56].mxu0 %v4977_v26  ;;  %v5053_v26 = vld [vmem:[%s5383_s13 + $0x414] ss:$84 sps:$4 sm:$0xff]  }
  0x98   : > { %2925 = vmatmul.mubr.bf16.gmra.mrb[56].mxu1 %v4978_v29  ;;  %2835 = vmatprep.mubr.bf16.mxu0 %v4983_v30  ;;  %v5058_v29 = vld [vmem:[%s5383_s13 + $0x418] ss:$84 sps:$4 sm:$0xff]   ;;  %v5063_v30 = vld [vmem:[%s5383_s13 + $0x4bc] ss:$84 sps:$4 sm:$0xff]  }
  0x99   : > { %2932 = vmatprep.mubr.bf16.mxu1 %v4985_v31  ;;  %v5065_v31 = vld [vmem:[%s5383_s13 + $0x4c4] ss:$84 sps:$4 sm:$0xff]  }
  0x9f   : > { %2836 = vmatmul.mubr.bf16.gmra.mrb[60].mxu0 %v4987_v32  ;;  %v5067_v32 = vld [vmem:[%s5383_s13 + $0x4b8] ss:$84 sps:$4 sm:$0xff]  }
  0xa0   : > { %2933 = vmatmul.mubr.bf16.gmra.mrb[60].mxu1 %v4988_v33  ;;  %2973 = vmatprep.mubr.bf16.mxu0 %v4995_v34  ;;  %v5068_v33 = vld [vmem:[%s5383_s13 + $0x4c0] ss:$84 sps:$4 sm:$0xff]  }
  0xa1   : > { %3070 = vmatprep.mubr.bf16.mxu1 %v4998_v35  ;;  %v5075_v34 = vld [vmem:[%s5383_s13 + $0x34] ss:$84 sps:$4 sm:$0xff]   ;;  %v5078_v35 = vld [vmem:[%s5383_s13 + $0x3c] ss:$84 sps:$4 sm:$0xff]  }
  0xa7   : > { %2974 = vmatmul.mubr.bf16.vlgmr.msra.gmra.mrb[64].mxu0 %v4993_v36  ;;  %v5073_v36 = vld [vmem:[%s5383_s13 + $0x30] ss:$84 sps:$4 sm:$0xff]  }
  0xa8   : > { %3071 = vmatmul.mubr.bf16.vlgmr.msra.gmra.mrb[64].mxu1 %v4996_v37  ;;  %4473 = vmatpush3.bf16.msra.mxu0 %v5001_v38  ;;  %v5076_v37 = vld [vmem:[%s5383_s13 + $0x38] ss:$84 sps:$4 sm:$0xff]   ;;  %v5081_v38 = vld [vmem:[%s6239_s1 + $0x400] sm:$0xff]  }
  0xa9   : > { %4537 = vmatpush3.bf16.msra.mxu1 %v5002_v39  ;;  %2981 = vmatprep.mubr.bf16.mxu0 %v5003_v40  ;;  %v5082_v39 = vld [vmem:[%s6239_s1 + $0x480] sm:$0xff]   ;;  %v5083_v40 = vld [vmem:[%s5383_s13 + $0xdc] ss:$84 sps:$4 sm:$0xff]  }
  0xaa   : > { %3078 = vmatprep.mubr.bf16.mxu1 %v5005_v41  ;;  %4474 = vmatprep.subr.bf16.mxu0 %v5009_v42  ;;  %v5085_v41 = vld [vmem:[%s5383_s13 + $0xe4] ss:$84 sps:$4 sm:$0xff]   ;;  %v5089_v42 = vld [vmem:[%s6239_s1 + $0x448] sm:$0xff]  }
  0xab   : > { %4538 = vmatprep.subr.bf16.mxu1 %v5010_v43  ;;  %v5090_v43 = vld [vmem:[%s6239_s1 + $0x4c8] sm:$0xff]  }
  0xac   : > { %4475 = vmatpush3.bf16.msra.mxu0 %v5011_v44  ;;  %v5091_v44 = vld [vmem:[%s6239_s1 + $0x408] sm:$0xff]  }
  0xad   : > { %4539 = vmatpush3.bf16.msra.mxu1 %v5012_v45  ;;  %4476 = vmatprep.subr.bf16.mxu0 %v5019_v47  ;;  %v5092_v45 = vld [vmem:[%s6239_s1 + $0x488] sm:$0xff]   ;;  %v5099_v47 = vld [vmem:[%s6239_s1 + $0x450] sm:$0xff]  }
  0xae   : > { %4540 = vmatprep.subr.bf16.mxu1 %v5020_v50  ;;  %v5093_v50 = vld [vmem:[%s5383_s13 + $0x184] ss:$84 sps:$4 sm:$0xff]  }
  0xaf   : > { %2982 = vmatmul.mubr.bf16.gmra.mrb[68].mxu0 %v5007_v46  ;;  %v5087_v46 = vld [vmem:[%s5383_s13 + $0xd8] ss:$84 sps:$4 sm:$0xff]  }
  0xb0   : > { %3079 = vmatmul.mubr.bf16.gmra.mrb[68].mxu1 %v5008_v48  ;;  %2989 = vmatprep.mubr.bf16.mxu0 %v5013_v49  ;;  %v5100_v48 = vld [vmem:[%s6239_s1 + $0x4d0] sm:$0xff]  }
  0xb1   : > { %3086 = vmatprep.mubr.bf16.mxu1 %v5015_v51  ;;  %4477 = vmatpush3.bf16.msra.mxu0 %v5021_v52  ;;  %v5088_v49 = vld [vmem:[%s5383_s13 + $0xe0] ss:$84 sps:$4 sm:$0xff]  }
  0xb2   : > { %4541 = vmatpush3.bf16.msra.mxu1 %v5022_v53  ;;  %4478 = vmatprep.subr.bf16.mxu0 %v5029_v54  ;;  %v5095_v51 = vld [vmem:[%s5383_s13 + $0x18c] ss:$84 sps:$4 sm:$0xff]   ;;  %v5101_v52 = vld [vmem:[%s6239_s1 + $0x410] sm:$0xff]   ;;  %v5109_v54 = vld [vmem:[%s6239_s1 + $0x458] sm:$0xff]  }
  0xb3   : > { %4542 = vmatprep.subr.bf16.mxu1 %v5030_v55  ;;  %v5102_v53 = vld [vmem:[%s6239_s1 + $0x490] sm:$0xff]   ;;  %v5110_v55 = vld [vmem:[%s6239_s1 + $0x4d8] sm:$0xff]  }
  0xb5   : > { %4479 = vmatpush3.bf16.msra.mxu0 %v5031_v57  ;;  %v5097_v57 = vld [vmem:[%s5383_s13 + $0x180] ss:$84 sps:$4 sm:$0xff]  }
  0xb6   : > { %4543 = vmatpush3.bf16.msra.mxu1 %v5032_v58  ;;  %4480 = vmatprep.subr.bf16.mxu0 %v5039_v61  ;;  %v5112_v58 = vld [vmem:[%s6239_s1 + $0x498] sm:$0xff]   ;;  %v5119_v61 = vld [vmem:[%s6239_s1 + $0x460] sm:$0xff]  }
  0xb7   : > { %2990 = vmatmul.mubr.bf16.gmra.mrb[72].mxu0 %v5017_v56  ;;  %4544 = vmatprep.subr.bf16.mxu1 %v5040_v63  ;;  %v5111_v56 = vld [vmem:[%s6239_s1 + $0x418] sm:$0xff]   ;;  %v5105_v63 = vld [vmem:[%s5383_s13 + $0x234] ss:$84 sps:$4 sm:$0xff]  }
  0xb8   : > { %3087 = vmatmul.mubr.bf16.gmra.mrb[72].mxu1 %v5018_v59  ;;  %2997 = vmatprep.mubr.bf16.mxu0 %v5023_v60  ;;  %v5098_v59 = vld [vmem:[%s5383_s13 + $0x188] ss:$84 sps:$4 sm:$0xff]   ;;  %v5103_v60 = vld [vmem:[%s5383_s13 + $0x22c] ss:$84 sps:$4 sm:$0xff]  }
  0xb9   : > { %3094 = vmatprep.mubr.bf16.mxu1 %v5025_v62  ;;  %4481 = vmatpush3.bf16.msra.mxu0 %v5041_v0  ;;  %v5120_v62 = vld [vmem:[%s6239_s1 + $0x4e0] sm:$0xff]  }
  0xba   : > { %4545 = vmatpush3.bf16.msra.mxu1 %v5042_v1  ;;  %4482 = vmatprep.subr.bf16.mxu0 %v5049_v2  ;;  %v5121_v0 = vld [vmem:[%s6239_s1 + $0x420] sm:$0xff]   ;;  %v5129_v2 = vld [vmem:[%s6239_s1 + $0x468] sm:$0xff]  }
  0xbb   : > { %4546 = vmatprep.subr.bf16.mxu1 %v5050_v3  ;;  %v5122_v1 = vld [vmem:[%s6239_s1 + $0x4a0] sm:$0xff]   ;;  %v5130_v3 = vld [vmem:[%s6239_s1 + $0x4e8] sm:$0xff]  }
  0xbd   : > { %4483 = vmatpush3.bf16.msra.mxu0 %v5051_v4  ;;  %v5858_v4 = vld [vmem:[%s6240_s2] ss:$0 sm:$0xff] }
  0xbe   : > { %4547 = vmatpush3.bf16.msra.mxu1 %v5052_v6  ;;  %4484 = vmatprep.subr.bf16.mxu0 %v5059_v9  ;;  %v5131_v6 = vld [vmem:[%s6239_s1 + $0x428] sm:$0xff]   ;;  %v5108_v9 = vld [vmem:[%s5383_s13 + $0x230] ss:$84 sps:$4 sm:$0xff]  }
  0xbf   : > { %2998 = vmatmul.mubr.bf16.gmra.mrb[76].mxu0 %v5027_v5  ;;  %4548 = vmatprep.subr.bf16.mxu1 %v5060_v10  ;;  %v5107_v5 = vld [vmem:[%s5383_s13 + $0x228] ss:$84 sps:$4 sm:$0xff]  }
  0xc0   : > { %3095 = vmatmul.mubr.bf16.gmra.mrb[76].mxu1 %v5028_v7  ;;  %3005 = vmatprep.mubr.bf16.mxu0 %v5033_v8  ;;  %v5132_v7 = vld [vmem:[%s6239_s1 + $0x4a8] sm:$0xff]  }
  0xc1   : > { %3102 = vmatprep.mubr.bf16.mxu1 %v5035_v11  ;;  %4485 = vmatpush3.bf16.msra.mxu0 %v5061_v12  ;;  %v5113_v10 = vld [vmem:[%s5383_s13 + $0x2d4] ss:$84 sps:$4 sm:$0xff]  }
  0xc2   : > { %4549 = vmatpush3.bf16.msra.mxu1 %v5062_v13  ;;  %4486 = vmatprep.subr.bf16.mxu0 %v5069_v14  ;;  %v5139_v11 = vld [vmem:[%s6239_s1 + $0x470] sm:$0xff]  }
  0xc3   : > { %4550 = vmatprep.subr.bf16.mxu1 %v5070_v15  ;;  %v5115_v14 = vld [vmem:[%s5383_s13 + $0x2dc] ss:$84 sps:$4 sm:$0xff]  }
  0xc4   : > { %v5140_v15 = vld [vmem:[%s6239_s1 + $0x4f0] sm:$0xff]  }
  0xc5   : > { %4487 = vmatpush3.bf16.msra.mxu0 %v5071_v17 }
  0xc6   : > { %4551 = vmatpush3.bf16.msra.mxu1 %v5072_v18  ;;  %4600 = vmatprep.subr.bf16.mxu0 %v5079_v22  ;;  %v5141_v22 = vld [vmem:[%s6239_s1 + $0x430] sm:$0xff]  }
  0xc7   : > { %3006 = vmatmul.mubr.bf16.gmra.mrb[80].mxu0 %v5037_v16  ;;  %4664 = vmatprep.subr.bf16.mxu1 %v5080_v23 }
  0xc8   : > { %3103 = vmatmul.mubr.bf16.gmra.mrb[80].mxu1 %v5038_v19  ;;  %3013 = vmatprep.mubr.bf16.mxu0 %v5043_v20 }
  0xc9   : > { %3110 = vmatprep.mubr.bf16.mxu1 %v5045_v21 }
  0xcf   : > { %3014 = vmatmul.mubr.bf16.gmra.mrb[84].mxu0 %v5047_v24 }
  0xd0   : > { %3111 = vmatmul.mubr.bf16.gmra.mrb[84].mxu1 %v5048_v25  ;;  %3021 = vmatprep.mubr.bf16.mxu0 %v5053_v26  ;;  %v5142_v26 = vld [vmem:[%s6239_s1 + $0x4b0] sm:$0xff]  }
  0xd1   : > { %3118 = vmatprep.mubr.bf16.mxu1 %v5055_v27  ;;  %v5149_v27 = vld [vmem:[%s6239_s1 + $0x478] sm:$0xff]  }
  0xd7   : > { %3022 = vmatmul.mubr.bf16.gmra.mrb[88].mxu0 %v5057_v28 }
  0xd8   : > { %3119 = vmatmul.mubr.bf16.gmra.mrb[88].mxu1 %v5058_v29  ;;  %3029 = vmatprep.mubr.bf16.mxu0 %v5063_v30  ;;  %v5150_v29 = vld [vmem:[%s6239_s1 + $0x4f8] sm:$0xff]  }
  0xd9   : > { %3126 = vmatprep.mubr.bf16.mxu1 %v5065_v31 }
  0xdf   : > { %3030 = vmatmul.mubr.bf16.gmra.mrb[92].mxu0 %v5067_v32  ;;  %v5117_v32 = vld [vmem:[%s5383_s13 + $0x2d0] ss:$84 sps:$4 sm:$0xff]  }
  0xe0   : > { %3127 = vmatmul.mubr.bf16.gmra.mrb[92].mxu1 %v5068_v33  ;;  %3167 = vmatprep.mubr.bf16.mxu0 %v5075_v34  ;;  %v5151_v33 = vld [vmem:[%s6239_s1 + $0x438] sm:$0xff]  }
  0xe1   : > { %3264 = vmatprep.mubr.bf16.mxu1 %v5078_v35 }
  0xe7   : > { %3168 = vmatmul.mubr.bf16.vlgmr.msra.gmra.mrb[96].mxu0 %v5073_v36  ;;  %v5118_v36 = vld [vmem:[%s5383_s13 + $0x2d8] ss:$84 sps:$4 sm:$0xff]  }
  0xe8   : > { %3265 = vmatmul.mubr.bf16.vlgmr.msra.gmra.mrb[96].mxu1 %v5076_v37  ;;  %4601 = vmatpush3.bf16.msra.mxu0 %v5081_v38  ;;  %v5152_v37 = vld [vmem:[%s6239_s1 + $0x4b8] sm:$0xff]   ;;  %v5905_v38 = vld [vmem:[%s6239_s1 + $0x500] sm:$0xff]  }
  0xe9   : > { %4665 = vmatpush3.bf16.msra.mxu1 %v5082_v39  ;;  %3175 = vmatprep.mubr.bf16.mxu0 %v5083_v40 }
  0xea   : > { %3272 = vmatprep.mubr.bf16.mxu1 %v5085_v41  ;;  %4602 = vmatprep.subr.bf16.mxu0 %v5089_v42  ;;  %v5123_v41 = vld [vmem:[%s5383_s13 + $0x37c] ss:$84 sps:$4 sm:$0xff]  }
  0xeb   : > { %4666 = vmatprep.subr.bf16.mxu1 %v5090_v43 }
  0xec   : > { %4603 = vmatpush3.bf16.msra.mxu0 %v5091_v44 }
  0xed   : > { %4667 = vmatpush3.bf16.msra.mxu1 %v5092_v45  ;;  %4604 = vmatprep.subr.bf16.mxu0 %v5099_v47 }
  0xee   : > { %4668 = vmatprep.subr.bf16.mxu1 %v5100_v48  ;;  %v5125_v48 = vld [vmem:[%s5383_s13 + $0x384] ss:$84 sps:$4 sm:$0xff]  }
  0xef   : > { %3176 = vmatmul.mubr.bf16.gmra.mrb[100].mxu0 %v5087_v46 }
  0xf0   : > { %3273 = vmatmul.mubr.bf16.gmra.mrb[100].mxu1 %v5088_v49  ;;  %3183 = vmatprep.mubr.bf16.mxu0 %v5093_v50 }
  0xf1   : > { %3280 = vmatprep.mubr.bf16.mxu1 %v5095_v51  ;;  %4605 = vmatpush3.bf16.msra.mxu0 %v5101_v52 }
  0xf2   : > { %4669 = vmatpush3.bf16.msra.mxu1 %v5102_v53  ;;  %4606 = vmatprep.subr.bf16.mxu0 %v5109_v54 }
  0xf3   : > { %4670 = vmatprep.subr.bf16.mxu1 %v5110_v55 }
  0xf5   : > { %4607 = vmatpush3.bf16.msra.mxu0 %v5111_v56 }
  0xf6   : > { %4671 = vmatpush3.bf16.msra.mxu1 %v5112_v58  ;;  %4608 = vmatprep.subr.bf16.mxu0 %v5119_v61  ;;  %v5128_v58 = vld [vmem:[%s5383_s13 + $0x380] ss:$84 sps:$4 sm:$0xff]  }
  0xf7   : > { %3184 = vmatmul.mubr.bf16.gmra.mrb[104].mxu0 %v5097_v57  ;;  %4672 = vmatprep.subr.bf16.mxu1 %v5120_v62  ;;  %v5127_v57 = vld [vmem:[%s5383_s13 + $0x378] ss:$84 sps:$4 sm:$0xff]  }
  0xf8   : > { %3281 = vmatmul.mubr.bf16.gmra.mrb[104].mxu1 %v5098_v59  ;;  %3191 = vmatprep.mubr.bf16.mxu0 %v5103_v60 }
  0xf9   : > { %3288 = vmatprep.mubr.bf16.mxu1 %v5105_v63  ;;  %4609 = vmatpush3.bf16.msra.mxu0 %v5121_v0  ;;  %v5133_v0 = vld [vmem:[%s5383_s13 + $0x424] ss:$84 sps:$4 sm:$0xff]  }
  0xfa   : > { %v4104_v8 = vpop.f32.mrb[0].mxu0  ;;  %4673 = vmatpush3.bf16.msra.mxu1 %v5122_v1  ;;  %4610 = vmatprep.subr.bf16.mxu0 %v5129_v2 }
  0xfb   : > { %v4168_v12 = vpop.f32.mrb[0].mxu1  ;;  %v4105_v13 = vpop.f32.mrb[1].mxu0  ;;  %4674 = vmatprep.subr.bf16.mxu1 %v5130_v3 }
  0xfc   : > { %v4106_v16 = vadd.f32 %v4105_v13, %v4104_v8  ;;  %v4169_v17 = vpop.f32.mrb[1].mxu1  ;;  %v4107_v18 = vpop.f32.mrb[2].mxu0 }
  0xfd   : > { %v4170_v19 = vadd.f32 %v4169_v17, %v4168_v12  ;;  %v4171_v20 = vpop.f32.mrb[2].mxu1  ;;  %v4108_v21 = vpop.f32.mrb[3].mxu0  ;;  %4611 = vmatpush3.bf16.msra.mxu0 %v5131_v6  ;;  %v5137_v12 = vld [vmem:[%s5383_s13 + $0x420] ss:$84 sps:$4 sm:$0xff]  }
  0xfe   : > { %v2588_v23 = vadd.f32 %v4106_v16, %v5858_v4  ;;  %v4109_v24 = vadd.f32 %v4108_v21, %v4107_v18  ;;  %v4172_v25 = vpop.f32.mrb[3].mxu1  ;;  %4675 = vmatpush3.bf16.msra.mxu1 %v5132_v7  ;;  %4612 = vmatprep.subr.bf16.mxu0 %v5139_v11  ;;  %v5143_v21 = vld [vmem:[%s5383_s13 + $0x4cc] ss:$84 sps:$4 sm:$0xff]  }
  0xff   : > { %v4173_v28 = vadd.f32 %v4172_v25, %v4171_v20  ;;  %3192 = vmatmul.mubr.bf16.gmra.mrb[108].mxu0 %v5107_v5  ;;  %4676 = vmatprep.subr.bf16.mxu1 %v5140_v15  ;;  %v5135_v5 = vld [vmem:[%s5383_s13 + $0x42c] ss:$84 sps:$4 sm:$0xff]   ;;  %v5138_v15 = vld [vmem:[%s5383_s13 + $0x428] ss:$84 sps:$4 sm:$0xff]  }
 0x100   : > { %v5889_v30 = vadd.f32 %v4170_v19, %v2588_v23  ;;  %v2591_v31 = vadd.f32 %v4109_v24, %v5858_v4  ;;  %3289 = vmatmul.mubr.bf16.gmra.mrb[108].mxu1 %v5108_v9  ;;  %3199 = vmatprep.mubr.bf16.mxu0 %v5113_v10  ;;  %v5145_v25 = vld [vmem:[%s5383_s13 + $0x4d4] ss:$84 sps:$4 sm:$0xff]  }
 0x101   : > { %3296 = vmatprep.mubr.bf16.mxu1 %v5115_v14  ;;  %4613 = vmatpush3.bf16.msra.mxu0 %v5141_v22 }
 0x102   : > { %v5896_v34 = vadd.f32 %v4173_v28, %v2591_v31  ;;  %v4110_v35 = vpop.f32.mrb[4].mxu0  ;;  %4677 = vmatpush3.bf16.msra.mxu1 %v5142_v26  ;;  %4614 = vmatprep.subr.bf16.mxu0 %v5149_v27 }
 0x103   : > { %v4174_v39 = vpop.f32.mrb[4].mxu1  ;;  %v4111_v40 = vpop.f32.mrb[5].mxu0  ;;  %4678 = vmatprep.subr.bf16.mxu1 %v5150_v29 }
 0x104   : > { %v4112_v42 = vadd.f32 %v4111_v40, %v4110_v35  ;;  %v4175_v43 = vpop.f32.mrb[5].mxu1  ;;  %v4113_v44 = vpop.f32.mrb[6].mxu0 }
 0x105   : > { %v4176_v45 = vadd.f32 %v4175_v43, %v4174_v39  ;;  %v4177_v46 = vpop.f32.mrb[6].mxu1  ;;  %v4114_v47 = vpop.f32.mrb[7].mxu0  ;;  %4615 = vmatpush3.bf16.msra.mxu0 %v5151_v33  ;;  %v5147_v33 = vld [vmem:[%s5383_s13 + $0x4c8] ss:$84 sps:$4 sm:$0xff]  }
 0x106   : > { %v2596_v49 = vadd.f32 %v4112_v42, %v5858_v4  ;;  %v4115_v50 = vadd.f32 %v4114_v47, %v4113_v44  ;;  %v4178_v51 = vpop.f32.mrb[7].mxu1  ;;  %4679 = vmatpush3.bf16.msra.mxu1 %v5152_v37  ;;  %4744 = vmatprep.subr.bf16.mxu0 %v5905_v38  ;;  %v5148_v37 = vld [vmem:[%s5383_s13 + $0x4d0] ss:$84 sps:$4 sm:$0xff]  }
 0x107   : > { %v4179_v52 = vadd.f32 %v4178_v51, %v4177_v46  ;;  %3200 = vmatmul.mubr.bf16.gmra.mrb[112].mxu0 %v5117_v32  ;;  %4776 = vmatprep.subr.bf16.mxu1 %v5905_v38 }
 0x108   : > { %v5912_v53 = vadd.f32 %v4176_v45, %v2596_v49  ;;  %v2599_v54 = vadd.f32 %v4115_v50, %v5858_v4  ;;  %3297 = vmatmul.mubr.bf16.gmra.mrb[112].mxu1 %v5118_v36  ;;  %3207 = vmatprep.mubr.bf16.mxu0 %v5123_v41  ;;  %v5155_v41 = vld [vmem:[%s5383_s13 + $0x44] ss:$84 sps:$4 sm:$0xff]  }
 0x109   : > { %3304 = vmatprep.mubr.bf16.mxu1 %v5125_v48  ;;  %v5158_v48 = vld [vmem:[%s5383_s13 + $0x4c] ss:$84 sps:$4 sm:$0xff]  }
 0x10a   : > { %v5915_v55 = vadd.f32 %v4179_v52, %v2599_v54  ;;  %v4116_v56 = vpop.f32.mrb[8].mxu0 }
 0x10b   : > { %v4180_v59 = vpop.f32.mrb[8].mxu1  ;;  %v4117_v60 = vpop.f32.mrb[9].mxu0 }
 0x10c   : > { %v4118_v61 = vadd.f32 %v4117_v60, %v4116_v56  ;;  %v4181_v62 = vpop.f32.mrb[9].mxu1  ;;  %v4119_v63 = vpop.f32.mrb[10].mxu0 }
 0x10d   : > { %v4182_v1 = vadd.f32 %v4181_v62, %v4180_v59  ;;  %v4183_v2 = vpop.f32.mrb[10].mxu1  ;;  %v4120_v3 = vpop.f32.mrb[11].mxu0 }
 0x10e   : > { %v2604_v6 = vadd.f32 %v4118_v61, %v5858_v4  ;;  %v4121_v7 = vadd.f32 %v4120_v3, %v4119_v63  ;;  %v4184_v8 = vpop.f32.mrb[11].mxu1  ;;  %v5153_v61 = vld [vmem:[%s5383_s13 + $0x40] ss:$84 sps:$4 sm:$0xff]  }
 0x10f   : > { %v4185_v9 = vadd.f32 %v4184_v8, %v4183_v2  ;;  %3208 = vmatmul.mubr.bf16.gmra.mrb[116].mxu0 %v5127_v57 }
 0x110   : > { %v5922_v10 = vadd.f32 %v4182_v1, %v2604_v6  ;;  %v2607_v11 = vadd.f32 %v4121_v7, %v5858_v4  ;;  %3305 = vmatmul.mubr.bf16.gmra.mrb[116].mxu1 %v5128_v58  ;;  %3215 = vmatprep.mubr.bf16.mxu0 %v5133_v0  ;;  %v5156_v1 = vld [vmem:[%s5383_s13 + $0x48] ss:$84 sps:$4 sm:$0xff]   ;;  %v5160_v6 = vld [vmem:[%s5383_s13 + $0xec] ss:$84 sps:$4 sm:$0xff]  }
 0x111   : > { %3312 = vmatprep.mubr.bf16.mxu1 %v5135_v5 }
 0x112   : > { %v5926_v13 = vadd.f32 %v4185_v9, %v2607_v11  ;;  %v4122_v14 = vpop.f32.mrb[12].mxu0  ;;  %v5162_v11 = vld [vmem:[%s5383_s13 + $0xf4] ss:$84 sps:$4 sm:$0xff]  }
 0x113   : > { %v4186_v16 = vpop.f32.mrb[12].mxu1  ;;  %v4123_v17 = vpop.f32.mrb[13].mxu0 }
 0x114   : > { %v4124_v18 = vadd.f32 %v4123_v17, %v4122_v14  ;;  %v4187_v19 = vpop.f32.mrb[13].mxu1  ;;  %v4125_v20 = vpop.f32.mrb[14].mxu0  ;;  %v5173_v17 = vld [vmem:[%s6239_s1 + $0x510] sm:$0xff]  }
 0x115   : > { %v4188_v22 = vadd.f32 %v4187_v19, %v4186_v16  ;;  %v4189_v23 = vpop.f32.mrb[14].mxu1  ;;  %v4126_v24 = vpop.f32.mrb[15].mxu0 }
 0x116   : > { %v2612_v26 = vadd.f32 %v4124_v18, %v5858_v4  ;;  %v4127_v27 = vadd.f32 %v4126_v24, %v4125_v20  ;;  %v4190_v28 = vpop.f32.mrb[15].mxu1 }
 0x117   : > { %v4191_v29 = vadd.f32 %v4190_v28, %v4189_v23  ;;  %3216 = vmatmul.mubr.bf16.gmra.mrb[120].mxu0 %v5137_v12  ;;  %v5166_v12 = vld [vmem:[%s6239_s1 + $0x508] sm:$0xff]  }
 0x118   : > { %v5932_v31 = vadd.f32 %v4188_v22, %v2612_v26  ;;  %v2615_v32 = vadd.f32 %v4127_v27, %v5858_v4  ;;  %3313 = vmatmul.mubr.bf16.gmra.mrb[120].mxu1 %v5138_v15  ;;  %3223 = vmatprep.mubr.bf16.mxu0 %v5143_v21  ;;  %v5164_v22 = vld [vmem:[%s5383_s13 + $0xe8] ss:$84 sps:$4 sm:$0xff]  }
 0x119   : > { %3320 = vmatprep.mubr.bf16.mxu1 %v5145_v25  ;;  %v5167_v26 = vld [vmem:[%s5383_s13 + $0x194] ss:$84 sps:$4 sm:$0xff]  }
 0x11a   : > { %v5936_v35 = vadd.f32 %v4191_v29, %v2615_v32  ;;  %v4128_v36 = vpop.f32.mrb[16].mxu0  ;;  %v5169_v32 = vld [vmem:[%s5383_s13 + $0x19c] ss:$84 sps:$4 sm:$0xff]  }
 0x11b   : > { %v4192_v39 = vpop.f32.mrb[16].mxu1  ;;  %v4129_v40 = vpop.f32.mrb[17].mxu0 }
 0x11c   : > { %v4130_v42 = vadd.f32 %v4129_v40, %v4128_v36  ;;  %v4193_v43 = vpop.f32.mrb[17].mxu1  ;;  %v4131_v44 = vpop.f32.mrb[18].mxu0 }
 0x11d   : > { %v4194_v45 = vadd.f32 %v4193_v43, %v4192_v39  ;;  %v4195_v46 = vpop.f32.mrb[18].mxu1  ;;  %v4132_v47 = vpop.f32.mrb[19].mxu0  ;;  %v5180_v39 = vld [vmem:[%s6239_s1 + $0x518] sm:$0xff]  }
 0x11e   : > { %v2620_v49 = vadd.f32 %v4130_v42, %v5858_v4  ;;  %v4133_v50 = vadd.f32 %v4132_v47, %v4131_v44  ;;  %v4196_v51 = vpop.f32.mrb[19].mxu1 }
 0x11f   : > { %v4197_v52 = vadd.f32 %v4196_v51, %v4195_v46  ;;  %3224 = vmatmul.mubr.bf16.gmra.mrb[124].mxu0 %v5147_v33 }
 0x120   : > { %v5942_v54 = vadd.f32 %v4194_v45, %v2620_v49  ;;  %v2623_v56 = vadd.f32 %v4133_v50, %v5858_v4  ;;  %3321 = vmatmul.mubr.bf16.gmra.mrb[124].mxu1 %v5148_v37  ;;  %3361 = vmatprep.mubr.bf16.mxu0 %v5155_v41  ;;  %v5187_v45 = vld [vmem:[%s6239_s1 + $0x520] sm:$0xff]  }
 0x121   : > { %3458 = vmatprep.mubr.bf16.mxu1 %v5158_v48  ;;  %v5171_v48 = vld [vmem:[%s5383_s13 + $0x190] ss:$84 sps:$4 sm:$0xff]  }
 0x122   : > { %v5945_v57 = vadd.f32 %v4197_v52, %v2623_v56  ;;  %v4134_v58 = vpop.f32.mrb[20].mxu0  ;;  %v5172_v52 = vld [vmem:[%s5383_s13 + $0x198] ss:$84 sps:$4 sm:$0xff]   ;;  %v5174_v56 = vld [vmem:[%s5383_s13 + $0x23c] ss:$84 sps:$4 sm:$0xff]  }
 0x123   : > { %v4198_v59 = vpop.f32.mrb[20].mxu1  ;;  %v4135_v60 = vpop.f32.mrb[21].mxu0 }
 0x124   : > { %v4136_v62 = vadd.f32 %v4135_v60, %v4134_v58  ;;  %v4199_v63 = vpop.f32.mrb[21].mxu1  ;;  %v4137_v0 = vpop.f32.mrb[22].mxu0 }
 0x125   : > { %v4200_v2 = vadd.f32 %v4199_v63, %v4198_v59  ;;  %v4201_v3 = vpop.f32.mrb[22].mxu1  ;;  %v4138_v5 = vpop.f32.mrb[23].mxu0 }
 0x126   : > { %v2628_v7 = vadd.f32 %v4136_v62, %v5858_v4  ;;  %v4139_v8 = vadd.f32 %v4138_v5, %v4137_v0  ;;  %v4202_v9 = vpop.f32.mrb[23].mxu1 }
 0x127   : > { %v4203_v14 = vadd.f32 %v4202_v9, %v4201_v3  ;;  %3362 = vmatmul.mubr.bf16.vlgmr.msra.gmra.mrb[128].mxu0 %v5153_v61  ;;  %v5176_v61 = vld [vmem:[%s5383_s13 + $0x244] ss:$84 sps:$4 sm:$0xff]  }
 0x128   : > { %v5955_v15 = vadd.f32 %v4200_v2, %v2628_v7  ;;  %v2631_v16 = vadd.f32 %v4139_v8, %v5858_v4  ;;  %3459 = vmatmul.mubr.bf16.vlgmr.msra.gmra.mrb[128].mxu1 %v5156_v1  ;;  %4745 = vmatpush3.bf16.msra.mxu0 %v5905_v38  ;;  %v5194_v1 = vld [vmem:[%s6239_s1 + $0x528] sm:$0xff]   ;;  %v5201_v8 = vld [vmem:[%s6239_s1 + $0x530] sm:$0xff]  }
 0x129   : > { %4784 = vmatpush3.bf16.msra.mxu1 %v5905_v38  ;;  %3369 = vmatprep.mubr.bf16.mxu0 %v5160_v6  ;;  %v5165_v38 = vld [vmem:[%s5383_s13 + $0xf0] ss:$84 sps:$4 sm:$0xff]  }
 0x12a   : > { %v5963_v18 = vadd.f32 %v4203_v14, %v2631_v16  ;;  %v4140_v19 = vpop.f32.mrb[24].mxu0  ;;  %3466 = vmatprep.mubr.bf16.mxu1 %v5162_v11  ;;  %4746 = vmatprep.subr.bf16.mxu0 %v5166_v12 }
 0x12b   : > { %v4204_v20 = vpop.f32.mrb[24].mxu1  ;;  %v4141_v21 = vpop.f32.mrb[25].mxu0  ;;  %4777 = vmatprep.subr.bf16.mxu1 %v5166_v12 }
 0x12c   : > { %v4142_v23 = vadd.f32 %v4141_v21, %v4140_v19  ;;  %v4205_v24 = vpop.f32.mrb[25].mxu1  ;;  %v4143_v25 = vpop.f32.mrb[26].mxu0  ;;  %4747 = vmatpush3.bf16.msra.mxu0 %v5166_v12  ;;  %v5181_v19 = vld [vmem:[%s5383_s13 + $0x2e4] ss:$84 sps:$4 sm:$0xff]  }
 0x12d   : > { %v4206_v27 = vadd.f32 %v4205_v24, %v4204_v20  ;;  %v4207_v28 = vpop.f32.mrb[26].mxu1  ;;  %v4144_v29 = vpop.f32.mrb[27].mxu0  ;;  %4785 = vmatpush3.bf16.msra.mxu1 %v5166_v12  ;;  %4748 = vmatprep.subr.bf16.mxu0 %v5173_v17  ;;  %v5178_v12 = vld [vmem:[%s5383_s13 + $0x238] ss:$84 sps:$4 sm:$0xff]  }
 0x12e   : > { %v2636_v33 = vadd.f32 %v4142_v23, %v5858_v4  ;;  %v4145_v36 = vadd.f32 %v4144_v29, %v4143_v25  ;;  %v4208_v37 = vpop.f32.mrb[27].mxu1  ;;  %4778 = vmatprep.subr.bf16.mxu1 %v5173_v17  ;;  %v5183_v23 = vld [vmem:[%s5383_s13 + $0x2ec] ss:$84 sps:$4 sm:$0xff]  }
 0x12f   : > { %v4209_v40 = vadd.f32 %v4208_v37, %v4207_v28  ;;  %3370 = vmatmul.mubr.bf16.gmra.mrb[132].mxu0 %v5164_v22  ;;  %v5185_v37 = vld [vmem:[%s5383_s13 + $0x2e0] ss:$84 sps:$4 sm:$0xff]  }
 0x130   : > { %v5973_v41 = vadd.f32 %v4206_v27, %v2636_v33  ;;  %v2639_v42 = vadd.f32 %v4145_v36, %v5858_v4  ;;  %3467 = vmatmul.mubr.bf16.gmra.mrb[132].mxu1 %v5165_v38  ;;  %3377 = vmatprep.mubr.bf16.mxu0 %v5167_v26  ;;  %v5208_v26 = vld [vmem:[%s6239_s1 + $0x538] sm:$0xff]  }
 0x131   : > { %3474 = vmatprep.mubr.bf16.mxu1 %v5169_v32  ;;  %4749 = vmatpush3.bf16.msra.mxu0 %v5173_v17 }
 0x132   : > { %v5976_v43 = vadd.f32 %v4209_v40, %v2639_v42  ;;  %v4146_v44 = vpop.f32.mrb[28].mxu0  ;;  %4786 = vmatpush3.bf16.msra.mxu1 %v5173_v17  ;;  %4750 = vmatprep.subr.bf16.mxu0 %v5180_v39  ;;  %v5179_v17 = vld [vmem:[%s5383_s13 + $0x240] ss:$84 sps:$4 sm:$0xff]  }
 0x133   : > { %v4210_v46 = vpop.f32.mrb[28].mxu1  ;;  %v4147_v47 = vpop.f32.mrb[29].mxu0  ;;  %4779 = vmatprep.subr.bf16.mxu1 %v5180_v39 }
 0x134   : > { %v4148_v49 = vadd.f32 %v4147_v47, %v4146_v44  ;;  %v4211_v50 = vpop.f32.mrb[29].mxu1  ;;  %v4149_v51 = vpop.f32.mrb[30].mxu0  ;;  %v5188_v44 = vld [vmem:[%s5383_s13 + $0x38c] ss:$84 sps:$4 sm:$0xff]  }
 0x135   : > { %v4212_v58 = vadd.f32 %v4211_v50, %v4210_v46  ;;  %v4213_v59 = vpop.f32.mrb[30].mxu1  ;;  %v4150_v60 = vpop.f32.mrb[31].mxu0  ;;  %4751 = vmatpush3.bf16.msra.mxu0 %v5180_v39 }
 0x136   : > { %v2644_v62 = vadd.f32 %v4148_v49, %v5858_v4  ;;  %v4151_v63 = vadd.f32 %v4150_v60, %v4149_v51  ;;  %v4214_v0 = vpop.f32.mrb[31].mxu1  ;;  %4787 = vmatpush3.bf16.msra.mxu1 %v5180_v39  ;;  %4752 = vmatprep.subr.bf16.mxu0 %v5187_v45 }
 0x137   : > { %v4215_v2 = vadd.f32 %v4214_v0, %v4213_v59  ;;  %3378 = vmatmul.mubr.bf16.gmra.mrb[136].mxu0 %v5171_v48  ;;  %4780 = vmatprep.subr.bf16.mxu1 %v5187_v45  ;;  %v5190_v48 = vld [vmem:[%s5383_s13 + $0x394] ss:$84 sps:$4 sm:$0xff]  }
 0x138   : > { %v5989_v3 = vadd.f32 %v4212_v58, %v2644_v62  ;;  %v2647_v5 = vadd.f32 %v4151_v63, %v5858_v4  ;;  %3475 = vmatmul.mubr.bf16.gmra.mrb[136].mxu1 %v5172_v52  ;;  %3385 = vmatprep.mubr.bf16.mxu0 %v5174_v56  ;;  %v5192_v62 = vld [vmem:[%s5383_s13 + $0x388] ss:$84 sps:$4 sm:$0xff]  }
 0x139   : > { %3482 = vmatprep.mubr.bf16.mxu1 %v5176_v61  ;;  %4753 = vmatpush3.bf16.msra.mxu0 %v5187_v45 }
 0x13a   : > { %v5992_v6 = vadd.f32 %v4215_v2, %v2647_v5  ;;  %v4232_v7 = vpop.f32.mrb[32].mxu0  ;;  %4788 = vmatpush3.bf16.msra.mxu1 %v5187_v45  ;;  %4754 = vmatprep.subr.bf16.mxu0 %v5194_v1  ;;  %v5193_v2 = vld [vmem:[%s5383_s13 + $0x390] ss:$84 sps:$4 sm:$0xff]   ;;  %v5195_v5 = vld [vmem:[%s5383_s13 + $0x434] ss:$84 sps:$4 sm:$0xff]  }
 0x13b   : > { %v4296_v9 = vpop.f32.mrb[32].mxu1  ;;  %v4233_v11 = vpop.f32.mrb[33].mxu0  ;;  %4781 = vmatprep.subr.bf16.mxu1 %v5194_v1 }
 0x13c   : > { %v4234_v4 = vadd.f32 %v4233_v11, %v4232_v7  ;;  %v4297_v14 = vpop.f32.mrb[33].mxu1  ;;  %v4235_v16 = vpop.f32.mrb[34].mxu0 }
 0x13d   : > { %v4298_v20 = vadd.f32 %v4297_v14, %v4296_v9  ;;  %v4299_v21 = vpop.f32.mrb[34].mxu1  ;;  %v4236_v22 = vpop.f32.mrb[35].mxu0  ;;  %4755 = vmatpush3.bf16.msra.mxu0 %v5194_v1 }
 0x13e   : > { %v2782_v24 = vadd.f32 %v4234_v4, %v5889_v30  ;;  %v4237_v25 = vadd.f32 %v4236_v22, %v4235_v16  ;;  %v4300_v38 = vpop.f32.mrb[35].mxu1  ;;  %4789 = vmatpush3.bf16.msra.mxu1 %v5194_v1  ;;  %4756 = vmatprep.subr.bf16.mxu0 %v5201_v8 }
 0x13f   : > { %v4301_v27 = vadd.f32 %v4300_v38, %v4299_v21  ;;  %3386 = vmatmul.mubr.bf16.gmra.mrb[140].mxu0 %v5178_v12  ;;  %4782 = vmatprep.subr.bf16.mxu1 %v5201_v8  ;;  %v5200_v38 = vld [vmem:[%s5383_s13 + $0x438] ss:$84 sps:$4 sm:$0xff]  }
 0x140   : > { %v6005_v28 = vadd.f32 %v4298_v20, %v2782_v24  ;;  %v2785_v29 = vadd.f32 %v4237_v25, %v5896_v34  ;;  %3483 = vmatmul.mubr.bf16.gmra.mrb[140].mxu1 %v5179_v17  ;;  %3393 = vmatprep.mubr.bf16.mxu0 %v5181_v19  ;;  %v5186_v34 = vld [vmem:[%s5383_s13 + $0x2e8] ss:$84 sps:$4 sm:$0xff]  }
 0x141   : > { %3490 = vmatprep.mubr.bf16.mxu1 %v5183_v23  ;;  %4757 = vmatpush3.bf16.msra.mxu0 %v5201_v8 }
 0x142   : > { %v6008_v30 = vadd.f32 %v4301_v27, %v2785_v29  ;;  %v4238_v32 = vpop.f32.mrb[36].mxu0  ;;  %4790 = vmatpush3.bf16.msra.mxu1 %v5201_v8  ;;  %4758 = vmatprep.subr.bf16.mxu0 %v5208_v26 }
 0x143   : > { %v4302_v33 = vpop.f32.mrb[36].mxu1  ;;  %v4239_v36 = vpop.f32.mrb[37].mxu0  ;;  %4783 = vmatprep.subr.bf16.mxu1 %v5208_v26 }
 0x144   : > { %v4240_v39 = vadd.f32 %v4239_v36, %v4238_v32  ;;  %v4303_v40 = vpop.f32.mrb[37].mxu1  ;;  %v4241_v42 = vpop.f32.mrb[38].mxu0 }
 0x145   : > { %v4304_v45 = vadd.f32 %v4303_v40, %v4302_v33  ;;  %v4305_v46 = vpop.f32.mrb[38].mxu1  ;;  %v4242_v47 = vpop.f32.mrb[39].mxu0  ;;  %4759 = vmatpush3.bf16.msra.mxu0 %v5208_v26 }
 0x146   : > { %v2790_v49 = vadd.f32 %v4240_v39, %v5912_v53  ;;  %v4243_v50 = vadd.f32 %v4242_v47, %v4241_v42  ;;  %v4306_v51 = vpop.f32.mrb[39].mxu1  ;;  %4791 = vmatpush3.bf16.msra.mxu1 %v5208_v26  ;;  %v5202_v26 = vld [vmem:[%s5383_s13 + $0x4dc] ss:$84 sps:$4 sm:$0xff]  }
 0x147   : > { %v4307_v52 = vadd.f32 %v4306_v51, %v4305_v46  ;;  %3394 = vmatmul.mubr.bf16.gmra.mrb[144].mxu0 %v5185_v37  ;;  %v5209_v51 = vld [vmem:[%s5383_s13 + $0x50] ss:$84 sps:$4 sm:$0xff]  }
 0x148   : > { %v6015_v56 = vadd.f32 %v4304_v45, %v2790_v49  ;;  %v2793_v58 = vadd.f32 %v4243_v50, %v5915_v55  ;;  %3491 = vmatmul.mubr.bf16.gmra.mrb[144].mxu1 %v5186_v34  ;;  %3401 = vmatprep.mubr.bf16.mxu0 %v5188_v44  ;;  %v5197_v55 = vld [vmem:[%s5383_s13 + $0x43c] ss:$84 sps:$4 sm:$0xff]   ;;  %v5207_v50 = vld [vmem:[%s5383_s13 + $0x4e0] ss:$84 sps:$4 sm:$0xff]  }
 0x149   : > { %3498 = vmatprep.mubr.bf16.mxu1 %v5190_v48 }
 0x14a   : > { %v6018_v59 = vadd.f32 %v4307_v52, %v2793_v58  ;;  %v4244_v60 = vpop.f32.mrb[40].mxu0 }
 0x14b   : > { %v4308_v61 = vpop.f32.mrb[40].mxu1  ;;  %v4245_v53 = vpop.f32.mrb[41].mxu0 }
 0x14c   : > { %v4246_v63 = vadd.f32 %v4245_v53, %v4244_v60  ;;  %v4309_v0 = vpop.f32.mrb[41].mxu1  ;;  %v4247_v1 = vpop.f32.mrb[42].mxu0 }
 0x14d   : > { %v4310_v7 = vadd.f32 %v4309_v0, %v4308_v61  ;;  %v4311_v8 = vpop.f32.mrb[42].mxu1  ;;  %v4248_v9 = vpop.f32.mrb[43].mxu0 }
 0x14e   : > { %v2798_v11 = vadd.f32 %v4246_v63, %v5922_v10  ;;  %v4249_v12 = vadd.f32 %v4248_v9, %v4247_v1  ;;  %v4312_v4 = vpop.f32.mrb[43].mxu1  ;;  %v5199_v10 = vld [vmem:[%s5383_s13 + $0x430] ss:$84 sps:$4 sm:$0xff]  }
 0x14f   : > { %v4313_v14 = vadd.f32 %v4312_v4, %v4311_v8  ;;  %3402 = vmatmul.mubr.bf16.gmra.mrb[148].mxu0 %v5192_v62  ;;  %v5213_v4 = vld [vmem:[%s5383_s13 + $0x1a0] ss:$84 sps:$4 sm:$0xff]  }
 0x150   : > { %v6025_v16 = vadd.f32 %v4310_v7, %v2798_v11  ;;  %v2801_v17 = vadd.f32 %v4249_v12, %v5926_v13  ;;  %3499 = vmatmul.mubr.bf16.gmra.mrb[148].mxu1 %v5193_v2  ;;  %3409 = vmatprep.mubr.bf16.mxu0 %v5195_v5  ;;  %v5204_v13 = vld [vmem:[%s5383_s13 + $0x4e4] ss:$84 sps:$4 sm:$0xff]  }
 0x151   : > { %3506 = vmatprep.mubr.bf16.mxu1 %v5197_v55  ;;  %v5212_v12 = vld [vmem:[%s5383_s13 + $0x398] ss:$84 sps:$4 sm:$0xff]  }
 0x152   : > { %v6028_v19 = vadd.f32 %v4313_v14, %v2801_v17  ;;  %v4250_v20 = vpop.f32.mrb[44].mxu0 }
 0x153   : > { %v4314_v21 = vpop.f32.mrb[44].mxu1  ;;  %v4251_v22 = vpop.f32.mrb[45].mxu0 }
 0x154   : > { %v4252_v23 = vadd.f32 %v4251_v22, %v4250_v20  ;;  %v4315_v24 = vpop.f32.mrb[45].mxu1  ;;  %v4253_v25 = vpop.f32.mrb[46].mxu0 }
 0x155   : > { %v4316_v27 = vadd.f32 %v4315_v24, %v4314_v21  ;;  %v4317_v29 = vpop.f32.mrb[46].mxu1  ;;  %v4254_v32 = vpop.f32.mrb[47].mxu0 }
 0x156   : > { %v2806_v33 = vadd.f32 %v4252_v23, %v5932_v31  ;;  %v4255_v36 = vadd.f32 %v4254_v32, %v4253_v25  ;;  %v4318_v37 = vpop.f32.mrb[47].mxu1  ;;  %v5206_v31 = vld [vmem:[%s5383_s13 + $0x4d8] ss:$84 sps:$4 sm:$0xff]   ;;  %v5215_v32 = vld [vmem:[%s5383_s13 + $0x248] ss:$84 sps:$4 sm:$0xff]  }
 0x157   : > { %v4319_v39 = vadd.f32 %v4318_v37, %v4317_v29  ;;  %3410 = vmatmul.mubr.bf16.gmra.mrb[152].mxu0 %v5199_v10 }
 0x158   : > { %v6035_v40 = vadd.f32 %v4316_v27, %v2806_v33  ;;  %v2809_v42 = vadd.f32 %v4255_v36, %v5936_v35  ;;  %3507 = vmatmul.mubr.bf16.gmra.mrb[152].mxu1 %v5200_v38  ;;  %3417 = vmatprep.mubr.bf16.mxu0 %v5202_v26  ;;  %v5210_v35 = vld [vmem:[%s5383_s13 + $0x2f0] ss:$84 sps:$4 sm:$0xff]   ;;  %v5216_v36 = vld [vmem:[%s5383_s13 + $0x4e8] ss:$84 sps:$4 sm:$0xff]  }
 0x159   : > { %3514 = vmatprep.mubr.bf16.mxu1 %v5204_v13 }
 0x15a   : > { %v6038_v34 = vadd.f32 %v4319_v39, %v2809_v42  ;;  %v4256_v44 = vpop.f32.mrb[48].mxu0 }
 0x15b   : > { %v4320_v45 = vpop.f32.mrb[48].mxu1  ;;  %v4257_v46 = vpop.f32.mrb[49].mxu0 }
 0x15c   : > { %v4258_v47 = vadd.f32 %v4257_v46, %v4256_v44  ;;  %v4321_v48 = vpop.f32.mrb[49].mxu1  ;;  %v4259_v49 = vpop.f32.mrb[50].mxu0 }
 0x15d   : > { %v4322_v52 = vadd.f32 %v4321_v48, %v4320_v45  ;;  %v4323_v58 = vpop.f32.mrb[50].mxu1  ;;  %v4260_v60 = vpop.f32.mrb[51].mxu0 }
 0x15e   : > { %v2814_v61 = vadd.f32 %v4258_v47, %v5942_v54  ;;  %v4261_v53 = vadd.f32 %v4260_v60, %v4259_v49  ;;  %v4324_v62 = vpop.f32.mrb[51].mxu1  ;;  %v5211_v54 = vld [vmem:[%s5383_s13 + $0xf8] ss:$84 sps:$4 sm:$0xff]  }
 0x15f   : > { %v4325_v63 = vadd.f32 %v4324_v62, %v4323_v58  ;;  %3418 = vmatmul.mubr.bf16.gmra.mrb[156].mxu0 %v5206_v31 }
 0x160   : > { %v6045_v0 = vadd.f32 %v4322_v52, %v2814_v61  ;;  %v2817_v1 = vadd.f32 %v4261_v53, %v5945_v57  ;;  %3515 = vmatmul.mubr.bf16.gmra.mrb[156].mxu1 %v5207_v50  ;;  %4760 = vmatprep.mubr.bf16.mxu0 %v5209_v51  ;;  %v5214_v57 = vld [vmem:[%s5383_s13 + $0x440] ss:$84 sps:$4 sm:$0xff]   ;;  %s3748_s13 = sshll.u32 %s6243_s19, 3 }
 0x161   : > { %4768 = vmatprep.mubr.bf16.mxu1 %v5210_v35  ;;  %s6217_s20 = scalar_lea.vmem %s6241_s3, %s3748_s13 }
 0x162   : > { %v6048_v2 = vadd.f32 %v4325_v63, %v2817_v1  ;;  %v4262_v5 = vpop.f32.mrb[52].mxu0 }
 0x163   : > { %v4326_v7 = vpop.f32.mrb[52].mxu1  ;;  %v4263_v8 = vpop.f32.mrb[53].mxu0 }
 0x164   : > { %v4264_v9 = vadd.f32 %v4263_v8, %v4262_v5  ;;  %v4327_v55 = vpop.f32.mrb[53].mxu1  ;;  %v4265_v11 = vpop.f32.mrb[54].mxu0 }
 0x165   : > { %v4328_v14 = vadd.f32 %v4327_v55, %v4326_v7  ;;  %v4329_v17 = vpop.f32.mrb[54].mxu1  ;;  %v4266_v20 = vpop.f32.mrb[55].mxu0 }
 0x166   : > { %v2822_v21 = vadd.f32 %v4264_v9, %v5955_v15  ;;  %v4267_v22 = vadd.f32 %v4266_v20, %v4265_v11  ;;  %v4330_v10 = vpop.f32.mrb[55].mxu1 }
 0x167   : > { %v4331_v23 = vadd.f32 %v4330_v10, %v4329_v17  ;;  %4761 = vmatmul.mubr.bf16.vlgmr.msra.gmra.mrb[160].mxu0 %v5211_v54 }
 0x168   : > { %v6055_v24 = vadd.f32 %v4328_v14, %v2822_v21  ;;  %v2825_v25 = vadd.f32 %v4267_v22, %v5963_v18  ;;  %4769 = vmatmul.mubr.bf16.vlgmr.msra.gmra.mrb[160].mxu1 %v5212_v12  ;;  %4764 = vmatprep.mubr.bf16.mxu0 %v5213_v4 }
 0x169   : > { %4772 = vmatprep.mubr.bf16.mxu1 %v5214_v57 }
 0x16a   : > { %v6058_v38 = vadd.f32 %v4331_v23, %v2825_v25  ;;  %v4268_v26 = vpop.f32.mrb[56].mxu0 }
 0x16b   : > { %v4332_v27 = vpop.f32.mrb[56].mxu1  ;;  %v4269_v29 = vpop.f32.mrb[57].mxu0 }
 0x16c   : > { %v4270_v13 = vadd.f32 %v4269_v29, %v4268_v26  ;;  %v4333_v15 = vpop.f32.mrb[57].mxu1  ;;  %v4271_v33 = vpop.f32.mrb[58].mxu0 }
 0x16d   : > { %v4334_v37 = vadd.f32 %v4333_v15, %v4332_v27  ;;  %v4335_v39 = vpop.f32.mrb[58].mxu1  ;;  %v4272_v42 = vpop.f32.mrb[59].mxu0 }
 0x16e   : > { %v2830_v44 = vadd.f32 %v4270_v13, %v5973_v41  ;;  %v4273_v45 = vadd.f32 %v4272_v42, %v4271_v33  ;;  %v4336_v18 = vpop.f32.mrb[59].mxu1 }
 0x16f   : > { %v4337_v46 = vadd.f32 %v4336_v18, %v4335_v39  ;;  %4765 = vmatmul.mubr.bf16.gmra.mrb[164].mxu0 %v5215_v32 }
 0x170   : > { %v6063_v31 = vadd.f32 %v4334_v37, %v2830_v44  ;;  %v2833_v47 = vadd.f32 %v4273_v45, %v5976_v43  ;;  %4773 = vmatmul.mubr.bf16.gmra.mrb[164].mxu1 %v5216_v36 }
 0x172   : > { %v6066_v48 = vadd.f32 %v4337_v46, %v2833_v47  ;;  %v4274_v49 = vpop.f32.mrb[60].mxu0 }
 0x173   : > { %v4338_v50 = vpop.f32.mrb[60].mxu1  ;;  %v4275_v51 = vpop.f32.mrb[61].mxu0 }
 0x174   : > { %v4276_v52 = vadd.f32 %v4275_v51, %v4274_v49  ;;  %v4339_v58 = vpop.f32.mrb[61].mxu1  ;;  %v4277_v60 = vpop.f32.mrb[62].mxu0 }
 0x175   : > { %v4340_v35 = vadd.f32 %v4339_v58, %v4338_v50  ;;  %v4341_v61 = vpop.f32.mrb[62].mxu1  ;;  %v4278_v41 = vpop.f32.mrb[63].mxu0 }
 0x176   : > { %v2838_v53 = vadd.f32 %v4276_v52, %v5989_v3  ;;  %v4279_v62 = vadd.f32 %v4278_v41, %v4277_v60  ;;  %v4342_v63 = vpop.f32.mrb[63].mxu1 }
 0x177   : > { %v4343_v1 = vadd.f32 %v4342_v63, %v4341_v61 }
 0x178   : > { %v6069_v5 = vadd.f32 %v4340_v35, %v2838_v53  ;;  %v2841_v43 = vadd.f32 %v4279_v62, %v5992_v6 }
 0x17a   : > { %v6072_v7 = vadd.f32 %v4343_v1, %v2841_v43  ;;  %v4360_v8 = vpop.f32.mrb[64].mxu0 }
 0x17b   : > { %v4424_v54 = vpop.f32.mrb[64].mxu1  ;;  %v4361_v9 = vpop.f32.mrb[65].mxu0 }
 0x17c   : > { %v4362_v55 = vadd.f32 %v4361_v9, %v4360_v8  ;;  %v4425_v11 = vpop.f32.mrb[65].mxu1  ;;  %v4363_v12 = vpop.f32.mrb[66].mxu0 }
 0x17d   : > { %v4426_v4 = vadd.f32 %v4425_v11, %v4424_v54  ;;  %v4427_v14 = vpop.f32.mrb[66].mxu1  ;;  %v4364_v17 = vpop.f32.mrb[67].mxu0 }
 0x17e   : > { %v2976_v3 = vadd.f32 %v4362_v55, %v6005_v28  ;;  %v4365_v20 = vadd.f32 %v4364_v17, %v4363_v12  ;;  %v4428_v57 = vpop.f32.mrb[67].mxu1 }
 0x17f   : > { %v4429_v21 = vadd.f32 %v4428_v57, %v4427_v14 }
 0x180   : > { %v6075_v22 = vadd.f32 %v4426_v4, %v2976_v3  ;;  %v2979_v6 = vadd.f32 %v4365_v20, %v6008_v30 }
 0x182   : > { %v6078_v10 = vadd.f32 %v4429_v21, %v2979_v6  ;;  %v4366_v23 = vpop.f32.mrb[68].mxu0 }
 0x183   : > { %v4430_v25 = vpop.f32.mrb[68].mxu1  ;;  %v4367_v26 = vpop.f32.mrb[69].mxu0 }
 0x184   : > { %v4368_v27 = vadd.f32 %v4367_v26, %v4366_v23  ;;  %v4431_v29 = vpop.f32.mrb[69].mxu1  ;;  %v4369_v32 = vpop.f32.mrb[70].mxu0 }
 0x185   : > { %v4432_v13 = vadd.f32 %v4431_v29, %v4430_v25  ;;  %v4433_v15 = vpop.f32.mrb[70].mxu1  ;;  %v4370_v33 = vpop.f32.mrb[71].mxu0 }
 0x186   : > { %v2984_v28 = vadd.f32 %v4368_v27, %v6015_v56  ;;  %v4371_v36 = vadd.f32 %v4370_v33, %v4369_v32  ;;  %v4434_v37 = vpop.f32.mrb[71].mxu1 }
 0x187   : > { %v4435_v39 = vadd.f32 %v4434_v37, %v4433_v15 }
 0x188   : > { %v6081_v42 = vadd.f32 %v4432_v13, %v2984_v28  ;;  %v2987_v30 = vadd.f32 %v4371_v36, %v6018_v59 }
 0x18a   : > { %v6084_v44 = vadd.f32 %v4435_v39, %v2987_v30  ;;  %v4372_v45 = vpop.f32.mrb[72].mxu0 }
 0x18b   : > { %v4436_v18 = vpop.f32.mrb[72].mxu1  ;;  %v4373_v46 = vpop.f32.mrb[73].mxu0 }
 0x18c   : > { %v4374_v47 = vadd.f32 %v4373_v46, %v4372_v45  ;;  %v4437_v49 = vpop.f32.mrb[73].mxu1  ;;  %v4375_v50 = vpop.f32.mrb[74].mxu0 }
 0x18d   : > { %v4438_v51 = vadd.f32 %v4437_v49, %v4436_v18  ;;  %v4439_v52 = vpop.f32.mrb[74].mxu1  ;;  %v4376_v58 = vpop.f32.mrb[75].mxu0 }
 0x18e   : > { %v2992_v56 = vadd.f32 %v4374_v47, %v6025_v16  ;;  %v4377_v60 = vadd.f32 %v4376_v58, %v4375_v50  ;;  %v4440_v35 = vpop.f32.mrb[75].mxu1 }
 0x18f   : > { %v4441_v61 = vadd.f32 %v4440_v35, %v4439_v52 }
 0x190   : > { %v6087_v41 = vadd.f32 %v4438_v51, %v2992_v56  ;;  %v2995_v59 = vadd.f32 %v4377_v60, %v6028_v19 }
 0x192   : > { %v6090_v53 = vadd.f32 %v4441_v61, %v2995_v59  ;;  %v4378_v62 = vpop.f32.mrb[76].mxu0 }
 0x193   : > { %v4442_v63 = vpop.f32.mrb[76].mxu1  ;;  %v4379_v1 = vpop.f32.mrb[77].mxu0 }
 0x194   : > { %v4380_v43 = vadd.f32 %v4379_v1, %v4378_v62  ;;  %v4443_v8 = vpop.f32.mrb[77].mxu1  ;;  %v4381_v54 = vpop.f32.mrb[78].mxu0 }
 0x195   : > { %v4444_v9 = vadd.f32 %v4443_v8, %v4442_v63  ;;  %v4445_v55 = vpop.f32.mrb[78].mxu1  ;;  %v4382_v11 = vpop.f32.mrb[79].mxu0 }
 0x196   : > { %v3000_v16 = vadd.f32 %v4380_v43, %v6035_v40  ;;  %v4383_v12 = vadd.f32 %v4382_v11, %v4381_v54  ;;  %v4446_v4 = vpop.f32.mrb[79].mxu1 }
 0x197   : > { %v4447_v14 = vadd.f32 %v4446_v4, %v4445_v55 }
 0x198   : > { %v6093_v17 = vadd.f32 %v4444_v9, %v3000_v16  ;;  %v3003_v19 = vadd.f32 %v4383_v12, %v6038_v34 }
 0x19a   : > { %v6096_v3 = vadd.f32 %v4447_v14, %v3003_v19  ;;  %v4384_v20 = vpop.f32.mrb[80].mxu0 }
 0x19b   : > { %v4448_v57 = vpop.f32.mrb[80].mxu1  ;;  %v4385_v21 = vpop.f32.mrb[81].mxu0 }
 0x19c   : > { %v4386_v6 = vadd.f32 %v4385_v21, %v4384_v20  ;;  %v4449_v23 = vpop.f32.mrb[81].mxu1  ;;  %v4387_v25 = vpop.f32.mrb[82].mxu0 }
 0x19d   : > { %v4450_v26 = vadd.f32 %v4449_v23, %v4448_v57  ;;  %v4451_v27 = vpop.f32.mrb[82].mxu1  ;;  %v4388_v29 = vpop.f32.mrb[83].mxu0 }
 0x19e   : > { %v3008_v40 = vadd.f32 %v4386_v6, %v6045_v0  ;;  %v4389_v32 = vadd.f32 %v4388_v29, %v4387_v25  ;;  %v4452_v13 = vpop.f32.mrb[83].mxu1 }
 0x19f   : > { %v4453_v15 = vadd.f32 %v4452_v13, %v4451_v27 }
 0x1a0   : > { %v6099_v33 = vadd.f32 %v4450_v26, %v3008_v40  ;;  %v3011_v34 = vadd.f32 %v4389_v32, %v6048_v2 }
 0x1a2   : > { %v6102_v28 = vadd.f32 %v4453_v15, %v3011_v34  ;;  %v4390_v36 = vpop.f32.mrb[84].mxu0 }
 0x1a3   : > { %v4454_v37 = vpop.f32.mrb[84].mxu1  ;;  %v4391_v39 = vpop.f32.mrb[85].mxu0 }
 0x1a4   : > { %v4392_v30 = vadd.f32 %v4391_v39, %v4390_v36  ;;  %v4455_v45 = vpop.f32.mrb[85].mxu1  ;;  %v4393_v18 = vpop.f32.mrb[86].mxu0 }
 0x1a5   : > { %v4456_v46 = vadd.f32 %v4455_v45, %v4454_v37  ;;  %v4457_v47 = vpop.f32.mrb[86].mxu1  ;;  %v4394_v49 = vpop.f32.mrb[87].mxu0 }
 0x1a6   : > { %v3016_v0 = vadd.f32 %v4392_v30, %v6055_v24  ;;  %v4395_v50 = vadd.f32 %v4394_v49, %v4393_v18  ;;  %v4458_v51 = vpop.f32.mrb[87].mxu1 }
 0x1a7   : > { %v4459_v52 = vadd.f32 %v4458_v51, %v4457_v47 }
 0x1a8   : > { %v6105_v58 = vadd.f32 %v4456_v46, %v3016_v0  ;;  %v3019_v2 = vadd.f32 %v4395_v50, %v6058_v38 }
 0x1aa   : > { %v6108_v56 = vadd.f32 %v4459_v52, %v3019_v2  ;;  %v4396_v60 = vpop.f32.mrb[88].mxu0 }
 0x1ab   : > { %v4460_v35 = vpop.f32.mrb[88].mxu1  ;;  %v4397_v61 = vpop.f32.mrb[89].mxu0 }
 0x1ac   : > { %v4398_v59 = vadd.f32 %v4397_v61, %v4396_v60  ;;  %v4461_v62 = vpop.f32.mrb[89].mxu1  ;;  %v4399_v63 = vpop.f32.mrb[90].mxu0 }
 0x1ad   : > { %v4462_v1 = vadd.f32 %v4461_v62, %v4460_v35  ;;  %v4463_v43 = vpop.f32.mrb[90].mxu1  ;;  %v4400_v8 = vpop.f32.mrb[91].mxu0 }
 0x1ae   : > { %v3024_v24 = vadd.f32 %v4398_v59, %v6063_v31  ;;  %v4401_v54 = vadd.f32 %v4400_v8, %v4399_v63  ;;  %v4464_v9 = vpop.f32.mrb[91].mxu1 }
 0x1af   : > { %v4465_v55 = vadd.f32 %v4464_v9, %v4463_v43 }
 0x1b0   : > { %v6111_v11 = vadd.f32 %v4462_v1, %v3024_v24  ;;  %v3027_v38 = vadd.f32 %v4401_v54, %v6066_v48 }
 0x1b2   : > { %v6114_v16 = vadd.f32 %v4465_v55, %v3027_v38  ;;  %v4402_v12 = vpop.f32.mrb[92].mxu0 }
 0x1b3   : > { %v4466_v4 = vpop.f32.mrb[92].mxu1  ;;  %v4403_v14 = vpop.f32.mrb[93].mxu0 }
 0x1b4   : > { %v4404_v19 = vadd.f32 %v4403_v14, %v4402_v12  ;;  %v4467_v20 = vpop.f32.mrb[93].mxu1  ;;  %v4405_v57 = vpop.f32.mrb[94].mxu0 }
 0x1b5   : > { %v4468_v21 = vadd.f32 %v4467_v20, %v4466_v4  ;;  %v4469_v6 = vpop.f32.mrb[94].mxu1  ;;  %v4406_v23 = vpop.f32.mrb[95].mxu0 }
 0x1b6   : > { %v3032_v31 = vadd.f32 %v4404_v19, %v6069_v5  ;;  %v4407_v25 = vadd.f32 %v4406_v23, %v4405_v57  ;;  %v4470_v26 = vpop.f32.mrb[95].mxu1 }
 0x1b7   : > { %v4471_v27 = vadd.f32 %v4470_v26, %v4469_v6 }
 0x1b8   : > { %v6117_v29 = vadd.f32 %v4468_v21, %v3032_v31  ;;  %v3035_v48 = vadd.f32 %v4407_v25, %v6072_v7 }
 0x1ba   : > { %v6120_v40 = vadd.f32 %v4471_v27, %v3035_v48  ;;  %v4488_v32 = vpop.f32.mrb[96].mxu0 }
 0x1bb   : > { %v4552_v13 = vpop.f32.mrb[96].mxu1  ;;  %v4489_v15 = vpop.f32.mrb[97].mxu0 }
 0x1bc   : > { %v4490_v34 = vadd.f32 %v4489_v15, %v4488_v32  ;;  %v4553_v36 = vpop.f32.mrb[97].mxu1  ;;  %v4491_v37 = vpop.f32.mrb[98].mxu0 }
 0x1bd   : > { %v4554_v39 = vadd.f32 %v4553_v36, %v4552_v13  ;;  %v4555_v30 = vpop.f32.mrb[98].mxu1  ;;  %v4492_v45 = vpop.f32.mrb[99].mxu0 }
 0x1be   : > { %v3170_v5 = vadd.f32 %v4490_v34, %v6075_v22  ;;  %v4493_v18 = vadd.f32 %v4492_v45, %v4491_v37  ;;  %v4556_v46 = vpop.f32.mrb[99].mxu1 }
 0x1bf   : > { %v4557_v47 = vadd.f32 %v4556_v46, %v4555_v30 }
 0x1c0   : > { %v6123_v49 = vadd.f32 %v4554_v39, %v3170_v5  ;;  %v3173_v7 = vadd.f32 %v4493_v18, %v6078_v10 }
 0x1c2   : > { %v6126_v0 = vadd.f32 %v4557_v47, %v3173_v7  ;;  %v4494_v50 = vpop.f32.mrb[100].mxu0 }
 0x1c3   : > { %v4558_v51 = vpop.f32.mrb[100].mxu1  ;;  %v4495_v52 = vpop.f32.mrb[101].mxu0 }
 0x1c4   : > { %v4496_v2 = vadd.f32 %v4495_v52, %v4494_v50  ;;  %v4559_v60 = vpop.f32.mrb[101].mxu1  ;;  %v4497_v35 = vpop.f32.mrb[102].mxu0 }
 0x1c5   : > { %v4560_v61 = vadd.f32 %v4559_v60, %v4558_v51  ;;  %v4561_v59 = vpop.f32.mrb[102].mxu1  ;;  %v4498_v62 = vpop.f32.mrb[103].mxu0 }
 0x1c6   : > { %v3178_v22 = vadd.f32 %v4496_v2, %v6081_v42  ;;  %v4499_v63 = vadd.f32 %v4498_v62, %v4497_v35  ;;  %v4562_v1 = vpop.f32.mrb[103].mxu1 }
 0x1c7   : > { %v4563_v43 = vadd.f32 %v4562_v1, %v4561_v59 }
 0x1c8   : > { %v6129_v8 = vadd.f32 %v4560_v61, %v3178_v22  ;;  %v3181_v10 = vadd.f32 %v4499_v63, %v6084_v44 }
 0x1ca   : > { %v6132_v24 = vadd.f32 %v4563_v43, %v3181_v10  ;;  %v4500_v54 = vpop.f32.mrb[104].mxu0 }
 0x1cb   : > { %v4564_v9 = vpop.f32.mrb[104].mxu1  ;;  %v4501_v55 = vpop.f32.mrb[105].mxu0 }
 0x1cc   : > { %v4502_v38 = vadd.f32 %v4501_v55, %v4500_v54  ;;  %v4565_v12 = vpop.f32.mrb[105].mxu1  ;;  %v4503_v4 = vpop.f32.mrb[106].mxu0 }
 0x1cd   : > { %v4566_v14 = vadd.f32 %v4565_v12, %v4564_v9  ;;  %v4567_v19 = vpop.f32.mrb[106].mxu1  ;;  %v4504_v20 = vpop.f32.mrb[107].mxu0 }
 0x1ce   : > { %v3186_v42 = vadd.f32 %v4502_v38, %v6087_v41  ;;  %v4505_v57 = vadd.f32 %v4504_v20, %v4503_v4  ;;  %v4568_v21 = vpop.f32.mrb[107].mxu1 }
 0x1cf   : > { %v4569_v6 = vadd.f32 %v4568_v21, %v4567_v19 }
 0x1d0   : > { %v6135_v23 = vadd.f32 %v4566_v14, %v3186_v42  ;;  %v3189_v44 = vadd.f32 %v4505_v57, %v6090_v53 }
 0x1d2   : > { %v6138_v31 = vadd.f32 %v4569_v6, %v3189_v44  ;;  %v4506_v25 = vpop.f32.mrb[108].mxu0 }
 0x1d3   : > { %v4570_v26 = vpop.f32.mrb[108].mxu1  ;;  %v4507_v27 = vpop.f32.mrb[109].mxu0 }
 0x1d4   : > { %v4508_v48 = vadd.f32 %v4507_v27, %v4506_v25  ;;  %v4571_v32 = vpop.f32.mrb[109].mxu1  ;;  %v4509_v13 = vpop.f32.mrb[110].mxu0 }
 0x1d5   : > { %v4572_v15 = vadd.f32 %v4571_v32, %v4570_v26  ;;  %v4573_v34 = vpop.f32.mrb[110].mxu1  ;;  %v4510_v36 = vpop.f32.mrb[111].mxu0 }
 0x1d6   : > { %v3194_v41 = vadd.f32 %v4508_v48, %v6093_v17  ;;  %v4511_v37 = vadd.f32 %v4510_v36, %v4509_v13  ;;  %v4574_v39 = vpop.f32.mrb[111].mxu1 }
 0x1d7   : > { %v4575_v30 = vadd.f32 %v4574_v39, %v4573_v34 }
 0x1d8   : > { %v6141_v45 = vadd.f32 %v4572_v15, %v3194_v41  ;;  %v3197_v53 = vadd.f32 %v4511_v37, %v6096_v3 }
 0x1da   : > { %v6144_v5 = vadd.f32 %v4575_v30, %v3197_v53  ;;  %v4512_v18 = vpop.f32.mrb[112].mxu0 }
 0x1db   : > { %v4576_v46 = vpop.f32.mrb[112].mxu1  ;;  %v4513_v47 = vpop.f32.mrb[113].mxu0 }
 0x1dc   : > { %v4514_v7 = vadd.f32 %v4513_v47, %v4512_v18  ;;  %v4577_v50 = vpop.f32.mrb[113].mxu1  ;;  %v4515_v51 = vpop.f32.mrb[114].mxu0 }
 0x1dd   : > { %v4578_v52 = vadd.f32 %v4577_v50, %v4576_v46  ;;  %v4579_v2 = vpop.f32.mrb[114].mxu1  ;;  %v4516_v60 = vpop.f32.mrb[115].mxu0 }
 0x1de   : > { %v3202_v17 = vadd.f32 %v4514_v7, %v6099_v33  ;;  %v4517_v35 = vadd.f32 %v4516_v60, %v4515_v51  ;;  %v4580_v61 = vpop.f32.mrb[115].mxu1 }
 0x1df   : > { %v4581_v59 = vadd.f32 %v4580_v61, %v4579_v2 }
 0x1e0   : > { %v6147_v62 = vadd.f32 %v4578_v52, %v3202_v17  ;;  %v3205_v3 = vadd.f32 %v4517_v35, %v6102_v28 }
 0x1e2   : > { %v6150_v22 = vadd.f32 %v4581_v59, %v3205_v3  ;;  %v4518_v63 = vpop.f32.mrb[116].mxu0 }
 0x1e3   : > { %v4582_v1 = vpop.f32.mrb[116].mxu1  ;;  %v4519_v43 = vpop.f32.mrb[117].mxu0 }
 0x1e4   : > { %v4520_v10 = vadd.f32 %v4519_v43, %v4518_v63  ;;  %v4583_v54 = vpop.f32.mrb[117].mxu1  ;;  %v4521_v9 = vpop.f32.mrb[118].mxu0 }
 0x1e5   : > { %v4584_v55 = vadd.f32 %v4583_v54, %v4582_v1  ;;  %v4585_v38 = vpop.f32.mrb[118].mxu1  ;;  %v4522_v12 = vpop.f32.mrb[119].mxu0 }
 0x1e6   : > { %v3210_v33 = vadd.f32 %v4520_v10, %v6105_v58  ;;  %v4523_v4 = vadd.f32 %v4522_v12, %v4521_v9  ;;  %v4586_v14 = vpop.f32.mrb[119].mxu1 }
 0x1e7   : > { %v4587_v19 = vadd.f32 %v4586_v14, %v4585_v38 }
 0x1e8   : > { %v6153_v20 = vadd.f32 %v4584_v55, %v3210_v33  ;;  %v3213_v28 = vadd.f32 %v4523_v4, %v6108_v56 }
 0x1ea   : > { %v6156_v42 = vadd.f32 %v4587_v19, %v3213_v28  ;;  %v4524_v57 = vpop.f32.mrb[120].mxu0 }
 0x1eb   : > { %v4588_v21 = vpop.f32.mrb[120].mxu1  ;;  %v4525_v6 = vpop.f32.mrb[121].mxu0 }
 0x1ec   : > { %v4526_v44 = vadd.f32 %v4525_v6, %v4524_v57  ;;  %v4589_v25 = vpop.f32.mrb[121].mxu1  ;;  %v4527_v26 = vpop.f32.mrb[122].mxu0 }
 0x1ed   : > { %v4590_v27 = vadd.f32 %v4589_v25, %v4588_v21  ;;  %v4591_v48 = vpop.f32.mrb[122].mxu1  ;;  %v4528_v32 = vpop.f32.mrb[123].mxu0 }
 0x1ee   : > { %v3218_v58 = vadd.f32 %v4526_v44, %v6111_v11  ;;  %v4529_v13 = vadd.f32 %v4528_v32, %v4527_v26  ;;  %v4592_v15 = vpop.f32.mrb[123].mxu1 }
 0x1ef   : > { %v4593_v34 = vadd.f32 %v4592_v15, %v4591_v48 }
 0x1f0   : > { %v6159_v36 = vadd.f32 %v4590_v27, %v3218_v58  ;;  %v3221_v56 = vadd.f32 %v4529_v13, %v6114_v16 }
 0x1f2   : > { %v6162_v41 = vadd.f32 %v4593_v34, %v3221_v56  ;;  %v4530_v37 = vpop.f32.mrb[124].mxu0 }
 0x1f3   : > { %v4594_v39 = vpop.f32.mrb[124].mxu1  ;;  %v4531_v30 = vpop.f32.mrb[125].mxu0 }
 0x1f4   : > { %v4532_v53 = vadd.f32 %v4531_v30, %v4530_v37  ;;  %v4595_v18 = vpop.f32.mrb[125].mxu1  ;;  %v4533_v46 = vpop.f32.mrb[126].mxu0 }
 0x1f5   : > { %v4596_v47 = vadd.f32 %v4595_v18, %v4594_v39  ;;  %v4597_v7 = vpop.f32.mrb[126].mxu1  ;;  %v4534_v50 = vpop.f32.mrb[127].mxu0 }
 0x1f6   : > { %v3226_v11 = vadd.f32 %v4532_v53, %v6117_v29  ;;  %v4535_v51 = vadd.f32 %v4534_v50, %v4533_v46  ;;  %v4598_v52 = vpop.f32.mrb[127].mxu1 }
 0x1f7   : > { %v4599_v2 = vadd.f32 %v4598_v52, %v4597_v7 }
 0x1f8   : > { %v6165_v60 = vadd.f32 %v4596_v47, %v3226_v11  ;;  %v3229_v16 = vadd.f32 %v4535_v51, %v6120_v40 }
 0x1fa   : > { %v6168_v17 = vadd.f32 %v4599_v2, %v3229_v16  ;;  %v4616_v35 = vpop.f32.mrb[128].mxu0 }
 0x1fb   : > { %v4680_v61 = vpop.f32.mrb[128].mxu1  ;;  %v4617_v59 = vpop.f32.mrb[129].mxu0 }
 0x1fc   : > { %v4618_v3 = vadd.f32 %v4617_v59, %v4616_v35  ;;  %v4681_v63 = vpop.f32.mrb[129].mxu1  ;;  %v4619_v1 = vpop.f32.mrb[130].mxu0 }
 0x1fd   : > { %v4682_v43 = vadd.f32 %v4681_v63, %v4680_v61  ;;  %v4683_v10 = vpop.f32.mrb[130].mxu1  ;;  %v4620_v54 = vpop.f32.mrb[131].mxu0 }
 0x1fe   : > { %v3364_v29 = vadd.f32 %v4618_v3, %v6123_v49  ;;  %v4621_v9 = vadd.f32 %v4620_v54, %v4619_v1  ;;  %v4684_v55 = vpop.f32.mrb[131].mxu1 }
 0x1ff   : > { %v4685_v38 = vadd.f32 %v4684_v55, %v4683_v10 }
 0x200   : > { %v3367_v12 = vadd.f32 %v4621_v9, %v6126_v0  ;;  %v6172_v33 = vadd.f32 %v4682_v43, %v3364_v29 }
 0x202   : > { %v4622_v40 = vpop.f32.mrb[132].mxu0  ;;  %v6174_v4 = vadd.f32 %v4685_v38, %v3367_v12 }
 0x203   : > { %v4686_v14 = vpop.f32.mrb[132].mxu1  ;;  %v4623_v19 = vpop.f32.mrb[133].mxu0 }
 0x204   : > { %v4624_v28 = vadd.f32 %v4623_v19, %v4622_v40  ;;  %v4687_v57 = vpop.f32.mrb[133].mxu1  ;;  %v4625_v21 = vpop.f32.mrb[134].mxu0 }
 0x205   : > { %v4688_v6 = vadd.f32 %v4687_v57, %v4686_v14  ;;  %v4689_v44 = vpop.f32.mrb[134].mxu1  ;;  %v4626_v25 = vpop.f32.mrb[135].mxu0 }
 0x206   : > { %v3372_v49 = vadd.f32 %v4624_v28, %v6129_v8  ;;  %v4627_v26 = vadd.f32 %v4626_v25, %v4625_v21  ;;  %v4690_v27 = vpop.f32.mrb[135].mxu1 }
 0x207   : > { %v4691_v48 = vadd.f32 %v4690_v27, %v4689_v44 }
 0x208   : > { %v3375_v0 = vadd.f32 %v4627_v26, %v6132_v24  ;;  %v6178_v32 = vadd.f32 %v4688_v6, %v3372_v49 }
 0x20a   : > { %v4628_v58 = vpop.f32.mrb[136].mxu0  ;;  %v6180_v13 = vadd.f32 %v4691_v48, %v3375_v0 }
 0x20b   : > { %v4692_v15 = vpop.f32.mrb[136].mxu1  ;;  %v4629_v34 = vpop.f32.mrb[137].mxu0 }
 0x20c   : > { %v4630_v56 = vadd.f32 %v4629_v34, %v4628_v58  ;;  %v4693_v37 = vpop.f32.mrb[137].mxu1  ;;  %v4631_v39 = vpop.f32.mrb[138].mxu0 }
 0x20d   : > { %v4694_v30 = vadd.f32 %v4693_v37, %v4692_v15  ;;  %v4695_v53 = vpop.f32.mrb[138].mxu1  ;;  %v4632_v18 = vpop.f32.mrb[139].mxu0 }
 0x20e   : > { %v3380_v8 = vadd.f32 %v4630_v56, %v6135_v23  ;;  %v4633_v46 = vadd.f32 %v4632_v18, %v4631_v39  ;;  %v4696_v47 = vpop.f32.mrb[139].mxu1 }
 0x20f   : > { %v4697_v7 = vadd.f32 %v4696_v47, %v4695_v53 }
 0x210   : > { %v3383_v24 = vadd.f32 %v4633_v46, %v6138_v31  ;;  %v6184_v50 = vadd.f32 %v4694_v30, %v3380_v8 }
 0x212   : > { %v4634_v11 = vpop.f32.mrb[140].mxu0  ;;  %v6186_v51 = vadd.f32 %v4697_v7, %v3383_v24 }
 0x213   : > { %v4698_v52 = vpop.f32.mrb[140].mxu1  ;;  %v4635_v2 = vpop.f32.mrb[141].mxu0 }
 0x214   : > { %v4636_v16 = vadd.f32 %v4635_v2, %v4634_v11  ;;  %v4699_v35 = vpop.f32.mrb[141].mxu1  ;;  %v4637_v61 = vpop.f32.mrb[142].mxu0 }
 0x215   : > { %v4700_v59 = vadd.f32 %v4699_v35, %v4698_v52  ;;  %v4701_v3 = vpop.f32.mrb[142].mxu1  ;;  %v4638_v63 = vpop.f32.mrb[143].mxu0 }
 0x216   : > { %v3388_v23 = vadd.f32 %v4636_v16, %v6141_v45  ;;  %v4639_v1 = vadd.f32 %v4638_v63, %v4637_v61  ;;  %v4702_v43 = vpop.f32.mrb[143].mxu1 }
 0x217   : > { %v4703_v10 = vadd.f32 %v4702_v43, %v4701_v3 }
 0x218   : > { %v3391_v31 = vadd.f32 %v4639_v1, %v6144_v5  ;;  %v6190_v54 = vadd.f32 %v4700_v59, %v3388_v23 }
 0x21a   : > { %v4640_v29 = vpop.f32.mrb[144].mxu0  ;;  %v6192_v9 = vadd.f32 %v4703_v10, %v3391_v31 }
 0x21b   : > { %v4704_v55 = vpop.f32.mrb[144].mxu1  ;;  %v4641_v38 = vpop.f32.mrb[145].mxu0 }
 0x21c   : > { %v4642_v12 = vadd.f32 %v4641_v38, %v4640_v29  ;;  %v4705_v40 = vpop.f32.mrb[145].mxu1  ;;  %v4643_v14 = vpop.f32.mrb[146].mxu0 }
 0x21d   : > { %v4706_v19 = vadd.f32 %v4705_v40, %v4704_v55  ;;  %v4707_v28 = vpop.f32.mrb[146].mxu1  ;;  %v4644_v57 = vpop.f32.mrb[147].mxu0 }
 0x21e   : > { %v3396_v45 = vadd.f32 %v4642_v12, %v6147_v62  ;;  %v4645_v21 = vadd.f32 %v4644_v57, %v4643_v14  ;;  %v4708_v6 = vpop.f32.mrb[147].mxu1 }
 0x21f   : > { %v4709_v44 = vadd.f32 %v4708_v6, %v4707_v28 }
 0x220   : > { %v3399_v5 = vadd.f32 %v4645_v21, %v6150_v22  ;;  %v3493_v25 = vadd.f32 %v4706_v19, %v3396_v45 }
 0x222   : > { %v4646_v49 = vpop.f32.mrb[148].mxu0  ;;  %v6196_v26 = vadd.f32 %v4709_v44, %v3399_v5 }
 0x223   : > { %v4710_v27 = vpop.f32.mrb[148].mxu1  ;;  %v4647_v48 = vpop.f32.mrb[149].mxu0 }
 0x224   : > { %v4648_v0 = vadd.f32 %v4647_v48, %v4646_v49  ;;  %v4711_v58 = vpop.f32.mrb[149].mxu1  ;;  %v4649_v15 = vpop.f32.mrb[150].mxu0 }
 0x225   : > { %v4712_v34 = vadd.f32 %v4711_v58, %v4710_v27  ;;  %v4713_v56 = vpop.f32.mrb[150].mxu1  ;;  %v4650_v37 = vpop.f32.mrb[151].mxu0 }
 0x226   : > { %v3404_v39 = vadd.f32 %v4648_v0, %v6153_v20  ;;  %v4651_v62 = vadd.f32 %v4650_v37, %v4649_v15  ;;  %v4714_v30 = vpop.f32.mrb[151].mxu1 }
 0x227   : > { %v4715_v53 = vadd.f32 %v4714_v30, %v4713_v56 }
 0x228   : > { %v3407_v18 = vadd.f32 %v4651_v62, %v6156_v42  ;;  %v3501_v22 = vadd.f32 %v4712_v34, %v3404_v39 }
 0x22a   : > { %v4652_v8 = vpop.f32.mrb[152].mxu0  ;;  %v3504_v46 = vadd.f32 %v4715_v53, %v3407_v18 }
 0x22b   : > { %v4716_v47 = vpop.f32.mrb[152].mxu1  ;;  %v4653_v7 = vpop.f32.mrb[153].mxu0 }
 0x22c   : > { %v4654_v24 = vadd.f32 %v4653_v7, %v4652_v8  ;;  %v4717_v11 = vpop.f32.mrb[153].mxu1  ;;  %v4655_v52 = vpop.f32.mrb[154].mxu0 }
 0x22d   : > { %v4718_v2 = vadd.f32 %v4717_v11, %v4716_v47  ;;  %v4719_v16 = vpop.f32.mrb[154].mxu1  ;;  %v4656_v35 = vpop.f32.mrb[155].mxu0 }
 0x22e   : > { %v3412_v61 = vadd.f32 %v4654_v24, %v6159_v36  ;;  %v4657_v59 = vadd.f32 %v4656_v35, %v4655_v52  ;;  %v4720_v20 = vpop.f32.mrb[155].mxu1 }
 0x22f   : > { %v4721_v3 = vadd.f32 %v4720_v20, %v4719_v16 }
 0x230   : > { %v3415_v63 = vadd.f32 %v4657_v59, %v6162_v41  ;;  %v3509_v23 = vadd.f32 %v4718_v2, %v3412_v61 }
 0x232   : > { %v4658_v42 = vpop.f32.mrb[156].mxu0  ;;  %v3512_v1 = vadd.f32 %v4721_v3, %v3415_v63 }
 0x233   : > { %v4722_v43 = vpop.f32.mrb[156].mxu1  ;;  %v4659_v10 = vpop.f32.mrb[157].mxu0 }
 0x234   : > { %v4660_v31 = vadd.f32 %v4659_v10, %v4658_v42  ;;  %v4723_v29 = vpop.f32.mrb[157].mxu1  ;;  %v4661_v55 = vpop.f32.mrb[158].mxu0 }
 0x235   : > { %v4724_v38 = vadd.f32 %v4723_v29, %v4722_v43  ;;  %v4725_v12 = vpop.f32.mrb[158].mxu1  ;;  %v4662_v40 = vpop.f32.mrb[159].mxu0 }
 0x236   : > { %v3420_v14 = vadd.f32 %v4660_v31, %v6165_v60  ;;  %v4663_v19 = vadd.f32 %v4662_v40, %v4661_v55  ;;  %v4726_v36 = vpop.f32.mrb[159].mxu1 }
 0x237   : > { %v4727_v28 = vadd.f32 %v4726_v36, %v4725_v12 }
 0x238   : > { %v3423_v57 = vadd.f32 %v4663_v19, %v6168_v17  ;;  %v3517_v45 = vadd.f32 %v4724_v38, %v3420_v14 }
 0x23a   : > { %v4762_v41 = vpop.f32.mrb[160].mxu0  ;;  %v3520_v21 = vadd.f32 %v4727_v28, %v3423_v57 }
 0x23b   : > { %v3566_v6 = vadd.f32 %v4762_v41, %v6178_v32  ;;  %v4770_v44 = vpop.f32.mrb[160].mxu1  ;;  %v3557_v5 = vpop.f32.mrb[161].mxu0 }
 0x23c   : > { %v3598_v49 = vadd.f32 %v4770_v44, %v3501_v22  ;;  %v3558_v27 = vadd.f32 %v3557_v5, %v6172_v33  ;;  %v3589_v48 = vpop.f32.mrb[161].mxu1  ;;  %v4763_v0 = vpop.f32.mrb[162].mxu0 }
 0x23d   : > { %5217 = vtanh.f32 %v3566_v6  ;;  %v3590_v58 = vadd.f32 %v3589_v48, %v3493_v25  ;;  %v3569_v60 = vadd.f32 %v4763_v0, %v6180_v13  ;;  %v4771_v15 = vpop.f32.mrb[162].mxu1  ;;  %v3560_v34 = vpop.f32.mrb[163].mxu0 }
 0x23e   : > { %5219 = vtanh.f32 %v3598_v49  ;;  %v3601_v17 = vadd.f32 %v4771_v15, %v3504_v46  ;;  %v3561_v56 = vadd.f32 %v3560_v34, %v6174_v4  ;;  %v3592_v37 = vpop.f32.mrb[163].mxu1 }
 0x23f   : > { %5221 = vtanh.f32 %v3558_v27  ;;  %v3593_v32 = vadd.f32 %v3592_v37, %v6196_v26 }
 0x240   : > { %5223 = vtanh.f32 %v3590_v58 }
 0x241   : > { %5225 = vtanh.f32 %v3569_v60 }
 0x242   : > { %5227 = vtanh.f32 %v3601_v17  ;;  %v4766_v33 = vpop.f32.mrb[164].mxu0 }
 0x243   : > { %5229 = vtanh.f32 %v3561_v56  ;;  %v3582_v25 = vadd.f32 %v4766_v33, %v6190_v54  ;;  %v4774_v39 = vpop.f32.mrb[164].mxu1  ;;  %v3573_v13 = vpop.f32.mrb[165].mxu0 }
 0x244   : > { %5231 = vtanh.f32 %v3593_v32  ;;  %v3614_v62 = vadd.f32 %v4774_v39, %v3517_v45  ;;  %v3574_v30 = vadd.f32 %v3573_v13, %v6184_v50  ;;  %v3605_v53 = vpop.f32.mrb[165].mxu1  ;;  %v4767_v4 = vpop.f32.mrb[166].mxu0 }
 0x245   : > { %5233 = vtanh.f32 %v3582_v25  ;;  %v3606_v18 = vadd.f32 %v3605_v53, %v3509_v23  ;;  %v3585_v26 = vadd.f32 %v4767_v4, %v6192_v9  ;;  %v4775_v22 = vpop.f32.mrb[166].mxu1  ;;  %v3576_v8 = vpop.f32.mrb[167].mxu0 }
 0x246   : > { %5235 = vtanh.f32 %v3614_v62  ;;  %v3617_v46 = vadd.f32 %v4775_v22, %v3520_v21  ;;  %v3577_v47 = vadd.f32 %v3576_v8, %v6186_v51  ;;  %v3608_v54 = vpop.f32.mrb[167].mxu1 }
 0x247   : > { %v5218_v7 = vpop.eup %5217  ;;  %5237 = vtanh.f32 %v3574_v30  ;;  %v3609_v24 = vadd.f32 %v3608_v54, %v3512_v1 }
 0x248   : > { %v5220_v11 = vpop.eup %5219  ;;  %v3638_v52 = vadd.f32 1.0, %v5218_v7  ;;  %5239 = vtanh.f32 %v3606_v18 }
 0x249   : > { %v5222_v50 = vpop.eup %5221  ;;  %v3646_v9 = vadd.f32 1.0, %v5220_v11  ;;  %5241 = vtanh.f32 %v3585_v26 }
 0x24a   : > { %v5224_v2 = vpop.eup %5223  ;;  %v3654_v16 = vmul.f32 0.5, %v3638_v52  ;;  %v3636_v51 = vadd.f32 1.0, %v5222_v50  ;;  %5243 = vtanh.f32 %v3617_v46 }
 0x24b   : > { %v5226_v35 = vpop.eup %5225  ;;  %v3662_v61 = vmul.f32 0.5, %v3646_v9  ;;  %v3644_v59 = vadd.f32 1.0, %v5224_v2  ;;  %5245 = vtanh.f32 %v3577_v47 }
 0x24c   : > { %v5228_v20 = vpop.eup %5227  ;;  %3670 = vst [vmem:[%s6217_s20 + $0x10] sm:$0xff] %v3654_v16  ;;  %v3652_v3 = vmul.f32 0.5, %v3636_v51  ;;  %v3639_v63 = vadd.f32 1.0, %v5226_v35  ;;  %5247 = vtanh.f32 %v3609_v24 }
 0x24d   : > { %v5230_v23 = vpop.eup %5229  ;;  %3678 = vst [vmem:[%s6217_s20 + $0x50] sm:$0xff] %v3662_v61  ;;  %v3660_v42 = vmul.f32 0.5, %v3644_v59  ;;  %v3647_v1 = vadd.f32 1.0, %v5228_v20 }
 0x24e   : > { %v5232_v43 = vpop.eup %5231  ;;  %3668 = vst [vmem:[%s6217_s20] sm:$0xff] %v3652_v3  ;;  %v3655_v10 = vmul.f32 0.5, %v3639_v63  ;;  %v3637_v31 = vadd.f32 1.0, %v5230_v23 }
 0x24f   : > { %v5234_v29 = vpop.eup %5233  ;;  %3676 = vst [vmem:[%s6217_s20 + $0x40] sm:$0xff] %v3660_v42  ;;  %v3663_v55 = vmul.f32 0.5, %v3647_v1  ;;  %v3645_v38 = vadd.f32 1.0, %v5232_v43 }
 0x250   : > { %v5236_v12 = vpop.eup %5235  ;;  %3671 = vst [vmem:[%s6217_s20 + $0x18] sm:$0xff] %v3655_v10  ;;  %v3653_v40 = vmul.f32 0.5, %v3637_v31  ;;  %v3642_v14 = vadd.f32 1.0, %v5234_v29 }
 0x251   : > { %v5238_v19 = vpop.eup %5237  ;;  %3679 = vst [vmem:[%s6217_s20 + $0x58] sm:$0xff] %v3663_v55  ;;  %v3661_v36 = vmul.f32 0.5, %v3645_v38  ;;  %v3650_v28 = vadd.f32 1.0, %v5236_v12 }
 0x252   : > { %v5240_v57 = vpop.eup %5239  ;;  %3669 = vst [vmem:[%s6217_s20 + $0x8] sm:$0xff] %v3653_v40  ;;  %v3658_v45 = vmul.f32 0.5, %v3642_v14  ;;  %v3640_v41 = vadd.f32 1.0, %v5238_v19 }
 0x253   : > { %v5242_v21 = vpop.eup %5241  ;;  %3677 = vst [vmem:[%s6217_s20 + $0x48] sm:$0xff] %v3661_v36  ;;  %v3666_v6 = vmul.f32 0.5, %v3650_v28  ;;  %v3648_v44 = vadd.f32 1.0, %v5240_v57 }
 0x254   : > { %v5244_v5 = vpop.eup %5243  ;;  %3674 = vst [vmem:[%s6217_s20 + $0x30] sm:$0xff] %v3658_v45  ;;  %v3656_v49 = vmul.f32 0.5, %v3640_v41  ;;  %v3643_v27 = vadd.f32 1.0, %v5242_v21 }
 0x255   : > { %v5246_v48 = vpop.eup %5245  ;;  %3682 = vst [vmem:[%s6217_s20 + $0x70] sm:$0xff] %v3666_v6  ;;  %v3664_v0 = vmul.f32 0.5, %v3648_v44  ;;  %v3651_v58 = vadd.f32 1.0, %v5244_v5 }
 0x256   : > { %v5248_v60 = vpop.eup %5247  ;;  %3672 = vst [vmem:[%s6217_s20 + $0x20] sm:$0xff] %v3656_v49  ;;  %v3659_v15 = vmul.f32 0.5, %v3643_v27  ;;  %v3641_v34 = vadd.f32 1.0, %v5246_v48 }
 0x257   : > { %3680 = vst [vmem:[%s6217_s20 + $0x60] sm:$0xff] %v3664_v0  ;;  %v3667_v17 = vmul.f32 0.5, %v3651_v58  ;;  %v3649_v56 = vadd.f32 1.0, %v5248_v60 }
 0x258   : > { %3675 = vst [vmem:[%s6217_s20 + $0x38] sm:$0xff] %v3659_v15  ;;  %v3657_v37 = vmul.f32 0.5, %v3641_v34 }
 0x259   : > { %3683 = vst [vmem:[%s6217_s20 + $0x78] sm:$0xff] %v3667_v17  ;;  %v3665_v32 = vmul.f32 0.5, %v3649_v56 }
 0x25a   : > { %3673 = vst [vmem:[%s6217_s20 + $0x28] sm:$0xff] %v3657_v37 }
 0x25b   : > { %3681 = vst [vmem:[%s6217_s20 + $0x68] sm:$0xff] %v3665_v32 }
 0x25c PF: > { %s13_s12 = sadd.s32 1, %s5255_s12  }
 0x25d   : > { %p10_p4 = scmp.ge.s32.totalorder %s13_s12, 6  }
 0x25f   :  { %12 = sbr.rel (!%p10_p4) target bundleno = 1 (0x1), region = 62 }

</bundles_post_ra>
